<compile_context>
chip_gen: v7x
topology: tpu7x:2x2x1
jax: 0.10.0
libtpu: 0.0.40
codegen_flags: <defaults>
</compile_context>

<pallas_src>
import functools
import numpy as np
import jax
import jax.numpy as jnp
from jax import lax
from jax.experimental import pallas as pl
from jax.experimental.pallas import tpu as pltpu

F32 = jnp.float32
BF16 = jnp.bfloat16


# ----------------------------------------------------------------------------
# Hardware-aware configuration
# ----------------------------------------------------------------------------

def _vmem_limit_bytes():
    """Generation-aware scoped-VMEM limit: ~48 MiB on v7x, ~96 MiB on v5e/v6e."""
    try:
        cap = int(pltpu.get_tpu_info().vmem_capacity_bytes)
    except Exception:
        cap = 128 * 1024 * 1024
    return max(16 * 1024 * 1024, min(cap * 3 // 4, 112 * 1024 * 1024))


_VMEM_LIMIT = _vmem_limit_bytes()


def _probe_buffered():
    """Check whether BlockSpec(pipeline_mode=pl.Buffered(1)) lowers on this jax."""
    try:
        def k(x_ref, o_ref):
            o_ref[...] = x_ref[...] + 1.0
        f = pl.pallas_call(
            k, grid=(2,),
            in_specs=[pl.BlockSpec((8, 128), lambda i: (0, 0),
                                   pipeline_mode=pl.Buffered(1))],
            out_specs=pl.BlockSpec((8, 128), lambda i: (i, 0)),
            out_shape=jax.ShapeDtypeStruct((16, 128), jnp.float32))
        jax.block_until_ready(jax.jit(f)(jnp.zeros((8, 128), jnp.float32)))
        return True
    except Exception:
        return False


_BUFFERED_OK = _probe_buffered()


def _const_spec(shape):
    """BlockSpec for grid-invariant operands (weights/biases): single-buffered."""
    index_map = lambda *_: (0,) * len(shape)
    if _BUFFERED_OK:
        return pl.BlockSpec(shape, index_map, pipeline_mode=pl.Buffered(1))
    return pl.BlockSpec(shape, index_map)


def _cparams(grid_len):
    return pltpu.CompilerParams(
        dimension_semantics=("parallel",) * grid_len,
        vmem_limit_bytes=_VMEM_LIMIT)


def _round_up(n, m):
    return ((n + m - 1) // m) * m


def _pick_tile(M, cap=512):
    """8-aligned row tile <= cap; rows are padded up to a multiple of it."""
    Mp = _round_up(M, 8)
    tm = min(cap, Mp)
    Mp = _round_up(Mp, tm)
    return tm, Mp


def _pad_rows(x, Mp):
    M = x.shape[0]
    if Mp == M:
        return x
    return jnp.pad(x, ((0, Mp - M),) + ((0, 0),) * (x.ndim - 1))


def _ln(x, g, b):
    mean = jnp.mean(x, axis=-1, keepdims=True)
    var = jnp.mean((x - mean) ** 2, axis=-1, keepdims=True)
    return (x - mean) * lax.rsqrt(var + 1e-5) * g + b


# ----------------------------------------------------------------------------
# Small helper kernels (patch embed, ln_pre, fused LN + projection heads)
# ----------------------------------------------------------------------------

def _linear_kernel(x_ref, w_ref, b_ref, o_ref):
    y = jnp.dot(x_ref[...].astype(BF16), w_ref[...].astype(BF16),
                preferred_element_type=F32) + b_ref[...]
    o_ref[...] = y.astype(o_ref.dtype)


def linear(x, w, b):
    M, K = x.shape
    N = w.shape[1]
    tm, Mp = _pick_tile(M)
    out = pl.pallas_call(
        _linear_kernel,
        grid=(Mp // tm,),
        in_specs=[pl.BlockSpec((tm, K), lambda i: (i, 0)),
                  _const_spec((K, N)), _const_spec((1, N))],
        out_specs=pl.BlockSpec((tm, N), lambda i: (i, 0)),
        out_shape=jax.ShapeDtypeStruct((Mp, N), F32),
        compiler_params=_cparams(1),
    )(_pad_rows(x, Mp), w, b.reshape(1, N))
    return out[:M]


def _ln_kernel(x_ref, g_ref, b_ref, o_ref):
    o_ref[...] = _ln(x_ref[...].astype(F32), g_ref[...], b_ref[...]).astype(o_ref.dtype)


def layernorm(x, g, b):
    M, D = x.shape
    tm, Mp = _pick_tile(M)
    out = pl.pallas_call(
        _ln_kernel,
        grid=(Mp // tm,),
        in_specs=[pl.BlockSpec((tm, D), lambda i: (i, 0)),
                  _const_spec((1, D)), _const_spec((1, D))],
        out_specs=pl.BlockSpec((tm, D), lambda i: (i, 0)),
        out_shape=jax.ShapeDtypeStruct((Mp, D), F32),
        compiler_params=_cparams(1),
    )(_pad_rows(x, Mp), g.reshape(1, D), b.reshape(1, D))
    return out[:M]


def _ln_linear_kernel(x_ref, g_ref, b_ref, w_ref, wb_ref, o_ref):
    h = _ln(x_ref[...].astype(F32), g_ref[...], b_ref[...])
    y = jnp.dot(h.astype(BF16), w_ref[...].astype(BF16),
                preferred_element_type=F32) + wb_ref[...]
    o_ref[...] = y.astype(o_ref.dtype)


def ln_linear(x, g, b, w, wb):
    """Fused LayerNorm + linear (ln_post+visual_proj, ln_final+text_proj)."""
    M, D = x.shape
    N = w.shape[1]
    tm, Mp = _pick_tile(M)
    out = pl.pallas_call(
        _ln_linear_kernel,
        grid=(Mp // tm,),
        in_specs=[pl.BlockSpec((tm, D), lambda i: (i, 0)),
                  _const_spec((1, D)), _const_spec((1, D)),
                  _const_spec((D, N)), _const_spec((1, N))],
        out_specs=pl.BlockSpec((tm, N), lambda i: (i, 0)),
        out_shape=jax.ShapeDtypeStruct((Mp, N), F32),
        compiler_params=_cparams(1),
    )(_pad_rows(x, Mp), g.reshape(1, D), b.reshape(1, D), w, wb.reshape(1, N))
    return out[:M]


# ----------------------------------------------------------------------------
# Fully fused transformer residual block (one pallas_call per layer)
# ----------------------------------------------------------------------------

def _block_kernel(x_ref, ln1g_ref, ln1b_ref, wqkv_ref, bqkv_ref,
                  wo_ref, bo_ref, ln2g_ref, ln2b_ref,
                  w1_ref, b1_ref, w2_ref, b2_ref,
                  o_ref, attn_scr,
                  *, H, Dh, S_valid, causal, scale):
    x = x_ref[0].astype(F32)                                  # [S, D]
    S = x.shape[0]
    D = H * Dh

    # --- LN1 + packed QKV projection (MXU) ---
    h = _ln(x, ln1g_ref[...], ln1b_ref[...])
    qkv = jnp.dot(h.astype(BF16), wqkv_ref[...].astype(BF16),
                  preferred_element_type=F32) + bqkv_ref[...]  # [S, 3D]

    # --- additive attention bias generated in-kernel (no mask DMA) ---
    need_mask = causal or (S_valid < S)
    if need_mask:
        rows = lax.broadcasted_iota(jnp.int32, (S, S), 0)
        cols = lax.broadcasted_iota(jnp.int32, (S, S), 1)
        ok = cols < S_valid                                   # key-padding mask
        if causal:
            ok = jnp.logical_and(ok, cols <= rows)
        bias = jnp.where(ok, 0.0, -1e9).astype(F32)

    # --- multi-head attention; each head stores into its own lane slice ---
    for hd in range(H):                                       # H static -> unrolled
        q = (qkv[:, hd * Dh:(hd + 1) * Dh] * scale).astype(BF16)
        k = qkv[:, D + hd * Dh:D + (hd + 1) * Dh].astype(BF16)
        v = qkv[:, 2 * D + hd * Dh:2 * D + (hd + 1) * Dh].astype(BF16)
        s = lax.dot_general(q, k, (((1,), (1,)), ((), ())),
                            preferred_element_type=F32)        # [S, S]
        if need_mask:
            s = s + bias
        s = s - jnp.max(s, axis=-1, keepdims=True)
        e = jnp.exp(s)
        p = e * pl.reciprocal(jnp.sum(e, axis=-1, keepdims=True), approx=True)
        attn_scr[:, hd * Dh:(hd + 1) * Dh] = jnp.dot(
            p.astype(BF16), v, preferred_element_type=F32)

    # --- output projection + residual ---
    y = jnp.dot(attn_scr[...].astype(BF16), wo_ref[...].astype(BF16),
                preferred_element_type=F32) + bo_ref[...] + x  # [S, D]

    # --- LN2 + MLP (QuickGELU) + residual; hidden never leaves VMEM ---
    # TODO(synk): K-tile the MLP hidden dim for real ViT-L sizes (fully resident
    # bf16 w1/w2 + double buffers do not fit v7x's 64 MiB VMEM with headroom).
    h2 = _ln(y, ln2g_ref[...], ln2b_ref[...])
    m = jnp.dot(h2.astype(BF16), w1_ref[...].astype(BF16),
                preferred_element_type=F32) + b1_ref[...]
    m = m * (1.0 / (1.0 + jnp.exp(-1.702 * m)))                # QuickGELU
    m = jnp.dot(m.astype(BF16), w2_ref[...].astype(BF16),
                preferred_element_type=F32) + b2_ref[...]
    o_ref[0] = (y + m).astype(o_ref.dtype)


def residual_block(x, p, H, causal, S_valid):
    """One fused pallas_call per transformer layer, gridded over batch."""
    B, S, D = x.shape
    Dh = D // H
    Hid = p["mlp_w1"].shape[1]
    kern = functools.partial(_block_kernel, H=H, Dh=Dh, S_valid=S_valid,
                             causal=causal, scale=1.0 / float(Dh) ** 0.5)
    return pl.pallas_call(
        kern,
        grid=(B,),
        in_specs=[pl.BlockSpec((1, S, D), lambda b: (b, 0, 0)),
                  _const_spec((1, D)), _const_spec((1, D)),
                  _const_spec((D, 3 * D)), _const_spec((1, 3 * D)),
                  _const_spec((D, D)), _const_spec((1, D)),
                  _const_spec((1, D)), _const_spec((1, D)),
                  _const_spec((D, Hid)), _const_spec((1, Hid)),
                  _const_spec((Hid, D)), _const_spec((1, D))],
        out_specs=pl.BlockSpec((1, S, D), lambda b: (b, 0, 0)),
        out_shape=jax.ShapeDtypeStruct((B, S, D), F32),
        scratch_shapes=[pltpu.VMEM((S, D), F32)],
        compiler_params=_cparams(1),
    )(x,
      p["ln1_g"].reshape(1, D), p["ln1_b"].reshape(1, D),
      p["w_qkv"], p["b_qkv"].reshape(1, 3 * D),
      p["w_o"], p["b_o"].reshape(1, D),
      p["ln2_g"].reshape(1, D), p["ln2_b"].reshape(1, D),
      p["mlp_w1"], p["mlp_b1"].reshape(1, Hid),
      p["mlp_w2"], p["mlp_b2"].reshape(1, D))


# ----------------------------------------------------------------------------
# Head kernel: normalization, logits (lane-dense), cosine-similarity scores
# ----------------------------------------------------------------------------

def _head_kernel(img_ref, txt_ref, txtd_ref, old_ref, oldd_ref, ls_ref,
                 l1_ref, l2_ref, s_ref, *, n_cls, n_dom):
    def l2norm(x):
        return x * lax.rsqrt(jnp.maximum(jnp.sum(x * x, axis=-1, keepdims=True),
                                         1e-12))

    img = l2norm(img_ref[...].astype(F32))
    txt = l2norm(txt_ref[...].astype(F32))      # [CP, De] (rows >= n_cls are zero-pad)
    txtd = l2norm(txtd_ref[...].astype(F32))    # [DP, De]
    old = l2norm(old_ref[...].astype(F32))
    oldd = l2norm(oldd_ref[...].astype(F32))
    scale = jnp.exp(ls_ref[...])                # [1, 1]

    # lane-dense (padded) logits; sliced back to n_cls / n_dom outside the kernel
    l1_ref[...] = (scale * lax.dot_general(img, txt, (((1,), (1,)), ((), ())),
                                           preferred_element_type=F32)).astype(l1_ref.dtype)
    l2_ref[...] = (scale * lax.dot_general(img, txtd, (((1,), (1,)), ((), ())),
                                           preferred_element_type=F32)).astype(l2_ref.dtype)

    # inputs are unit-norm, so cosine similarity is a plain row-wise dot; ignore pad rows
    def cos_score(a, b, n):
        sim = jnp.sum(a * b, axis=-1, keepdims=True)                        # [P, 1]
        mask = (lax.broadcasted_iota(jnp.int32, sim.shape, 0) < n).astype(F32)
        return 1.0 - jnp.sum(sim * mask, axis=0, keepdims=True) / n         # [1, 1]

    lanes = lax.broadcasted_iota(jnp.int32, s_ref.shape, 1)
    vals = jnp.where(lanes == 0, cos_score(txt, old, n_cls),
                     jnp.where(lanes == 1, cos_score(txtd, oldd, n_dom), 0.0))
    s_ref[...] = vals.astype(s_ref.dtype)


def clip_head(image_features, text_features, text_features_domain,
              ori_embedding, ori_embedding_domain, logit_scale):
    B = image_features.shape[0]
    n_cls = text_features.shape[0]
    n_dom = text_features_domain.shape[0]
    CP = _round_up(max(n_cls, 8), 128)          # lane-dense logits store
    DP = _round_up(max(n_dom, 8), 128)

    def pad(a, P):
        return jnp.pad(a, ((0, P - a.shape[0]), (0, 0)))

    kern = functools.partial(_head_kernel, n_cls=n_cls, n_dom=n_dom)
    logits1_p, logits2_p, scores = pl.pallas_call(
        kern,
        out_shape=(jax.ShapeDtypeStruct((B, CP), F32),
                   jax.ShapeDtypeStruct((B, DP), F32),
                   jax.ShapeDtypeStruct((1, 128), F32)),
        compiler_params=pltpu.CompilerParams(vmem_limit_bytes=_VMEM_LIMIT),
    )(image_features, pad(text_features, CP), pad(text_features_domain, DP),
      pad(ori_embedding, CP), pad(ori_embedding_domain, DP),
      logit_scale.reshape(1, 1))
    return (logits1_p[:, :n_cls], logits2_p[:, :n_dom], scores[0, 0], scores[0, 1])


# ----------------------------------------------------------------------------
# CLIP pieces: image encoder, text encoder, prompt learner
# ----------------------------------------------------------------------------

def encode_image(image, vp, cfg):
    # NCHW input; patch conv (stride = kernel = patch) as patch-extract + matmul
    B, C, Himg, Wimg = image.shape
    ps = cfg["patch"]                        # static python int (not traced)
    gh, gw = Himg // ps, Wimg // ps
    patches = image.reshape(B, C, gh, ps, gw, ps).transpose(0, 2, 4, 1, 3, 5)
    patches = patches.reshape(B * gh * gw, C * ps * ps)
    Dv = vp["conv_w"].shape[1]
    x = linear(patches, vp["conv_w"], vp["conv_b"])
    x = x.reshape(B, gh * gw, Dv)
    cls = jnp.broadcast_to(vp["class_emb"][None, None, :], (B, 1, Dv))
    x = jnp.concatenate([cls, x], axis=1) + vp["pos_emb"][None]   # [B, S_real, Dv]
    S_real = x.shape[1]
    S_pad = _round_up(S_real, 8)             # sublane-dense tiles; pad keys masked in-kernel
    if S_pad != S_real:
        x = jnp.pad(x, ((0, 0), (0, S_pad - S_real), (0, 0)))
    x = layernorm(x.reshape(B * S_pad, Dv),
                  vp["ln_pre_g"], vp["ln_pre_b"]).reshape(B, S_pad, Dv)
    for blk in vp["blocks"]:
        x = residual_block(x, blk, cfg["Hv"], causal=False, S_valid=S_real)
    # ln_post + visual projection fused, applied only to the CLS token
    return ln_linear(x[:, 0, :], vp["ln_post_g"], vp["ln_post_b"],
                     vp["proj"], vp["proj_b"])


def encode_text(prompts, tokenized_prompts, tp, cfg):
    # prompts: [N, L, Dt]; tokenized_prompts: [N, L] int32 (EOT has the max id)
    N, L, D = prompts.shape
    x = prompts + tp["pos_emb"][None]
    for blk in tp["blocks"]:
        x = residual_block(x, blk, cfg["Ht"], causal=True, S_valid=L)
    eot = jnp.argmax(tokenized_prompts, axis=-1)               # [N]
    x_eot = x[jnp.arange(N), eot]                              # [N, D]
    # LN is per-token, so gather-then-(LN+proj) == LN-then-gather-then-proj; fuse them.
    return ln_linear(x_eot, tp["ln_final_g"], tp["ln_final_b"],
                     tp["text_projection"], tp["proj_b"])


def prompt_learner_forward(ctx, prefix, suffix):
    # class_token_position == 'end'
    n_cls = prefix.shape[0]
    if ctx.ndim == 2:
        ctx = jnp.broadcast_to(ctx[None], (n_cls,) + ctx.shape)
    return jnp.concatenate([prefix, ctx, suffix], axis=1)      # [n_cls, L, Dt]


# ----------------------------------------------------------------------------
# CustomCLIP forward
# ----------------------------------------------------------------------------

def custom_clip_forward(cfg, params, image):
    image_features = encode_image(image, params["visual"], cfg)           # [B, De]

    pl_cls = params["prompt_learner"]
    pl_dom = params["prompt_learner_domain"]
    prompts = prompt_learner_forward(pl_cls["ctx"], pl_cls["token_prefix"],
                                     pl_cls["token_suffix"])
    prompts_domain = prompt_learner_forward(pl_dom["ctx"], pl_dom["token_prefix"],
                                            pl_dom["token_suffix"])
    n_cls = prompts.shape[0]

    # Batched text encoding: class + domain prompts share the text transformer,
    # so encode them in ONE pass (text weights stream through VMEM once).
    prompts_all = jnp.concatenate([prompts, prompts_domain], axis=0)
    tok_all = jnp.concatenate([pl_cls["tokenized_prompts"],
                               pl_dom["tokenized_prompts"]], axis=0)
    text_all = encode_text(prompts_all, tok_all, params["text"], cfg)
    text_features = text_all[:n_cls]
    text_features_domain = text_all[n_cls:]

    # normalization, logits and cosine-similarity scores all inside one Pallas kernel
    logits1, logits2, score, score_domain = clip_head(
        image_features, text_features, text_features_domain,
        pl_cls["text_features"], pl_dom["text_features"], params["logit_scale"])
    return logits1, logits2, score, score_domain


# ----------------------------------------------------------------------------
# Deterministic synthetic parameter initialization
# ----------------------------------------------------------------------------

def _init_block(key, D, hidden):
    ks = jax.random.split(key, 4)
    std = 0.02
    return dict(
        ln1_g=jnp.ones((D,), F32), ln1_b=jnp.zeros((D,), F32),
        ln2_g=jnp.ones((D,), F32), ln2_b=jnp.zeros((D,), F32),
        w_qkv=(std * jax.random.normal(ks[0], (D, 3 * D), F32)).astype(BF16),
        b_qkv=jnp.zeros((3 * D,), F32),
        w_o=(std * jax.random.normal(ks[1], (D, D), F32)).astype(BF16),
        b_o=jnp.zeros((D,), F32),
        mlp_w1=(std * jax.random.normal(ks[2], (D, hidden), F32)).astype(BF16),
        mlp_b1=jnp.zeros((hidden,), F32),
        mlp_w2=(std * jax.random.normal(ks[3], (hidden, D), F32)).astype(BF16),
        mlp_b2=jnp.zeros((D,), F32),
    )


def _make_tokenized(name_lens, L, n_ctx):
    tok = np.zeros((len(name_lens), L), np.int32)
    for i, nl in enumerate(name_lens):
        eot = 1 + n_ctx + nl + 1        # SOT + ctx + class tokens + '.'
        tok[i, 0] = 49406               # SOT
        tok[i, 1:eot] = 1 + np.arange(eot - 1)
        tok[i, eot] = 49407             # EOT (max id -> argmax picks it)
    return jnp.asarray(tok)


def _init_prompt_learner(key, n_cls, n_ctx, L, Dt, De, name_lens):
    ks = jax.random.split(key, 3)
    embedding = 0.02 * jax.random.normal(ks[0], (n_cls, L, Dt), F32)  # token_embedding output
    ctx = 0.02 * jax.random.normal(ks[1], (n_ctx, Dt), F32)           # generic context
    ori = jax.random.normal(ks[2], (n_cls, De), F32)                  # GPT text features
    ori = ori / jnp.linalg.norm(ori, axis=-1, keepdims=True)
    return dict(
        ctx=ctx,
        token_prefix=embedding[:, :1, :],
        token_suffix=embedding[:, 1 + n_ctx:, :],
        tokenized_prompts=_make_tokenized(name_lens, L, n_ctx),
        text_features=ori,
    )


def init_custom_clip(key, *, img_size, patch, Dv, layers_v,
                     Dt, layers_t, L, De, n_cls, n_dom, n_ctx):
    keys = jax.random.split(key, 12)
    std = 0.02

    gh = img_size // patch
    S_v = gh * gh + 1
    visual = dict(
        conv_w=(std * jax.random.normal(keys[0], (3 * patch * patch, Dv), F32)).astype(BF16),
        conv_b=jnp.zeros((Dv,), F32),
        class_emb=std * jax.random.normal(keys[1], (Dv,), F32),
        pos_emb=std * jax.random.normal(keys[2], (S_v, Dv), F32),
        ln_pre_g=jnp.ones((Dv,), F32), ln_pre_b=jnp.zeros((Dv,), F32),
        ln_post_g=jnp.ones((Dv,), F32), ln_post_b=jnp.zeros((Dv,), F32),
        proj=(std * jax.random.normal(keys[3], (Dv, De), F32)).astype(BF16),
        proj_b=jnp.zeros((De,), F32),
        blocks=[_init_block(k, Dv, 4 * Dv) for k in jax.random.split(keys[4], layers_v)],
    )

    text = dict(
        pos_emb=std * jax.random.normal(keys[5], (L, Dt), F32),
        ln_final_g=jnp.ones((Dt,), F32), ln_final_b=jnp.zeros((Dt,), F32),
        text_projection=(std * jax.random.normal(keys[6], (Dt, De), F32)).astype(BF16),
        proj_b=jnp.zeros((De,), F32),
        blocks=[_init_block(k, Dt, 4 * Dt) for k in jax.random.split(keys[7], layers_t)],
    )

    name_lens_cls = [1 + (i % 3) for i in range(n_cls)]
    name_lens_dom = [1 + (i % 2) for i in range(n_dom)]
    prompt_learner = _init_prompt_learner(keys[8], n_cls, n_ctx, L, Dt, De, name_lens_cls)
    prompt_learner_domain = _init_prompt_learner(keys[9], n_dom, n_ctx, L, Dt, De,
                                                 name_lens_dom)

    return dict(
        visual=visual,
        text=text,
        prompt_learner=prompt_learner,
        prompt_learner_domain=prompt_learner_domain,
        logit_scale=jnp.asarray(np.log(1.0 / 0.07), F32),    # CLIP init
    )


# ----------------------------------------------------------------------------
# main
# ----------------------------------------------------------------------------

if __name__ == "__main__":
    key = jax.random.PRNGKey(0)
    k_param, k_img = jax.random.split(key)

    B, C_in, IMG = 2, 3, 16
    # static architecture config stays OUTSIDE the jitted params pytree
    cfg = dict(patch=8, Hv=4, Ht=4)

    params = init_custom_clip(
        k_param,
        img_size=IMG, patch=cfg["patch"], Dv=64, layers_v=2,
        Dt=64, layers_t=2, L=16, De=32,
        n_cls=4, n_dom=2, n_ctx=4,
    )

    image = jax.random.normal(k_img, (B, C_in, IMG, IMG), F32)   # NCHW

    fwd = jax.jit(functools.partial(custom_clip_forward, cfg))
    logits1, logits2, score, score_domain = fwd(params, image)
    jax.block_until_ready((logits1, logits2, score, score_domain))

    assert logits1.shape == (B, 4)
    assert logits2.shape == (B, 2)
    assert score.shape == () and score_domain.shape == ()
    print("KERNEL_OK")
</pallas_src>

<mosaic_0001>
module attributes {stable_mosaic.version = 11 : i64} {
  func.func @k(%arg0: i32, %arg1: memref<8x128xf32, #tpu.memory_space<vmem>>, %arg2: memref<8x128xf32, #tpu.memory_space<vmem>>) attributes {dimension_semantics = [#tpu.dimension_semantics<arbitrary>], iteration_bounds = array<i64: 2>, scalar_prefetch = 0 : i64, scratch_operands = 0 : i64, tpu.core_type = #tpu.core_type<tc>, window_params = [{pipeline_mode = #tpu.pipeline_mode<synchronous>, transform_indices = @transform_0, window_bounds = array<i64: 8, 128>}, {transform_indices = @transform_1, window_bounds = array<i64: 8, 128>}]} {
    %c0 = arith.constant 0 : index
    %c0_0 = arith.constant 0 : index
    %0 = vector.load %arg1[%c0, %c0_0] : memref<8x128xf32, #tpu.memory_space<vmem>>, vector<8x128xf32>
    %cst = arith.constant 1.000000e+00 : f32
    %1 = vector.broadcast %cst : f32 to vector<8x128xf32>
    %2 = arith.addf %0, %1 : vector<8x128xf32>
    %c0_1 = arith.constant 0 : index
    %c0_2 = arith.constant 0 : index
    %3 = vector.load %arg2[%c0_1, %c0_2] : memref<8x128xf32, #tpu.memory_space<vmem>>, vector<8x128xf32>
    tpu.vector_store %arg2[%c0_1, %c0_2], %2 {strides = array<i32>} : memref<8x128xf32, #tpu.memory_space<vmem>>, vector<8x128xf32>,
    return
  }
  func.func @transform_0(%arg0: i32) -> (i32, i32) {
    %c0_i32 = arith.constant 0 : i32
    %c0_i32_0 = arith.constant 0 : i32
    %c0_i32_1 = arith.constant 0 : i32
    return %c0_i32, %c0_i32_0 : i32, i32
  }
  func.func @transform_1(%arg0: i32) -> (i32, i32) {
    %c0_i32 = arith.constant 0 : i32
    %c0_i32_0 = arith.constant 0 : i32
    return %arg0, %c0_i32 : i32, i32
  }
}

module attributes {stable_mosaic.version = 11 : i64} {
  func.func @_linear_kernel(%arg0: i32, %arg1: memref<8x192xf32, #tpu.memory_space<vmem>>, %arg2: memref<192x64xbf16, #tpu.memory_space<vmem>>, %arg3: memref<1x64xf32, #tpu.memory_space<vmem>>, %arg4: memref<8x64xf32, #tpu.memory_space<vmem>>) attributes {dimension_semantics = [#tpu.dimension_semantics<parallel>], iteration_bounds = array<i64: 1>, scalar_prefetch = 0 : i64, scratch_operands = 0 : i64, tpu.core_type = #tpu.core_type<tc>, window_params = [{transform_indices = @transform_0, window_bounds = array<i64: 8, 192>}, {pipeline_mode = #tpu.pipeline_mode<synchronous>, transform_indices = @transform_1, window_bounds = array<i64: 192, 64>}, {pipeline_mode = #tpu.pipeline_mode<synchronous>, transform_indices = @transform_2, window_bounds = array<i64: 1, 64>}, {transform_indices = @transform_3, window_bounds = array<i64: 8, 64>}]} {
    %c0 = arith.constant 0 : index
    %c0_0 = arith.constant 0 : index
    %0 = vector.load %arg1[%c0, %c0_0] : memref<8x192xf32, #tpu.memory_space<vmem>>, vector<8x192xf32>
    %1 = arith.truncf %0 : vector<8x192xf32> to vector<8x192xbf16>
    %c0_1 = arith.constant 0 : index
    %c0_2 = arith.constant 0 : index
    %2 = vector.load %arg2[%c0_1, %c0_2] : memref<192x64xbf16, #tpu.memory_space<vmem>>, vector<192x64xbf16>
    %cst = arith.constant dense<0.000000e+00> : vector<8x64xf32>
    %3 = tpu.matmul %1, %2, %cst {dimension_numbers = #tpu.dot_dimension_numbers<[1], [0], [0], [1], [0, 0, 1, 1], [], []>} : vector<8x192xbf16>, vector<192x64xbf16>, vector<8x64xf32> -> vector<8x64xf32>
    %c0_3 = arith.constant 0 : index
    %c0_4 = arith.constant 0 : index
    %4 = vector.load %arg3[%c0_3, %c0_4] : memref<1x64xf32, #tpu.memory_space<vmem>>, vector<1x64xf32>
    %5 = vector.broadcast %4 : vector<1x64xf32> to vector<8x64xf32>
    %6 = arith.addf %3, %5 : vector<8x64xf32>
    %c0_5 = arith.constant 0 : index
    %c0_6 = arith.constant 0 : index
    %7 = vector.load %arg4[%c0_5, %c0_6] : memref<8x64xf32, #tpu.memory_space<vmem>>, vector<8x64xf32>
    tpu.vector_store %arg4[%c0_5, %c0_6], %6 {strides = array<i32>} : memref<8x64xf32, #tpu.memory_space<vmem>>, vector<8x64xf32>,
    return
  }
  func.func @transform_0(%arg0: i32) -> (i32, i32) {
    %c0_i32 = arith.constant 0 : i32
    %c0_i32_0 = arith.constant 0 : i32
    return %arg0, %c0_i32 : i32, i32
  }
  func.func @transform_1(%arg0: i32) -> (i32, i32) {
    %c0_i32 = arith.constant 0 : i32
    %c0_i32_0 = arith.constant 0 : i32
    %c0_i32_1 = arith.constant 0 : i32
    return %c0_i32, %c0_i32_0 : i32, i32
  }
  func.func @transform_2(%arg0: i32) -> (i32, i32) {
    %c0_i32 = arith.constant 0 : i32
    %c0_i32_0 = arith.constant 0 : i32
    %c0_i32_1 = arith.constant 0 : i32
    return %c0_i32, %c0_i32_0 : i32, i32
  }
  func.func @transform_3(%arg0: i32) -> (i32, i32) {
    %c0_i32 = arith.constant 0 : i32
    %c0_i32_0 = arith.constant 0 : i32
    return %arg0, %c0_i32 : i32, i32
  }
}

module attributes {stable_mosaic.version = 11 : i64} {
  func.func @_ln_kernel(%arg0: i32, %arg1: memref<16x64xf32, #tpu.memory_space<vmem>>, %arg2: memref<1x64xf32, #tpu.memory_space<vmem>>, %arg3: memref<1x64xf32, #tpu.memory_space<vmem>>, %arg4: memref<16x64xf32, #tpu.memory_space<vmem>>) attributes {dimension_semantics = [#tpu.dimension_semantics<parallel>], iteration_bounds = array<i64: 1>, scalar_prefetch = 0 : i64, scratch_operands = 0 : i64, tpu.core_type = #tpu.core_type<tc>, window_params = [{transform_indices = @transform_0, window_bounds = array<i64: 16, 64>}, {pipeline_mode = #tpu.pipeline_mode<synchronous>, transform_indices = @transform_1, window_bounds = array<i64: 1, 64>}, {pipeline_mode = #tpu.pipeline_mode<synchronous>, transform_indices = @transform_2, window_bounds = array<i64: 1, 64>}, {transform_indices = @transform_3, window_bounds = array<i64: 16, 64>}]} {
    %c0 = arith.constant 0 : index
    %c0_0 = arith.constant 0 : index
    %0 = vector.load %arg1[%c0, %c0_0] : memref<16x64xf32, #tpu.memory_space<vmem>>, vector<16x64xf32>
    %c0_1 = arith.constant 0 : index
    %c0_2 = arith.constant 0 : index
    %1 = vector.load %arg2[%c0_1, %c0_2] : memref<1x64xf32, #tpu.memory_space<vmem>>, vector<1x64xf32>
    %c0_3 = arith.constant 0 : index
    %c0_4 = arith.constant 0 : index
    %2 = vector.load %arg3[%c0_3, %c0_4] : memref<1x64xf32, #tpu.memory_space<vmem>>, vector<1x64xf32>
    %cst = arith.constant dense<0.000000e+00> : vector<16xf32>
    %3 = vector.multi_reduction <add>, %0, %cst [1] : vector<16x64xf32> to vector<16xf32>
    %4 = vector.shape_cast %3 : vector<16xf32> to vector<16x1xf32>
    %cst_5 = arith.constant 6.400000e+01 : f32
    %5 = vector.broadcast %cst_5 : f32 to vector<16x1xf32>
    %6 = arith.divf %4, %5 : vector<16x1xf32>
    %7 = vector.broadcast %6 : vector<16x1xf32> to vector<16x64xf32>
    %8 = arith.subf %0, %7 : vector<16x64xf32>
    %9 = arith.mulf %8, %8 : vector<16x64xf32>
    %cst_6 = arith.constant dense<0.000000e+00> : vector<16xf32>
    %10 = vector.multi_reduction <add>, %9, %cst_6 [1] : vector<16x64xf32> to vector<16xf32>
    %11 = vector.shape_cast %10 : vector<16xf32> to vector<16x1xf32>
    %cst_7 = arith.constant 6.400000e+01 : f32
    %12 = vector.broadcast %cst_7 : f32 to vector<16x1xf32>
    %13 = arith.divf %11, %12 : vector<16x1xf32>
    %14 = vector.broadcast %6 : vector<16x1xf32> to vector<16x64xf32>
    %15 = arith.subf %0, %14 : vector<16x64xf32>
    %cst_8 = arith.constant 9.99999974E-6 : f32
    %16 = vector.broadcast %cst_8 : f32 to vector<16x1xf32>
    %17 = arith.addf %13, %16 : vector<16x1xf32>
    %18 = math.rsqrt %17 : vector<16x1xf32>
    %19 = vector.broadcast %18 : vector<16x1xf32> to vector<16x64xf32>
    %20 = arith.mulf %15, %19 : vector<16x64xf32>
    %21 = vector.broadcast %1 : vector<1x64xf32> to vector<16x64xf32>
    %22 = arith.mulf %20, %21 : vector<16x64xf32>
    %23 = vector.broadcast %2 : vector<1x64xf32> to vector<16x64xf32>
    %24 = arith.addf %22, %23 : vector<16x64xf32>
    %c0_9 = arith.constant 0 : index
    %c0_10 = arith.constant 0 : index
    %25 = vector.load %arg4[%c0_9, %c0_10] : memref<16x64xf32, #tpu.memory_space<vmem>>, vector<16x64xf32>
    tpu.vector_store %arg4[%c0_9, %c0_10], %24 {strides = array<i32>} : memref<16x64xf32, #tpu.memory_space<vmem>>, vector<16x64xf32>,
    return
  }
  func.func @transform_0(%arg0: i32) -> (i32, i32) {
    %c0_i32 = arith.constant 0 : i32
    %c0_i32_0 = arith.constant 0 : i32
    return %arg0, %c0_i32 : i32, i32
  }
  func.func @transform_1(%arg0: i32) -> (i32, i32) {
    %c0_i32 = arith.constant 0 : i32
    %c0_i32_0 = arith.constant 0 : i32
    %c0_i32_1 = arith.constant 0 : i32
    return %c0_i32, %c0_i32_0 : i32, i32
  }
  func.func @transform_2(%arg0: i32) -> (i32, i32) {
    %c0_i32 = arith.constant 0 : i32
    %c0_i32_0 = arith.constant 0 : i32
    %c0_i32_1 = arith.constant 0 : i32
    return %c0_i32, %c0_i32_0 : i32, i32
  }
  func.func @transform_3(%arg0: i32) -> (i32, i32) {
    %c0_i32 = arith.constant 0 : i32
    %c0_i32_0 = arith.constant 0 : i32
    return %arg0, %c0_i32 : i32, i32
  }
}

module attributes {stable_mosaic.version = 11 : i64} {
  func.func @_block_kernel(%arg0: i32, %arg1: memref<1x8x64xf32, #tpu.memory_space<vmem>>, %arg2: memref<1x64xf32, #tpu.memory_space<vmem>>, %arg3: memref<1x64xf32, #tpu.memory_space<vmem>>, %arg4: memref<64x192xbf16, #tpu.memory_space<vmem>>, %arg5: memref<1x192xf32, #tpu.memory_space<vmem>>, %arg6: memref<64x64xbf16, #tpu.memory_space<vmem>>, %arg7: memref<1x64xf32, #tpu.memory_space<vmem>>, %arg8: memref<1x64xf32, #tpu.memory_space<vmem>>, %arg9: memref<1x64xf32, #tpu.memory_space<vmem>>, %arg10: memref<64x256xbf16, #tpu.memory_space<vmem>>, %arg11: memref<1x256xf32, #tpu.memory_space<vmem>>, %arg12: memref<256x64xbf16, #tpu.memory_space<vmem>>, %arg13: memref<1x64xf32, #tpu.memory_space<vmem>>, %arg14: memref<1x8x64xf32, #tpu.memory_space<vmem>>, %arg15: memref<8x64xf32, #tpu.memory_space<vmem>>) attributes {dimension_semantics = [#tpu.dimension_semantics<parallel>], iteration_bounds = array<i64: 2>, scalar_prefetch = 0 : i64, scratch_operands = 1 : i64, tpu.core_type = #tpu.core_type<tc>, window_params = [{transform_indices = @transform_0, window_bounds = array<i64: 1, 8, 64>}, {pipeline_mode = #tpu.pipeline_mode<synchronous>, transform_indices = @transform_1, window_bounds = array<i64: 1, 64>}, {pipeline_mode = #tpu.pipeline_mode<synchronous>, transform_indices = @transform_2, window_bounds = array<i64: 1, 64>}, {pipeline_mode = #tpu.pipeline_mode<synchronous>, transform_indices = @transform_3, window_bounds = array<i64: 64, 192>}, {pipeline_mode = #tpu.pipeline_mode<synchronous>, transform_indices = @transform_4, window_bounds = array<i64: 1, 192>}, {pipeline_mode = #tpu.pipeline_mode<synchronous>, transform_indices = @transform_5, window_bounds = array<i64: 64, 64>}, {pipeline_mode = #tpu.pipeline_mode<synchronous>, transform_indices = @transform_6, window_bounds = array<i64: 1, 64>}, {pipeline_mode = #tpu.pipeline_mode<synchronous>, transform_indices = @transform_7, window_bounds = array<i64: 1, 64>}, {pipeline_mode = #tpu.pipeline_mode<synchronous>, transform_indices = @transform_8, window_bounds = array<i64: 1, 64>}, {pipeline_mode = #tpu.pipeline_mode<synchronous>, transform_indices = @transform_9, window_bounds = array<i64: 64, 256>}, {pipeline_mode = #tpu.pipeline_mode<synchronous>, transform_indices = @transform_10, window_bounds = array<i64: 1, 256>}, {pipeline_mode = #tpu.pipeline_mode<synchronous>, transform_indices = @transform_11, window_bounds = array<i64: 256, 64>}, {pipeline_mode = #tpu.pipeline_mode<synchronous>, transform_indices = @transform_12, window_bounds = array<i64: 1, 64>}, {transform_indices = @transform_13, window_bounds = array<i64: 1, 8, 64>}]} {
    %c0 = arith.constant 0 : index
    %c0_0 = arith.constant 0 : index
    %c0_1 = arith.constant 0 : index
    %0 = vector.load %arg1[%c0, %c0_0, %c0_1] : memref<1x8x64xf32, #tpu.memory_space<vmem>>, vector<1x8x64xf32>
    %1 = vector.shape_cast %0 : vector<1x8x64xf32> to vector<8x64xf32>
    %c0_2 = arith.constant 0 : index
    %c0_3 = arith.constant 0 : index
    %2 = vector.load %arg2[%c0_2, %c0_3] : memref<1x64xf32, #tpu.memory_space<vmem>>, vector<1x64xf32>
    %c0_4 = arith.constant 0 : index
    %c0_5 = arith.constant 0 : index
    %3 = vector.load %arg3[%c0_4, %c0_5] : memref<1x64xf32, #tpu.memory_space<vmem>>, vector<1x64xf32>
    %cst = arith.constant dense<0.000000e+00> : vector<8xf32>
    %4 = vector.multi_reduction <add>, %1, %cst [1] : vector<8x64xf32> to vector<8xf32>
    %5 = vector.shape_cast %4 : vector<8xf32> to vector<8x1xf32>
    %cst_6 = arith.constant 6.400000e+01 : f32
    %6 = vector.broadcast %cst_6 : f32 to vector<8x1xf32>
    %7 = arith.divf %5, %6 : vector<8x1xf32>
    %8 = vector.broadcast %7 : vector<8x1xf32> to vector<8x64xf32>
    %9 = arith.subf %1, %8 : vector<8x64xf32>
    %10 = arith.mulf %9, %9 : vector<8x64xf32>
    %cst_7 = arith.constant dense<0.000000e+00> : vector<8xf32>
    %11 = vector.multi_reduction <add>, %10, %cst_7 [1] : vector<8x64xf32> to vector<8xf32>
    %12 = vector.shape_cast %11 : vector<8xf32> to vector<8x1xf32>
    %cst_8 = arith.constant 6.400000e+01 : f32
    %13 = vector.broadcast %cst_8 : f32 to vector<8x1xf32>
    %14 = arith.divf %12, %13 : vector<8x1xf32>
    %15 = vector.broadcast %7 : vector<8x1xf32> to vector<8x64xf32>
    %16 = arith.subf %1, %15 : vector<8x64xf32>
    %cst_9 = arith.constant 9.99999974E-6 : f32
    %17 = vector.broadcast %cst_9 : f32 to vector<8x1xf32>
    %18 = arith.addf %14, %17 : vector<8x1xf32>
    %19 = math.rsqrt %18 : vector<8x1xf32>
    %20 = vector.broadcast %19 : vector<8x1xf32> to vector<8x64xf32>
    %21 = arith.mulf %16, %20 : vector<8x64xf32>
    %22 = vector.broadcast %2 : vector<1x64xf32> to vector<8x64xf32>
    %23 = arith.mulf %21, %22 : vector<8x64xf32>
    %24 = vector.broadcast %3 : vector<1x64xf32> to vector<8x64xf32>
    %25 = arith.addf %23, %24 : vector<8x64xf32>
    %26 = arith.truncf %25 : vector<8x64xf32> to vector<8x64xbf16>
    %c0_10 = arith.constant 0 : index
    %c0_11 = arith.constant 0 : index
    %27 = vector.load %arg4[%c0_10, %c0_11] : memref<64x192xbf16, #tpu.memory_space<vmem>>, vector<64x192xbf16>
    %cst_12 = arith.constant dense<0.000000e+00> : vector<8x192xf32>
    %28 = tpu.matmul %26, %27, %cst_12 {dimension_numbers = #tpu.dot_dimension_numbers<[1], [0], [0], [1], [0, 0, 1, 1], [], []>} : vector<8x64xbf16>, vector<64x192xbf16>, vector<8x192xf32> -> vector<8x192xf32>
    %c0_13 = arith.constant 0 : index
    %c0_14 = arith.constant 0 : index
    %29 = vector.load %arg5[%c0_13, %c0_14] : memref<1x192xf32, #tpu.memory_space<vmem>>, vector<1x192xf32>
    %30 = vector.broadcast %29 : vector<1x192xf32> to vector<8x192xf32>
    %31 = arith.addf %28, %30 : vector<8x192xf32>
    %32 = tpu.iota {dimensions = array<i32: 1>} : vector<8x8xi32>
    %c5_i32 = arith.constant 5 : i32
    %33 = vector.broadcast %c5_i32 : i32 to vector<8x8xi32>
    %34 = arith.cmpi slt, %32, %33 : vector<8x8xi32>
    %cst_15 = arith.constant 0.000000e+00 : f32
    %cst_16 = arith.constant -1.000000e+09 : f32
    %35 = vector.broadcast %cst_15 : f32 to vector<8x8xf32>
    %36 = vector.broadcast %cst_16 : f32 to vector<8x8xf32>
    %37 = arith.select %34, %35, %36 : vector<8x8xi1>, vector<8x8xf32>
    %38 = vector.extract_strided_slice %31 {offsets = [0, 0], sizes = [8, 16], strides = [1, 1]} : vector<8x192xf32> to vector<8x16xf32>
    %cst_17 = arith.constant 2.500000e-01 : f32
    %39 = vector.broadcast %cst_17 : f32 to vector<8x16xf32>
    %40 = arith.mulf %38, %39 : vector<8x16xf32>
    %41 = arith.truncf %40 : vector<8x16xf32> to vector<8x16xbf16>
    %42 = vector.extract_strided_slice %31 {offsets = [0, 64], sizes = [8, 16], strides = [1, 1]} : vector<8x192xf32> to vector<8x16xf32>
    %43 = arith.truncf %42 : vector<8x16xf32> to vector<8x16xbf16>
    %44 = vector.extract_strided_slice %31 {offsets = [0, 128], sizes = [8, 16], strides = [1, 1]} : vector<8x192xf32> to vector<8x16xf32>
    %45 = arith.truncf %44 : vector<8x16xf32> to vector<8x16xbf16>
    %cst_18 = arith.constant dense<0.000000e+00> : vector<8x8xf32>
    %46 = tpu.matmul %41, %43, %cst_18 {dimension_numbers = #tpu.dot_dimension_numbers<[1], [1], [0], [0], [0, 0, 1, 0], [], []>} : vector<8x16xbf16>, vector<8x16xbf16>, vector<8x8xf32> -> vector<8x8xf32>
    %47 = arith.addf %46, %37 : vector<8x8xf32>
    %cst_19 = arith.constant dense<0xFF800000> : vector<8xf32>
    %48 = vector.multi_reduction <maximumf>, %47, %cst_19 [1] : vector<8x8xf32> to vector<8xf32>
    %49 = vector.shape_cast %48 : vector<8xf32> to vector<8x1xf32>
    %50 = vector.broadcast %49 : vector<8x1xf32> to vector<8x8xf32>
    %51 = arith.subf %47, %50 : vector<8x8xf32>
    %52 = math.exp %51 : vector<8x8xf32>
    %cst_20 = arith.constant dense<0.000000e+00> : vector<8xf32>
    %53 = vector.multi_reduction <add>, %52, %cst_20 [1] : vector<8x8xf32> to vector<8xf32>
    %54 = vector.shape_cast %53 : vector<8xf32> to vector<8x1xf32>
    %55 = tpu.reciprocal %54 {approx = true} : vector<8x1xf32> -> vector<8x1xf32>
    %56 = vector.broadcast %55 : vector<8x1xf32> to vector<8x8xf32>
    %57 = arith.mulf %52, %56 : vector<8x8xf32>
    %58 = arith.truncf %57 : vector<8x8xf32> to vector<8x8xbf16>
    %cst_21 = arith.constant dense<0.000000e+00> : vector<8x16xf32>
    %59 = tpu.matmul %58, %45, %cst_21 {dimension_numbers = #tpu.dot_dimension_numbers<[1], [0], [0], [1], [0, 0, 1, 1], [], []>} : vector<8x8xbf16>, vector<8x16xbf16>, vector<8x16xf32> -> vector<8x16xf32>
    %c0_22 = arith.constant 0 : index
    %c0_23 = arith.constant 0 : index
    %60 = vector.load %arg15[%c0_22, %c0_23] : memref<8x64xf32, #tpu.memory_space<vmem>>, vector<8x16xf32>
    tpu.vector_store %arg15[%c0_22, %c0_23], %59 {strides = array<i32>} : memref<8x64xf32, #tpu.memory_space<vmem>>, vector<8x16xf32>,
    %61 = vector.extract_strided_slice %31 {offsets = [0, 16], sizes = [8, 16], strides = [1, 1]} : vector<8x192xf32> to vector<8x16xf32>
    %cst_24 = arith.constant 2.500000e-01 : f32
    %62 = vector.broadcast %cst_24 : f32 to vector<8x16xf32>
    %63 = arith.mulf %61, %62 : vector<8x16xf32>
    %64 = arith.truncf %63 : vector<8x16xf32> to vector<8x16xbf16>
    %65 = vector.extract_strided_slice %31 {offsets = [0, 80], sizes = [8, 16], strides = [1, 1]} : vector<8x192xf32> to vector<8x16xf32>
    %66 = arith.truncf %65 : vector<8x16xf32> to vector<8x16xbf16>
    %67 = vector.extract_strided_slice %31 {offsets = [0, 144], sizes = [8, 16], strides = [1, 1]} : vector<8x192xf32> to vector<8x16xf32>
    %68 = arith.truncf %67 : vector<8x16xf32> to vector<8x16xbf16>
    %cst_25 = arith.constant dense<0.000000e+00> : vector<8x8xf32>
    %69 = tpu.matmul %64, %66, %cst_25 {dimension_numbers = #tpu.dot_dimension_numbers<[1], [1], [0], [0], [0, 0, 1, 0], [], []>} : vector<8x16xbf16>, vector<8x16xbf16>, vector<8x8xf32> -> vector<8x8xf32>
    %70 = arith.addf %69, %37 : vector<8x8xf32>
    %cst_26 = arith.constant dense<0xFF800000> : vector<8xf32>
    %71 = vector.multi_reduction <maximumf>, %70, %cst_26 [1] : vector<8x8xf32> to vector<8xf32>
    %72 = vector.shape_cast %71 : vector<8xf32> to vector<8x1xf32>
    %73 = vector.broadcast %72 : vector<8x1xf32> to vector<8x8xf32>
    %74 = arith.subf %70, %73 : vector<8x8xf32>
    %75 = math.exp %74 : vector<8x8xf32>
    %cst_27 = arith.constant dense<0.000000e+00> : vector<8xf32>
    %76 = vector.multi_reduction <add>, %75, %cst_27 [1] : vector<8x8xf32> to vector<8xf32>
    %77 = vector.shape_cast %76 : vector<8xf32> to vector<8x1xf32>
    %78 = tpu.reciprocal %77 {approx = true} : vector<8x1xf32> -> vector<8x1xf32>
    %79 = vector.broadcast %78 : vector<8x1xf32> to vector<8x8xf32>
    %80 = arith.mulf %75, %79 : vector<8x8xf32>
    %81 = arith.truncf %80 : vector<8x8xf32> to vector<8x8xbf16>
    %cst_28 = arith.constant dense<0.000000e+00> : vector<8x16xf32>
    %82 = tpu.matmul %81, %68, %cst_28 {dimension_numbers = #tpu.dot_dimension_numbers<[1], [0], [0], [1], [0, 0, 1, 1], [], []>} : vector<8x8xbf16>, vector<8x16xbf16>, vector<8x16xf32> -> vector<8x16xf32>
    %c0_29 = arith.constant 0 : index
    %c16 = arith.constant 16 : index
    %83 = vector.load %arg15[%c0_29, %c16] : memref<8x64xf32, #tpu.memory_space<vmem>>, vector<8x16xf32>
    tpu.vector_store %arg15[%c0_29, %c16], %82 {strides = array<i32>} : memref<8x64xf32, #tpu.memory_space<vmem>>, vector<8x16xf32>,
    %84 = vector.extract_strided_slice %31 {offsets = [0, 32], sizes = [8, 16], strides = [1, 1]} : vector<8x192xf32> to vector<8x16xf32>
    %cst_30 = arith.constant 2.500000e-01 : f32
    %85 = vector.broadcast %cst_30 : f32 to vector<8x16xf32>
    %86 = arith.mulf %84, %85 : vector<8x16xf32>
    %87 = arith.truncf %86 : vector<8x16xf32> to vector<8x16xbf16>
    %88 = vector.extract_strided_slice %31 {offsets = [0, 96], sizes = [8, 16], strides = [1, 1]} : vector<8x192xf32> to vector<8x16xf32>
    %89 = arith.truncf %88 : vector<8x16xf32> to vector<8x16xbf16>
    %90 = vector.extract_strided_slice %31 {offsets = [0, 160], sizes = [8, 16], strides = [1, 1]} : vector<8x192xf32> to vector<8x16xf32>
    %91 = arith.truncf %90 : vector<8x16xf32> to vector<8x16xbf16>
    %cst_31 = arith.constant dense<0.000000e+00> : vector<8x8xf32>
    %92 = tpu.matmul %87, %89, %cst_31 {dimension_numbers = #tpu.dot_dimension_numbers<[1], [1], [0], [0], [0, 0, 1, 0], [], []>} : vector<8x16xbf16>, vector<8x16xbf16>, vector<8x8xf32> -> vector<8x8xf32>
    %93 = arith.addf %92, %37 : vector<8x8xf32>
    %cst_32 = arith.constant dense<0xFF800000> : vector<8xf32>
    %94 = vector.multi_reduction <maximumf>, %93, %cst_32 [1] : vector<8x8xf32> to vector<8xf32>
    %95 = vector.shape_cast %94 : vector<8xf32> to vector<8x1xf32>
    %96 = vector.broadcast %95 : vector<8x1xf32> to vector<8x8xf32>
    %97 = arith.subf %93, %96 : vector<8x8xf32>
    %98 = math.exp %97 : vector<8x8xf32>
    %cst_33 = arith.constant dense<0.000000e+00> : vector<8xf32>
    %99 = vector.multi_reduction <add>, %98, %cst_33 [1] : vector<8x8xf32> to vector<8xf32>
    %100 = vector.shape_cast %99 : vector<8xf32> to vector<8x1xf32>
    %101 = tpu.reciprocal %100 {approx = true} : vector<8x1xf32> -> vector<8x1xf32>
    %102 = vector.broadcast %101 : vector<8x1xf32> to vector<8x8xf32>
    %103 = arith.mulf %98, %102 : vector<8x8xf32>
    %104 = arith.truncf %103 : vector<8x8xf32> to vector<8x8xbf16>
    %cst_34 = arith.constant dense<0.000000e+00> : vector<8x16xf32>
    %105 = tpu.matmul %104, %91, %cst_34 {dimension_numbers = #tpu.dot_dimension_numbers<[1], [0], [0], [1], [0, 0, 1, 1], [], []>} : vector<8x8xbf16>, vector<8x16xbf16>, vector<8x16xf32> -> vector<8x16xf32>
    %c0_35 = arith.constant 0 : index
    %c32 = arith.constant 32 : index
    %106 = vector.load %arg15[%c0_35, %c32] : memref<8x64xf32, #tpu.memory_space<vmem>>, vector<8x16xf32>
    tpu.vector_store %arg15[%c0_35, %c32], %105 {strides = array<i32>} : memref<8x64xf32, #tpu.memory_space<vmem>>, vector<8x16xf32>,
    %107 = vector.extract_strided_slice %31 {offsets = [0, 48], sizes = [8, 16], strides = [1, 1]} : vector<8x192xf32> to vector<8x16xf32>
    %cst_36 = arith.constant 2.500000e-01 : f32
    %108 = vector.broadcast %cst_36 : f32 to vector<8x16xf32>
    %109 = arith.mulf %107, %108 : vector<8x16xf32>
    %110 = arith.truncf %109 : vector<8x16xf32> to vector<8x16xbf16>
    %111 = vector.extract_strided_slice %31 {offsets = [0, 112], sizes = [8, 16], strides = [1, 1]} : vector<8x192xf32> to vector<8x16xf32>
    %112 = arith.truncf %111 : vector<8x16xf32> to vector<8x16xbf16>
    %113 = vector.extract_strided_slice %31 {offsets = [0, 176], sizes = [8, 16], strides = [1, 1]} : vector<8x192xf32> to vector<8x16xf32>
    %114 = arith.truncf %113 : vector<8x16xf32> to vector<8x16xbf16>
    %cst_37 = arith.constant dense<0.000000e+00> : vector<8x8xf32>
    %115 = tpu.matmul %110, %112, %cst_37 {dimension_numbers = #tpu.dot_dimension_numbers<[1], [1], [0], [0], [0, 0, 1, 0], [], []>} : vector<8x16xbf16>, vector<8x16xbf16>, vector<8x8xf32> -> vector<8x8xf32>
    %116 = arith.addf %115, %37 : vector<8x8xf32>
    %cst_38 = arith.constant dense<0xFF800000> : vector<8xf32>
    %117 = vector.multi_reduction <maximumf>, %116, %cst_38 [1] : vector<8x8xf32> to vector<8xf32>
    %118 = vector.shape_cast %117 : vector<8xf32> to vector<8x1xf32>
    %119 = vector.broadcast %118 : vector<8x1xf32> to vector<8x8xf32>
    %120 = arith.subf %116, %119 : vector<8x8xf32>
    %121 = math.exp %120 : vector<8x8xf32>
    %cst_39 = arith.constant dense<0.000000e+00> : vector<8xf32>
    %122 = vector.multi_reduction <add>, %121, %cst_39 [1] : vector<8x8xf32> to vector<8xf32>
    %123 = vector.shape_cast %122 : vector<8xf32> to vector<8x1xf32>
    %124 = tpu.reciprocal %123 {approx = true} : vector<8x1xf32> -> vector<8x1xf32>
    %125 = vector.broadcast %124 : vector<8x1xf32> to vector<8x8xf32>
    %126 = arith.mulf %121, %125 : vector<8x8xf32>
    %127 = arith.truncf %126 : vector<8x8xf32> to vector<8x8xbf16>
    %cst_40 = arith.constant dense<0.000000e+00> : vector<8x16xf32>
    %128 = tpu.matmul %127, %114, %cst_40 {dimension_numbers = #tpu.dot_dimension_numbers<[1], [0], [0], [1], [0, 0, 1, 1], [], []>} : vector<8x8xbf16>, vector<8x16xbf16>, vector<8x16xf32> -> vector<8x16xf32>
    %c0_41 = arith.constant 0 : index
    %c48 = arith.constant 48 : index
    %129 = vector.load %arg15[%c0_41, %c48] : memref<8x64xf32, #tpu.memory_space<vmem>>, vector<8x16xf32>
    tpu.vector_store %arg15[%c0_41, %c48], %128 {strides = array<i32>} : memref<8x64xf32, #tpu.memory_space<vmem>>, vector<8x16xf32>,
    %c0_42 = arith.constant 0 : index
    %c0_43 = arith.constant 0 : index
    %130 = vector.load %arg15[%c0_42, %c0_43] : memref<8x64xf32, #tpu.memory_space<vmem>>, vector<8x64xf32>
    %131 = arith.truncf %130 : vector<8x64xf32> to vector<8x64xbf16>
    %c0_44 = arith.constant 0 : index
    %c0_45 = arith.constant 0 : index
    %132 = vector.load %arg6[%c0_44, %c0_45] : memref<64x64xbf16, #tpu.memory_space<vmem>>, vector<64x64xbf16>
    %cst_46 = arith.constant dense<0.000000e+00> : vector<8x64xf32>
    %133 = tpu.matmul %131, %132, %cst_46 {dimension_numbers = #tpu.dot_dimension_numbers<[1], [0], [0], [1], [0, 0, 1, 1], [], []>} : vector<8x64xbf16>, vector<64x64xbf16>, vector<8x64xf32> -> vector<8x64xf32>
    %c0_47 = arith.constant 0 : index
    %c0_48 = arith.constant 0 : index
    %134 = vector.load %arg7[%c0_47, %c0_48] : memref<1x64xf32, #tpu.memory_space<vmem>>, vector<1x64xf32>
    %135 = vector.broadcast %134 : vector<1x64xf32> to vector<8x64xf32>
    %136 = arith.addf %133, %135 : vector<8x64xf32>
    %137 = arith.addf %136, %1 : vector<8x64xf32>
    %c0_49 = arith.constant 0 : index
    %c0_50 = arith.constant 0 : index
    %138 = vector.load %arg8[%c0_49, %c0_50] : memref<1x64xf32, #tpu.memory_space<vmem>>, vector<1x64xf32>
    %c0_51 = arith.constant 0 : index
    %c0_52 = arith.constant 0 : index
    %139 = vector.load %arg9[%c0_51, %c0_52] : memref<1x64xf32, #tpu.memory_space<vmem>>, vector<1x64xf32>
    %cst_53 = arith.constant dense<0.000000e+00> : vector<8xf32>
    %140 = vector.multi_reduction <add>, %137, %cst_53 [1] : vector<8x64xf32> to vector<8xf32>
    %141 = vector.shape_cast %140 : vector<8xf32> to vector<8x1xf32>
    %cst_54 = arith.constant 6.400000e+01 : f32
    %142 = vector.broadcast %cst_54 : f32 to vector<8x1xf32>
    %143 = arith.divf %141, %142 : vector<8x1xf32>
    %144 = vector.broadcast %143 : vector<8x1xf32> to vector<8x64xf32>
    %145 = arith.subf %137, %144 : vector<8x64xf32>
    %146 = arith.mulf %145, %145 : vector<8x64xf32>
    %cst_55 = arith.constant dense<0.000000e+00> : vector<8xf32>
    %147 = vector.multi_reduction <add>, %146, %cst_55 [1] : vector<8x64xf32> to vector<8xf32>
    %148 = vector.shape_cast %147 : vector<8xf32> to vector<8x1xf32>
    %cst_56 = arith.constant 6.400000e+01 : f32
    %149 = vector.broadcast %cst_56 : f32 to vector<8x1xf32>
    %150 = arith.divf %148, %149 : vector<8x1xf32>
    %151 = vector.broadcast %143 : vector<8x1xf32> to vector<8x64xf32>
    %152 = arith.subf %137, %151 : vector<8x64xf32>
    %cst_57 = arith.constant 9.99999974E-6 : f32
    %153 = vector.broadcast %cst_57 : f32 to vector<8x1xf32>
    %154 = arith.addf %150, %153 : vector<8x1xf32>
    %155 = math.rsqrt %154 : vector<8x1xf32>
    %156 = vector.broadcast %155 : vector<8x1xf32> to vector<8x64xf32>
    %157 = arith.mulf %152, %156 : vector<8x64xf32>
    %158 = vector.broadcast %138 : vector<1x64xf32> to vector<8x64xf32>
    %159 = arith.mulf %157, %158 : vector<8x64xf32>
    %160 = vector.broadcast %139 : vector<1x64xf32> to vector<8x64xf32>
    %161 = arith.addf %159, %160 : vector<8x64xf32>
    %162 = arith.truncf %161 : vector<8x64xf32> to vector<8x64xbf16>
    %c0_58 = arith.constant 0 : index
    %c0_59 = arith.constant 0 : index
    %163 = vector.load %arg10[%c0_58, %c0_59] : memref<64x256xbf16, #tpu.memory_space<vmem>>, vector<64x256xbf16>
    %cst_60 = arith.constant dense<0.000000e+00> : vector<8x256xf32>
    %164 = tpu.matmul %162, %163, %cst_60 {dimension_numbers = #tpu.dot_dimension_numbers<[1], [0], [0], [1], [0, 0, 1, 1], [], []>} : vector<8x64xbf16>, vector<64x256xbf16>, vector<8x256xf32> -> vector<8x256xf32>
    %c0_61 = arith.constant 0 : index
    %c0_62 = arith.constant 0 : index
    %165 = vector.load %arg11[%c0_61, %c0_62] : memref<1x256xf32, #tpu.memory_space<vmem>>, vector<1x256xf32>
    %166 = vector.broadcast %165 : vector<1x256xf32> to vector<8x256xf32>
    %167 = arith.addf %164, %166 : vector<8x256xf32>
    %cst_63 = arith.constant -1.702000e+00 : f32
    %168 = vector.broadcast %cst_63 : f32 to vector<8x256xf32>
    %169 = arith.mulf %168, %167 : vector<8x256xf32>
    %170 = math.exp %169 : vector<8x256xf32>
    %cst_64 = arith.constant 1.000000e+00 : f32
    %171 = vector.broadcast %cst_64 : f32 to vector<8x256xf32>
    %172 = arith.addf %171, %170 : vector<8x256xf32>
    %cst_65 = arith.constant 1.000000e+00 : f32
    %173 = vector.broadcast %cst_65 : f32 to vector<8x256xf32>
    %174 = arith.divf %173, %172 : vector<8x256xf32>
    %175 = arith.mulf %167, %174 : vector<8x256xf32>
    %176 = arith.truncf %175 : vector<8x256xf32> to vector<8x256xbf16>
    %c0_66 = arith.constant 0 : index
    %c0_67 = arith.constant 0 : index
    %177 = vector.load %arg12[%c0_66, %c0_67] : memref<256x64xbf16, #tpu.memory_space<vmem>>, vector<256x64xbf16>
    %cst_68 = arith.constant dense<0.000000e+00> : vector<8x64xf32>
    %178 = tpu.matmul %176, %177, %cst_68 {dimension_numbers = #tpu.dot_dimension_numbers<[1], [0], [0], [1], [0, 0, 1, 1], [], []>} : vector<8x256xbf16>, vector<256x64xbf16>, vector<8x64xf32> -> vector<8x64xf32>
    %c0_69 = arith.constant 0 : index
    %c0_70 = arith.constant 0 : index
    %179 = vector.load %arg13[%c0_69, %c0_70] : memref<1x64xf32, #tpu.memory_space<vmem>>, vector<1x64xf32>
    %180 = vector.broadcast %179 : vector<1x64xf32> to vector<8x64xf32>
    %181 = arith.addf %178, %180 : vector<8x64xf32>
    %182 = arith.addf %137, %181 : vector<8x64xf32>
    %c0_71 = arith.constant 0 : index
    %c0_72 = arith.constant 0 : index
    %c0_73 = arith.constant 0 : index
    %183 = vector.load %arg14[%c0_71, %c0_72, %c0_73] : memref<1x8x64xf32, #tpu.memory_space<vmem>>, vector<1x8x64xf32>
    %184 = vector.shape_cast %183 : vector<1x8x64xf32> to vector<8x64xf32>
    %185 = vector.shape_cast %182 : vector<8x64xf32> to vector<1x8x64xf32>
    tpu.vector_store %arg14[%c0_71, %c0_72, %c0_73], %185 {strides = array<i32>} : memref<1x8x64xf32, #tpu.memory_space<vmem>>, vector<1x8x64xf32>,
    return
  }
  func.func @transform_0(%arg0: i32) -> (i32, i32, i32) {
    %c0_i32 = arith.constant 0 : i32
    %c0_i32_0 = arith.constant 0 : i32
    %c0_i32_1 = arith.constant 0 : i32
    return %arg0, %c0_i32, %c0_i32_0 : i32, i32, i32
  }
  func.func @transform_1(%arg0: i32) -> (i32, i32) {
    %c0_i32 = arith.constant 0 : i32
    %c0_i32_0 = arith.constant 0 : i32
    %c0_i32_1 = arith.constant 0 : i32
    return %c0_i32, %c0_i32_0 : i32, i32
  }
  func.func @transform_2(%arg0: i32) -> (i32, i32) {
    %c0_i32 = arith.constant 0 : i32
    %c0_i32_0 = arith.constant 0 : i32
    %c0_i32_1 = arith.constant 0 : i32
    return %c0_i32, %c0_i32_0 : i32, i32
  }
  func.func @transform_3(%arg0: i32) -> (i32, i32) {
    %c0_i32 = arith.constant 0 : i32
    %c0_i32_0 = arith.constant 0 : i32
    %c0_i32_1 = arith.constant 0 : i32
    return %c0_i32, %c0_i32_0 : i32, i32
  }
  func.func @transform_4(%arg0: i32) -> (i32, i32) {
    %c0_i32 = arith.constant 0 : i32
    %c0_i32_0 = arith.constant 0 : i32
    %c0_i32_1 = arith.constant 0 : i32
    return %c0_i32, %c0_i32_0 : i32, i32
  }
  func.func @transform_5(%arg0: i32) -> (i32, i32) {
    %c0_i32 = arith.constant 0 : i32
    %c0_i32_0 = arith.constant 0 : i32
    %c0_i32_1 = arith.constant 0 : i32
    return %c0_i32, %c0_i32_0 : i32, i32
  }
  func.func @transform_6(%arg0: i32) -> (i32, i32) {
    %c0_i32 = arith.constant 0 : i32
    %c0_i32_0 = arith.constant 0 : i32
    %c0_i32_1 = arith.constant 0 : i32
    return %c0_i32, %c0_i32_0 : i32, i32
  }
  func.func @transform_7(%arg0: i32) -> (i32, i32) {
    %c0_i32 = arith.constant 0 : i32
    %c0_i32_0 = arith.constant 0 : i32
    %c0_i32_1 = arith.constant 0 : i32
    return %c0_i32, %c0_i32_0 : i32, i32
  }
  func.func @transform_8(%arg0: i32) -> (i32, i32) {
    %c0_i32 = arith.constant 0 : i32
    %c0_i32_0 = arith.constant 0 : i32
    %c0_i32_1 = arith.constant 0 : i32
    return %c0_i32, %c0_i32_0 : i32, i32
  }
  func.func @transform_9(%arg0: i32) -> (i32, i32) {
    %c0_i32 = arith.constant 0 : i32
    %c0_i32_0 = arith.constant 0 : i32
    %c0_i32_1 = arith.constant 0 : i32
    return %c0_i32, %c0_i32_0 : i32, i32
  }
  func.func @transform_10(%arg0: i32) -> (i32, i32) {
    %c0_i32 = arith.constant 0 : i32
    %c0_i32_0 = arith.constant 0 : i32
    %c0_i32_1 = arith.constant 0 : i32
    return %c0_i32, %c0_i32_0 : i32, i32
  }
  func.func @transform_11(%arg0: i32) -> (i32, i32) {
    %c0_i32 = arith.constant 0 : i32
    %c0_i32_0 = arith.constant 0 : i32
    %c0_i32_1 = arith.constant 0 : i32
    return %c0_i32, %c0_i32_0 : i32, i32
  }
  func.func @transform_12(%arg0: i32) -> (i32, i32) {
    %c0_i32 = arith.constant 0 : i32
    %c0_i32_0 = arith.constant 0 : i32
    %c0_i32_1 = arith.constant 0 : i32
    return %c0_i32, %c0_i32_0 : i32, i32
  }
  func.func @transform_13(%arg0: i32) -> (i32, i32, i32) {
    %c0_i32 = arith.constant 0 : i32
    %c0_i32_0 = arith.constant 0 : i32
    %c0_i32_1 = arith.constant 0 : i32
    return %arg0, %c0_i32, %c0_i32_0 : i32, i32, i32
  }
}

module attributes {stable_mosaic.version = 11 : i64} {
  func.func @_ln_linear_kernel(%arg0: i32, %arg1: memref<8x64xf32, #tpu.memory_space<vmem>>, %arg2: memref<1x64xf32, #tpu.memory_space<vmem>>, %arg3: memref<1x64xf32, #tpu.memory_space<vmem>>, %arg4: memref<64x32xbf16, #tpu.memory_space<vmem>>, %arg5: memref<1x32xf32, #tpu.memory_space<vmem>>, %arg6: memref<8x32xf32, #tpu.memory_space<vmem>>) attributes {dimension_semantics = [#tpu.dimension_semantics<parallel>], iteration_bounds = array<i64: 1>, scalar_prefetch = 0 : i64, scratch_operands = 0 : i64, tpu.core_type = #tpu.core_type<tc>, window_params = [{transform_indices = @transform_0, window_bounds = array<i64: 8, 64>}, {pipeline_mode = #tpu.pipeline_mode<synchronous>, transform_indices = @transform_1, window_bounds = array<i64: 1, 64>}, {pipeline_mode = #tpu.pipeline_mode<synchronous>, transform_indices = @transform_2, window_bounds = array<i64: 1, 64>}, {pipeline_mode = #tpu.pipeline_mode<synchronous>, transform_indices = @transform_3, window_bounds = array<i64: 64, 32>}, {pipeline_mode = #tpu.pipeline_mode<synchronous>, transform_indices = @transform_4, window_bounds = array<i64: 1, 32>}, {transform_indices = @transform_5, window_bounds = array<i64: 8, 32>}]} {
    %c0 = arith.constant 0 : index
    %c0_0 = arith.constant 0 : index
    %0 = vector.load %arg1[%c0, %c0_0] : memref<8x64xf32, #tpu.memory_space<vmem>>, vector<8x64xf32>
    %c0_1 = arith.constant 0 : index
    %c0_2 = arith.constant 0 : index
    %1 = vector.load %arg2[%c0_1, %c0_2] : memref<1x64xf32, #tpu.memory_space<vmem>>, vector<1x64xf32>
    %c0_3 = arith.constant 0 : index
    %c0_4 = arith.constant 0 : index
    %2 = vector.load %arg3[%c0_3, %c0_4] : memref<1x64xf32, #tpu.memory_space<vmem>>, vector<1x64xf32>
    %cst = arith.constant dense<0.000000e+00> : vector<8xf32>
    %3 = vector.multi_reduction <add>, %0, %cst [1] : vector<8x64xf32> to vector<8xf32>
    %4 = vector.shape_cast %3 : vector<8xf32> to vector<8x1xf32>
    %cst_5 = arith.constant 6.400000e+01 : f32
    %5 = vector.broadcast %cst_5 : f32 to vector<8x1xf32>
    %6 = arith.divf %4, %5 : vector<8x1xf32>
    %7 = vector.broadcast %6 : vector<8x1xf32> to vector<8x64xf32>
    %8 = arith.subf %0, %7 : vector<8x64xf32>
    %9 = arith.mulf %8, %8 : vector<8x64xf32>
    %cst_6 = arith.constant dense<0.000000e+00> : vector<8xf32>
    %10 = vector.multi_reduction <add>, %9, %cst_6 [1] : vector<8x64xf32> to vector<8xf32>
    %11 = vector.shape_cast %10 : vector<8xf32> to vector<8x1xf32>
    %cst_7 = arith.constant 6.400000e+01 : f32
    %12 = vector.broadcast %cst_7 : f32 to vector<8x1xf32>
    %13 = arith.divf %11, %12 : vector<8x1xf32>
    %14 = vector.broadcast %6 : vector<8x1xf32> to vector<8x64xf32>
    %15 = arith.subf %0, %14 : vector<8x64xf32>
    %cst_8 = arith.constant 9.99999974E-6 : f32
    %16 = vector.broadcast %cst_8 : f32 to vector<8x1xf32>
    %17 = arith.addf %13, %16 : vector<8x1xf32>
    %18 = math.rsqrt %17 : vector<8x1xf32>
    %19 = vector.broadcast %18 : vector<8x1xf32> to vector<8x64xf32>
    %20 = arith.mulf %15, %19 : vector<8x64xf32>
    %21 = vector.broadcast %1 : vector<1x64xf32> to vector<8x64xf32>
    %22 = arith.mulf %20, %21 : vector<8x64xf32>
    %23 = vector.broadcast %2 : vector<1x64xf32> to vector<8x64xf32>
    %24 = arith.addf %22, %23 : vector<8x64xf32>
    %25 = arith.truncf %24 : vector<8x64xf32> to vector<8x64xbf16>
    %c0_9 = arith.constant 0 : index
    %c0_10 = arith.constant 0 : index
    %26 = vector.load %arg4[%c0_9, %c0_10] : memref<64x32xbf16, #tpu.memory_space<vmem>>, vector<64x32xbf16>
    %cst_11 = arith.constant dense<0.000000e+00> : vector<8x32xf32>
    %27 = tpu.matmul %25, %26, %cst_11 {dimension_numbers = #tpu.dot_dimension_numbers<[1], [0], [0], [1], [0, 0, 1, 1], [], []>} : vector<8x64xbf16>, vector<64x32xbf16>, vector<8x32xf32> -> vector<8x32xf32>
    %c0_12 = arith.constant 0 : index
    %c0_13 = arith.constant 0 : index
    %28 = vector.load %arg5[%c0_12, %c0_13] : memref<1x32xf32, #tpu.memory_space<vmem>>, vector<1x32xf32>
    %29 = vector.broadcast %28 : vector<1x32xf32> to vector<8x32xf32>
    %30 = arith.addf %27, %29 : vector<8x32xf32>
    %c0_14 = arith.constant 0 : index
    %c0_15 = arith.constant 0 : index
    %31 = vector.load %arg6[%c0_14, %c0_15] : memref<8x32xf32, #tpu.memory_space<vmem>>, vector<8x32xf32>
    tpu.vector_store %arg6[%c0_14, %c0_15], %30 {strides = array<i32>} : memref<8x32xf32, #tpu.memory_space<vmem>>, vector<8x32xf32>,
    return
  }
  func.func @transform_0(%arg0: i32) -> (i32, i32) {
    %c0_i32 = arith.constant 0 : i32
    %c0_i32_0 = arith.constant 0 : i32
    return %arg0, %c0_i32 : i32, i32
  }
  func.func @transform_1(%arg0: i32) -> (i32, i32) {
    %c0_i32 = arith.constant 0 : i32
    %c0_i32_0 = arith.constant 0 : i32
    %c0_i32_1 = arith.constant 0 : i32
    return %c0_i32, %c0_i32_0 : i32, i32
  }
  func.func @transform_2(%arg0: i32) -> (i32, i32) {
    %c0_i32 = arith.constant 0 : i32
    %c0_i32_0 = arith.constant 0 : i32
    %c0_i32_1 = arith.constant 0 : i32
    return %c0_i32, %c0_i32_0 : i32, i32
  }
  func.func @transform_3(%arg0: i32) -> (i32, i32) {
    %c0_i32 = arith.constant 0 : i32
    %c0_i32_0 = arith.constant 0 : i32
    %c0_i32_1 = arith.constant 0 : i32
    return %c0_i32, %c0_i32_0 : i32, i32
  }
  func.func @transform_4(%arg0: i32) -> (i32, i32) {
    %c0_i32 = arith.constant 0 : i32
    %c0_i32_0 = arith.constant 0 : i32
    %c0_i32_1 = arith.constant 0 : i32
    return %c0_i32, %c0_i32_0 : i32, i32
  }
  func.func @transform_5(%arg0: i32) -> (i32, i32) {
    %c0_i32 = arith.constant 0 : i32
    %c0_i32_0 = arith.constant 0 : i32
    return %arg0, %c0_i32 : i32, i32
  }
}

module attributes {stable_mosaic.version = 11 : i64} {
  func.func @_block_kernel(%arg0: i32, %arg1: memref<1x16x64xf32, #tpu.memory_space<vmem>>, %arg2: memref<1x64xf32, #tpu.memory_space<vmem>>, %arg3: memref<1x64xf32, #tpu.memory_space<vmem>>, %arg4: memref<64x192xbf16, #tpu.memory_space<vmem>>, %arg5: memref<1x192xf32, #tpu.memory_space<vmem>>, %arg6: memref<64x64xbf16, #tpu.memory_space<vmem>>, %arg7: memref<1x64xf32, #tpu.memory_space<vmem>>, %arg8: memref<1x64xf32, #tpu.memory_space<vmem>>, %arg9: memref<1x64xf32, #tpu.memory_space<vmem>>, %arg10: memref<64x256xbf16, #tpu.memory_space<vmem>>, %arg11: memref<1x256xf32, #tpu.memory_space<vmem>>, %arg12: memref<256x64xbf16, #tpu.memory_space<vmem>>, %arg13: memref<1x64xf32, #tpu.memory_space<vmem>>, %arg14: memref<1x16x64xf32, #tpu.memory_space<vmem>>, %arg15: memref<16x64xf32, #tpu.memory_space<vmem>>) attributes {dimension_semantics = [#tpu.dimension_semantics<parallel>], iteration_bounds = array<i64: 6>, scalar_prefetch = 0 : i64, scratch_operands = 1 : i64, tpu.core_type = #tpu.core_type<tc>, window_params = [{transform_indices = @transform_0, window_bounds = array<i64: 1, 16, 64>}, {pipeline_mode = #tpu.pipeline_mode<synchronous>, transform_indices = @transform_1, window_bounds = array<i64: 1, 64>}, {pipeline_mode = #tpu.pipeline_mode<synchronous>, transform_indices = @transform_2, window_bounds = array<i64: 1, 64>}, {pipeline_mode = #tpu.pipeline_mode<synchronous>, transform_indices = @transform_3, window_bounds = array<i64: 64, 192>}, {pipeline_mode = #tpu.pipeline_mode<synchronous>, transform_indices = @transform_4, window_bounds = array<i64: 1, 192>}, {pipeline_mode = #tpu.pipeline_mode<synchronous>, transform_indices = @transform_5, window_bounds = array<i64: 64, 64>}, {pipeline_mode = #tpu.pipeline_mode<synchronous>, transform_indices = @transform_6, window_bounds = array<i64: 1, 64>}, {pipeline_mode = #tpu.pipeline_mode<synchronous>, transform_indices = @transform_7, window_bounds = array<i64: 1, 64>}, {pipeline_mode = #tpu.pipeline_mode<synchronous>, transform_indices = @transform_8, window_bounds = array<i64: 1, 64>}, {pipeline_mode = #tpu.pipeline_mode<synchronous>, transform_indices = @transform_9, window_bounds = array<i64: 64, 256>}, {pipeline_mode = #tpu.pipeline_mode<synchronous>, transform_indices = @transform_10, window_bounds = array<i64: 1, 256>}, {pipeline_mode = #tpu.pipeline_mode<synchronous>, transform_indices = @transform_11, window_bounds = array<i64: 256, 64>}, {pipeline_mode = #tpu.pipeline_mode<synchronous>, transform_indices = @transform_12, window_bounds = array<i64: 1, 64>}, {transform_indices = @transform_13, window_bounds = array<i64: 1, 16, 64>}]} {
    %c0 = arith.constant 0 : index
    %c0_0 = arith.constant 0 : index
    %c0_1 = arith.constant 0 : index
    %0 = vector.load %arg1[%c0, %c0_0, %c0_1] : memref<1x16x64xf32, #tpu.memory_space<vmem>>, vector<1x16x64xf32>
    %1 = vector.shape_cast %0 : vector<1x16x64xf32> to vector<16x64xf32>
    %c0_2 = arith.constant 0 : index
    %c0_3 = arith.constant 0 : index
    %2 = vector.load %arg2[%c0_2, %c0_3] : memref<1x64xf32, #tpu.memory_space<vmem>>, vector<1x64xf32>
    %c0_4 = arith.constant 0 : index
    %c0_5 = arith.constant 0 : index
    %3 = vector.load %arg3[%c0_4, %c0_5] : memref<1x64xf32, #tpu.memory_space<vmem>>, vector<1x64xf32>
    %cst = arith.constant dense<0.000000e+00> : vector<16xf32>
    %4 = vector.multi_reduction <add>, %1, %cst [1] : vector<16x64xf32> to vector<16xf32>
    %5 = vector.shape_cast %4 : vector<16xf32> to vector<16x1xf32>
    %cst_6 = arith.constant 6.400000e+01 : f32
    %6 = vector.broadcast %cst_6 : f32 to vector<16x1xf32>
    %7 = arith.divf %5, %6 : vector<16x1xf32>
    %8 = vector.broadcast %7 : vector<16x1xf32> to vector<16x64xf32>
    %9 = arith.subf %1, %8 : vector<16x64xf32>
    %10 = arith.mulf %9, %9 : vector<16x64xf32>
    %cst_7 = arith.constant dense<0.000000e+00> : vector<16xf32>
    %11 = vector.multi_reduction <add>, %10, %cst_7 [1] : vector<16x64xf32> to vector<16xf32>
    %12 = vector.shape_cast %11 : vector<16xf32> to vector<16x1xf32>
    %cst_8 = arith.constant 6.400000e+01 : f32
    %13 = vector.broadcast %cst_8 : f32 to vector<16x1xf32>
    %14 = arith.divf %12, %13 : vector<16x1xf32>
    %15 = vector.broadcast %7 : vector<16x1xf32> to vector<16x64xf32>
    %16 = arith.subf %1, %15 : vector<16x64xf32>
    %cst_9 = arith.constant 9.99999974E-6 : f32
    %17 = vector.broadcast %cst_9 : f32 to vector<16x1xf32>
    %18 = arith.addf %14, %17 : vector<16x1xf32>
    %19 = math.rsqrt %18 : vector<16x1xf32>
    %20 = vector.broadcast %19 : vector<16x1xf32> to vector<16x64xf32>
    %21 = arith.mulf %16, %20 : vector<16x64xf32>
    %22 = vector.broadcast %2 : vector<1x64xf32> to vector<16x64xf32>
    %23 = arith.mulf %21, %22 : vector<16x64xf32>
    %24 = vector.broadcast %3 : vector<1x64xf32> to vector<16x64xf32>
    %25 = arith.addf %23, %24 : vector<16x64xf32>
    %26 = arith.truncf %25 : vector<16x64xf32> to vector<16x64xbf16>
    %c0_10 = arith.constant 0 : index
    %c0_11 = arith.constant 0 : index
    %27 = vector.load %arg4[%c0_10, %c0_11] : memref<64x192xbf16, #tpu.memory_space<vmem>>, vector<64x192xbf16>
    %cst_12 = arith.constant dense<0.000000e+00> : vector<16x192xf32>
    %28 = tpu.matmul %26, %27, %cst_12 {dimension_numbers = #tpu.dot_dimension_numbers<[1], [0], [0], [1], [0, 0, 1, 1], [], []>} : vector<16x64xbf16>, vector<64x192xbf16>, vector<16x192xf32> -> vector<16x192xf32>
    %c0_13 = arith.constant 0 : index
    %c0_14 = arith.constant 0 : index
    %29 = vector.load %arg5[%c0_13, %c0_14] : memref<1x192xf32, #tpu.memory_space<vmem>>, vector<1x192xf32>
    %30 = vector.broadcast %29 : vector<1x192xf32> to vector<16x192xf32>
    %31 = arith.addf %28, %30 : vector<16x192xf32>
    %32 = tpu.iota {dimensions = array<i32: 0>} : vector<16x16xi32>
    %33 = tpu.iota {dimensions = array<i32: 1>} : vector<16x16xi32>
    %c16_i32 = arith.constant 16 : i32
    %34 = vector.broadcast %c16_i32 : i32 to vector<16x16xi32>
    %35 = arith.cmpi slt, %33, %34 : vector<16x16xi32>
    %36 = arith.cmpi sle, %33, %32 : vector<16x16xi32>
    %37 = arith.andi %35, %36 : vector<16x16xi1>
    %cst_15 = arith.constant 0.000000e+00 : f32
    %cst_16 = arith.constant -1.000000e+09 : f32
    %38 = vector.broadcast %cst_15 : f32 to vector<16x16xf32>
    %39 = vector.broadcast %cst_16 : f32 to vector<16x16xf32>
    %40 = arith.select %37, %38, %39 : vector<16x16xi1>, vector<16x16xf32>
    %41 = vector.extract_strided_slice %31 {offsets = [0, 0], sizes = [16, 16], strides = [1, 1]} : vector<16x192xf32> to vector<16x16xf32>
    %cst_17 = arith.constant 2.500000e-01 : f32
    %42 = vector.broadcast %cst_17 : f32 to vector<16x16xf32>
    %43 = arith.mulf %41, %42 : vector<16x16xf32>
    %44 = arith.truncf %43 : vector<16x16xf32> to vector<16x16xbf16>
    %45 = vector.extract_strided_slice %31 {offsets = [0, 64], sizes = [16, 16], strides = [1, 1]} : vector<16x192xf32> to vector<16x16xf32>
    %46 = arith.truncf %45 : vector<16x16xf32> to vector<16x16xbf16>
    %47 = vector.extract_strided_slice %31 {offsets = [0, 128], sizes = [16, 16], strides = [1, 1]} : vector<16x192xf32> to vector<16x16xf32>
    %48 = arith.truncf %47 : vector<16x16xf32> to vector<16x16xbf16>
    %cst_18 = arith.constant dense<0.000000e+00> : vector<16x16xf32>
    %49 = tpu.matmul %44, %46, %cst_18 {dimension_numbers = #tpu.dot_dimension_numbers<[1], [1], [0], [0], [0, 0, 1, 0], [], []>} : vector<16x16xbf16>, vector<16x16xbf16>, vector<16x16xf32> -> vector<16x16xf32>
    %50 = arith.addf %49, %40 : vector<16x16xf32>
    %cst_19 = arith.constant dense<0xFF800000> : vector<16xf32>
    %51 = vector.multi_reduction <maximumf>, %50, %cst_19 [1] : vector<16x16xf32> to vector<16xf32>
    %52 = vector.shape_cast %51 : vector<16xf32> to vector<16x1xf32>
    %53 = vector.broadcast %52 : vector<16x1xf32> to vector<16x16xf32>
    %54 = arith.subf %50, %53 : vector<16x16xf32>
    %55 = math.exp %54 : vector<16x16xf32>
    %cst_20 = arith.constant dense<0.000000e+00> : vector<16xf32>
    %56 = vector.multi_reduction <add>, %55, %cst_20 [1] : vector<16x16xf32> to vector<16xf32>
    %57 = vector.shape_cast %56 : vector<16xf32> to vector<16x1xf32>
    %58 = tpu.reciprocal %57 {approx = true} : vector<16x1xf32> -> vector<16x1xf32>
    %59 = vector.broadcast %58 : vector<16x1xf32> to vector<16x16xf32>
    %60 = arith.mulf %55, %59 : vector<16x16xf32>
    %61 = arith.truncf %60 : vector<16x16xf32> to vector<16x16xbf16>
    %cst_21 = arith.constant dense<0.000000e+00> : vector<16x16xf32>
    %62 = tpu.matmul %61, %48, %cst_21 {dimension_numbers = #tpu.dot_dimension_numbers<[1], [0], [0], [1], [0, 0, 1, 1], [], []>} : vector<16x16xbf16>, vector<16x16xbf16>, vector<16x16xf32> -> vector<16x16xf32>
    %c0_22 = arith.constant 0 : index
    %c0_23 = arith.constant 0 : index
    %63 = vector.load %arg15[%c0_22, %c0_23] : memref<16x64xf32, #tpu.memory_space<vmem>>, vector<16x16xf32>
    tpu.vector_store %arg15[%c0_22, %c0_23], %62 {strides = array<i32>} : memref<16x64xf32, #tpu.memory_space<vmem>>, vector<16x16xf32>,
    %64 = vector.extract_strided_slice %31 {offsets = [0, 16], sizes = [16, 16], strides = [1, 1]} : vector<16x192xf32> to vector<16x16xf32>
    %cst_24 = arith.constant 2.500000e-01 : f32
    %65 = vector.broadcast %cst_24 : f32 to vector<16x16xf32>
    %66 = arith.mulf %64, %65 : vector<16x16xf32>
    %67 = arith.truncf %66 : vector<16x16xf32> to vector<16x16xbf16>
    %68 = vector.extract_strided_slice %31 {offsets = [0, 80], sizes = [16, 16], strides = [1, 1]} : vector<16x192xf32> to vector<16x16xf32>
    %69 = arith.truncf %68 : vector<16x16xf32> to vector<16x16xbf16>
    %70 = vector.extract_strided_slice %31 {offsets = [0, 144], sizes = [16, 16], strides = [1, 1]} : vector<16x192xf32> to vector<16x16xf32>
    %71 = arith.truncf %70 : vector<16x16xf32> to vector<16x16xbf16>
    %cst_25 = arith.constant dense<0.000000e+00> : vector<16x16xf32>
    %72 = tpu.matmul %67, %69, %cst_25 {dimension_numbers = #tpu.dot_dimension_numbers<[1], [1], [0], [0], [0, 0, 1, 0], [], []>} : vector<16x16xbf16>, vector<16x16xbf16>, vector<16x16xf32> -> vector<16x16xf32>
    %73 = arith.addf %72, %40 : vector<16x16xf32>
    %cst_26 = arith.constant dense<0xFF800000> : vector<16xf32>
    %74 = vector.multi_reduction <maximumf>, %73, %cst_26 [1] : vector<16x16xf32> to vector<16xf32>
    %75 = vector.shape_cast %74 : vector<16xf32> to vector<16x1xf32>
    %76 = vector.broadcast %75 : vector<16x1xf32> to vector<16x16xf32>
    %77 = arith.subf %73, %76 : vector<16x16xf32>
    %78 = math.exp %77 : vector<16x16xf32>
    %cst_27 = arith.constant dense<0.000000e+00> : vector<16xf32>
    %79 = vector.multi_reduction <add>, %78, %cst_27 [1] : vector<16x16xf32> to vector<16xf32>
    %80 = vector.shape_cast %79 : vector<16xf32> to vector<16x1xf32>
    %81 = tpu.reciprocal %80 {approx = true} : vector<16x1xf32> -> vector<16x1xf32>
    %82 = vector.broadcast %81 : vector<16x1xf32> to vector<16x16xf32>
    %83 = arith.mulf %78, %82 : vector<16x16xf32>
    %84 = arith.truncf %83 : vector<16x16xf32> to vector<16x16xbf16>
    %cst_28 = arith.constant dense<0.000000e+00> : vector<16x16xf32>
    %85 = tpu.matmul %84, %71, %cst_28 {dimension_numbers = #tpu.dot_dimension_numbers<[1], [0], [0], [1], [0, 0, 1, 1], [], []>} : vector<16x16xbf16>, vector<16x16xbf16>, vector<16x16xf32> -> vector<16x16xf32>
    %c0_29 = arith.constant 0 : index
    %c16 = arith.constant 16 : index
    %86 = vector.load %arg15[%c0_29, %c16] : memref<16x64xf32, #tpu.memory_space<vmem>>, vector<16x16xf32>
    tpu.vector_store %arg15[%c0_29, %c16], %85 {strides = array<i32>} : memref<16x64xf32, #tpu.memory_space<vmem>>, vector<16x16xf32>,
    %87 = vector.extract_strided_slice %31 {offsets = [0, 32], sizes = [16, 16], strides = [1, 1]} : vector<16x192xf32> to vector<16x16xf32>
    %cst_30 = arith.constant 2.500000e-01 : f32
    %88 = vector.broadcast %cst_30 : f32 to vector<16x16xf32>
    %89 = arith.mulf %87, %88 : vector<16x16xf32>
    %90 = arith.truncf %89 : vector<16x16xf32> to vector<16x16xbf16>
    %91 = vector.extract_strided_slice %31 {offsets = [0, 96], sizes = [16, 16], strides = [1, 1]} : vector<16x192xf32> to vector<16x16xf32>
    %92 = arith.truncf %91 : vector<16x16xf32> to vector<16x16xbf16>
    %93 = vector.extract_strided_slice %31 {offsets = [0, 160], sizes = [16, 16], strides = [1, 1]} : vector<16x192xf32> to vector<16x16xf32>
    %94 = arith.truncf %93 : vector<16x16xf32> to vector<16x16xbf16>
    %cst_31 = arith.constant dense<0.000000e+00> : vector<16x16xf32>
    %95 = tpu.matmul %90, %92, %cst_31 {dimension_numbers = #tpu.dot_dimension_numbers<[1], [1], [0], [0], [0, 0, 1, 0], [], []>} : vector<16x16xbf16>, vector<16x16xbf16>, vector<16x16xf32> -> vector<16x16xf32>
    %96 = arith.addf %95, %40 : vector<16x16xf32>
    %cst_32 = arith.constant dense<0xFF800000> : vector<16xf32>
    %97 = vector.multi_reduction <maximumf>, %96, %cst_32 [1] : vector<16x16xf32> to vector<16xf32>
    %98 = vector.shape_cast %97 : vector<16xf32> to vector<16x1xf32>
    %99 = vector.broadcast %98 : vector<16x1xf32> to vector<16x16xf32>
    %100 = arith.subf %96, %99 : vector<16x16xf32>
    %101 = math.exp %100 : vector<16x16xf32>
    %cst_33 = arith.constant dense<0.000000e+00> : vector<16xf32>
    %102 = vector.multi_reduction <add>, %101, %cst_33 [1] : vector<16x16xf32> to vector<16xf32>
    %103 = vector.shape_cast %102 : vector<16xf32> to vector<16x1xf32>
    %104 = tpu.reciprocal %103 {approx = true} : vector<16x1xf32> -> vector<16x1xf32>
    %105 = vector.broadcast %104 : vector<16x1xf32> to vector<16x16xf32>
    %106 = arith.mulf %101, %105 : vector<16x16xf32>
    %107 = arith.truncf %106 : vector<16x16xf32> to vector<16x16xbf16>
    %cst_34 = arith.constant dense<0.000000e+00> : vector<16x16xf32>
    %108 = tpu.matmul %107, %94, %cst_34 {dimension_numbers = #tpu.dot_dimension_numbers<[1], [0], [0], [1], [0, 0, 1, 1], [], []>} : vector<16x16xbf16>, vector<16x16xbf16>, vector<16x16xf32> -> vector<16x16xf32>
    %c0_35 = arith.constant 0 : index
    %c32 = arith.constant 32 : index
    %109 = vector.load %arg15[%c0_35, %c32] : memref<16x64xf32, #tpu.memory_space<vmem>>, vector<16x16xf32>
    tpu.vector_store %arg15[%c0_35, %c32], %108 {strides = array<i32>} : memref<16x64xf32, #tpu.memory_space<vmem>>, vector<16x16xf32>,
    %110 = vector.extract_strided_slice %31 {offsets = [0, 48], sizes = [16, 16], strides = [1, 1]} : vector<16x192xf32> to vector<16x16xf32>
    %cst_36 = arith.constant 2.500000e-01 : f32
    %111 = vector.broadcast %cst_36 : f32 to vector<16x16xf32>
    %112 = arith.mulf %110, %111 : vector<16x16xf32>
    %113 = arith.truncf %112 : vector<16x16xf32> to vector<16x16xbf16>
    %114 = vector.extract_strided_slice %31 {offsets = [0, 112], sizes = [16, 16], strides = [1, 1]} : vector<16x192xf32> to vector<16x16xf32>
    %115 = arith.truncf %114 : vector<16x16xf32> to vector<16x16xbf16>
    %116 = vector.extract_strided_slice %31 {offsets = [0, 176], sizes = [16, 16], strides = [1, 1]} : vector<16x192xf32> to vector<16x16xf32>
    %117 = arith.truncf %116 : vector<16x16xf32> to vector<16x16xbf16>
    %cst_37 = arith.constant dense<0.000000e+00> : vector<16x16xf32>
    %118 = tpu.matmul %113, %115, %cst_37 {dimension_numbers = #tpu.dot_dimension_numbers<[1], [1], [0], [0], [0, 0, 1, 0], [], []>} : vector<16x16xbf16>, vector<16x16xbf16>, vector<16x16xf32> -> vector<16x16xf32>
    %119 = arith.addf %118, %40 : vector<16x16xf32>
    %cst_38 = arith.constant dense<0xFF800000> : vector<16xf32>
    %120 = vector.multi_reduction <maximumf>, %119, %cst_38 [1] : vector<16x16xf32> to vector<16xf32>
    %121 = vector.shape_cast %120 : vector<16xf32> to vector<16x1xf32>
    %122 = vector.broadcast %121 : vector<16x1xf32> to vector<16x16xf32>
    %123 = arith.subf %119, %122 : vector<16x16xf32>
    %124 = math.exp %123 : vector<16x16xf32>
    %cst_39 = arith.constant dense<0.000000e+00> : vector<16xf32>
    %125 = vector.multi_reduction <add>, %124, %cst_39 [1] : vector<16x16xf32> to vector<16xf32>
    %126 = vector.shape_cast %125 : vector<16xf32> to vector<16x1xf32>
    %127 = tpu.reciprocal %126 {approx = true} : vector<16x1xf32> -> vector<16x1xf32>
    %128 = vector.broadcast %127 : vector<16x1xf32> to vector<16x16xf32>
    %129 = arith.mulf %124, %128 : vector<16x16xf32>
    %130 = arith.truncf %129 : vector<16x16xf32> to vector<16x16xbf16>
    %cst_40 = arith.constant dense<0.000000e+00> : vector<16x16xf32>
    %131 = tpu.matmul %130, %117, %cst_40 {dimension_numbers = #tpu.dot_dimension_numbers<[1], [0], [0], [1], [0, 0, 1, 1], [], []>} : vector<16x16xbf16>, vector<16x16xbf16>, vector<16x16xf32> -> vector<16x16xf32>
    %c0_41 = arith.constant 0 : index
    %c48 = arith.constant 48 : index
    %132 = vector.load %arg15[%c0_41, %c48] : memref<16x64xf32, #tpu.memory_space<vmem>>, vector<16x16xf32>
    tpu.vector_store %arg15[%c0_41, %c48], %131 {strides = array<i32>} : memref<16x64xf32, #tpu.memory_space<vmem>>, vector<16x16xf32>,
    %c0_42 = arith.constant 0 : index
    %c0_43 = arith.constant 0 : index
    %133 = vector.load %arg15[%c0_42, %c0_43] : memref<16x64xf32, #tpu.memory_space<vmem>>, vector<16x64xf32>
    %134 = arith.truncf %133 : vector<16x64xf32> to vector<16x64xbf16>
    %c0_44 = arith.constant 0 : index
    %c0_45 = arith.constant 0 : index
    %135 = vector.load %arg6[%c0_44, %c0_45] : memref<64x64xbf16, #tpu.memory_space<vmem>>, vector<64x64xbf16>
    %cst_46 = arith.constant dense<0.000000e+00> : vector<16x64xf32>
    %136 = tpu.matmul %134, %135, %cst_46 {dimension_numbers = #tpu.dot_dimension_numbers<[1], [0], [0], [1], [0, 0, 1, 1], [], []>} : vector<16x64xbf16>, vector<64x64xbf16>, vector<16x64xf32> -> vector<16x64xf32>
    %c0_47 = arith.constant 0 : index
    %c0_48 = arith.constant 0 : index
    %137 = vector.load %arg7[%c0_47, %c0_48] : memref<1x64xf32, #tpu.memory_space<vmem>>, vector<1x64xf32>
    %138 = vector.broadcast %137 : vector<1x64xf32> to vector<16x64xf32>
    %139 = arith.addf %136, %138 : vector<16x64xf32>
    %140 = arith.addf %139, %1 : vector<16x64xf32>
    %c0_49 = arith.constant 0 : index
    %c0_50 = arith.constant 0 : index
    %141 = vector.load %arg8[%c0_49, %c0_50] : memref<1x64xf32, #tpu.memory_space<vmem>>, vector<1x64xf32>
    %c0_51 = arith.constant 0 : index
    %c0_52 = arith.constant 0 : index
    %142 = vector.load %arg9[%c0_51, %c0_52] : memref<1x64xf32, #tpu.memory_space<vmem>>, vector<1x64xf32>
    %cst_53 = arith.constant dense<0.000000e+00> : vector<16xf32>
    %143 = vector.multi_reduction <add>, %140, %cst_53 [1] : vector<16x64xf32> to vector<16xf32>
    %144 = vector.shape_cast %143 : vector<16xf32> to vector<16x1xf32>
    %cst_54 = arith.constant 6.400000e+01 : f32
    %145 = vector.broadcast %cst_54 : f32 to vector<16x1xf32>
    %146 = arith.divf %144, %145 : vector<16x1xf32>
    %147 = vector.broadcast %146 : vector<16x1xf32> to vector<16x64xf32>
    %148 = arith.subf %140, %147 : vector<16x64xf32>
    %149 = arith.mulf %148, %148 : vector<16x64xf32>
    %cst_55 = arith.constant dense<0.000000e+00> : vector<16xf32>
    %150 = vector.multi_reduction <add>, %149, %cst_55 [1] : vector<16x64xf32> to vector<16xf32>
    %151 = vector.shape_cast %150 : vector<16xf32> to vector<16x1xf32>
    %cst_56 = arith.constant 6.400000e+01 : f32
    %152 = vector.broadcast %cst_56 : f32 to vector<16x1xf32>
    %153 = arith.divf %151, %152 : vector<16x1xf32>
    %154 = vector.broadcast %146 : vector<16x1xf32> to vector<16x64xf32>
    %155 = arith.subf %140, %154 : vector<16x64xf32>
    %cst_57 = arith.constant 9.99999974E-6 : f32
    %156 = vector.broadcast %cst_57 : f32 to vector<16x1xf32>
    %157 = arith.addf %153, %156 : vector<16x1xf32>
    %158 = math.rsqrt %157 : vector<16x1xf32>
    %159 = vector.broadcast %158 : vector<16x1xf32> to vector<16x64xf32>
    %160 = arith.mulf %155, %159 : vector<16x64xf32>
    %161 = vector.broadcast %141 : vector<1x64xf32> to vector<16x64xf32>
    %162 = arith.mulf %160, %161 : vector<16x64xf32>
    %163 = vector.broadcast %142 : vector<1x64xf32> to vector<16x64xf32>
    %164 = arith.addf %162, %163 : vector<16x64xf32>
    %165 = arith.truncf %164 : vector<16x64xf32> to vector<16x64xbf16>
    %c0_58 = arith.constant 0 : index
    %c0_59 = arith.constant 0 : index
    %166 = vector.load %arg10[%c0_58, %c0_59] : memref<64x256xbf16, #tpu.memory_space<vmem>>, vector<64x256xbf16>
    %cst_60 = arith.constant dense<0.000000e+00> : vector<16x256xf32>
    %167 = tpu.matmul %165, %166, %cst_60 {dimension_numbers = #tpu.dot_dimension_numbers<[1], [0], [0], [1], [0, 0, 1, 1], [], []>} : vector<16x64xbf16>, vector<64x256xbf16>, vector<16x256xf32> -> vector<16x256xf32>
    %c0_61 = arith.constant 0 : index
    %c0_62 = arith.constant 0 : index
    %168 = vector.load %arg11[%c0_61, %c0_62] : memref<1x256xf32, #tpu.memory_space<vmem>>, vector<1x256xf32>
    %169 = vector.broadcast %168 : vector<1x256xf32> to vector<16x256xf32>
    %170 = arith.addf %167, %169 : vector<16x256xf32>
    %cst_63 = arith.constant -1.702000e+00 : f32
    %171 = vector.broadcast %cst_63 : f32 to vector<16x256xf32>
    %172 = arith.mulf %171, %170 : vector<16x256xf32>
    %173 = math.exp %172 : vector<16x256xf32>
    %cst_64 = arith.constant 1.000000e+00 : f32
    %174 = vector.broadcast %cst_64 : f32 to vector<16x256xf32>
    %175 = arith.addf %174, %173 : vector<16x256xf32>
    %cst_65 = arith.constant 1.000000e+00 : f32
    %176 = vector.broadcast %cst_65 : f32 to vector<16x256xf32>
    %177 = arith.divf %176, %175 : vector<16x256xf32>
    %178 = arith.mulf %170, %177 : vector<16x256xf32>
    %179 = arith.truncf %178 : vector<16x256xf32> to vector<16x256xbf16>
    %c0_66 = arith.constant 0 : index
    %c0_67 = arith.constant 0 : index
    %180 = vector.load %arg12[%c0_66, %c0_67] : memref<256x64xbf16, #tpu.memory_space<vmem>>, vector<256x64xbf16>
    %cst_68 = arith.constant dense<0.000000e+00> : vector<16x64xf32>
    %181 = tpu.matmul %179, %180, %cst_68 {dimension_numbers = #tpu.dot_dimension_numbers<[1], [0], [0], [1], [0, 0, 1, 1], [], []>} : vector<16x256xbf16>, vector<256x64xbf16>, vector<16x64xf32> -> vector<16x64xf32>
    %c0_69 = arith.constant 0 : index
    %c0_70 = arith.constant 0 : index
    %182 = vector.load %arg13[%c0_69, %c0_70] : memref<1x64xf32, #tpu.memory_space<vmem>>, vector<1x64xf32>
    %183 = vector.broadcast %182 : vector<1x64xf32> to vector<16x64xf32>
    %184 = arith.addf %181, %183 : vector<16x64xf32>
    %185 = arith.addf %140, %184 : vector<16x64xf32>
    %c0_71 = arith.constant 0 : index
    %c0_72 = arith.constant 0 : index
    %c0_73 = arith.constant 0 : index
    %186 = vector.load %arg14[%c0_71, %c0_72, %c0_73] : memref<1x16x64xf32, #tpu.memory_space<vmem>>, vector<1x16x64xf32>
    %187 = vector.shape_cast %186 : vector<1x16x64xf32> to vector<16x64xf32>
    %188 = vector.shape_cast %185 : vector<16x64xf32> to vector<1x16x64xf32>
    tpu.vector_store %arg14[%c0_71, %c0_72, %c0_73], %188 {strides = array<i32>} : memref<1x16x64xf32, #tpu.memory_space<vmem>>, vector<1x16x64xf32>,
    return
  }
  func.func @transform_0(%arg0: i32) -> (i32, i32, i32) {
    %c0_i32 = arith.constant 0 : i32
    %c0_i32_0 = arith.constant 0 : i32
    %c0_i32_1 = arith.constant 0 : i32
    return %arg0, %c0_i32, %c0_i32_0 : i32, i32, i32
  }
  func.func @transform_1(%arg0: i32) -> (i32, i32) {
    %c0_i32 = arith.constant 0 : i32
    %c0_i32_0 = arith.constant 0 : i32
    %c0_i32_1 = arith.constant 0 : i32
    return %c0_i32, %c0_i32_0 : i32, i32
  }
  func.func @transform_2(%arg0: i32) -> (i32, i32) {
    %c0_i32 = arith.constant 0 : i32
    %c0_i32_0 = arith.constant 0 : i32
    %c0_i32_1 = arith.constant 0 : i32
    return %c0_i32, %c0_i32_0 : i32, i32
  }
  func.func @transform_3(%arg0: i32) -> (i32, i32) {
    %c0_i32 = arith.constant 0 : i32
    %c0_i32_0 = arith.constant 0 : i32
    %c0_i32_1 = arith.constant 0 : i32
    return %c0_i32, %c0_i32_0 : i32, i32
  }
  func.func @transform_4(%arg0: i32) -> (i32, i32) {
    %c0_i32 = arith.constant 0 : i32
    %c0_i32_0 = arith.constant 0 : i32
    %c0_i32_1 = arith.constant 0 : i32
    return %c0_i32, %c0_i32_0 : i32, i32
  }
  func.func @transform_5(%arg0: i32) -> (i32, i32) {
    %c0_i32 = arith.constant 0 : i32
    %c0_i32_0 = arith.constant 0 : i32
    %c0_i32_1 = arith.constant 0 : i32
    return %c0_i32, %c0_i32_0 : i32, i32
  }
  func.func @transform_6(%arg0: i32) -> (i32, i32) {
    %c0_i32 = arith.constant 0 : i32
    %c0_i32_0 = arith.constant 0 : i32
    %c0_i32_1 = arith.constant 0 : i32
    return %c0_i32, %c0_i32_0 : i32, i32
  }
  func.func @transform_7(%arg0: i32) -> (i32, i32) {
    %c0_i32 = arith.constant 0 : i32
    %c0_i32_0 = arith.constant 0 : i32
    %c0_i32_1 = arith.constant 0 : i32
    return %c0_i32, %c0_i32_0 : i32, i32
  }
  func.func @transform_8(%arg0: i32) -> (i32, i32) {
    %c0_i32 = arith.constant 0 : i32
    %c0_i32_0 = arith.constant 0 : i32
    %c0_i32_1 = arith.constant 0 : i32
    return %c0_i32, %c0_i32_0 : i32, i32
  }
  func.func @transform_9(%arg0: i32) -> (i32, i32) {
    %c0_i32 = arith.constant 0 : i32
    %c0_i32_0 = arith.constant 0 : i32
    %c0_i32_1 = arith.constant 0 : i32
    return %c0_i32, %c0_i32_0 : i32, i32
  }
  func.func @transform_10(%arg0: i32) -> (i32, i32) {
    %c0_i32 = arith.constant 0 : i32
    %c0_i32_0 = arith.constant 0 : i32
    %c0_i32_1 = arith.constant 0 : i32
    return %c0_i32, %c0_i32_0 : i32, i32
  }
  func.func @transform_11(%arg0: i32) -> (i32, i32) {
    %c0_i32 = arith.constant 0 : i32
    %c0_i32_0 = arith.constant 0 : i32
    %c0_i32_1 = arith.constant 0 : i32
    return %c0_i32, %c0_i32_0 : i32, i32
  }
  func.func @transform_12(%arg0: i32) -> (i32, i32) {
    %c0_i32 = arith.constant 0 : i32
    %c0_i32_0 = arith.constant 0 : i32
    %c0_i32_1 = arith.constant 0 : i32
    return %c0_i32, %c0_i32_0 : i32, i32
  }
  func.func @transform_13(%arg0: i32) -> (i32, i32, i32) {
    %c0_i32 = arith.constant 0 : i32
    %c0_i32_0 = arith.constant 0 : i32
    %c0_i32_1 = arith.constant 0 : i32
    return %arg0, %c0_i32, %c0_i32_0 : i32, i32, i32
  }
}

module attributes {stable_mosaic.version = 11 : i64} {
  func.func @_head_kernel(%arg0: memref<2x32xf32, #tpu.memory_space<vmem>>, %arg1: memref<128x32xf32, #tpu.memory_space<vmem>>, %arg2: memref<128x32xf32, #tpu.memory_space<vmem>>, %arg3: memref<128x32xf32, #tpu.memory_space<vmem>>, %arg4: memref<128x32xf32, #tpu.memory_space<vmem>>, %arg5: memref<1x1xf32, #tpu.memory_space<vmem>>, %arg6: memref<2x128xf32, #tpu.memory_space<vmem>>, %arg7: memref<2x128xf32, #tpu.memory_space<vmem>>, %arg8: memref<1x128xf32, #tpu.memory_space<vmem>>) attributes {dimension_semantics = [], scalar_prefetch = 0 : i64, scratch_operands = 0 : i64, tpu.core_type = #tpu.core_type<tc>} {
    %c0 = arith.constant 0 : index
    %c0_0 = arith.constant 0 : index
    %0 = vector.load %arg0[%c0, %c0_0] : memref<2x32xf32, #tpu.memory_space<vmem>>, vector<2x32xf32>
    %1 = arith.mulf %0, %0 : vector<2x32xf32>
    %cst = arith.constant dense<0.000000e+00> : vector<2xf32>
    %2 = vector.multi_reduction <add>, %1, %cst [1] : vector<2x32xf32> to vector<2xf32>
    %3 = vector.shape_cast %2 : vector<2xf32> to vector<2x1xf32>
    %cst_1 = arith.constant 9.99999996E-13 : f32
    %4 = vector.broadcast %cst_1 : f32 to vector<2x1xf32>
    %5 = arith.maximumf %3, %4 : vector<2x1xf32>
    %6 = math.rsqrt %5 : vector<2x1xf32>
    %7 = vector.broadcast %6 : vector<2x1xf32> to vector<2x32xf32>
    %8 = arith.mulf %0, %7 : vector<2x32xf32>
    %c0_2 = arith.constant 0 : index
    %c0_3 = arith.constant 0 : index
    %9 = vector.load %arg1[%c0_2, %c0_3] : memref<128x32xf32, #tpu.memory_space<vmem>>, vector<128x32xf32>
    %10 = arith.mulf %9, %9 : vector<128x32xf32>
    %cst_4 = arith.constant dense<0.000000e+00> : vector<128xf32>
    %11 = vector.multi_reduction <add>, %10, %cst_4 [1] : vector<128x32xf32> to vector<128xf32>
    %12 = vector.shape_cast %11 : vector<128xf32> to vector<128x1xf32>
    %cst_5 = arith.constant 9.99999996E-13 : f32
    %13 = vector.broadcast %cst_5 : f32 to vector<128x1xf32>
    %14 = arith.maximumf %12, %13 : vector<128x1xf32>
    %15 = math.rsqrt %14 : vector<128x1xf32>
    %16 = vector.broadcast %15 : vector<128x1xf32> to vector<128x32xf32>
    %17 = arith.mulf %9, %16 : vector<128x32xf32>
    %c0_6 = arith.constant 0 : index
    %c0_7 = arith.constant 0 : index
    %18 = vector.load %arg2[%c0_6, %c0_7] : memref<128x32xf32, #tpu.memory_space<vmem>>, vector<128x32xf32>
    %19 = arith.mulf %18, %18 : vector<128x32xf32>
    %cst_8 = arith.constant dense<0.000000e+00> : vector<128xf32>
    %20 = vector.multi_reduction <add>, %19, %cst_8 [1] : vector<128x32xf32> to vector<128xf32>
    %21 = vector.shape_cast %20 : vector<128xf32> to vector<128x1xf32>
    %cst_9 = arith.constant 9.99999996E-13 : f32
    %22 = vector.broadcast %cst_9 : f32 to vector<128x1xf32>
    %23 = arith.maximumf %21, %22 : vector<128x1xf32>
    %24 = math.rsqrt %23 : vector<128x1xf32>
    %25 = vector.broadcast %24 : vector<128x1xf32> to vector<128x32xf32>
    %26 = arith.mulf %18, %25 : vector<128x32xf32>
    %c0_10 = arith.constant 0 : index
    %c0_11 = arith.constant 0 : index
    %27 = vector.load %arg3[%c0_10, %c0_11] : memref<128x32xf32, #tpu.memory_space<vmem>>, vector<128x32xf32>
    %28 = arith.mulf %27, %27 : vector<128x32xf32>
    %cst_12 = arith.constant dense<0.000000e+00> : vector<128xf32>
    %29 = vector.multi_reduction <add>, %28, %cst_12 [1] : vector<128x32xf32> to vector<128xf32>
    %30 = vector.shape_cast %29 : vector<128xf32> to vector<128x1xf32>
    %cst_13 = arith.constant 9.99999996E-13 : f32
    %31 = vector.broadcast %cst_13 : f32 to vector<128x1xf32>
    %32 = arith.maximumf %30, %31 : vector<128x1xf32>
    %33 = math.rsqrt %32 : vector<128x1xf32>
    %34 = vector.broadcast %33 : vector<128x1xf32> to vector<128x32xf32>
    %35 = arith.mulf %27, %34 : vector<128x32xf32>
    %c0_14 = arith.constant 0 : index
    %c0_15 = arith.constant 0 : index
    %36 = vector.load %arg4[%c0_14, %c0_15] : memref<128x32xf32, #tpu.memory_space<vmem>>, vector<128x32xf32>
    %37 = arith.mulf %36, %36 : vector<128x32xf32>
    %cst_16 = arith.constant dense<0.000000e+00> : vector<128xf32>
    %38 = vector.multi_reduction <add>, %37, %cst_16 [1] : vector<128x32xf32> to vector<128xf32>
    %39 = vector.shape_cast %38 : vector<128xf32> to vector<128x1xf32>
    %cst_17 = arith.constant 9.99999996E-13 : f32
    %40 = vector.broadcast %cst_17 : f32 to vector<128x1xf32>
    %41 = arith.maximumf %39, %40 : vector<128x1xf32>
    %42 = math.rsqrt %41 : vector<128x1xf32>
    %43 = vector.broadcast %42 : vector<128x1xf32> to vector<128x32xf32>
    %44 = arith.mulf %36, %43 : vector<128x32xf32>
    %c0_18 = arith.constant 0 : index
    %c0_19 = arith.constant 0 : index
    %45 = vector.load %arg5[%c0_18, %c0_19] : memref<1x1xf32, #tpu.memory_space<vmem>>, vector<1x1xf32>
    %46 = math.exp %45 : vector<1x1xf32>
    %cst_20 = arith.constant dense<0.000000e+00> : vector<2x128xf32>
    %47 = tpu.matmul %8, %17, %cst_20 {dimension_numbers = #tpu.dot_dimension_numbers<[1], [1], [0], [0], [0, 0, 1, 0], [], []>} : vector<2x32xf32>, vector<128x32xf32>, vector<2x128xf32> -> vector<2x128xf32>
    %48 = vector.broadcast %46 : vector<1x1xf32> to vector<2x128xf32>
    %49 = arith.mulf %48, %47 : vector<2x128xf32>
    %c0_21 = arith.constant 0 : index
    %c0_22 = arith.constant 0 : index
    %50 = vector.load %arg6[%c0_21, %c0_22] : memref<2x128xf32, #tpu.memory_space<vmem>>, vector<2x128xf32>
    tpu.vector_store %arg6[%c0_21, %c0_22], %49 {strides = array<i32>} : memref<2x128xf32, #tpu.memory_space<vmem>>, vector<2x128xf32>,
    %cst_23 = arith.constant dense<0.000000e+00> : vector<2x128xf32>
    %51 = tpu.matmul %8, %26, %cst_23 {dimension_numbers = #tpu.dot_dimension_numbers<[1], [1], [0], [0], [0, 0, 1, 0], [], []>} : vector<2x32xf32>, vector<128x32xf32>, vector<2x128xf32> -> vector<2x128xf32>
    %52 = vector.broadcast %46 : vector<1x1xf32> to vector<2x128xf32>
    %53 = arith.mulf %52, %51 : vector<2x128xf32>
    %c0_24 = arith.constant 0 : index
    %c0_25 = arith.constant 0 : index
    %54 = vector.load %arg7[%c0_24, %c0_25] : memref<2x128xf32, #tpu.memory_space<vmem>>, vector<2x128xf32>
    tpu.vector_store %arg7[%c0_24, %c0_25], %53 {strides = array<i32>} : memref<2x128xf32, #tpu.memory_space<vmem>>, vector<2x128xf32>,
    %55 = tpu.iota {dimensions = array<i32: 1>} : vector<1x128xi32>
    %c0_i32 = arith.constant 0 : i32
    %56 = vector.broadcast %c0_i32 : i32 to vector<1x128xi32>
    %57 = arith.cmpi eq, %55, %56 : vector<1x128xi32>
    %58 = arith.mulf %17, %35 : vector<128x32xf32>
    %cst_26 = arith.constant dense<0.000000e+00> : vector<128xf32>
    %59 = vector.multi_reduction <add>, %58, %cst_26 [1] : vector<128x32xf32> to vector<128xf32>
    %60 = vector.shape_cast %59 : vector<128xf32> to vector<128x1xf32>
    %61 = tpu.iota {dimensions = array<i32: 0>} : vector<128x1xi32>
    %c4_i32 = arith.constant 4 : i32
    %62 = vector.broadcast %c4_i32 : i32 to vector<128x1xi32>
    %63 = arith.cmpi slt, %61, %62 : vector<128x1xi32>
    %64 = arith.extui %63 : vector<128x1xi1> to vector<128x1xi32>
    %65 = arith.sitofp %64 : vector<128x1xi32> to vector<128x1xf32>
    %66 = arith.mulf %60, %65 : vector<128x1xf32>
    %cst_27 = arith.constant dense<0.000000e+00> : vector<1xf32>
    %67 = vector.multi_reduction <add>, %66, %cst_27 [0] : vector<128x1xf32> to vector<1xf32>
    %68 = vector.shape_cast %67 : vector<1xf32> to vector<1x1xf32>
    %cst_28 = arith.constant 4.000000e+00 : f32
    %69 = vector.broadcast %cst_28 : f32 to vector<1x1xf32>
    %70 = arith.divf %68, %69 : vector<1x1xf32>
    %cst_29 = arith.constant 1.000000e+00 : f32
    %71 = vector.broadcast %cst_29 : f32 to vector<1x1xf32>
    %72 = arith.subf %71, %70 : vector<1x1xf32>
    %c1_i32 = arith.constant 1 : i32
    %73 = vector.broadcast %c1_i32 : i32 to vector<1x128xi32>
    %74 = arith.cmpi eq, %55, %73 : vector<1x128xi32>
    %75 = arith.mulf %26, %44 : vector<128x32xf32>
    %cst_30 = arith.constant dense<0.000000e+00> : vector<128xf32>
    %76 = vector.multi_reduction <add>, %75, %cst_30 [1] : vector<128x32xf32> to vector<128xf32>
    %77 = vector.shape_cast %76 : vector<128xf32> to vector<128x1xf32>
    %78 = tpu.iota {dimensions = array<i32: 0>} : vector<128x1xi32>
    %c2_i32 = arith.constant 2 : i32
    %79 = vector.broadcast %c2_i32 : i32 to vector<128x1xi32>
    %80 = arith.cmpi slt, %78, %79 : vector<128x1xi32>
    %81 = arith.extui %80 : vector<128x1xi1> to vector<128x1xi32>
    %82 = arith.sitofp %81 : vector<128x1xi32> to vector<128x1xf32>
    %83 = arith.mulf %77, %82 : vector<128x1xf32>
    %cst_31 = arith.constant dense<0.000000e+00> : vector<1xf32>
    %84 = vector.multi_reduction <add>, %83, %cst_31 [0] : vector<128x1xf32> to vector<1xf32>
    %85 = vector.shape_cast %84 : vector<1xf32> to vector<1x1xf32>
    %cst_32 = arith.constant 2.000000e+00 : f32
    %86 = vector.broadcast %cst_32 : f32 to vector<1x1xf32>
    %87 = arith.divf %85, %86 : vector<1x1xf32>
    %cst_33 = arith.constant 1.000000e+00 : f32
    %88 = vector.broadcast %cst_33 : f32 to vector<1x1xf32>
    %89 = arith.subf %88, %87 : vector<1x1xf32>
    %cst_34 = arith.constant 0.000000e+00 : f32
    %90 = vector.shape_cast %89 : vector<1x1xf32> to vector<1x1xf32>
    %91 = vector.broadcast %90 : vector<1x1xf32> to vector<1x128xf32>
    %92 = vector.broadcast %cst_34 : f32 to vector<1x128xf32>
    %93 = arith.select %74, %91, %92 : vector<1x128xi1>, vector<1x128xf32>
    %94 = vector.shape_cast %72 : vector<1x1xf32> to vector<1x1xf32>
    %95 = vector.broadcast %94 : vector<1x1xf32> to vector<1x128xf32>
    %96 = arith.select %57, %95, %93 : vector<1x128xi1>, vector<1x128xf32>
    %c0_35 = arith.constant 0 : index
    %c0_36 = arith.constant 0 : index
    %97 = vector.load %arg8[%c0_35, %c0_36] : memref<1x128xf32, #tpu.memory_space<vmem>>, vector<1x128xf32>
    tpu.vector_store %arg8[%c0_35, %c0_36], %96 {strides = array<i32>} : memref<1x128xf32, #tpu.memory_space<vmem>>, vector<1x128xf32>,
    return
  }
}

</mosaic_0001>

<bundles_post_ra>
// kernel: tpu_custom_call.1
= control target key start
LH: loop header
LB: loop body
LE: loop exit
PB: predicated region body
PF: predicated region fallthrough
CT: control target
= control target key end

     0   :  { %6 = vsyncpa [#allocation3], 0  ;;  %s482_s0 = inlined_call_operand.hbm [shape: f32[8,128], index: 0, kind: input, shape index: {}]   ;;  %s483_s1 = inlined_call_operand.hbm [shape: f32[16,128], index: 1, kind: output, shape index: {}]  }
   0x1   :  { %7 = vsyncpa [#allocation4], 0 }
   0x2   :  { %9 = vsyncpa [#allocation4 + $0x1], 0  ;;  %s352_s6 = smov 0   ;;  %s354_s7 = smov 0  }
   0x3   :  { %s356_s8 = smov 0   ;;  %s358_s9 = smov 0  }
   0x4 LB: > { %s373_s10 = sadd.s32 4294967295, %s338_s9   ;;  %s184_s11 = sadd.s32 4294967294, %s338_s9   ;;  %s338_s9 = sphi %s358_s9, %s499_s9   ;;  %s334_s8 = sphi %s356_s8, %s498_s8   ;;  %s330_s7 = sphi %s354_s7, %s497_s7   ;;  %s326_s6 = sphi %s352_s6, %s496_s6  }
   0x5   : > { %s377_s12 = sadd.s32 1, %s338_s9   ;;  %s43_s13 = sadd.s32 1, %s334_s8 }
   0x6   : > { %s40_s14 = ssub.s32 %s338_s9, %s377_s12  ;;  %p53_p0 = scmp.ne.s32.totalorder %s334_s8, %s330_s7 }
   0x7   : > { %p41_p1 = scmp.eq.s32.totalorder %s40_s14, 0  ;;  %p54_p2 = scmp.eq.s32.totalorder %s373_s10, 1 }
   0x8   : > { %p59_p3 = scmp.ne.s32.totalorder %s330_s7, %s326_s6  ;;  %p60_p4 = scmp.eq.s32.totalorder %s184_s11, 1 }
   0x9   : > { %s388_s15 = scalar_select %p41_p1, %s334_s8, %s43_s13  }
   0xa   : > { %p390_p5 = por %p54_p2, %p53_p0  ;;  %p394_p6 = por %p60_p4, %p59_p3 }
   0xb   : > { %p185_p7 = scmp.ge.s32.totalorder %s338_s9, 1  ;;  %p67_p8 = scmp.lt.s32.totalorder %s338_s9, 3 }
   0xc   : > { %s487_s16 = scalar_select %p390_p5, 1, 0 }
   0xd   : > { %s488_s17 = scalar_select %p394_p6, 1, 0 }
   0xe   : > { %p484_p9 = scmp.eq.s32.totalorder %s373_s10, 0  ;;  %p401_p10 = pnand %p185_p7, %p67_p8 }
   0xf   : > { %s340_s19 = smov [#allocation2]   ;;  %s244_s24 = scalar_lea.hbm %s482_s0, 128 }
  0x10   : > { %s489_s18 = scalar_select %p401_p10, 1, 0 }
  0x11   : > { %s80_s20 = sshll.u32 %s340_s19, 4  ;;  %p200_p11 = pneg %p401_p10  ;;  %s81_s20 = int_to_ptr.vmem [resolvable:$true] %s80_s20 }
  0x12   : > { %p245_p13 = scmp.ne.s32.totalorder %s482_s0, %s244_s24  ;;  %p251_p3 = scmp.lt.u32.totalorder %s244_s24, %s482_s0 }
  0x13   : > { %p409_p12 = pnand %p484_p9, %p200_p11 }
  0x15   : > { %p246_p0 = pneg %p409_p12 }
  0x17   : > { %p247_p1 = pnand %p246_p0, %p245_p13 }
  0x19   : > { %p248_p2 = pneg %p247_p1 }
  0x1b   : > { %p253_p4 = pnand %p251_p3, %p248_p2 }
  0x1d   : > { %256 = shalt.err (!%p253_p4)
}
  0x1e   : > { %s257_s29 = scalar_lea.vmem %s81_s20, 128  ;;  %p265_p9 = scmp.lt.s32.totalorder %s81_s20, %s81_s20 }
  0x1f   : > { %p258_p7 = scmp.ne.s32.totalorder %s81_s20, %s257_s29  ;;  %p266_p6 = scmp.lt.s32.totalorder %s257_s29, %s257_s29 }
  0x21   : > { %p260_p8 = pnand %p258_p7, %p246_p0  ;;  %p267_p5 = por %p266_p6, %p265_p9 }
  0x23   : > { %p261_p11 = pneg %p260_p8 }
  0x25   : > { %p268_p10 = pnand %p267_p5, %p261_p11 }
  0x27   : > { %271 = shalt.err (!%p268_p10)
}
  0x28   : > { %203 = dma.hbm_to_vmem [thread:$0]  (!%p409_p12), %s482_s0, 128, %s81_s20, [#allocation3]  }
  0x29   : > { %p491_p13 = scmp.ne.s32.totalorder %s489_s18, 0 }
  0x2a   : > { %p492_p1 = scmp.eq.s32.totalorder (!%p491_p13), %s373_s10, 0 }
  0x2b   : > { %93 = sbr.rel (%p491_p13) target bundleno = 77 (0x4d), region = 24 }
  0x32   : > { %317 = dma.done.wait (%p492_p1), [#allocation3], 128   ;;  %p493_p0 = pmov %p492_p1 }
  0x33   : > { %s105_s3 = sand.u32 1, %s330_s7   ;;  %s191_s13 = sshll.u32 %s373_s10, 7  ;;  %v108_v0 = vld [vmem:[#allocation2] sm:$0xff] }
  0x34   : > { %319 = vsyncadd (%p493_p0), [#allocation3], 4294967168  ;;  %s189_s4 = sshll.u32 %s105_s3, 3  ;;  %v109_v1 = vadd.f32 1.0, %v108_v0  ;;  %s442_s19 = scalar_lea.hbm %s483_s1, %s191_s13 }
  0x35   : > { %s107_s5 = scalar_lea.vmem [#allocation5], %s189_s4  ;;  %s112_s20 = scalar_lea.sflag [#allocation4], %s105_s3 }
  0x36   : > { %s125_s11 = sshll.u32 %s107_s5, 4  ;;  %110 = vst [vmem:[%s107_s5] sm:$0xff] %v109_v1  ;;  %p494_p6 = scmp.ne.s32.totalorder %s487_s16, 0  ;;  %s437_s11 = int_to_ptr.vmem [resolvable:$true] %s125_s11 }
  0x37   : > { %s272_s21 = scalar_lea.vmem %s437_s11, 128  ;;  %s341_s10 = smov [#allocation5]  }
  0x38   : > { %p273_p5 = scmp.ne.s32.totalorder %s437_s11, %s272_s21  ;;  %s276_s22 = sshll.u32 %s341_s10, 4  ;;  %s277_s22 = int_to_ptr.vmem [resolvable:$false] %s276_s22 }
  0x39   : > { %s278_s23 = scalar_lea.vmem %s277_s22, 256  ;;  %p279_p12 = scmp.lt.s32.totalorder %s437_s11, %s277_s22 }
  0x3a   : > { %p274_p9 = pnand %p273_p5, %p494_p6  ;;  %p280_p2 = scmp.lt.s32.totalorder %s278_s23, %s272_s21 }
  0x3c   : > { %p275_p10 = pneg %p274_p9  ;;  %p281_p3 = por %p280_p2, %p279_p12 }
  0x3e   : > { %p282_p4 = pnand %p281_p3, %p275_p10 }
  0x40   : > { %285 = shalt.err (!%p282_p4)
}
  0x41   : > { %s286_s24 = scalar_lea.hbm %s442_s19, 128  ;;  %s290_s27 = scalar_lea.hbm %s483_s1, 256 }
  0x42   : > { %p287_p7 = scmp.ne.s32.totalorder %s442_s19, %s286_s24  ;;  %p291_p13 = scmp.lt.u32.totalorder %s442_s19, %s483_s1 }
  0x43   : > { %p292_p1 = scmp.lt.u32.totalorder %s290_s27, %s286_s24  ;;  %p294_p5 = scmp.lt.u32.totalorder %s286_s24, %s442_s19 }
  0x44   : > { %p288_p8 = pnand %p287_p7, %p494_p6 }
  0x45   : > { %p293_p0 = por %p292_p1, %p291_p13 }
  0x46   : > { %p289_p11 = pneg %p288_p8 }
  0x47   : > { %p295_p9 = por %p294_p5, %p293_p0 }
  0x49   : > { %p296_p10 = pnand %p295_p9, %p289_p11 }
  0x4b   : > { %299 = shalt.err (!%p296_p10)
}
  0x4c   : > { %198 = dma.vmem_to_hbm [thread:$0]  (%p494_p6), %s437_s11, 128, %s442_s19, %s112_s20  }
  0x4d PF: > { %p210_p12 = scmp.ge.s32.totalorder %s338_s9, 2  ;;  %s137_s30 = sand.u32 1, %s326_s6  }
  0x4e   : > { %p495_p2 = scmp.ne.s32.totalorder %s488_s17, 0  ;;  %s138_s2 = scalar_lea.sflag [#allocation4], %s137_s30 }
  0x50   : > { %p205_p3 = pnand %p210_p12, %p495_p2 }
  0x52   : > { %321 = dma.done.wait (!%p205_p3), %s138_s2, 128  }
  0x53   : > { %323 = vsyncadd (!%p205_p3), %s138_s2, 4294967168  ;;  %p12_p4 = scmp.ge.s32.totalorder %s377_s12, 4   ;;  %s496_s6 = smov %s330_s7 }
  0x54   : > { %s497_s7 = smov %s334_s8  ;;  %s498_s8 = smov %s388_s15 }
  0x55   : > { %s499_s9 = smov %s377_s12  ;;  %14 = sbr.rel (!%p12_p4) target bundleno = 4 (0x4), region = 61 }
  0x5c   :  { %143 = vsyncpa [#allocation3], 1 }
  0x5d   :  { %145 = vsyncpa [#allocation3 + $0x1], 1 }
  0x5e   :  { %146 = vsyncpa [#allocation4], 1 }
  0x5f   :  { %148 = vsyncpa [#allocation4 + $0x1], 1 }

// kernel: custom_clip_forward.9
= control target key start
LH: loop header
LB: loop body
LE: loop exit
PB: predicated region body
PF: predicated region fallthrough
CT: control target
= control target key end

     0   :  { %8 = vsyncpa [#allocation3], 0  ;;  %s425_s0 = inlined_call_operand.hbm [shape: f32[8,192], index: 0, kind: input, shape index: {}]   ;;  %s426_s1 = inlined_call_operand.hbm [shape: bf16[192,64], index: 1, kind: input, shape index: {}]   ;;  %s427_s2 = inlined_call_operand.hbm [shape: f32[1,64], index: 2, kind: input, shape index: {}]   ;;  %s428_s3 = inlined_call_operand.hbm [shape: f32[8,64], index: 3, kind: output, shape index: {}]  }
   0x1   :  { %9 = vsyncpa [#allocation6], 0 }
   0x2   :  { %10 = vsyncpa [#allocation4], 0  ;;  %s348_s12 = smov [#allocation5]   ;;  %s254_s16 = scalar_lea.hbm %s426_s1, 1536 }
   0x3   :  { %s26_s13 = sshll.u32 %s348_s12, 4  ;;  %p255_p0 = scmp.ne.s32.totalorder %s426_s1, %s254_s16  ;;  %s27_s13 = int_to_ptr.vmem [resolvable:$true] %s26_s13 }
   0x4   :  { %p258_p1 = scmp.lt.u32.totalorder %s254_s16, %s426_s1 }
   0x6   :  { %p260_p2 = pnand %p258_p1, %p255_p0 }
   0x8   :  { %263 = shalt.err (!%p260_p2)
}
   0x9   :  { %s264_s21 = scalar_lea.vmem %s27_s13, 1536  ;;  %p269_p4 = scmp.lt.s32.totalorder %s27_s13, %s27_s13 }
   0xa   :  { %p265_p3 = scmp.ne.s32.totalorder %s27_s13, %s264_s21  ;;  %p270_p5 = scmp.lt.s32.totalorder %s264_s21, %s264_s21 }
   0xc   :  { %p271_p6 = por %p270_p5, %p269_p4 }
   0xe   :  { %p272_p7 = pnand %p271_p6, %p265_p3 }
  0x10   :  { %275 = shalt.err (!%p272_p7)
}
  0x11   :  { %s349_s22 = smov 64   ;;  %s350_s23 = smov 4  }
  0x12   :  { %32 = dma.hbm_to_vmem [thread:$0]  %s426_s1, 1536, %s27_s13, [#allocation6], %s349_s22, %s349_s22, %s350_s23  }
  0x13   :  { %s351_s26 = smov [#allocation2]   ;;  %s352_s28 = smov [#allocation7]  }
  0x14   :  { %s17_s27 = sshll.u32 %s351_s26, 4  ;;  %s39_s29 = sshll.u32 %s352_s28, 4  ;;  %s18_s27 = int_to_ptr.vmem [resolvable:$true] %s17_s27  ;;  %s40_s29 = int_to_ptr.vmem [resolvable:$true] %s39_s29 }
  0x15   :  { %s276_s5 = scalar_lea.hbm %s425_s0, 256 }
  0x16   :  { %p277_p8 = scmp.ne.s32.totalorder %s425_s0, %s276_s5  ;;  %p280_p9 = scmp.lt.u32.totalorder %s276_s5, %s425_s0 }
  0x18   :  { %p282_p10 = pnand %p280_p9, %p277_p8 }
  0x1a   :  { %285 = shalt.err (!%p282_p10)
}
  0x1b   :  { %s286_s1 = scalar_lea.vmem %s18_s27, 256  ;;  %p291_p12 = scmp.lt.s32.totalorder %s18_s27, %s18_s27 }
  0x1c   :  { %p287_p11 = scmp.ne.s32.totalorder %s18_s27, %s286_s1  ;;  %p292_p13 = scmp.lt.s32.totalorder %s286_s1, %s286_s1 }
  0x1e   :  { %p293_p0 = por %p292_p13, %p291_p12 }
  0x20   :  { %p294_p1 = pnand %p293_p0, %p287_p11 }
  0x22   :  { %297 = shalt.err (!%p294_p1)
}
  0x23   :  { %20 = dma.hbm_to_vmem [thread:$0]  %s425_s0, 256, %s18_s27, [#allocation3]  }
  0x24   :  { %s298_s14 = scalar_lea.hbm %s427_s2, 16 }
  0x25   :  { %p299_p2 = scmp.ne.s32.totalorder %s427_s2, %s298_s14  ;;  %p302_p3 = scmp.lt.u32.totalorder %s298_s14, %s427_s2 }
  0x27   :  { %p304_p4 = pnand %p302_p3, %p299_p2 }
  0x29   :  { %307 = shalt.err (!%p304_p4)
}
  0x2a   :  { %s308_s19 = scalar_lea.vmem %s40_s29, 16  ;;  %s312_s20 = scalar_lea.vmem %s40_s29, 32 }
  0x2b   :  { %p309_p5 = scmp.ne.s32.totalorder %s40_s29, %s308_s19  ;;  %p313_p6 = scmp.lt.s32.totalorder %s40_s29, %s40_s29 }
  0x2c   :  { %p314_p7 = scmp.lt.s32.totalorder %s312_s20, %s308_s19 }
  0x2e   :  { %p315_p8 = por %p314_p7, %p313_p6 }
  0x30   :  { %p316_p9 = pnand %p315_p8, %p309_p5 }
  0x32   :  { %319 = shalt.err (!%p316_p9)
}
  0x33   :  { %42 = dma.hbm_to_vmem [thread:$0]  %s427_s2, 16, %s40_s29, [#allocation6]  }
  0x34   :  { %342 = dma.done.wait [#allocation3], 256  }
  0x35   :  { %343 = vsyncadd [#allocation3], 4294967040 }
  0x36   :  { %344 = dma.done.wait [#allocation6], 1552  }
  0x37   :  { %345 = vsyncadd [#allocation6], 4294965744  ;;  %v353_v0 = vmov 0   ;;  %v242_v1 = vld [vmem:[#allocation5] sm:$0xff]   ;;  %v243_v2 = vld [vmem:[#allocation5 + $0x8] sm:$0xff]   ;;  %vm160_vm0 = vcmask 523264  }
  0x38   :  { %164 = vmatprep.subr.bf16.mxu0 %v353_v0  ;;  %v244_v3 = vld [vmem:[#allocation5 + $0x10] sm:$0xff]   ;;  %v245_v4 = vld [vmem:[#allocation5 + $0x18] sm:$0xff]   ;;  %v246_v7 = vld [vmem:[#allocation5 + $0x20] sm:$0xff]   ;;  %s354_s2 = smov [#allocation8]  }
  0x39   :  { %165 = vmatpush1.bf16.msra.mxu0 %v242_v1  ;;  %v54_v5 = vld [vmem:[#allocation2 + $0x8] sm:$0xff]  ;;  %v247_v8 = vld [vmem:[#allocation5 + $0x28] sm:$0xff]   ;;  %v248_v9 = vld [vmem:[#allocation5 + $0x30] sm:$0xff]   ;;  %s211_s22 = sshll.u32 %s354_s2, 4  ;;  %s212_s22 = int_to_ptr.vmem [resolvable:$true] %s211_s22 }
  0x3a   :  { %166 = vmatprep.subr.bf16.mxu0 %v353_v0  ;;  %v56_v6 = vpack.c.bf16 %v54_v5, %v54_v5  ;;  %v249_v10 = vld [vmem:[#allocation5 + $0x38] sm:$0xff]   ;;  %v250_v11 = vld [vmem:[#allocation5 + $0x40] sm:$0xff]   ;;  %v251_v12 = vld [vmem:[#allocation5 + $0x48] sm:$0xff]   ;;  %s320_s23 = scalar_lea.vmem %s212_s22, 128  ;;  %p325_p11 = scmp.lt.s32.totalorder %s212_s22, %s212_s22 }
  0x3b   :  { %v252_v13 = vld [vmem:[#allocation5 + $0x50] sm:$0xff]   ;;  %v253_v14 = vld [vmem:[#allocation5 + $0x58] sm:$0xff]   ;;  %v221_v17 = vld [vmem:[#allocation7] ss:$0 sm:$0xff]  ;;  %p321_p10 = scmp.ne.s32.totalorder %s212_s22, %s320_s23  ;;  %p326_p12 = scmp.lt.s32.totalorder %s320_s23, %s320_s23 }
  0x3c   :  { %234 = vmatprep.mubr.msk.bf16.mxu0 %vm160_vm0, %v56_v6  ;;  %v53_v15 = vld [vmem:[#allocation2] sm:$0xff] }
  0x3d   :  { %167 = vmatpush1.bf16.msra.mxu0 %v243_v2  ;;  %v55_v16 = vpack.c.bf16 %v53_v15, %v53_v15  ;;  %p327_p13 = por %p326_p12, %p325_p11 }
  0x3e   :  { %168 = vmatprep.subr.bf16.mxu0 %v353_v0 }
  0x3f   :  { %p328_p0 = pnand %p327_p13, %p321_p10 }
  0x41   :  { %169 = vmatpush1.bf16.msra.mxu0 %v244_v3 }
  0x42   :  { %170 = vmatprep.subr.bf16.mxu0 %v353_v0 }
  0x45   :  { %171 = vmatpush1.bf16.msra.mxu0 %v245_v4 }
  0x46   :  { %172 = vmatprep.subr.bf16.mxu0 %v353_v0 }
  0x49   :  { %173 = vmatpush1.bf16.msra.mxu0 %v246_v7 }
  0x4a   :  { %174 = vmatprep.subr.bf16.mxu0 %v353_v0 }
  0x4d   :  { %175 = vmatpush1.bf16.msra.mxu0 %v247_v8 }
  0x4e   :  { %176 = vmatprep.subr.bf16.mxu0 %v353_v0 }
  0x51   :  { %177 = vmatpush1.bf16.msra.mxu0 %v248_v9 }
  0x52   :  { %178 = vmatprep.subr.bf16.mxu0 %v353_v0 }
  0x55   :  { %179 = vmatpush1.bf16.msra.mxu0 %v249_v10 }
  0x56   :  { %180 = vmatprep.subr.bf16.mxu0 %v353_v0 }
  0x59   :  { %181 = vmatpush1.bf16.msra.mxu0 %v250_v11 }
  0x5a   :  { %182 = vmatprep.subr.bf16.mxu0 %v353_v0 }
  0x5d   :  { %183 = vmatpush1.bf16.msra.mxu0 %v251_v12 }
  0x5e   :  { %184 = vmatprep.subr.bf16.mxu0 %v353_v0 }
  0x61   :  { %185 = vmatpush1.bf16.msra.mxu0 %v252_v13 }
  0x62   :  { %186 = vmatprep.subr.bf16.mxu0 %v353_v0 }
  0x65   :  { %187 = vmatpush1.bf16.msra.mxu0 %v253_v14 }
  0x68   :  { %197 = vmatmul.mubr.bf16.vlgmr.msra.gmra.mrb[0].mxu0 %v55_v16 }
 0x13b   :  { %v198_v18 = vpop.f32.mrb[0].mxu0 }
 0x13c   :  { %v199_v19 = vadd.f32 %v221_v17, %v198_v18  ;;  %v200_v20 = vpop.f32.mrb[1].mxu0 }
 0x13d   :  { %v201_v21 = vpop.f32.mrb[2].mxu0 }
 0x13e   :  { %204 = vst.msk [vmem:[#allocation8] sm:$0xff] %vm160_vm0, %v199_v19  ;;  %v202_v22 = vpop.f32.mrb[3].mxu0 }
 0x13f   :  { %331 = shalt.err (!%p328_p0)
}
 0x140   :  { %s332_s26 = scalar_lea.hbm %s428_s3, 128 }
 0x141   :  { %p333_p1 = scmp.ne.s32.totalorder %s428_s3, %s332_s26  ;;  %p336_p2 = scmp.lt.u32.totalorder %s332_s26, %s428_s3 }
 0x143   :  { %p338_p3 = pnand %p336_p2, %p333_p1 }
 0x145   :  { %341 = shalt.err (!%p338_p3)
}
 0x146   :  { %214 = dma.vmem_to_hbm [thread:$0]  %s212_s22, 128, %s428_s3, [#allocation4]  }
 0x147   :  { %346 = dma.done.wait [#allocation4], 128  }
 0x148   :  { %347 = vsyncadd [#allocation4], 4294967168 }
 0x149   :  { %218 = vsyncpa [#allocation3], 1 }
 0x14a   :  { %219 = vsyncpa [#allocation6], 1 }
 0x14b   :  { %220 = vsyncpa [#allocation4], 1 }

// kernel: custom_clip_forward.10
= control target key start
LH: loop header
LB: loop body
LE: loop exit
PB: predicated region body
PF: predicated region fallthrough
CT: control target
= control target key end

     0   :  { %8 = vsyncpa [#allocation3], 0  ;;  %s319_s0 = inlined_call_operand.hbm [shape: f32[16,64], index: 0, kind: input, shape index: {}]   ;;  %s320_s1 = inlined_call_operand.hbm [shape: f32[1,64], index: 1, kind: input, shape index: {}]   ;;  %s321_s2 = inlined_call_operand.hbm [shape: f32[1,64], index: 2, kind: input, shape index: {}]   ;;  %s322_s3 = inlined_call_operand.hbm [shape: f32[16,64], index: 3, kind: output, shape index: {}]  }
   0x1   :  { %9 = vsyncpa [#allocation6], 0 }
   0x2   :  { %10 = vsyncpa [#allocation4], 0  ;;  %s226_s12 = smov [#allocation5]   ;;  %s227_s14 = smov [#allocation2]  }
   0x3   :  { %s29_s13 = sshll.u32 %s226_s12, 4  ;;  %s16_s15 = sshll.u32 %s227_s14, 4  ;;  %s30_s13 = int_to_ptr.vmem [resolvable:$true] %s29_s13  ;;  %s252_s15 = int_to_ptr.vmem [resolvable:$true] %s16_s15 }
   0x4   :  { %s132_s18 = scalar_lea.hbm %s320_s1, 16 }
   0x5   :  { %p133_p0 = scmp.ne.s32.totalorder %s320_s1, %s132_s18  ;;  %p136_p1 = scmp.lt.u32.totalorder %s132_s18, %s320_s1 }
   0x7   :  { %p138_p2 = pnand %p136_p1, %p133_p0 }
   0x9   :  { %141 = shalt.err (!%p138_p2)
}
   0xa   :  { %s142_s23 = scalar_lea.vmem %s30_s13, 16  ;;  %s146_s24 = scalar_lea.vmem %s30_s13, 32 }
   0xb   :  { %p143_p3 = scmp.ne.s32.totalorder %s30_s13, %s142_s23  ;;  %p147_p4 = scmp.lt.s32.totalorder %s30_s13, %s30_s13 }
   0xc   :  { %p148_p5 = scmp.lt.s32.totalorder %s146_s24, %s142_s23 }
   0xe   :  { %p149_p6 = por %p148_p5, %p147_p4 }
  0x10   :  { %p150_p7 = pnand %p149_p6, %p143_p3 }
  0x12   :  { %153 = shalt.err (!%p150_p7)
}
  0x13   :  { %32 = dma.hbm_to_vmem [thread:$0]  %s320_s1, 16, %s30_s13, [#allocation6]  }
  0x14   :  { %s154_s29 = scalar_lea.hbm %s319_s0, 256 }
  0x15   :  { %p155_p8 = scmp.ne.s32.totalorder %s319_s0, %s154_s29  ;;  %p158_p9 = scmp.lt.u32.totalorder %s154_s29, %s319_s0 }
  0x17   :  { %p160_p10 = pnand %p158_p9, %p155_p8 }
  0x19   :  { %163 = shalt.err (!%p160_p10)
}
  0x1a   :  { %s164_s7 = scalar_lea.vmem %s252_s15, 256  ;;  %p169_p12 = scmp.lt.s32.totalorder %s252_s15, %s252_s15 }
  0x1b   :  { %p165_p11 = scmp.ne.s32.totalorder %s252_s15, %s164_s7  ;;  %p170_p13 = scmp.lt.s32.totalorder %s164_s7, %s164_s7 }
  0x1d   :  { %p171_p0 = por %p170_p13, %p169_p12 }
  0x1f   :  { %p172_p1 = pnand %p171_p0, %p165_p11 }
  0x21   :  { %175 = shalt.err (!%p172_p1)
}
  0x22   :  { %s228_s1 = smov 128   ;;  %s229_s8 = smov 8  }
  0x23   :  { %22 = dma.hbm_to_vmem [thread:$0]  %s319_s0, 256, %s252_s15, [#allocation3], %s228_s1, %s228_s1, %s229_s8  }
  0x24   :  { %s230_s11 = smov [#allocation7]   ;;  %s176_s16 = scalar_lea.hbm %s321_s2, 16 }
  0x25   :  { %s39_s12 = sshll.u32 %s230_s11, 4  ;;  %p177_p2 = scmp.ne.s32.totalorder %s321_s2, %s176_s16  ;;  %s40_s12 = int_to_ptr.vmem [resolvable:$true] %s39_s12 }
  0x26   :  { %p180_p3 = scmp.lt.u32.totalorder %s176_s16, %s321_s2 }
  0x28   :  { %p182_p4 = pnand %p180_p3, %p177_p2 }
  0x2a   :  { %185 = shalt.err (!%p182_p4)
}
  0x2b   :  { %s186_s21 = scalar_lea.vmem %s40_s12, 16  ;;  %s190_s0 = scalar_lea.vmem %s40_s12, 32 }
  0x2c   :  { %p187_p5 = scmp.ne.s32.totalorder %s40_s12, %s186_s21  ;;  %p191_p6 = scmp.lt.s32.totalorder %s40_s12, %s40_s12 }
  0x2d   :  { %p192_p7 = scmp.lt.s32.totalorder %s190_s0, %s186_s21 }
  0x2f   :  { %p193_p8 = por %p192_p7, %p191_p6 }
  0x31   :  { %p194_p9 = pnand %p193_p8, %p187_p5 }
  0x33   :  { %197 = shalt.err (!%p194_p9)
}
  0x34   :  { %42 = dma.hbm_to_vmem [thread:$0]  %s321_s2, 16, %s40_s12, [#allocation6]  }
  0x35   :  { %220 = dma.done.wait [#allocation3], 256  }
  0x36   :  { %221 = vsyncadd [#allocation3], 4294967040 }
  0x37   :  { %222 = dma.done.wait [#allocation6], 32  }
  0x38   :  { %223 = vsyncadd [#allocation6], 4294967264  ;;  %vm56_vm0 = vcmask 523264   ;;  %v52_v0 = vld [vmem:[#allocation2] sm:$0xff]  ;;  %v53_v1 = vld [vmem:[#allocation2 + $0x8] sm:$0xff]  ;;  %s231_s2 = smov [#allocation8]  }
  0x39   :  { %v57_v2 = vsel %vm56_vm0, %v52_v0, 0.0  ;;  %v60_v3 = vsel %vm56_vm0, %v53_v1, 0.0  ;;  %v120_v21 = vld [vmem:[#allocation5] ss:$0 sm:$0xff]  ;;  %v121_v23 = vld [vmem:[#allocation7] ss:$0 sm:$0xff] }
  0x3a   :  { %58 = vadd.xlane.f32.xlu0 %v57_v2  ;;  %s107_s23 = sshll.u32 %s231_s2, 4  ;;  %s108_s23 = int_to_ptr.vmem [resolvable:$true] %s107_s23 }
  0x3b   :  { %s198_s24 = scalar_lea.vmem %s108_s23, 256  ;;  %p203_p11 = scmp.lt.s32.totalorder %s108_s23, %s108_s23 }
  0x3c   :  { %p199_p10 = scmp.ne.s32.totalorder %s108_s23, %s198_s24  ;;  %p204_p12 = scmp.lt.s32.totalorder %s198_s24, %s198_s24 }
  0x3e   :  { %61 = vadd.xlane.f32.xlu0 %v60_v3  ;;  %p205_p13 = por %p204_p12, %p203_p11 }
  0x40   :  { %p206_p0 = pnand %p205_p13, %p199_p10 }
  0xc7   :  { %v59_v4 = vpop.xlane.xlu0 %58 }
  0xc8   :  { %v64_v5 = vmul.f32 0.015625, %v59_v4 }
  0xca   :  { %v66_v6 = vsub.f32 %v52_v0, %v64_v5 }
  0xcb   :  { %v62_v7 = vpop.xlane.xlu0 %61 }
  0xcc   :  { %v65_v8 = vmul.f32 0.015625, %v62_v7  ;;  %v68_v9 = vmul.f32 %v66_v6, %v66_v6 }
  0xce   :  { %v67_v10 = vsub.f32 %v53_v1, %v65_v8  ;;  %v70_v11 = vsel %vm56_vm0, %v68_v9, 0.0 }
  0xcf   :  { %71 = vadd.xlane.f32.xlu1 %v70_v11 }
  0xd0   :  { %v69_v12 = vmul.f32 %v67_v10, %v67_v10 }
  0xd2   :  { %v73_v13 = vsel %vm56_vm0, %v69_v12, 0.0 }
  0xd3   :  { %74 = vadd.xlane.f32.xlu1 %v73_v13 }
 0x15c   :  { %v72_v14 = vpop.xlane.xlu1 %71 }
 0x15d   :  { %v76_v15 = vmul.f32 0.015625, %v72_v14 }
 0x15f   :  { %v78_v16 = vadd.f32 1e-05, %v76_v15 }
 0x160   :  { %v75_v17 = vpop.xlane.xlu1 %74 }
 0x161   :  { %128 = vrsqrt.f32 %v78_v16  ;;  %v77_v18 = vmul.f32 0.015625, %v75_v17 }
 0x163   :  { %v79_v19 = vadd.f32 1e-05, %v77_v18 }
 0x165   :  { %130 = vrsqrt.f32 %v79_v19 }
 0x16b   :  { %v129_v20 = vpop.eup %128 }
 0x16c   :  { %v82_v22 = vmul.f32 %v129_v20, %v66_v6 }
 0x16e   :  { %v90_v24 = vmul.f32 %v120_v21, %v82_v22 }
 0x16f   :  { %v131_v25 = vpop.eup %130 }
 0x170   :  { %v83_v26 = vmul.f32 %v131_v25, %v67_v10  ;;  %v98_v27 = vadd.f32 %v121_v23, %v90_v24 }
 0x172   :  { %v91_v28 = vmul.f32 %v120_v21, %v83_v26  ;;  %100 = vst.msk [vmem:[#allocation8] sm:$0xff] %vm56_vm0, %v98_v27 }
 0x174   :  { %v99_v29 = vadd.f32 %v121_v23, %v91_v28 }
 0x176   :  { %101 = vst.msk [vmem:[#allocation8 + $0x8] sm:$0xff] %vm56_vm0, %v99_v29 }
 0x177   :  { %209 = shalt.err (!%p206_p0)
}
 0x178   :  { %s210_s27 = scalar_lea.hbm %s322_s3, 256 }
 0x179   :  { %p211_p1 = scmp.ne.s32.totalorder %s322_s3, %s210_s27  ;;  %p214_p2 = scmp.lt.u32.totalorder %s210_s27, %s322_s3 }
 0x17b   :  { %p216_p3 = pnand %p214_p2, %p211_p1 }
 0x17d   :  { %219 = shalt.err (!%p216_p3)
}
 0x17e   :  { %113 = dma.vmem_to_hbm [thread:$0]  %s108_s23, 256, %s322_s3, [#allocation4], %s228_s1, %s228_s1, %s229_s8  }
 0x17f   :  { %224 = dma.done.wait [#allocation4], 256  }
 0x180   :  { %225 = vsyncadd [#allocation4], 4294967040 }
 0x181   :  { %117 = vsyncpa [#allocation3], 1 }
 0x182   :  { %118 = vsyncpa [#allocation6], 1 }
 0x183   :  { %119 = vsyncpa [#allocation4], 1 }

// kernel: custom_clip_forward.13
= control target key start
LH: loop header
LB: loop body
LE: loop exit
PB: predicated region body
PF: predicated region fallthrough
CT: control target
= control target key end

     0   :  { %10 = vsyncpa [#allocation3], 0  ;;  %s519_s0 = inlined_call_operand.hbm [shape: f32[8,64], index: 0, kind: input, shape index: {}]   ;;  %s520_s1 = inlined_call_operand.hbm [shape: f32[1,64], index: 1, kind: input, shape index: {}]   ;;  %s521_s2 = inlined_call_operand.hbm [shape: f32[1,64], index: 2, kind: input, shape index: {}]   ;;  %s522_s3 = inlined_call_operand.hbm [shape: bf16[64,32], index: 3, kind: input, shape index: {}]   ;;  %s523_s4 = inlined_call_operand.hbm [shape: f32[1,32], index: 4, kind: input, shape index: {}]   ;;  %s524_s5 = inlined_call_operand.hbm [shape: f32[8,32], index: 5, kind: output, shape index: {}]  }
   0x1   :  { %11 = vsyncpa [#allocation6], 0 }
   0x2   :  { %12 = vsyncpa [#allocation9], 0 }
   0x3   :  { %13 = vsyncpa [#allocation4], 0  ;;  %s397_s18 = smov [#allocation5]   ;;  %s398_s20 = smov [#allocation8]  }
   0x4   :  { %s30_s19 = sshll.u32 %s397_s18, 4  ;;  %s49_s21 = sshll.u32 %s398_s20, 4  ;;  %s31_s19 = int_to_ptr.vmem [resolvable:$true] %s30_s19  ;;  %s437_s21 = int_to_ptr.vmem [resolvable:$true] %s49_s21 }
   0x5   :  { %s257_s24 = scalar_lea.hbm %s520_s1, 16 }
   0x6   :  { %p258_p0 = scmp.ne.s32.totalorder %s520_s1, %s257_s24  ;;  %p261_p1 = scmp.lt.u32.totalorder %s257_s24, %s520_s1 }
   0x8   :  { %p263_p2 = pnand %p261_p1, %p258_p0 }
   0xa   :  { %266 = shalt.err (!%p263_p2)
}
   0xb   :  { %s267_s29 = scalar_lea.vmem %s31_s19, 16  ;;  %s271_s30 = scalar_lea.vmem %s31_s19, 32 }
   0xc   :  { %p268_p3 = scmp.ne.s32.totalorder %s31_s19, %s267_s29  ;;  %p272_p4 = scmp.lt.s32.totalorder %s31_s19, %s31_s19 }
   0xd   :  { %p273_p5 = scmp.lt.s32.totalorder %s271_s30, %s267_s29 }
   0xf   :  { %p274_p6 = por %p273_p5, %p272_p4 }
  0x11   :  { %p275_p7 = pnand %p274_p6, %p268_p3 }
  0x13   :  { %278 = shalt.err (!%p275_p7)
}
  0x14   :  { %33 = dma.hbm_to_vmem [thread:$0]  %s520_s1, 16, %s31_s19, [#allocation6]  }
  0x15   :  { %s279_s10 = scalar_lea.hbm %s522_s3, 512 }
  0x16   :  { %p280_p8 = scmp.ne.s32.totalorder %s522_s3, %s279_s10  ;;  %p283_p9 = scmp.lt.u32.totalorder %s279_s10, %s522_s3 }
  0x18   :  { %p285_p10 = pnand %p283_p9, %p280_p8 }
  0x1a   :  { %288 = shalt.err (!%p285_p10)
}
  0x1b   :  { %s289_s15 = scalar_lea.vmem %s437_s21, 512  ;;  %p294_p12 = scmp.lt.s32.totalorder %s437_s21, %s437_s21 }
  0x1c   :  { %p290_p11 = scmp.ne.s32.totalorder %s437_s21, %s289_s15  ;;  %p295_p13 = scmp.lt.s32.totalorder %s289_s15, %s289_s15 }
  0x1e   :  { %p296_p0 = por %p295_p13, %p294_p12 }
  0x20   :  { %p297_p1 = pnand %p296_p0, %p290_p11 }
  0x22   :  { %300 = shalt.err (!%p297_p1)
}
  0x23   :  { %s399_s1 = smov 64   ;;  %s400_s16 = smov 4  }
  0x24   :  { %55 = dma.hbm_to_vmem [thread:$0]  %s522_s3, 512, %s437_s21, [#allocation9], %s399_s1, %s399_s1, %s400_s16  }
  0x25   :  { %s401_s19 = smov [#allocation2]   ;;  %s402_s22 = smov [#allocation7]  }
  0x26   :  { %s20_s20 = sshll.u32 %s401_s19, 4  ;;  %s40_s23 = sshll.u32 %s402_s22, 4  ;;  %s21_s20 = int_to_ptr.vmem [resolvable:$true] %s20_s20  ;;  %s41_s23 = int_to_ptr.vmem [resolvable:$true] %s40_s23 }
  0x27   :  { %s301_s26 = scalar_lea.hbm %s519_s0, 128 }
  0x28   :  { %p302_p2 = scmp.ne.s32.totalorder %s519_s0, %s301_s26  ;;  %p305_p3 = scmp.lt.u32.totalorder %s301_s26, %s519_s0 }
  0x2a   :  { %p307_p4 = pnand %p305_p3, %p302_p2 }
  0x2c   :  { %310 = shalt.err (!%p307_p4)
}
  0x2d   :  { %s311_s3 = scalar_lea.vmem %s21_s20, 128  ;;  %p316_p6 = scmp.lt.s32.totalorder %s21_s20, %s21_s20 }
  0x2e   :  { %p312_p5 = scmp.ne.s32.totalorder %s21_s20, %s311_s3  ;;  %p317_p7 = scmp.lt.s32.totalorder %s311_s3, %s311_s3 }
  0x30   :  { %p318_p8 = por %p317_p7, %p316_p6 }
  0x32   :  { %p319_p9 = pnand %p318_p8, %p312_p5 }
  0x34   :  { %322 = shalt.err (!%p319_p9)
}
  0x35   :  { %23 = dma.hbm_to_vmem [thread:$0]  %s519_s0, 128, %s21_s20, [#allocation3]  }
  0x36   :  { %s323_s9 = scalar_lea.hbm %s521_s2, 16 }
  0x37   :  { %p324_p10 = scmp.ne.s32.totalorder %s521_s2, %s323_s9  ;;  %p327_p11 = scmp.lt.u32.totalorder %s323_s9, %s521_s2 }
  0x39   :  { %p329_p12 = pnand %p327_p11, %p324_p10 }
  0x3b   :  { %332 = shalt.err (!%p329_p12)
}
  0x3c   :  { %s333_s14 = scalar_lea.vmem %s41_s23, 16  ;;  %s337_s15 = scalar_lea.vmem %s41_s23, 32 }
  0x3d   :  { %p334_p13 = scmp.ne.s32.totalorder %s41_s23, %s333_s14  ;;  %p338_p0 = scmp.lt.s32.totalorder %s41_s23, %s41_s23 }
  0x3e   :  { %p339_p1 = scmp.lt.s32.totalorder %s337_s15, %s333_s14 }
  0x40   :  { %p340_p2 = por %p339_p1, %p338_p0 }
  0x42   :  { %p341_p3 = pnand %p340_p2, %p334_p13 }
  0x44   :  { %344 = shalt.err (!%p341_p3)
}
  0x45   :  { %43 = dma.hbm_to_vmem [thread:$0]  %s521_s2, 16, %s41_s23, [#allocation6]  }
  0x46   :  { %s403_s16 = smov [#allocation10]   ;;  %s345_s20 = scalar_lea.hbm %s523_s4, 16 }
  0x47   :  { %s62_s17 = sshll.u32 %s403_s16, 4  ;;  %p346_p4 = scmp.ne.s32.totalorder %s523_s4, %s345_s20  ;;  %s63_s17 = int_to_ptr.vmem [resolvable:$true] %s62_s17 }
  0x48   :  { %p349_p5 = scmp.lt.u32.totalorder %s345_s20, %s523_s4 }
  0x4a   :  { %p351_p6 = pnand %p349_p5, %p346_p4 }
  0x4c   :  { %354 = shalt.err (!%p351_p6)
}
  0x4d   :  { %s355_s27 = scalar_lea.vmem %s63_s17, 16  ;;  %s359_s2 = scalar_lea.vmem %s63_s17, 32 }
  0x4e   :  { %p356_p7 = scmp.ne.s32.totalorder %s63_s17, %s355_s27  ;;  %p360_p8 = scmp.lt.s32.totalorder %s63_s17, %s63_s17 }
  0x4f   :  { %p361_p9 = scmp.lt.s32.totalorder %s359_s2, %s355_s27 }
  0x51   :  { %p362_p10 = por %p361_p9, %p360_p8 }
  0x53   :  { %p363_p11 = pnand %p362_p10, %p356_p7 }
  0x55   :  { %366 = shalt.err (!%p363_p11)
}
  0x56   :  { %65 = dma.hbm_to_vmem [thread:$0]  %s523_s4, 16, %s63_s17, [#allocation9]  }
  0x57   :  { %389 = dma.done.wait [#allocation3], 128  }
  0x58   :  { %390 = vsyncadd [#allocation3], 4294967168 }
  0x59   :  { %391 = dma.done.wait [#allocation6], 32  }
  0x5a   :  { %392 = vsyncadd [#allocation6], 4294967264 }
  0x5b   :  { %393 = dma.done.wait [#allocation9], 528  }
  0x5c   :  { %394 = vsyncadd [#allocation9], 4294966768  ;;  %vm85_vm0 = vcmask 523264   ;;  %v82_v0 = vld [vmem:[#allocation2] sm:$0xff]  ;;  %v251_v7 = vld [vmem:[#allocation8] sm:$0xff]   ;;  %v404_v8 = vmov 0.0  }
  0x5d   :  { %v86_v1 = vsel %vm85_vm0, %v82_v0, 0.0  ;;  %229 = vmatprep.subr.bf16.mxu0 %v404_v8  ;;  %v252_v9 = vld [vmem:[#allocation8 + $0x8] sm:$0xff]   ;;  %v253_v10 = vld [vmem:[#allocation8 + $0x10] sm:$0xff]   ;;  %v254_v11 = vld [vmem:[#allocation8 + $0x18] sm:$0xff]   ;;  %vm405_vm1 = vmmov 0   ;;  %s406_s4 = smov [#allocation11]  }
  0x5e   :  { %87 = vadd.xlane.f32.xlu0 %v86_v1  ;;  %230 = vmatpush3.bf16.msra.mxu0 %v251_v7  ;;  %v216_v16 = vld [vmem:[#allocation5] ss:$0 sm:$0xff]  ;;  %v217_v18 = vld [vmem:[#allocation7] ss:$0 sm:$0xff]  ;;  %v218_v22 = vld [vmem:[#allocation10] ss:$0 sm:$0xff] }
  0x5f   :  { %231 = vmatprep.subr.bf16.mxu0 %v404_v8  ;;  %237 = vmatprep.mubr.msk.bf16.mxu0 %vm405_vm1, %v404_v8  ;;  %s205_s29 = sshll.u32 %s406_s4, 4  ;;  %vm197_vm2 = vcmask 261120   ;;  %s206_s29 = int_to_ptr.vmem [resolvable:$true] %s205_s29 }
  0x60   :  { %s367_s30 = scalar_lea.vmem %s206_s29, 128  ;;  %p372_p13 = scmp.lt.s32.totalorder %s206_s29, %s206_s29 }
  0x61   :  { %p368_p12 = scmp.ne.s32.totalorder %s206_s29, %s367_s30  ;;  %p373_p0 = scmp.lt.s32.totalorder %s367_s30, %s367_s30 }
  0x62   :  { %232 = vmatpush3.bf16.msra.mxu0 %v252_v9 }
  0x63   :  { %233 = vmatprep.subr.bf16.mxu0 %v404_v8  ;;  %p374_p1 = por %p373_p0, %p372_p13 }
  0x65   :  { %p375_p2 = pnand %p374_p1, %p368_p12 }
  0x66   :  { %234 = vmatpush3.bf16.msra.mxu0 %v253_v10 }
  0x67   :  { %235 = vmatprep.subr.bf16.mxu0 %v404_v8 }
  0x6a   :  { %236 = vmatpush3.bf16.msra.mxu0 %v254_v11 }
  0xeb   :  { %v88_v2 = vpop.xlane.xlu0 %87 }
  0xec   :  { %v90_v3 = vmul.f32 0.015625, %v88_v2 }
  0xee   :  { %v91_v4 = vsub.f32 %v82_v0, %v90_v3 }
  0xf0   :  { %v92_v5 = vmul.f32 %v91_v4, %v91_v4 }
  0xf2   :  { %v93_v6 = vsel %vm85_vm0, %v92_v5, 0.0 }
  0xf3   :  { %94 = vadd.xlane.f32.xlu0 %v93_v6 }
 0x180   :  { %v95_v12 = vpop.xlane.xlu0 %94 }
 0x181   :  { %v96_v13 = vmul.f32 0.015625, %v95_v12 }
 0x183   :  { %v97_v14 = vadd.f32 1e-05, %v96_v13 }
 0x185   :  { %255 = vrsqrt.f32 %v97_v14 }
 0x18f   :  { %v256_v15 = vpop.eup %255 }
 0x190   :  { %v99_v17 = vmul.f32 %v256_v15, %v91_v4 }
 0x192   :  { %v106_v19 = vmul.f32 %v216_v16, %v99_v17 }
 0x194   :  { %v113_v20 = vadd.f32 %v217_v18, %v106_v19 }
 0x196   :  { %v114_v21 = vpack.c.bf16 %v113_v20, %v113_v20 }
 0x198   :  { %238 = vmatmul.mubr.msk.bf16.vlgmr.msra.gmra.mrb[0].mxu0 %vm85_vm0, %v114_v21 }
 0x26b   :  { %v191_v23 = vpop.f32.mrb[0].mxu0 }
 0x26c   :  { %v192_v24 = vadd.f32 %v218_v22, %v191_v23  ;;  %v239_v25 = vpop.f32.mrb[1].mxu0 }
 0x26d   :  { %v194_v26 = vpop.f32.mrb[2].mxu0 }
 0x26e   :  { %v240_v27 = vpop.f32.mrb[3].mxu0  ;;  %198 = vst.msk [vmem:[#allocation11] sm:$0xff] %vm197_vm2, %v192_v24 }
 0x26f   :  { %378 = shalt.err (!%p375_p2)
}
 0x270   :  { %s379_s6 = scalar_lea.hbm %s524_s5, 128 }
 0x271   :  { %p380_p3 = scmp.ne.s32.totalorder %s524_s5, %s379_s6  ;;  %p383_p4 = scmp.lt.u32.totalorder %s379_s6, %s524_s5 }
 0x273   :  { %p385_p5 = pnand %p383_p4, %p380_p3 }
 0x275   :  { %388 = shalt.err (!%p385_p5)
}
 0x276   :  { %208 = dma.vmem_to_hbm [thread:$0]  %s206_s29, 128, %s524_s5, [#allocation4]  }
 0x277   :  { %395 = dma.done.wait [#allocation4], 128  }
 0x278   :  { %396 = vsyncadd [#allocation4], 4294967168 }
 0x279   :  { %212 = vsyncpa [#allocation3], 1 }
 0x27a   :  { %213 = vsyncpa [#allocation6], 1 }
 0x27b   :  { %214 = vsyncpa [#allocation9], 1 }
 0x27c   :  { %215 = vsyncpa [#allocation4], 1 }

// kernel: custom_clip_forward.11
= control target key start
LH: loop header
LB: loop body
LE: loop exit
PB: predicated region body
PF: predicated region fallthrough
CT: control target
= control target key end

     0   :  { %s3398_s0 = inlined_call_operand.hbm [shape: f32[2,8,64], index: 0, kind: input, shape index: {}]   ;;  %s3399_s1 = inlined_call_operand.hbm [shape: f32[1,64], index: 1, kind: input, shape index: {}]   ;;  %s3400_s2 = inlined_call_operand.hbm [shape: f32[1,64], index: 2, kind: input, shape index: {}]   ;;  %s3401_s3 = inlined_call_operand.hbm [shape: bf16[64,192], index: 3, kind: input, shape index: {}]   ;;  %s3402_s4 = inlined_call_operand.hbm [shape: f32[1,192], index: 4, kind: input, shape index: {}]   ;;  %s3403_s5 = inlined_call_operand.hbm [shape: bf16[64,64], index: 5, kind: input, shape index: {}]   ;;  %s3404_s6 = inlined_call_operand.hbm [shape: f32[1,64], index: 6, kind: input, shape index: {}]   ;;  %s3405_s7 = inlined_call_operand.hbm [shape: f32[1,64], index: 7, kind: input, shape index: {}]   ;;  %s3406_s8 = inlined_call_operand.hbm [shape: f32[1,64], index: 8, kind: input, shape index: {}]   ;;  %s3407_s9 = inlined_call_operand.hbm [shape: bf16[64,256], index: 9, kind: input, shape index: {}]   ;;  %s3408_s10 = inlined_call_operand.hbm [shape: f32[1,256], index: 10, kind: input, shape index: {}]   ;;  %s3409_s11 = inlined_call_operand.hbm [shape: bf16[256,64], index: 11, kind: input, shape index: {}]   ;;  %s3410_s12 = inlined_call_operand.hbm [shape: f32[1,64], index: 12, kind: input, shape index: {}]   ;;  %s3411_s13 = inlined_call_operand.hbm [shape: f32[2,8,64], index: 13, kind: output, shape index: {}]  }
   0x1   :  { %3424 = sst [smem:[#allocation36_spill]] %s3398_s0 }
   0x2   :  { %3425 = sst [smem:[#allocation37_spill]] %s3399_s1 }
   0x3   :  { %3426 = sst [smem:[#allocation38_spill]] %s3401_s3 }
   0x4   :  { %3427 = sst [smem:[#allocation39_spill]] %s3411_s13 }
   0x5   :  { %18 = vsyncpa [#allocation4], 0 }
   0x6   :  { %20 = vsyncpa [#allocation4 + $0x1], 0 }
   0x7   :  { %21 = vsyncpa [#allocation7], 0 }
   0x8   :  { %22 = vsyncpa [#allocation10], 0 }
   0x9   :  { %23 = vsyncpa [#allocation13], 0 }
   0xa   :  { %24 = vsyncpa [#allocation16], 0 }
   0xb   :  { %25 = vsyncpa [#allocation19], 0 }
   0xc   :  { %26 = vsyncpa [#allocation22], 0 }
   0xd   :  { %27 = vsyncpa [#allocation5], 0 }
   0xe   :  { %29 = vsyncpa [#allocation5 + $0x1], 0  ;;  %s2834_s25 = smov 0   ;;  %s2836_s26 = smov 0  }
   0xf   :  { %s2838_s27 = smov 0   ;;  %s2840_s28 = smov 0  }
  0x10 LB: > { %3428 = sst [smem:[#allocation33_spill]] %s2721_s25  ;;  %s2735_s29 = smov [#allocation6]   ;;  %s2733_s28 = sphi %s2840_s28, %s3471_s28   ;;  %s2729_s27 = sphi %s2838_s27, %s3470_s27   ;;  %s2725_s26 = sphi %s2836_s26, %s3469_s26   ;;  %s2721_s25 = sphi %s2834_s25, %s3468_s25  }
  0x11   : > { %s357_s30 = sshll.u32 %s2735_s29, 4  ;;  %s2855_s14 = sadd.s32 4294967295, %s2733_s28   ;;  %s2860_s30 = int_to_ptr.vmem [resolvable:$true] %s357_s30 }
  0x12   : > { %3429 = sst [smem:[#allocation34_spill]] %s2855_s14  ;;  %p1832_p0 = scmp.ge.s32.totalorder %s2733_s28, 1 }
  0x13   : > { %p3420_p1 = scmp.eq.s32.totalorder %s2855_s14, 0  ;;  %p344_p2 = scmp.lt.s32.totalorder %s2733_s28, 3 }
  0x14   : > { %s2736_s16 = smov [#allocation9]   ;;  %s2737_s19 = smov [#allocation12]  }
  0x15   : > { %p2862_p3 = pnand %p1832_p0, %p344_p2  ;;  %s378_s17 = sshll.u32 %s2736_s16, 4  ;;  %s2869_s17 = int_to_ptr.vmem [resolvable:$true] %s378_s17 }
  0x16   : > { %s402_s20 = sshll.u32 %s2737_s19, 4  ;;  %s3433_s1 = sld [smem:[#allocation37_spill]]  ;;  %s2877_s20 = int_to_ptr.vmem [resolvable:$true] %s402_s20 }
  0x17   : > { %s3430_s15 = scalar_select %p2862_p3, 1, 0 }
  0x18   : > { %p2075_p5 = pneg %p2862_p3 }
  0x19   : > { %3431 = sst [smem:[#allocation35_spill]] %s3430_s15 }
  0x1a   : > { %p2873_p6 = pnand %p2075_p5, %p3420_p1 }
  0x1c   : > { %s2277_s23 = scalar_lea.hbm %s3433_s1, 16  ;;  %p2887_p8 = pneg %p2873_p6 }
  0x1d   : > { %p2278_p7 = scmp.ne.s32.totalorder %s3433_s1, %s2277_s23  ;;  %p2284_p11 = scmp.lt.u32.totalorder %s2277_s23, %s3433_s1 }
  0x1f   : > { %p2280_p9 = pnand %p2887_p8, %p2278_p7 }
  0x21   : > { %p2281_p10 = pneg %p2280_p9 }
  0x23   : > { %p2286_p12 = pnand %p2284_p11, %p2281_p10 }
  0x25   : > { %2289 = shalt.err (!%p2286_p12)
}
  0x26   : > { %s2290_s21 = scalar_lea.vmem %s2860_s30, 16  ;;  %s2297_s22 = scalar_lea.vmem %s2860_s30, 32 }
  0x27   : > { %p2291_p13 = scmp.ne.s32.totalorder %s2860_s30, %s2290_s21  ;;  %p2298_p5 = scmp.lt.s32.totalorder %s2860_s30, %s2860_s30 }
  0x28   : > { %p2299_p7 = scmp.lt.s32.totalorder %s2297_s22, %s2290_s21 }
  0x29   : > { %p2293_p0 = pnand %p2291_p13, %p2887_p8 }
  0x2a   : > { %p2300_p9 = por %p2299_p7, %p2298_p5 }
  0x2b   : > { %p2294_p2 = pneg %p2293_p0 }
  0x2d   : > { %p2301_p4 = pnand %p2300_p9, %p2294_p2 }
  0x2f   : > { %2304 = shalt.err (!%p2301_p4)
}
  0x30   : > { %2078 = dma.hbm_to_vmem [thread:$0]  (!%p2873_p6), %s3433_s1, 16, %s2860_s30, [#allocation7]  }
  0x31   : > { %s3435_s3 = sld [smem:[#allocation38_spill]] }
  0x37   : > { %s2305_s19 = scalar_lea.hbm %s3435_s3, 1024 }
  0x38   : > { %p2306_p10 = scmp.ne.s32.totalorder %s3435_s3, %s2305_s19  ;;  %p2312_p4 = scmp.lt.u32.totalorder %s2305_s19, %s3435_s3 }
  0x3a   : > { %p2308_p11 = pnand %p2306_p10, %p2887_p8 }
  0x3c   : > { %p2309_p12 = pneg %p2308_p11 }
  0x3e   : > { %p2314_p13 = pnand %p2312_p4, %p2309_p12 }
  0x40   : > { %2317 = shalt.err (!%p2314_p13)
}
  0x41   : > { %s2318_s30 = scalar_lea.vmem %s2869_s17, 1024  ;;  %p2326_p7 = scmp.lt.s32.totalorder %s2869_s17, %s2869_s17 }
  0x42   : > { %p2319_p0 = scmp.ne.s32.totalorder %s2869_s17, %s2318_s30  ;;  %p2327_p9 = scmp.lt.s32.totalorder %s2318_s30, %s2318_s30 }
  0x44   : > { %p2321_p2 = pnand %p2319_p0, %p2887_p8  ;;  %p2328_p10 = por %p2327_p9, %p2326_p7 }
  0x46   : > { %p2322_p5 = pneg %p2321_p2 }
  0x48   : > { %p2329_p11 = pnand %p2328_p10, %p2322_p5 }
  0x4a   : > { %2332 = shalt.err (!%p2329_p11)
}
  0x4b   : > { %s3415_s0 = smov 128   ;;  %s3416_s15 = smov 8  }
  0x4c   : > { %2084 = dma.hbm_to_vmem [thread:$0]  (!%p2873_p6), %s3435_s3, 1024, %s2869_s17, [#allocation10], %s3415_s0, %s3415_s0, %s3416_s15  }
  0x4d   : > { %s2333_s19 = scalar_lea.hbm %s3403_s5, 512 }
  0x4e   : > { %p2334_p12 = scmp.ne.s32.totalorder %s3403_s5, %s2333_s19  ;;  %p2340_p0 = scmp.lt.u32.totalorder %s2333_s19, %s3403_s5 }
  0x50   : > { %p2336_p4 = pnand %p2334_p12, %p2887_p8 }
  0x52   : > { %p2337_p13 = pneg %p2336_p4 }
  0x54   : > { %p2342_p2 = pnand %p2340_p0, %p2337_p13 }
  0x56   : > { %2345 = shalt.err (!%p2342_p2)
}
  0x57   : > { %s2346_s17 = scalar_lea.vmem %s2877_s20, 512  ;;  %p2354_p10 = scmp.lt.s32.totalorder %s2877_s20, %s2877_s20 }
  0x58   : > { %p2347_p5 = scmp.ne.s32.totalorder %s2877_s20, %s2346_s17  ;;  %p2355_p11 = scmp.lt.s32.totalorder %s2346_s17, %s2346_s17 }
  0x5a   : > { %p2349_p7 = pnand %p2347_p5, %p2887_p8  ;;  %p2356_p12 = por %p2355_p11, %p2354_p10 }
  0x5c   : > { %p2350_p9 = pneg %p2349_p7 }
  0x5e   : > { %p2357_p4 = pnand %p2356_p12, %p2350_p9 }
  0x60   : > { %2360 = shalt.err (!%p2357_p4)
}
  0x61   : > { %s3422_s13 = smov 64   ;;  %s2741_s1 = smov 4  }
  0x62   : > { %2090 = dma.hbm_to_vmem [thread:$0]  (!%p2873_p6), %s3403_s5, 512, %s2877_s20, [#allocation13], %s3422_s13, %s3422_s13, %s2741_s1  }
  0x63   : > { %s2742_s29 = smov [#allocation15]   ;;  %s2743_s21 = smov [#allocation18]  }
  0x64   : > { %s427_s19 = sshll.u32 %s2742_s29, 4  ;;  %s448_s22 = sshll.u32 %s2743_s21, 4  ;;  %s428_s19 = int_to_ptr.vmem [resolvable:$true] %s427_s19  ;;  %s449_s22 = int_to_ptr.vmem [resolvable:$true] %s448_s22 }
  0x65   : > { %s2361_s0 = scalar_lea.hbm %s3405_s7, 16 }
  0x66   : > { %p2362_p13 = scmp.ne.s32.totalorder %s3405_s7, %s2361_s0  ;;  %p2368_p5 = scmp.lt.u32.totalorder %s2361_s0, %s3405_s7 }
  0x68   : > { %p2364_p0 = pnand %p2362_p13, %p2887_p8 }
  0x6a   : > { %p2365_p2 = pneg %p2364_p0 }
  0x6c   : > { %p2370_p7 = pnand %p2368_p5, %p2365_p2 }
  0x6e   : > { %2373 = shalt.err (!%p2370_p7)
}
  0x6f   : > { %s2374_s20 = scalar_lea.vmem %s428_s19, 16  ;;  %s2381_s23 = scalar_lea.vmem %s428_s19, 32 }
  0x70   : > { %p2375_p9 = scmp.ne.s32.totalorder %s428_s19, %s2374_s20  ;;  %p2382_p12 = scmp.lt.s32.totalorder %s428_s19, %s428_s19 }
  0x71   : > { %p2383_p4 = scmp.lt.s32.totalorder %s2381_s23, %s2374_s20 }
  0x72   : > { %p2377_p10 = pnand %p2375_p9, %p2887_p8 }
  0x73   : > { %p2384_p1 = por %p2383_p4, %p2382_p12 }
  0x74   : > { %p2378_p11 = pneg %p2377_p10 }
  0x76   : > { %p2385_p3 = pnand %p2384_p1, %p2378_p11 }
  0x78   : > { %2388 = shalt.err (!%p2385_p3)
}
  0x79   : > { %2096 = dma.hbm_to_vmem [thread:$0]  (!%p2873_p6), %s3405_s7, 16, %s428_s19, [#allocation16]  }
  0x7a   : > { %s2389_s0 = scalar_lea.hbm %s3407_s9, 1024 }
  0x7b   : > { %p2390_p13 = scmp.ne.s32.totalorder %s3407_s9, %s2389_s0  ;;  %p2396_p3 = scmp.lt.u32.totalorder %s2389_s0, %s3407_s9 }
  0x7d   : > { %p2392_p0 = pnand %p2390_p13, %p2887_p8 }
  0x7f   : > { %p2393_p1 = pneg %p2392_p0 }
  0x81   : > { %p2398_p2 = pnand %p2396_p3, %p2393_p1 }
  0x83   : > { %2401 = shalt.err (!%p2398_p2)
}
  0x84   : > { %s2402_s17 = scalar_lea.vmem %s449_s22, 1024  ;;  %p2410_p10 = scmp.lt.s32.totalorder %s449_s22, %s449_s22 }
  0x85   : > { %p2403_p5 = scmp.ne.s32.totalorder %s449_s22, %s2402_s17  ;;  %p2411_p11 = scmp.lt.s32.totalorder %s2402_s17, %s2402_s17 }
  0x87   : > { %p2405_p7 = pnand %p2403_p5, %p2887_p8  ;;  %p2412_p12 = por %p2411_p11, %p2410_p10 }
  0x89   : > { %p2406_p9 = pneg %p2405_p7 }
  0x8b   : > { %p2413_p4 = pnand %p2412_p12, %p2406_p9 }
  0x8d   : > { %2416 = shalt.err (!%p2413_p4)
}
  0x8e   : > { %s3436_s19 = smov 8   ;;  %s3437_s20 = smov 128  }
  0x8f   : > { %2102 = dma.hbm_to_vmem [thread:$0]  (!%p2873_p6), %s3407_s9, 1024, %s449_s22, [#allocation19], %s3437_s20, %s3437_s20, %s3436_s19  }
  0x90   : > { %s2744_s15 = smov [#allocation21]   ;;  %s2745_s14 = smov [#allocation8]  }
  0x91   : > { %s472_s25 = sshll.u32 %s2744_s15, 4  ;;  %s368_s0 = sshll.u32 %s2745_s14, 4  ;;  %s473_s25 = int_to_ptr.vmem [resolvable:$true] %s472_s25  ;;  %s369_s0 = int_to_ptr.vmem [resolvable:$true] %s368_s0 }
  0x92   : > { %s2417_s21 = scalar_lea.hbm %s3409_s11, 2048 }
  0x93   : > { %p2418_p13 = scmp.ne.s32.totalorder %s3409_s11, %s2417_s21  ;;  %p2424_p3 = scmp.lt.u32.totalorder %s2417_s21, %s3409_s11 }
  0x95   : > { %p2420_p0 = pnand %p2418_p13, %p2887_p8 }
  0x97   : > { %p2421_p1 = pneg %p2420_p0 }
  0x99   : > { %p2426_p2 = pnand %p2424_p3, %p2421_p1 }
  0x9b   : > { %2429 = shalt.err (!%p2426_p2)
}
  0x9c   : > { %s2430_s22 = scalar_lea.vmem %s473_s25, 2048  ;;  %p2438_p10 = scmp.lt.s32.totalorder %s473_s25, %s473_s25 }
  0x9d   : > { %p2431_p5 = scmp.ne.s32.totalorder %s473_s25, %s2430_s22  ;;  %p2439_p11 = scmp.lt.s32.totalorder %s2430_s22, %s2430_s22 }
  0x9f   : > { %p2433_p7 = pnand %p2431_p5, %p2887_p8  ;;  %p2440_p12 = por %p2439_p11, %p2438_p10 }
  0xa1   : > { %p2434_p9 = pneg %p2433_p7 }
  0xa3   : > { %p2441_p4 = pnand %p2440_p12, %p2434_p9 }
  0xa5   : > { %2444 = shalt.err (!%p2441_p4)
}
  0xa6   : > { %s3438_s19 = smov 64   ;;  %s2445_s14 = scalar_lea.hbm %s3400_s2, 16 }
  0xa7   : > { %2108 = dma.hbm_to_vmem [thread:$0]  (!%p2873_p6), %s3409_s11, 2048, %s473_s25, [#allocation22], %s3438_s19, %s3438_s19, %s2741_s1  }
  0xa8   : > { %p2446_p13 = scmp.ne.s32.totalorder %s3400_s2, %s2445_s14  ;;  %p2452_p3 = scmp.lt.u32.totalorder %s2445_s14, %s3400_s2 }
  0xaa   : > { %p2448_p0 = pnand %p2446_p13, %p2887_p8 }
  0xac   : > { %p2449_p1 = pneg %p2448_p0 }
  0xae   : > { %p2454_p2 = pnand %p2452_p3, %p2449_p1 }
  0xb0   : > { %2457 = shalt.err (!%p2454_p2)
}
  0xb1   : > { %s2458_s17 = scalar_lea.vmem %s369_s0, 16  ;;  %s2465_s1 = scalar_lea.vmem %s369_s0, 32 }
  0xb2   : > { %p2459_p5 = scmp.ne.s32.totalorder %s369_s0, %s2458_s17  ;;  %p2466_p10 = scmp.lt.s32.totalorder %s369_s0, %s369_s0 }
  0xb3   : > { %p2467_p11 = scmp.lt.s32.totalorder %s2465_s1, %s2458_s17 }
  0xb4   : > { %p2461_p7 = pnand %p2459_p5, %p2887_p8 }
  0xb5   : > { %p2468_p12 = por %p2467_p11, %p2466_p10 }
  0xb6   : > { %p2462_p9 = pneg %p2461_p7 }
  0xb8   : > { %p2469_p4 = pnand %p2468_p12, %p2462_p9 }
  0xba   : > { %2472 = shalt.err (!%p2469_p4)
}
  0xbb   : > { %2081 = dma.hbm_to_vmem [thread:$0]  (!%p2873_p6), %s3400_s2, 16, %s369_s0, [#allocation7]  }
  0xbc   : > { %s2746_s22 = smov [#allocation11]   ;;  %s2747_s13 = smov [#allocation14]  }
  0xbd   : > { %s392_s19 = sshll.u32 %s2746_s22, 4  ;;  %s416_s20 = sshll.u32 %s2747_s13, 4  ;;  %s393_s19 = int_to_ptr.vmem [resolvable:$true] %s392_s19  ;;  %s417_s20 = int_to_ptr.vmem [resolvable:$true] %s416_s20 }
  0xbe   : > { %s2473_s14 = scalar_lea.hbm %s3402_s4, 32 }
  0xbf   : > { %p2474_p13 = scmp.ne.s32.totalorder %s3402_s4, %s2473_s14  ;;  %p2480_p3 = scmp.lt.u32.totalorder %s2473_s14, %s3402_s4 }
  0xc1   : > { %p2476_p0 = pnand %p2474_p13, %p2887_p8 }
  0xc3   : > { %p2477_p1 = pneg %p2476_p0 }
  0xc5   : > { %p2482_p2 = pnand %p2480_p3, %p2477_p1 }
  0xc7   : > { %2485 = shalt.err (!%p2482_p2)
}
  0xc8   : > { %s2486_s0 = scalar_lea.vmem %s393_s19, 32  ;;  %p2494_p10 = scmp.lt.s32.totalorder %s393_s19, %s393_s19 }
  0xc9   : > { %p2487_p5 = scmp.ne.s32.totalorder %s393_s19, %s2486_s0  ;;  %p2495_p11 = scmp.lt.s32.totalorder %s2486_s0, %s2486_s0 }
  0xcb   : > { %p2489_p7 = pnand %p2487_p5, %p2887_p8  ;;  %p2496_p12 = por %p2495_p11, %p2494_p10 }
  0xcd   : > { %p2490_p9 = pneg %p2489_p7 }
  0xcf   : > { %p2497_p4 = pnand %p2496_p12, %p2490_p9 }
  0xd1   : > { %2500 = shalt.err (!%p2497_p4)
}
  0xd2   : > { %2087 = dma.hbm_to_vmem [thread:$0]  (!%p2873_p6), %s3402_s4, 32, %s393_s19, [#allocation10]  }
  0xd3   : > { %s2501_s22 = scalar_lea.hbm %s3404_s6, 16 }
  0xd4   : > { %p2502_p13 = scmp.ne.s32.totalorder %s3404_s6, %s2501_s22  ;;  %p2508_p3 = scmp.lt.u32.totalorder %s2501_s22, %s3404_s6 }
  0xd6   : > { %p2504_p0 = pnand %p2502_p13, %p2887_p8 }
  0xd8   : > { %p2505_p1 = pneg %p2504_p0 }
  0xda   : > { %p2510_p2 = pnand %p2508_p3, %p2505_p1 }
  0xdc   : > { %2513 = shalt.err (!%p2510_p2)
}
  0xdd   : > { %s2514_s24 = scalar_lea.vmem %s417_s20, 16  ;;  %s2521_s19 = scalar_lea.vmem %s417_s20, 32 }
  0xde   : > { %p2515_p5 = scmp.ne.s32.totalorder %s417_s20, %s2514_s24  ;;  %p2522_p10 = scmp.lt.s32.totalorder %s417_s20, %s417_s20 }
  0xdf   : > { %p2523_p11 = scmp.lt.s32.totalorder %s2521_s19, %s2514_s24 }
  0xe0   : > { %p2517_p7 = pnand %p2515_p5, %p2887_p8 }
  0xe1   : > { %p2524_p12 = por %p2523_p11, %p2522_p10 }
  0xe2   : > { %p2518_p9 = pneg %p2517_p7 }
  0xe4   : > { %p2525_p4 = pnand %p2524_p12, %p2518_p9 }
  0xe6   : > { %2528 = shalt.err (!%p2525_p4)
}
  0xe7   : > { %2093 = dma.hbm_to_vmem [thread:$0]  (!%p2873_p6), %s3404_s6, 16, %s417_s20, [#allocation13]  }
  0xe8   : > { %s2748_s30 = smov [#allocation17]   ;;  %s2749_s17 = smov [#allocation20]  }
  0xe9   : > { %s438_s0 = sshll.u32 %s2748_s30, 4  ;;  %s462_s1 = sshll.u32 %s2749_s17, 4  ;;  %s439_s0 = int_to_ptr.vmem [resolvable:$true] %s438_s0  ;;  %s463_s1 = int_to_ptr.vmem [resolvable:$true] %s462_s1 }
  0xea   : > { %s2529_s22 = scalar_lea.hbm %s3406_s8, 16 }
  0xeb   : > { %p2530_p13 = scmp.ne.s32.totalorder %s3406_s8, %s2529_s22  ;;  %p2536_p3 = scmp.lt.u32.totalorder %s2529_s22, %s3406_s8 }
  0xed   : > { %p2532_p0 = pnand %p2530_p13, %p2887_p8 }
  0xef   : > { %p2533_p1 = pneg %p2532_p0 }
  0xf1   : > { %p2538_p2 = pnand %p2536_p3, %p2533_p1 }
  0xf3   : > { %2541 = shalt.err (!%p2538_p2)
}
  0xf4   : > { %s2542_s20 = scalar_lea.vmem %s439_s0, 16  ;;  %s2549_s24 = scalar_lea.vmem %s439_s0, 32 }
  0xf5   : > { %p2543_p5 = scmp.ne.s32.totalorder %s439_s0, %s2542_s20  ;;  %p2550_p10 = scmp.lt.s32.totalorder %s439_s0, %s439_s0 }
  0xf6   : > { %p2551_p11 = scmp.lt.s32.totalorder %s2549_s24, %s2542_s20 }
  0xf7   : > { %p2545_p7 = pnand %p2543_p5, %p2887_p8 }
  0xf8   : > { %p2552_p12 = por %p2551_p11, %p2550_p10 }
  0xf9   : > { %p2546_p9 = pneg %p2545_p7 }
  0xfb   : > { %p2553_p4 = pnand %p2552_p12, %p2546_p9 }
  0xfd   : > { %2556 = shalt.err (!%p2553_p4)
}
  0xfe   : > { %2099 = dma.hbm_to_vmem [thread:$0]  (!%p2873_p6), %s3406_s8, 16, %s439_s0, [#allocation16]  }
  0xff   : > { %s2557_s17 = scalar_lea.hbm %s3408_s10, 32 }
 0x100   : > { %p2558_p13 = scmp.ne.s32.totalorder %s3408_s10, %s2557_s17  ;;  %p2564_p3 = scmp.lt.u32.totalorder %s2557_s17, %s3408_s10 }
 0x102   : > { %p2560_p0 = pnand %p2558_p13, %p2887_p8 }
 0x104   : > { %p2561_p1 = pneg %p2560_p0 }
 0x106   : > { %p2566_p2 = pnand %p2564_p3, %p2561_p1 }
 0x108   : > { %2569 = shalt.err (!%p2566_p2)
}
 0x109   : > { %s2570_s3 = scalar_lea.vmem %s463_s1, 32  ;;  %p2578_p10 = scmp.lt.s32.totalorder %s463_s1, %s463_s1 }
 0x10a   : > { %p2571_p5 = scmp.ne.s32.totalorder %s463_s1, %s2570_s3  ;;  %p2579_p11 = scmp.lt.s32.totalorder %s2570_s3, %s2570_s3 }
 0x10c   : > { %p2573_p7 = pnand %p2571_p5, %p2887_p8  ;;  %p2580_p12 = por %p2579_p11, %p2578_p10 }
 0x10e   : > { %p2574_p9 = pneg %p2573_p7 }
 0x110   : > { %p2581_p4 = pnand %p2580_p12, %p2574_p9 }
 0x112   : > { %2584 = shalt.err (!%p2581_p4)
}
 0x113   : > { %2105 = dma.hbm_to_vmem [thread:$0]  (!%p2873_p6), %s3408_s10, 32, %s463_s1, [#allocation19]  }
 0x114   : > { %s2750_s14 = smov [#allocation23]   ;;  %s2585_s29 = scalar_lea.hbm %s3410_s12, 16 }
 0x115   : > { %s486_s20 = sshll.u32 %s2750_s14, 4  ;;  %p2586_p13 = scmp.ne.s32.totalorder %s3410_s12, %s2585_s29  ;;  %s487_s20 = int_to_ptr.vmem [resolvable:$true] %s486_s20 }
 0x116   : > { %p2592_p3 = scmp.lt.u32.totalorder %s2585_s29, %s3410_s12 }
 0x117   : > { %p2588_p0 = pnand %p2586_p13, %p2887_p8 }
 0x119   : > { %p2589_p1 = pneg %p2588_p0 }
 0x11b   : > { %p2594_p2 = pnand %p2592_p3, %p2589_p1 }
 0x11d   : > { %2597 = shalt.err (!%p2594_p2)
}
 0x11e   : > { %s2598_s1 = scalar_lea.vmem %s487_s20, 16  ;;  %s2605_s23 = scalar_lea.vmem %s487_s20, 32 }
 0x11f   : > { %p2599_p5 = scmp.ne.s32.totalorder %s487_s20, %s2598_s1  ;;  %p2606_p10 = scmp.lt.s32.totalorder %s487_s20, %s487_s20 }
 0x120   : > { %p2607_p11 = scmp.lt.s32.totalorder %s2605_s23, %s2598_s1 }
 0x121   : > { %p2601_p7 = pnand %p2599_p5, %p2887_p8 }
 0x122   : > { %p2608_p12 = por %p2607_p11, %p2606_p10 }
 0x123   : > { %p2602_p9 = pneg %p2601_p7 }
 0x125   : > { %p2609_p4 = pnand %p2608_p12, %p2602_p9 }
 0x127   : > { %2612 = shalt.err (!%p2609_p4)
}
 0x128   : > { %s3439_s16 = sld [smem:[#allocation33_spill]]  ;;  %s3440_s3 = sld [smem:[#allocation34_spill]] }
 0x129   : > { %2111 = dma.hbm_to_vmem [thread:$0]  (!%p2873_p6), %s3410_s12, 16, %s487_s20, [#allocation22]  }
 0x12a   : > { %s1831_s0 = sadd.s32 4294967294, %s2733_s28   ;;  %s3131_s18 = sadd.s32 1, %s2733_s28  }
 0x12b   : > { %s39_s15 = ssub.s32 %s2733_s28, %s3131_s18  ;;  %s42_s14 = sadd.s32 1, %s2729_s27 }
 0x12c   : > { %p40_p8 = scmp.eq.s32.totalorder %s39_s15, 0  ;;  %p49_p13 = scmp.ne.s32.totalorder %s2729_s27, %s2725_s26 }
 0x12d   : > { %p50_p0 = scmp.eq.s32.totalorder %s2733_s28, 0  ;;  %p337_p7 = scmp.eq.s32.totalorder %s1831_s0, 1 }
 0x12e   : > { %p55_p1 = scmp.ne.s32.totalorder %s2725_s26, %s3439_s16  ;;  %p3442_p2 = scmp.eq.s32.totalorder %s3440_s3, 0 }
 0x12f   : > { %s3142_s24 = scalar_select %p40_p8, %s2729_s27, %s42_s14  }
 0x130   : > { %p3144_p3 = por %p50_p0, %p49_p13  ;;  %p3150_p6 = por %p3442_p2, %p55_p1 }
 0x131   : > { %p331_p5 = scmp.eq.s32.totalorder %s3440_s3, 1  ;;  %p2132_p9 = scmp.lt.s32.totalorder %s2733_s28, 2 }
 0x132   : > { %s497_s29 = sand.u32 1, %s2729_s27   ;;  %p3161_p11 = por %p337_p7, %p55_p1 }
 0x133   : > { %p3157_p10 = por %p331_p5, %p49_p13  ;;  %s1846_s17 = sshll.u32 %s497_s29, 3 }
 0x134   : > { %s3445_s30 = scalar_select %p3161_p11, 1, 0 }
 0x135   : > { %s3444_s21 = scalar_select %p3157_p10, 1, 0 }
 0x136   : > { %s1847_s25 = sshll.u32 %s2733_s28, 7  ;;  %s3446_s22 = sld [smem:[#allocation36_spill]] }
 0x137   : > { %s501_s16 = scalar_lea.vmem [#allocation3], %s1846_s17  ;;  %p3175_p12 = pnand %p2132_p9, %p3144_p3 }
 0x138   : > { %s508_s3 = sshll.u32 %s501_s16, 4  ;;  %s498_s15 = scalar_lea.sflag [#allocation4], %s497_s29  ;;  %s3171_s3 = int_to_ptr.vmem [resolvable:$true] %s508_s3 }
 0x139   : > { %p2615_p8 = pneg %p3175_p12 }
 0x13c   : > { %s3169_s13 = scalar_lea.hbm %s3446_s22, %s1847_s25  ;;  %s2618_s1 = scalar_lea.hbm %s3446_s22, 256 }
 0x13d   : > { %s2613_s14 = scalar_lea.hbm %s3169_s13, 128  ;;  %p2619_p1 = scmp.lt.u32.totalorder %s3169_s13, %s3446_s22 }
 0x13e   : > { %p2614_p4 = scmp.ne.s32.totalorder %s3169_s13, %s2613_s14  ;;  %p2620_p3 = scmp.lt.u32.totalorder %s2618_s1, %s2613_s14 }
 0x13f   : > { %p2622_p5 = scmp.lt.u32.totalorder %s2613_s14, %s3169_s13 }
 0x140   : > { %p2616_p13 = pnand %p2615_p8, %p2614_p4  ;;  %p2621_p2 = por %p2620_p3, %p2619_p1 }
 0x142   : > { %p2617_p0 = pneg %p2616_p13  ;;  %p2623_p7 = por %p2622_p5, %p2621_p2 }
 0x144   : > { %p2624_p9 = pnand %p2623_p7, %p2617_p0 }
 0x146   : > { %2627 = shalt.err (!%p2624_p9)
}
 0x147   : > { %s2628_s29 = scalar_lea.vmem %s3171_s3, 128  ;;  %s2751_s16 = smov [#allocation3]  }
 0x148   : > { %p2629_p4 = scmp.ne.s32.totalorder %s3171_s3, %s2628_s29  ;;  %s2633_s17 = sshll.u32 %s2751_s16, 4  ;;  %s2634_s17 = int_to_ptr.vmem [resolvable:$false] %s2633_s17 }
 0x149   : > { %s2635_s25 = scalar_lea.vmem %s2634_s17, 256  ;;  %p2636_p10 = scmp.lt.s32.totalorder %s3171_s3, %s2634_s17 }
 0x14a   : > { %p2631_p13 = pnand %p2629_p4, %p2615_p8  ;;  %p2637_p1 = scmp.lt.s32.totalorder %s2635_s25, %s2628_s29 }
 0x14c   : > { %p2632_p11 = pneg %p2631_p13  ;;  %p2638_p3 = por %p2637_p1, %p2636_p10 }
 0x14e   : > { %p2639_p2 = pnand %p2638_p3, %p2632_p11 }
 0x150   : > { %2642 = shalt.err (!%p2639_p2)
}
 0x151   : > { %2115 = dma.hbm_to_vmem [thread:$0]  (!%p3175_p12), %s3169_s13, 128, %s3171_s3, %s498_s15  }
 0x152   : > { %s3448_s14 = sld [smem:[#allocation35_spill]] }
 0x158   : > { %p3449_p0 = scmp.ne.s32.totalorder %s3448_s14, 0 }
 0x159   : > { %s3207_s1 = sand.u32 (!%p3449_p0), 1, %s2725_s26  }
 0x15a   : > { %517 = sbr.rel (%p3449_p0) target bundleno = 2974 (0xb9e), region = 72  ;;  %s1849_s19 = sshll.u32 (!%p3449_p0), %s3207_s1, 3 }
 0x15b   : > { %s520_s23 = scalar_lea.sflag (!%p3449_p0), [#allocation4], %s3207_s1  ;;  %s523_s29 = scalar_lea.vmem (!%p3449_p0), [#allocation3], %s1849_s19 }
 0x161   : > { %2688 = dma.done.wait (%p3150_p6), %s520_s23, 128  }
 0x162   : > { %2690 = vsyncadd (%p3150_p6), %s520_s23, 4294967168  ;;  %s3450_s13 = sld [smem:[#allocation34_spill]] }
 0x168   : > { %p3451_p10 = scmp.eq.s32.totalorder %s3450_s13, 0 }
 0x16a   : > { %2692 = dma.done.wait (%p3451_p10), [#allocation7], 32   ;;  %p3452_p11 = pmov %p3451_p10 }
 0x16b   : > { %p3453_p12 = pmov %p3451_p10 }
 0x16c   : > { %2694 = vsyncadd (%p3452_p11), [#allocation7], 4294967264 }
 0x16d   : > { %2696 = dma.done.wait (%p3453_p12), [#allocation10], 1056   ;;  %p3454_p8 = pmov %p3451_p10 }
 0x16f   : > { %2698 = vsyncadd (%p3454_p8), [#allocation10], 4294966240  ;;  %p3455_p5 = pmov %p3454_p8 }
 0x171   : > { %2700 = dma.done.wait (%p3455_p5), [#allocation13], 528   ;;  %p3456_p7 = pmov %p3455_p5 }
 0x172   : > { %p3457_p6 = pmov %p3455_p5 }
 0x173   : > { %2702 = vsyncadd (%p3456_p7), [#allocation13], 4294966768 }
 0x174   : > { %2704 = dma.done.wait (%p3457_p6), [#allocation16], 32   ;;  %p3458_p9 = pmov %p3455_p5 }
 0x175   : > { %p3459_p4 = pmov %p3455_p5 }
 0x176   : > { %2706 = vsyncadd (%p3458_p9), [#allocation16], 4294967264 }
 0x177   : > { %2708 = dma.done.wait (%p3459_p4), [#allocation19], 1056   ;;  %p3460_p13 = pmov %p3459_p4 }
 0x178   : > { %p3461_p1 = pmov %p3459_p4 }
 0x179   : > { %2710 = vsyncadd (%p3460_p13), [#allocation19], 4294966240 }
 0x17a   : > { %2712 = dma.done.wait (%p3461_p1), [#allocation22], 2064   ;;  %p3462_p3 = pmov %p3461_p1 }
 0x17b   : > { %vm618_vm0 = vcmask 523264   ;;  %v3241_v0 = vld [vmem:[%s523_s29] sm:$0xff]  ;;  %v2207_v8 = vld [vmem:[#allocation9] ss:$8 sps:$4 sm:$0xff]   ;;  %v2752_v11 = vmov 0   ;;  %v658_v26 = vlaneseq  ;;  %v2753_v28 = vmov 0.0  }
 0x17c   : > { %2714 = vsyncadd (%p3462_p3), [#allocation22], 4294965232  ;;  %v619_v1 = vsel %vm618_vm0, %v3241_v0, 0.0  ;;  %v2205_v7 = vld [vmem:[#allocation9 + $0x4] ss:$8 sps:$4 sm:$0xff]   ;;  %743 = vmatprep.mubr.bf16.mxu1 %v2752_v11  ;;  %1975 = vmatprep.subr.bf16.mxu0 %v2753_v28  ;;  %vm2754_vm1 = vmmov 0  }
 0x17d   : > { %620 = vadd.xlane.f32.xlu0 %v619_v1  ;;  %v2208_v9 = vld [vmem:[#allocation9 + $0x14] ss:$8 sps:$4 sm:$0xff]   ;;  %711 = vmatprep.subr.bf16.mxu1 %v2205_v7  ;;  %v2210_v10 = vld [vmem:[#allocation9 + $0x10] ss:$8 sps:$4 sm:$0xff]   ;;  %v2211_v12 = vld [vmem:[#allocation9 + $0x24] ss:$8 sps:$4 sm:$0xff]  }
 0x17e   : > { %712 = vmatpush1.bf16.msra.mxu1 %v2207_v8  ;;  %v2213_v13 = vld [vmem:[#allocation9 + $0x20] ss:$8 sps:$4 sm:$0xff]   ;;  %v2214_v14 = vld [vmem:[#allocation9 + $0x34] ss:$8 sps:$4 sm:$0xff]   ;;  %v2216_v15 = vld [vmem:[#allocation9 + $0x30] ss:$8 sps:$4 sm:$0xff]   ;;  %1977 = vmatprep.mubr.msk.bf16.mxu0 %vm2754_vm1, %v2753_v28 }
 0x17f   : > { %713 = vmatprep.subr.bf16.mxu1 %v2208_v9  ;;  %v1863_v20 = vld [vmem:[#allocation6] ss:$0 sm:$0xff]  ;;  %v1864_v22 = vld [vmem:[#allocation8] ss:$0 sm:$0xff]  ;;  %v3250_v27 = vshrl.u32 %v658_v26, 7  ;;  %s2755_s20 = smov 64  }
 0x180   : > { %v656_v30 = vld [vmem:[#allocation11] sm:$0x3]  ;;  %s2756_s3 = smov 112   ;;  %s2757_s0 = smov 48   ;;  %vm763_vm2 = vcmask 130048   ;;  %vm826_vm3 = vcmask 1043456  }
 0x181   : > { %v660_v29 = vsub.s32 0, %v3250_v27  ;;  %s2758_s15 = smov 32   ;;  %s2759_s16 = smov 96   ;;  %v664_v40 = vsub.s32 1, %v3250_v27  ;;  %v753_v56 = vand.u32 127, %v658_v26  ;;  %vm810_vm5 = vcmask 64512  }
 0x182   : > { %714 = vmatpush1.bf16.msra.mxu1 %v2210_v10  ;;  %s2760_s17 = smov 16   ;;  %s2761_s25 = smov 80   ;;  %v2762_v57 = vmov -1e+09   ;;  %vm987_vm6 = vcmask 261248   ;;  %vm1103_vm7 = vcmask 392448  }
 0x183   : > { %715 = vmatprep.subr.bf16.mxu1 %v2211_v12  ;;  %v661_v31 = vrot.slane %v656_v30, %v660_v29  ;;  %v665_v41 = vrot.slane %v656_v30, %v664_v40  ;;  %vm754_vm4 = vcmp.lt.s32.totalorder %v753_v56, 5  ;;  %vm1219_vm8 = vcmask 523648   ;;  %s1917_s14 = sshll.u32 %s3450_s13, 7  ;;  %s613_s23 = scalar_lea.vmem [#allocation24], %s1849_s19 }
 0x184   : > { %v755_v58 = vsel %vm754_vm4, 0.0, %v2762_v57  ;;  %s1647_s29 = sshll.u32 %s613_s23, 4  ;;  %p3464_p0 = scmp.ne.s32.totalorder %s3444_s21, 0  ;;  %s3355_s29 = int_to_ptr.vmem [resolvable:$true] %s1647_s29 }
 0x185   : > { %s2643_s13 = scalar_lea.vmem %s3355_s29, 128  ;;  %s2763_s19 = smov [#allocation24]  }
 0x186   : > { %716 = vmatpush1.bf16.msra.mxu1 %v2213_v13  ;;  %p2644_p2 = scmp.ne.s32.totalorder %s3355_s29, %s2643_s13 }
 0x187   : > { %717 = vmatprep.subr.bf16.mxu1 %v2214_v14 }
 0x188   : > { %p2645_p10 = pnand %p2644_p2, %p3464_p0 }
 0x18a   : > { %718 = vmatpush1.bf16.msra.mxu1 %v2216_v15  ;;  %p2646_p11 = pneg %p2645_p10 }
 0x18b   : > { %1963 = vmatprep.subr.bf16.mxu1 %v2753_v28 }
 0x20a   : > { %v621_v2 = vpop.xlane.xlu0 %620 }
 0x20b   : > { %v623_v3 = vmul.f32 0.015625, %v621_v2 }
 0x20d   : > { %v624_v4 = vsub.f32 %v3241_v0, %v623_v3 }
 0x20f   : > { %v625_v5 = vmul.f32 %v624_v4, %v624_v4 }
 0x211   : > { %v626_v6 = vsel %vm618_vm0, %v625_v5, 0.0 }
 0x212   : > { %627 = vadd.xlane.f32.xlu0 %v626_v6 }
 0x29f   : > { %v628_v16 = vpop.xlane.xlu0 %627 }
 0x2a0   : > { %v629_v17 = vmul.f32 0.015625, %v628_v16 }
 0x2a2   : > { %v630_v18 = vadd.f32 1e-05, %v629_v17 }
 0x2a4   : > { %2249 = vrsqrt.f32 %v630_v18 }
 0x2ae   : > { %v2250_v19 = vpop.eup %2249 }
 0x2af   : > { %v632_v21 = vmul.f32 %v2250_v19, %v624_v4 }
 0x2b1   : > { %v639_v23 = vmul.f32 %v1863_v20, %v632_v21 }
 0x2b3   : > { %v646_v24 = vadd.f32 %v1864_v22, %v639_v23 }
 0x2b5   : > { %v647_v25 = vpack.c.bf16 %v646_v24, %v646_v24 }
 0x2b7   : > { %1873 = vmatmul.mubr.msk.bf16.vlgmr.msra.gmra.mrb[0].mxu1 %vm618_vm0, %v647_v25 }
 0x2b8   : > { %1965 = vmatprep.mubr.msk.bf16.mxu1 %vm2754_vm1, %v2753_v28 }
 0x38a   : > { %v745_v32 = vpop.f32.mrb[0].mxu1 }
 0x38b   : > { %v746_v33 = vadd.f32 %v745_v32, %v661_v31  ;;  %v747_v34 = vpop.f32.mrb[1].mxu1 }
 0x38c   : > { %v749_v35 = vpop.f32.mrb[2].mxu1  ;;  %v748_v43 = vadd.f32 %v747_v34, %v665_v41 }
 0x38d   : > { %v756_v36 = vmul.f32 0.25, %v746_v33  ;;  %v758_v37 = vpack.c.bf16 %v746_v33, %v746_v33  ;;  %v750_v38 = vpop.f32.mrb[3].mxu1 }
 0x38e   : > { %v3272_v46 = vpack.c.bf16 %v748_v43, %v748_v43 }
 0x38f   : > { %v757_v39 = vpack.c.bf16 %v756_v36, %v756_v36  ;;  %761 = vrot.lane.b32.xlu1 %v758_v37, %s2755_s20 }
 0x390   : > { %v828_v49 = vsel %vm826_vm3, %v3272_v46, 0 }
 0x391   : > { %872 = vrot.lane.b32.xlu0 %v757_v39, %s2756_s3 }
 0x393   : > { %874 = vrot.lane.b32.xlu1 %v758_v37, %s2757_s0 }
 0x397   : > { %991 = vrot.lane.b32.xlu1 %v758_v37, %s2758_s15 }
 0x39b   : > { %989 = vrot.lane.b32.xlu1 %v757_v39, %s2759_s16 }
 0x39f   : > { %1107 = vrot.lane.b32.xlu1 %v758_v37, %s2760_s17 }
 0x3a3   : > { %1105 = vrot.lane.b32.xlu1 %v757_v39, %s2761_s25 }
 0x401   : > { %v762_v42 = vpop.permute.xlu1 %761 }
 0x402   : > { %v768_v44 = vsel %vm763_vm2, %v762_v42, 0 }
 0x403   : > { %1964 = vmatpush3.bf16.xpose.msra.mxu1 %v768_v44  ;;  %v873_v50 = vpop.permute.xlu0 %872 }
 0x404   : > { %1969 = vmatprep.subr.bf16.mxu1 %v2753_v28 }
 0x405   : > { %v875_v45 = vpop.permute.xlu1 %874 }
 0x406   : > { %v880_v47 = vsel %vm763_vm2, %v875_v45, 0 }
 0x407   : > { %1976 = vmatpush3.bf16.xpose.msra.mxu0 %v880_v47 }
 0x408   : > { %1987 = vmatprep.subr.bf16.mxu0 %v2753_v28 }
 0x409   : > { %v992_v48 = vpop.permute.xlu1 %991 }
 0x40a   : > { %1966 = vmatmul.mubr.msk.bf16.vlgmr.msra.gmra.mrb[4].mxu1 %vm763_vm2, %v757_v39  ;;  %v997_v52 = vsel %vm763_vm2, %v992_v48, 0 }
 0x40b   : > { %1970 = vmatpush3.bf16.msra.mxu1 %v828_v49  ;;  %1971 = vmatprep.mubr.msk.bf16.mxu1 %vm2754_vm1, %v2753_v28 }
 0x40c   : > { %1981 = vmatprep.subr.bf16.mxu1 %v2753_v28 }
 0x40d   : > { %v990_v51 = vpop.permute.xlu1 %989 }
 0x40e   : > { %1978 = vmatmul.mubr.msk.bf16.vlgmr.msra.gmra.mrb[0].mxu0 %vm763_vm2, %v873_v50 }
 0x40f   : > { %1988 = vmatpush3.bf16.xpose.msra.mxu0 %v997_v52  ;;  %1989 = vmatprep.mubr.msk.bf16.mxu0 %vm2754_vm1, %v2753_v28 }
 0x410   : > { %1999 = vmatprep.subr.bf16.mxu0 %v2753_v28 }
 0x411   : > { %v1108_v53 = vpop.permute.xlu1 %1107 }
 0x412   : > { %v1113_v54 = vsel %vm763_vm2, %v1108_v53, 0 }
 0x415   : > { %v1106_v55 = vpop.permute.xlu1 %1105 }
 0x416   : > { %1990 = vmatmul.mubr.msk.bf16.vlgmr.msra.gmra.mrb[4].mxu0 %vm763_vm2, %v990_v51 }
 0x417   : > { %2000 = vmatpush3.bf16.xpose.msra.mxu0 %v1113_v54  ;;  %2001 = vmatprep.mubr.msk.bf16.mxu0 %vm2754_vm1, %v2753_v28 }
 0x418   : > { %2011 = vmatprep.subr.bf16.mxu0 %v2753_v28 }
 0x41e   : > { %2002 = vmatmul.mubr.msk.bf16.vlgmr.msra.gmra.mrb[8].mxu0 %vm763_vm2, %v1106_v55 }
 0x41f   : > { %2019 = vmatprep.mubr.msk.bf16.mxu0 %vm2754_vm1, %v2753_v28 }
 0x4dd   : > { %v804_v59 = vpop.f32.mrb[4].mxu1 }
 0x4de   : > { %v805_v60 = vadd.f32 %v804_v59, %v755_v58  ;;  %v1967_v61 = vpop.f32.mrb[5].mxu1 }
 0x4df   : > { %v807_v62 = vpop.f32.mrb[6].mxu1 }
 0x4e0   : > { %v1968_v63 = vpop.f32.mrb[7].mxu1  ;;  %v811_v1 = vsel %vm810_vm5, %v805_v60, -inf }
 0x4e1   : > { %v916_v2 = vpop.f32.mrb[0].mxu0  ;;  %812 = vmax.xlane.f32.xlu1 %v811_v1 }
 0x4e2   : > { %v917_v3 = vadd.f32 %v916_v2, %v755_v58  ;;  %v1979_v4 = vpop.f32.mrb[1].mxu0 }
 0x4e3   : > { %v919_v5 = vpop.f32.mrb[2].mxu0 }
 0x4e4   : > { %v1980_v6 = vpop.f32.mrb[3].mxu0  ;;  %v922_v7 = vsel %vm810_vm5, %v917_v3, -inf }
 0x4e5   : > { %923 = vmax.xlane.f32.xlu0 %v922_v7 }
 0x4e9   : > { %v1033_v8 = vpop.f32.mrb[4].mxu0 }
 0x4ea   : > { %v1034_v9 = vadd.f32 %v1033_v8, %v755_v58  ;;  %v1991_v10 = vpop.f32.mrb[5].mxu0 }
 0x4eb   : > { %v1036_v12 = vpop.f32.mrb[6].mxu0 }
 0x4ec   : > { %v1992_v13 = vpop.f32.mrb[7].mxu0  ;;  %v1039_v14 = vsel %vm810_vm5, %v1034_v9, -inf }
 0x4ed   : > { %1040 = vmax.xlane.f32.xlu1 %v1039_v14  ;;  %v2217_v13 = vld [vmem:[#allocation12] sm:$0xff]   ;;  %v2218_v14 = vld [vmem:[#allocation12 + $0x8] sm:$0xff]  }
 0x4ee   : > { %2012 = vmatpush3.bf16.msra.mxu0 %v2217_v13  ;;  %v2246_v13 = vld [vmem:[#allocation21 + $0x30] sm:$0xff]  }
 0x4ef   : > { %2013 = vmatprep.subr.bf16.mxu0 %v2753_v28 }
 0x4f1   : > { %v1149_v15 = vpop.f32.mrb[8].mxu0 }
 0x4f2   : > { %v1150_v16 = vadd.f32 %v1149_v15, %v755_v58  ;;  %v2003_v17 = vpop.f32.mrb[9].mxu0  ;;  %2014 = vmatpush3.bf16.msra.mxu0 %v2218_v14  ;;  %v2220_v15 = vld [vmem:[#allocation12 + $0x18] sm:$0xff]   ;;  %v2247_v14 = vld [vmem:[#allocation21 + $0x78] sm:$0xff]  }
 0x4f3   : > { %v1152_v18 = vpop.f32.mrb[10].mxu0  ;;  %2015 = vmatprep.subr.bf16.mxu0 %v2753_v28 }
 0x4f4   : > { %v2004_v19 = vpop.f32.mrb[11].mxu0  ;;  %v1155_v20 = vsel %vm810_vm5, %v1150_v16, -inf }
 0x4f5   : > { %1156 = vmax.xlane.f32.xlu0 %v1155_v20 }
 0x56e   : > { %v813_v21 = vpop.xlane.xlu1 %812 }
 0x56f   : > { %v814_v22 = vsub.f32 %v805_v60, %v813_v21 }
 0x571   : > { %v815_v23 = vmul.f32 1.442695, %v814_v22 }
 0x572   : > { %v924_v24 = vpop.xlane.xlu0 %923 }
 0x573   : > { %2251 = vpow2.f32 %v815_v23  ;;  %v925_v25 = vsub.f32 %v917_v3, %v924_v24 }
 0x575   : > { %v926_v26 = vmul.f32 1.442695, %v925_v25 }
 0x577   : > { %2253 = vpow2.f32 %v926_v26 }
 0x57a   : > { %v1041_v39 = vpop.xlane.xlu1 %1040 }
 0x57b   : > { %v1042_v41 = vsub.f32 %v1034_v9, %v1041_v39 }
 0x57d   : > { %v2252_v30 = vpop.eup %2251  ;;  %v1043_v42 = vmul.f32 1.442695, %v1042_v41 }
 0x57e   : > { %v817_v31 = vsel %vm810_vm5, %v2252_v30, 0.0 }
 0x57f   : > { %818 = vadd.xlane.f32.xlu1 %v817_v31  ;;  %v1882_v31 = vld [vmem:[#allocation14] ss:$0 sm:$0xff] }
 0x581   : > { %v2254_v32 = vpop.eup %2253 }
 0x582   : > { %v1157_v33 = vpop.xlane.xlu0 %1156  ;;  %v928_v34 = vsel %vm810_vm5, %v2254_v32, 0.0 }
 0x583   : > { %v1158_v35 = vsub.f32 %v1150_v16, %v1157_v33  ;;  %929 = vadd.xlane.f32.xlu0 %v928_v34 }
 0x585   : > { %v1159_v36 = vmul.f32 1.442695, %v1158_v35 }
 0x587   : > { %2255 = vpow2.f32 %v1159_v36 }
 0x588   : > { %2257 = vpow2.f32 %v1043_v42 }
 0x590   : > { %935 = vrot.lane.b32.xlu1 %v3272_v46, %s2756_s3 }
 0x591   : > { %v2256_v37 = vpop.eup %2255 }
 0x592   : > { %v1161_v38 = vsel %vm810_vm5, %v2256_v37, 0.0  ;;  %v2258_v43 = vpop.eup %2257 }
 0x593   : > { %1162 = vadd.xlane.f32.xlu0 %v1161_v38  ;;  %v1045_v44 = vsel %vm810_vm5, %v2258_v43, 0.0 }
 0x5a9   : > { %1051 = vrot.lane.b32.xlu0 %v3272_v46, %s2759_s16  ;;  %s1634_s16 = scalar_lea.sflag [#allocation5], %s3207_s1 }
 0x5b4   : > { %1046 = vadd.xlane.f32.xlu1 %v1045_v44 }
 0x5c5   : > { %1167 = vrot.lane.b32.xlu1 %v3272_v46, %s2761_s25 }
 0x60c   : > { %v819_v45 = vpop.xlane.xlu1 %818 }
 0x60d   : > { %2259 = vrcp.f32 %v819_v45  ;;  %v2223_v45 = vld [vmem:[#allocation18 + $0x4] ss:$8 sps:$4 sm:$0xff]  }
 0x610   : > { %v930_v47 = vpop.xlane.xlu0 %929  ;;  %v936_v50 = vpop.permute.xlu1 %935 }
 0x611   : > { %2261 = vrcp.f32 %v930_v47  ;;  %v941_v53 = vsel %vm826_vm3, %v936_v50, 0  ;;  %v2221_v47 = vld [vmem:[#allocation18] ss:$8 sps:$4 sm:$0xff]  }
 0x612   : > { %v2227_v50 = vld [vmem:[#allocation18 + $0x20] ss:$8 sps:$4 sm:$0xff]  }
 0x617   : > { %v2260_v48 = vpop.eup %2259 }
 0x618   : > { %v821_v49 = vmul.f32 %v2260_v48, %v2252_v30  ;;  %v2226_v48 = vld [vmem:[#allocation18 + $0x14] ss:$8 sps:$4 sm:$0xff]  }
 0x61a   : > { %v822_v51 = vpack.c.bf16 %v821_v49, %v821_v49  ;;  %v2229_v49 = vld [vmem:[#allocation18 + $0x24] ss:$8 sps:$4 sm:$0xff]  }
 0x61b   : > { %v2262_v52 = vpop.eup %2261 }
 0x61c   : > { %1972 = vmatmul.mubr.msk.bf16.vlgmr.msra.gmra.mrb[8].mxu1 %vm810_vm5, %v822_v51  ;;  %v932_v54 = vmul.f32 %v2262_v52, %v2254_v32  ;;  %v2230_v51 = vld [vmem:[#allocation18 + $0x30] ss:$8 sps:$4 sm:$0xff]   ;;  %v2232_v52 = vld [vmem:[#allocation18 + $0x34] ss:$8 sps:$4 sm:$0xff]  }
 0x61d   : > { %1982 = vmatpush3.bf16.msra.mxu1 %v941_v53  ;;  %1983 = vmatprep.mubr.msk.bf16.mxu1 %vm2754_vm1, %v2753_v28 }
 0x61e   : > { %1993 = vmatprep.subr.bf16.mxu1 %v2753_v28  ;;  %v933_v55 = vpack.c.bf16 %v932_v54, %v932_v54 }
 0x620   : > { %v1163_v46 = vpop.xlane.xlu0 %1162 }
 0x624   : > { %v1052_v56 = vpop.permute.xlu0 %1051  ;;  %1984 = vmatmul.mubr.msk.bf16.vlgmr.msra.gmra.mrb[12].mxu1 %vm810_vm5, %v933_v55 }
 0x625   : > { %v1057_v57 = vsel %vm826_vm3, %v1052_v56, 0  ;;  %1995 = vmatprep.mubr.msk.bf16.mxu1 %vm2754_vm1, %v2753_v28  ;;  %v1888_v56 = vld [vmem:[#allocation15] ss:$0 sm:$0xff] }
 0x626   : > { %1994 = vmatpush3.bf16.msra.mxu1 %v1057_v57 }
 0x627   : > { %2005 = vmatprep.subr.bf16.mxu1 %v2753_v28 }
 0x641   : > { %v1047_v58 = vpop.xlane.xlu1 %1046 }
 0x642   : > { %2263 = vrcp.f32 %v1047_v58  ;;  %v1889_v58 = vld [vmem:[#allocation17] ss:$0 sm:$0xff] }
 0x643   : > { %2265 = vrcp.f32 %v1163_v46 }
 0x645   : > { %v1168_v61 = vpop.permute.xlu1 %1167 }
 0x646   : > { %v1173_v1 = vsel %vm826_vm3, %v1168_v61, 0 }
 0x64c   : > { %v2264_v59 = vpop.eup %2263 }
 0x64d   : > { %v1049_v60 = vmul.f32 %v2264_v59, %v2258_v43  ;;  %v2266_v63 = vpop.eup %2265 }
 0x64e   : > { %v1165_v2 = vmul.f32 %v2266_v63, %v2256_v37  ;;  %v2234_v63 = vld [vmem:[#allocation21] sm:$0xff]  }
 0x64f   : > { %v1050_v62 = vpack.c.bf16 %v1049_v60, %v1049_v60 }
 0x650   : > { %v1166_v3 = vpack.c.bf16 %v1165_v2, %v1165_v2  ;;  %v2236_v2 = vld [vmem:[#allocation21 + $0x8] sm:$0xff]  }
 0x651   : > { %1996 = vmatmul.mubr.msk.bf16.vlgmr.msra.gmra.mrb[16].mxu1 %vm810_vm5, %v1050_v62  ;;  %v2233_v62 = vld [vmem:[#allocation21 + $0x40] sm:$0xff]  }
 0x652   : > { %2006 = vmatpush3.bf16.msra.mxu1 %v1173_v1  ;;  %2007 = vmatprep.mubr.msk.bf16.mxu1 %vm2754_vm1, %v2753_v28  ;;  %v2235_v1 = vld [vmem:[#allocation21 + $0x48] sm:$0xff]  }
 0x653   : > { %1399 = vmatprep.subr.bf16.mxu1 %v2223_v45 }
 0x659   : > { %2008 = vmatmul.mubr.msk.bf16.vlgmr.msra.gmra.mrb[20].mxu1 %vm810_vm5, %v1166_v3  ;;  %v2237_v3 = vld [vmem:[#allocation21 + $0x50] sm:$0xff]  }
 0x65a   : > { %1431 = vmatprep.mubr.bf16.mxu1 %v2752_v11  ;;  %v2219_v11 = vld [vmem:[#allocation12 + $0x10] sm:$0xff]   ;;  %1400 = vmatpush1.bf16.msra.mxu1 %v2221_v47 }
 0x65b   : > { %2016 = vmatpush3.bf16.msra.mxu0 %v2219_v11  ;;  %1401 = vmatprep.subr.bf16.mxu1 %v2226_v48  ;;  %v2248_v11 = vld [vmem:[#allocation21 + $0x38] sm:$0xff]  }
 0x65c   : > { %2017 = vmatprep.subr.bf16.mxu0 %v2753_v28 }
 0x65f   : > { %2018 = vmatpush3.bf16.msra.mxu0 %v2220_v15  ;;  %v1344_v15 = vld [vmem:[#allocation20] sm:$0x3] }
 0x660   : > { %1941 = vmatprep.subr.bf16.mxu0 %v2233_v62 }
 0x6ef   : > { %v864_v4 = vpop.f32.mrb[8].mxu1 }
 0x6f0   : > { %870 = vst.msk [vmem:[#allocation2] sm:$0xff] %vm763_vm2, %v864_v4  ;;  %v1973_v5 = vpop.f32.mrb[9].mxu1  ;;  %v2238_v4 = vld [vmem:[#allocation21 + $0x10] sm:$0xff]  }
 0x6f1   : > { %v867_v6 = vpop.f32.mrb[10].mxu1  ;;  %v2239_v5 = vld [vmem:[#allocation21 + $0x58] sm:$0xff]  }
 0x6f2   : > { %v1974_v7 = vpop.f32.mrb[11].mxu1  ;;  %v2240_v6 = vld [vmem:[#allocation21 + $0x18] sm:$0xff]  }
 0x6f3   : > { %v2241_v7 = vld [vmem:[#allocation21 + $0x60] sm:$0xff]  }
 0x6f7   : > { %v977_v8 = vpop.f32.mrb[12].mxu1 }
 0x6f8   : > { %984 = vrot.lane.b32.xlu1 %v977_v8, %s2760_s17  ;;  %v1985_v9 = vpop.f32.mrb[13].mxu1  ;;  %v2242_v8 = vld [vmem:[#allocation21 + $0x20] sm:$0xff]   ;;  %s2647_s17 = sshll.u32 %s2763_s19, 4  ;;  %s2648_s17 = int_to_ptr.vmem [resolvable:$false] %s2647_s17 }
 0x6f9   : > { %v980_v10 = vpop.f32.mrb[14].mxu1  ;;  %v2243_v9 = vld [vmem:[#allocation21 + $0x68] sm:$0xff]   ;;  %s2649_s25 = scalar_lea.vmem %s2648_s17, 256  ;;  %p2650_p12 = scmp.lt.s32.totalorder %s3355_s29, %s2648_s17 }
 0x6fa   : > { %v1986_v12 = vpop.f32.mrb[15].mxu1  ;;  %v2244_v10 = vld [vmem:[#allocation21 + $0x28] sm:$0xff]   ;;  %p2651_p8 = scmp.lt.s32.totalorder %s2649_s25, %s2643_s13 }
 0x6fb   : > { %v2245_v12 = vld [vmem:[#allocation21 + $0x70] sm:$0xff]  }
 0x6fc   : > { %p2652_p5 = por %p2651_p8, %p2650_p12 }
 0x6fe   : > { %p2653_p7 = pnand %p2652_p5, %p2646_p11 }
 0x724   : > { %v1093_v16 = vpop.f32.mrb[16].mxu1 }
 0x725   : > { %1100 = vrot.lane.b32.xlu0 %v1093_v16, %s2758_s15  ;;  %v1997_v17 = vpop.f32.mrb[17].mxu1  ;;  %v1349_v16 = vrot.slane %v1344_v15, %v660_v29 }
 0x726   : > { %v1096_v18 = vpop.f32.mrb[18].mxu1  ;;  %v1353_v17 = vrot.slane %v1344_v15, %v664_v40 }
 0x727   : > { %v1998_v19 = vpop.f32.mrb[19].mxu1 }
 0x72c   : > { %v1209_v20 = vpop.f32.mrb[20].mxu1 }
 0x72d   : > { %1216 = vrot.lane.b32.xlu1 %v1209_v20, %s2757_s0  ;;  %v2009_v21 = vpop.f32.mrb[21].mxu1  ;;  %s3463_s0 = sld [smem:[#allocation39_spill]] }
 0x72e   : > { %v1212_v22 = vpop.f32.mrb[22].mxu1 }
 0x72f   : > { %v2010_v23 = vpop.f32.mrb[23].mxu1 }
 0x733   : > { %s3353_s15 = scalar_lea.hbm %s3463_s0, %s1917_s14 }
 0x76a   : > { %v985_v24 = vpop.permute.xlu1 %984 }
 0x76b   : > { %988 = vst.msk [vmem:[#allocation2] sm:$0xff] %vm987_vm6, %v985_v24 }
 0x797   : > { %v1101_v25 = vpop.permute.xlu0 %1100 }
 0x798   : > { %1104 = vst.msk [vmem:[#allocation2] sm:$0xff] %vm1103_vm7, %v1101_v25 }
 0x79f   : > { %v1217_v28 = vpop.permute.xlu1 %1216 }
 0x7a0   : > { %1220 = vst.msk [vmem:[#allocation2] sm:$0xff] %vm1219_vm8, %v1217_v28 }
 0x7a7   : > { %v1221_v26 = vld [vmem:[#allocation2] sm:$0xff] }
 0x7a8   : > { %v1222_v30 = vpack.c.bf16 %v1221_v26, %v1221_v26 }
 0x7aa   : > { %2020 = vmatmul.mubr.msk.bf16.vlgmr.msra.gmra.mrb[12].mxu0 %vm618_vm0, %v1222_v30 }
 0x7ab   : > { %1942 = vmatpush3.bf16.msra.mxu0 %v2234_v63 }
 0x7ac   : > { %1943 = vmatprep.subr.bf16.mxu0 %v2235_v1 }
 0x7af   : > { %1944 = vmatpush3.bf16.msra.mxu0 %v2236_v2 }
 0x7b0   : > { %1945 = vmatprep.subr.bf16.mxu0 %v2237_v3 }
 0x7b3   : > { %1946 = vmatpush3.bf16.msra.mxu0 %v2238_v4 }
 0x7b4   : > { %1947 = vmatprep.subr.bf16.mxu0 %v2239_v5 }
 0x7b7   : > { %1948 = vmatpush3.bf16.msra.mxu0 %v2240_v6 }
 0x7b8   : > { %1949 = vmatprep.subr.bf16.mxu0 %v2241_v7 }
 0x7bb   : > { %1950 = vmatpush3.bf16.msra.mxu0 %v2242_v8 }
 0x7bc   : > { %1951 = vmatprep.subr.bf16.mxu0 %v2243_v9 }
 0x7bf   : > { %1952 = vmatpush3.bf16.msra.mxu0 %v2244_v10 }
 0x7c0   : > { %1953 = vmatprep.subr.bf16.mxu0 %v2245_v12 }
 0x7c3   : > { %1954 = vmatpush3.bf16.msra.mxu0 %v2246_v13 }
 0x7c4   : > { %1955 = vmatprep.subr.bf16.mxu0 %v2247_v14 }
 0x7c7   : > { %1956 = vmatpush3.bf16.msra.mxu0 %v2248_v11 }
 0x87d   : > { %v1299_v32 = vpop.f32.mrb[12].mxu0 }
 0x87e   : > { %v1300_v33 = vadd.f32 %v1882_v31, %v1299_v32  ;;  %v2021_v34 = vpop.f32.mrb[13].mxu0 }
 0x87f   : > { %v1302_v35 = vpop.f32.mrb[14].mxu0 }
 0x880   : > { %v3335_v36 = vadd.f32 %v1300_v33, %v3241_v0  ;;  %v2022_v37 = vpop.f32.mrb[15].mxu0  ;;  %v2224_v0 = vld [vmem:[#allocation18 + $0x10] ss:$8 sps:$4 sm:$0xff]  }
 0x881   : > { %1402 = vmatpush1.bf16.msra.mxu1 %v2224_v0 }
 0x882   : > { %v1308_v38 = vsel %vm618_vm0, %v3335_v36, 0.0  ;;  %1403 = vmatprep.subr.bf16.mxu1 %v2229_v49 }
 0x883   : > { %1309 = vadd.xlane.f32.xlu0 %v1308_v38 }
 0x885   : > { %1404 = vmatpush1.bf16.msra.mxu1 %v2227_v50 }
 0x886   : > { %1405 = vmatprep.subr.bf16.mxu1 %v2232_v52 }
 0x889   : > { %1406 = vmatpush1.bf16.msra.mxu1 %v2230_v51 }
 0x910   : > { %v1310_v39 = vpop.xlane.xlu0 %1309 }
 0x911   : > { %v1311_v41 = vmul.f32 0.015625, %v1310_v39  ;;  %v1899_v39 = vld [vmem:[#allocation23] ss:$0 sm:$0xff] }
 0x913   : > { %v1312_v42 = vsub.f32 %v3335_v36, %v1311_v41 }
 0x915   : > { %v1313_v43 = vmul.f32 %v1312_v42, %v1312_v42 }
 0x917   : > { %v1314_v44 = vsel %vm618_vm0, %v1313_v43, 0.0 }
 0x918   : > { %1315 = vadd.xlane.f32.xlu1 %v1314_v44 }
 0x9a5   : > { %v1316_v53 = vpop.xlane.xlu1 %1315 }
 0x9a6   : > { %v1317_v54 = vmul.f32 0.015625, %v1316_v53 }
 0x9a8   : > { %v1318_v46 = vadd.f32 1e-05, %v1317_v54 }
 0x9aa   : > { %2267 = vrsqrt.f32 %v1318_v46 }
 0x9b4   : > { %v2268_v55 = vpop.eup %2267 }
 0x9b5   : > { %v1320_v57 = vmul.f32 %v2268_v55, %v1312_v42 }
 0x9b7   : > { %v1327_v59 = vmul.f32 %v1888_v56, %v1320_v57 }
 0x9b9   : > { %v1334_v60 = vadd.f32 %v1889_v58, %v1327_v59 }
 0x9bb   : > { %v1335_v61 = vpack.c.bf16 %v1334_v60, %v1334_v60 }
 0x9bd   : > { %1898 = vmatmul.mubr.msk.bf16.vlgmr.msra.gmra.mrb[24].mxu1 %vm618_vm0, %v1335_v61 }
 0xa90   : > { %v1433_v18 = vpop.f32.mrb[24].mxu1 }
 0xa91   : > { %v1434_v19 = vadd.f32 %v1433_v18, %v1349_v16  ;;  %v1435_v20 = vpop.f32.mrb[25].mxu1 }
 0xa92   : > { %v1436_v21 = vadd.f32 %v1435_v20, %v1353_v17  ;;  %v1437_v22 = vpop.f32.mrb[26].mxu1 }
 0xa93   : > { %v1440_v23 = vmul.f32 -1.702, %v1434_v19  ;;  %v1438_v24 = vpop.f32.mrb[27].mxu1 }
 0xa94   : > { %v1441_v25 = vmul.f32 -1.702, %v1436_v21 }
 0xa95   : > { %v1442_v28 = vmul.f32 1.442695, %v1440_v23 }
 0xa96   : > { %v1444_v26 = vmul.f32 1.442695, %v1441_v25 }
 0xa97   : > { %2269 = vpow2.f32 %v1442_v28 }
 0xa98   : > { %2271 = vpow2.f32 %v1444_v26 }
 0xaa1   : > { %v2270_v30 = vpop.eup %2269 }
 0xaa2   : > { %v2272_v31 = vpop.eup %2271  ;;  %v1446_v32 = vadd.f32 1.0, %v2270_v30 }
 0xaa3   : > { %v1447_v33 = vadd.f32 1.0, %v2272_v31 }
 0xaa4   : > { %2273 = vrcp.f32 %v1446_v32 }
 0xaa5   : > { %2275 = vrcp.f32 %v1447_v33 }
 0xaae   : > { %v2274_v27 = vpop.eup %2273 }
 0xaaf   : > { %v2276_v29 = vpop.eup %2275  ;;  %v1452_v40 = vmul.f32 %v2274_v27, %v1434_v19 }
 0xab0   : > { %v1453_v34 = vmul.f32 %v2276_v29, %v1436_v21 }
 0xab1   : > { %v1454_v37 = vpack.c.bf16 %v1452_v40, %v1452_v40 }
 0xab2   : > { %v1455_v35 = vpack.c.bf16 %v1453_v34, %v1453_v34 }
 0xab4   : > { %1623 = vmatprep.mubr.bf16.mxu0 %v1455_v35 }
 0xab5   : > { %1624 = vmatmul.mubr.bf16.vlgmr.msra.gmra.mrb[16].mxu0 %v1454_v37 }
 0xb88   : > { %v1957_v38 = vpop.f32.mrb[16].mxu0 }
 0xb89   : > { %v1958_v41 = vpop.f32.mrb[17].mxu0 }
 0xb8a   : > { %v1959_v42 = vadd.f32 %v1958_v41, %v1957_v38  ;;  %v1960_v43 = vpop.f32.mrb[18].mxu0 }
 0xb8b   : > { %v1961_v44 = vpop.f32.mrb[19].mxu0 }
 0xb8c   : > { %v1626_v45 = vadd.f32 %v1959_v42, %v1899_v39 }
 0xb8e   : > { %v1631_v47 = vadd.f32 %v1626_v45, %v3335_v36 }
 0xb90   : > { %1632 = vst.msk [vmem:[%s613_s23] sm:$0xff] %vm618_vm0, %v1631_v47 }
 0xb91   : > { %2656 = shalt.err (!%p2653_p7)
}
 0xb92   : > { %s2657_s1 = scalar_lea.hbm %s3353_s15, 128  ;;  %s2661_s20 = scalar_lea.hbm %s3463_s0, 256 }
 0xb93   : > { %p2658_p6 = scmp.ne.s32.totalorder %s3353_s15, %s2657_s1  ;;  %p2662_p13 = scmp.lt.u32.totalorder %s3353_s15, %s3463_s0 }
 0xb94   : > { %p2663_p1 = scmp.lt.u32.totalorder %s2661_s20, %s2657_s1  ;;  %p2665_p2 = scmp.lt.u32.totalorder %s2657_s1, %s3353_s15 }
 0xb95   : > { %p2659_p9 = pnand %p2658_p6, %p3464_p0 }
 0xb96   : > { %p2664_p3 = por %p2663_p1, %p2662_p13 }
 0xb97   : > { %p2660_p4 = pneg %p2659_p9 }
 0xb98   : > { %p2666_p10 = por %p2665_p2, %p2664_p3 }
 0xb9a   : > { %p2667_p11 = pnand %p2666_p10, %p2660_p4 }
 0xb9c   : > { %2670 = shalt.err (!%p2667_p11)
}
 0xb9d   : > { %2073 = dma.vmem_to_hbm [thread:$0]  (%p3464_p0), %s3355_s29, 128, %s3353_s15, %s1634_s16  }
 0xb9e PF: > { %s3465_s13 = sld [smem:[#allocation33_spill]]  ;;  %p3466_p12 = scmp.ne.s32.totalorder %s3445_s30, 0 }
 0xb9f   : > { %p3467_p8 = scmp.ge.s32.totalorder %s2733_s28, 2 }
 0xba1   : > { %p2117_p5 = pnand %p3467_p8, %p3466_p12 }
 0xba4   : > { %s1659_s17 = sand.u32 1, %s3465_s13  }
 0xba5   : > { %s1660_s25 = scalar_lea.sflag [#allocation5], %s1659_s17 }
 0xba6   : > { %2716 = dma.done.wait (!%p2117_p5), %s1660_s25, 128  }
 0xba7   : > { %2718 = vsyncadd (!%p2117_p5), %s1660_s25, 4294967168  ;;  %p32_p7 = scmp.ge.s32.totalorder %s3131_s18, 4   ;;  %s3468_s25 = smov %s2725_s26 }
 0xba8   : > { %s3469_s26 = smov %s2729_s27  ;;  %s3470_s27 = smov %s3142_s24 }
 0xba9   : > { %s3471_s28 = smov %s3131_s18  ;;  %34 = sbr.rel (!%p32_p7) target bundleno = 16 (0x10), region = 165 }
 0xbb0   :  { %1665 = vsyncpa [#allocation4], 1 }
 0xbb1   :  { %1667 = vsyncpa [#allocation4 + $0x1], 1 }
 0xbb2   :  { %1668 = vsyncpa [#allocation7], 1 }
 0xbb3   :  { %1669 = vsyncpa [#allocation10], 1 }
 0xbb4   :  { %1670 = vsyncpa [#allocation13], 1 }
 0xbb5   :  { %1671 = vsyncpa [#allocation16], 1 }
 0xbb6   :  { %1672 = vsyncpa [#allocation19], 1 }
 0xbb7   :  { %1673 = vsyncpa [#allocation22], 1 }
 0xbb8   :  { %1674 = vsyncpa [#allocation5], 1 }
 0xbb9   :  { %1676 = vsyncpa [#allocation5 + $0x1], 1 }

// kernel: custom_clip_forward.14
= control target key start
LH: loop header
LB: loop body
LE: loop exit
PB: predicated region body
PF: predicated region fallthrough
CT: control target
= control target key end

     0   :  { %s3600_s0 = inlined_call_operand.hbm [shape: f32[6,16,64], index: 0, kind: input, shape index: {}]   ;;  %s3601_s1 = inlined_call_operand.hbm [shape: f32[1,64], index: 1, kind: input, shape index: {}]   ;;  %s3602_s2 = inlined_call_operand.hbm [shape: f32[1,64], index: 2, kind: input, shape index: {}]   ;;  %s3603_s3 = inlined_call_operand.hbm [shape: bf16[64,192], index: 3, kind: input, shape index: {}]   ;;  %s3604_s4 = inlined_call_operand.hbm [shape: f32[1,192], index: 4, kind: input, shape index: {}]   ;;  %s3605_s5 = inlined_call_operand.hbm [shape: bf16[64,64], index: 5, kind: input, shape index: {}]   ;;  %s3606_s6 = inlined_call_operand.hbm [shape: f32[1,64], index: 6, kind: input, shape index: {}]   ;;  %s3607_s7 = inlined_call_operand.hbm [shape: f32[1,64], index: 7, kind: input, shape index: {}]   ;;  %s3608_s8 = inlined_call_operand.hbm [shape: f32[1,64], index: 8, kind: input, shape index: {}]   ;;  %s3609_s9 = inlined_call_operand.hbm [shape: bf16[64,256], index: 9, kind: input, shape index: {}]   ;;  %s3610_s10 = inlined_call_operand.hbm [shape: f32[1,256], index: 10, kind: input, shape index: {}]   ;;  %s3611_s11 = inlined_call_operand.hbm [shape: bf16[256,64], index: 11, kind: input, shape index: {}]   ;;  %s3612_s12 = inlined_call_operand.hbm [shape: f32[1,64], index: 12, kind: input, shape index: {}]   ;;  %s3613_s13 = inlined_call_operand.hbm [shape: f32[6,16,64], index: 13, kind: output, shape index: {}]  }
   0x1   :  { %3628 = sst [smem:[#allocation36_spill]] %s3600_s0 }
   0x2   :  { %3629 = sst [smem:[#allocation37_spill]] %s3601_s1 }
   0x3   :  { %3630 = sst [smem:[#allocation38_spill]] %s3602_s2 }
   0x4   :  { %3631 = sst [smem:[#allocation39_spill]] %s3603_s3 }
   0x5   :  { %3632 = sst [smem:[#allocation40_spill]] %s3613_s13 }
   0x6   :  { %18 = vsyncpa [#allocation4], 0 }
   0x7   :  { %20 = vsyncpa [#allocation4 + $0x1], 0 }
   0x8   :  { %21 = vsyncpa [#allocation7], 0 }
   0x9   :  { %22 = vsyncpa [#allocation10], 0 }
   0xa   :  { %23 = vsyncpa [#allocation13], 0 }
   0xb   :  { %24 = vsyncpa [#allocation16], 0 }
   0xc   :  { %25 = vsyncpa [#allocation19], 0 }
   0xd   :  { %26 = vsyncpa [#allocation22], 0 }
   0xe   :  { %27 = vsyncpa [#allocation5], 0 }
   0xf   :  { %29 = vsyncpa [#allocation5 + $0x1], 0  ;;  %s2997_s25 = smov 0   ;;  %s2999_s26 = smov 0  }
  0x10   :  { %s3001_s27 = smov 0   ;;  %s3003_s28 = smov 0  }
  0x11 LB: > { %3633 = sst [smem:[#allocation33_spill]] %s2882_s25  ;;  %s2896_s29 = smov [#allocation6]   ;;  %s2894_s28 = sphi %s3003_s28, %s3676_s28   ;;  %s2890_s27 = sphi %s3001_s27, %s3675_s27   ;;  %s2886_s26 = sphi %s2999_s26, %s3674_s26   ;;  %s2882_s25 = sphi %s2997_s25, %s3673_s25  }
  0x12   : > { %s357_s30 = sshll.u32 %s2896_s29, 4  ;;  %s3018_s14 = sadd.s32 4294967295, %s2894_s28   ;;  %s358_s30 = int_to_ptr.vmem [resolvable:$true] %s357_s30 }
  0x13   : > { %3634 = sst [smem:[#allocation34_spill]] %s3018_s14  ;;  %p1959_p0 = scmp.ge.s32.totalorder %s2894_s28, 1 }
  0x14   : > { %p3615_p1 = scmp.eq.s32.totalorder %s3018_s14, 0  ;;  %p344_p2 = scmp.lt.s32.totalorder %s2894_s28, 7 }
  0x15   : > { %s2897_s16 = smov [#allocation9]   ;;  %s2898_s19 = smov [#allocation12]  }
  0x16   : > { %p3023_p3 = pnand %p1959_p0, %p344_p2  ;;  %s378_s17 = sshll.u32 %s2897_s16, 4  ;;  %s3029_s17 = int_to_ptr.vmem [resolvable:$true] %s378_s17 }
  0x17   : > { %s402_s20 = sshll.u32 %s2898_s19, 4  ;;  %s3638_s1 = sld [smem:[#allocation37_spill]]  ;;  %s3037_s20 = int_to_ptr.vmem [resolvable:$true] %s402_s20 }
  0x18   : > { %s3635_s15 = scalar_select %p3023_p3, 1, 0 }
  0x19   : > { %p2206_p4 = pneg %p3023_p3 }
  0x1a   : > { %3636 = sst [smem:[#allocation35_spill]] %s3635_s15 }
  0x1b   : > { %p3033_p5 = pnand %p2206_p4, %p3615_p1 }
  0x1d   : > { %s2438_s23 = scalar_lea.hbm %s3638_s1, 16  ;;  %p3047_p7 = pneg %p3033_p5 }
  0x1e   : > { %p2439_p6 = scmp.ne.s32.totalorder %s3638_s1, %s2438_s23  ;;  %p2445_p10 = scmp.lt.u32.totalorder %s2438_s23, %s3638_s1 }
  0x20   : > { %p2441_p8 = pnand %p3047_p7, %p2439_p6 }
  0x22   : > { %p2442_p9 = pneg %p2441_p8 }
  0x24   : > { %p2447_p11 = pnand %p2445_p10, %p2442_p9 }
  0x26   : > { %2450 = shalt.err (!%p2447_p11)
}
  0x27   : > { %s2451_s21 = scalar_lea.vmem %s358_s30, 16  ;;  %s2458_s22 = scalar_lea.vmem %s358_s30, 32 }
  0x28   : > { %p2452_p12 = scmp.ne.s32.totalorder %s358_s30, %s2451_s21  ;;  %p2459_p2 = scmp.lt.s32.totalorder %s358_s30, %s358_s30 }
  0x29   : > { %p2460_p4 = scmp.lt.s32.totalorder %s2458_s22, %s2451_s21 }
  0x2a   : > { %p2454_p13 = pnand %p2452_p12, %p3047_p7 }
  0x2b   : > { %p2461_p1 = por %p2460_p4, %p2459_p2 }
  0x2c   : > { %p2455_p0 = pneg %p2454_p13 }
  0x2e   : > { %p2462_p3 = pnand %p2461_p1, %p2455_p0 }
  0x30   : > { %2465 = shalt.err (!%p2462_p3)
}
  0x31   : > { %2209 = dma.hbm_to_vmem [thread:$0]  (!%p3033_p5), %s3638_s1, 16, %s358_s30, [#allocation7]  }
  0x32   : > { %s3640_s3 = sld [smem:[#allocation39_spill]] }
  0x38   : > { %s2466_s19 = scalar_lea.hbm %s3640_s3, 1024 }
  0x39   : > { %p2467_p6 = scmp.ne.s32.totalorder %s3640_s3, %s2466_s19  ;;  %p2473_p1 = scmp.lt.u32.totalorder %s2466_s19, %s3640_s3 }
  0x3b   : > { %p2469_p8 = pnand %p2467_p6, %p3047_p7 }
  0x3d   : > { %p2470_p9 = pneg %p2469_p8 }
  0x3f   : > { %p2475_p3 = pnand %p2473_p1, %p2470_p9 }
  0x41   : > { %2478 = shalt.err (!%p2475_p3)
}
  0x42   : > { %s2479_s30 = scalar_lea.vmem %s3029_s17, 1024  ;;  %p2487_p13 = scmp.lt.s32.totalorder %s3029_s17, %s3029_s17 }
  0x43   : > { %p2480_p10 = scmp.ne.s32.totalorder %s3029_s17, %s2479_s30  ;;  %p2488_p0 = scmp.lt.s32.totalorder %s2479_s30, %s2479_s30 }
  0x45   : > { %p2482_p11 = pnand %p2480_p10, %p3047_p7  ;;  %p2489_p2 = por %p2488_p0, %p2487_p13 }
  0x47   : > { %p2483_p12 = pneg %p2482_p11 }
  0x49   : > { %p2490_p4 = pnand %p2489_p2, %p2483_p12 }
  0x4b   : > { %2493 = shalt.err (!%p2490_p4)
}
  0x4c   : > { %s3619_s0 = smov 128   ;;  %s3621_s15 = smov 8  }
  0x4d   : > { %2215 = dma.hbm_to_vmem [thread:$0]  (!%p3033_p5), %s3640_s3, 1024, %s3029_s17, [#allocation10], %s3619_s0, %s3619_s0, %s3621_s15  }
  0x4e   : > { %s2494_s19 = scalar_lea.hbm %s3605_s5, 512 }
  0x4f   : > { %p2495_p6 = scmp.ne.s32.totalorder %s3605_s5, %s2494_s19  ;;  %p2501_p1 = scmp.lt.u32.totalorder %s2494_s19, %s3605_s5 }
  0x51   : > { %p2497_p8 = pnand %p2495_p6, %p3047_p7 }
  0x53   : > { %p2498_p9 = pneg %p2497_p8 }
  0x55   : > { %p2503_p3 = pnand %p2501_p1, %p2498_p9 }
  0x57   : > { %2506 = shalt.err (!%p2503_p3)
}
  0x58   : > { %s2507_s17 = scalar_lea.vmem %s3037_s20, 512  ;;  %p2515_p13 = scmp.lt.s32.totalorder %s3037_s20, %s3037_s20 }
  0x59   : > { %p2508_p10 = scmp.ne.s32.totalorder %s3037_s20, %s2507_s17  ;;  %p2516_p0 = scmp.lt.s32.totalorder %s2507_s17, %s2507_s17 }
  0x5b   : > { %p2510_p11 = pnand %p2508_p10, %p3047_p7  ;;  %p2517_p2 = por %p2516_p0, %p2515_p13 }
  0x5d   : > { %p2511_p12 = pneg %p2510_p11 }
  0x5f   : > { %p2518_p4 = pnand %p2517_p2, %p2511_p12 }
  0x61   : > { %2521 = shalt.err (!%p2518_p4)
}
  0x62   : > { %s3626_s24 = smov 64   ;;  %s2902_s1 = smov 4  }
  0x63   : > { %2221 = dma.hbm_to_vmem [thread:$0]  (!%p3033_p5), %s3605_s5, 512, %s3037_s20, [#allocation13], %s3626_s24, %s3626_s24, %s2902_s1  }
  0x64   : > { %s2903_s23 = smov [#allocation15]   ;;  %s2904_s21 = smov [#allocation18]  }
  0x65   : > { %s427_s19 = sshll.u32 %s2903_s23, 4  ;;  %s448_s22 = sshll.u32 %s2904_s21, 4  ;;  %s428_s19 = int_to_ptr.vmem [resolvable:$true] %s427_s19  ;;  %s449_s22 = int_to_ptr.vmem [resolvable:$true] %s448_s22 }
  0x66   : > { %s2522_s0 = scalar_lea.hbm %s3607_s7, 16 }
  0x67   : > { %p2523_p6 = scmp.ne.s32.totalorder %s3607_s7, %s2522_s0  ;;  %p2529_p1 = scmp.lt.u32.totalorder %s2522_s0, %s3607_s7 }
  0x69   : > { %p2525_p8 = pnand %p2523_p6, %p3047_p7 }
  0x6b   : > { %p2526_p9 = pneg %p2525_p8 }
  0x6d   : > { %p2531_p3 = pnand %p2529_p1, %p2526_p9 }
  0x6f   : > { %2534 = shalt.err (!%p2531_p3)
}
  0x70   : > { %s2535_s20 = scalar_lea.vmem %s428_s19, 16  ;;  %s2542_s29 = scalar_lea.vmem %s428_s19, 32 }
  0x71   : > { %p2536_p10 = scmp.ne.s32.totalorder %s428_s19, %s2535_s20  ;;  %p2543_p13 = scmp.lt.s32.totalorder %s428_s19, %s428_s19 }
  0x72   : > { %p2544_p0 = scmp.lt.s32.totalorder %s2542_s29, %s2535_s20 }
  0x73   : > { %p2538_p11 = pnand %p2536_p10, %p3047_p7 }
  0x74   : > { %p2545_p2 = por %p2544_p0, %p2543_p13 }
  0x75   : > { %p2539_p12 = pneg %p2538_p11 }
  0x77   : > { %p2546_p4 = pnand %p2545_p2, %p2539_p12 }
  0x79   : > { %2549 = shalt.err (!%p2546_p4)
}
  0x7a   : > { %2227 = dma.hbm_to_vmem [thread:$0]  (!%p3033_p5), %s3607_s7, 16, %s428_s19, [#allocation16]  }
  0x7b   : > { %s2550_s0 = scalar_lea.hbm %s3609_s9, 1024 }
  0x7c   : > { %p2551_p6 = scmp.ne.s32.totalorder %s3609_s9, %s2550_s0  ;;  %p2557_p1 = scmp.lt.u32.totalorder %s2550_s0, %s3609_s9 }
  0x7e   : > { %p2553_p8 = pnand %p2551_p6, %p3047_p7 }
  0x80   : > { %p2554_p9 = pneg %p2553_p8 }
  0x82   : > { %p2559_p3 = pnand %p2557_p1, %p2554_p9 }
  0x84   : > { %2562 = shalt.err (!%p2559_p3)
}
  0x85   : > { %s2563_s17 = scalar_lea.vmem %s449_s22, 1024  ;;  %p2571_p13 = scmp.lt.s32.totalorder %s449_s22, %s449_s22 }
  0x86   : > { %p2564_p10 = scmp.ne.s32.totalorder %s449_s22, %s2563_s17  ;;  %p2572_p0 = scmp.lt.s32.totalorder %s2563_s17, %s2563_s17 }
  0x88   : > { %p2566_p11 = pnand %p2564_p10, %p3047_p7  ;;  %p2573_p2 = por %p2572_p0, %p2571_p13 }
  0x8a   : > { %p2567_p12 = pneg %p2566_p11 }
  0x8c   : > { %p2574_p4 = pnand %p2573_p2, %p2567_p12 }
  0x8e   : > { %2577 = shalt.err (!%p2574_p4)
}
  0x8f   : > { %s3641_s19 = smov 8   ;;  %s3642_s20 = smov 128  }
  0x90   : > { %2233 = dma.hbm_to_vmem [thread:$0]  (!%p3033_p5), %s3609_s9, 1024, %s449_s22, [#allocation19], %s3642_s20, %s3642_s20, %s3641_s19  }
  0x91   : > { %s2905_s15 = smov [#allocation21]   ;;  %s2906_s14 = smov [#allocation8]  }
  0x92   : > { %s472_s25 = sshll.u32 %s2905_s15, 4  ;;  %s368_s0 = sshll.u32 %s2906_s14, 4  ;;  %s473_s25 = int_to_ptr.vmem [resolvable:$true] %s472_s25  ;;  %s369_s0 = int_to_ptr.vmem [resolvable:$true] %s368_s0 }
  0x93   : > { %s2578_s21 = scalar_lea.hbm %s3611_s11, 2048 }
  0x94   : > { %p2579_p6 = scmp.ne.s32.totalorder %s3611_s11, %s2578_s21  ;;  %p2585_p1 = scmp.lt.u32.totalorder %s2578_s21, %s3611_s11 }
  0x96   : > { %p2581_p8 = pnand %p2579_p6, %p3047_p7 }
  0x98   : > { %p2582_p9 = pneg %p2581_p8 }
  0x9a   : > { %p2587_p3 = pnand %p2585_p1, %p2582_p9 }
  0x9c   : > { %2590 = shalt.err (!%p2587_p3)
}
  0x9d   : > { %s2591_s22 = scalar_lea.vmem %s473_s25, 2048  ;;  %p2599_p13 = scmp.lt.s32.totalorder %s473_s25, %s473_s25 }
  0x9e   : > { %p2592_p10 = scmp.ne.s32.totalorder %s473_s25, %s2591_s22  ;;  %p2600_p0 = scmp.lt.s32.totalorder %s2591_s22, %s2591_s22 }
  0xa0   : > { %p2594_p11 = pnand %p2592_p10, %p3047_p7  ;;  %p2601_p2 = por %p2600_p0, %p2599_p13 }
  0xa2   : > { %p2595_p12 = pneg %p2594_p11 }
  0xa4   : > { %p2602_p4 = pnand %p2601_p2, %p2595_p12 }
  0xa6   : > { %2605 = shalt.err (!%p2602_p4)
}
  0xa7   : > { %s3643_s3 = smov 64   ;;  %s3644_s2 = sld [smem:[#allocation38_spill]] }
  0xa8   : > { %2239 = dma.hbm_to_vmem [thread:$0]  (!%p3033_p5), %s3611_s11, 2048, %s473_s25, [#allocation22], %s3643_s3, %s3643_s3, %s2902_s1  }
  0xad   : > { %s2606_s23 = scalar_lea.hbm %s3644_s2, 16 }
  0xae   : > { %p2607_p6 = scmp.ne.s32.totalorder %s3644_s2, %s2606_s23  ;;  %p2613_p1 = scmp.lt.u32.totalorder %s2606_s23, %s3644_s2 }
  0xb0   : > { %p2609_p8 = pnand %p2607_p6, %p3047_p7 }
  0xb2   : > { %p2610_p9 = pneg %p2609_p8 }
  0xb4   : > { %p2615_p3 = pnand %p2613_p1, %p2610_p9 }
  0xb6   : > { %2618 = shalt.err (!%p2615_p3)
}
  0xb7   : > { %s2619_s22 = scalar_lea.vmem %s369_s0, 16  ;;  %s2626_s1 = scalar_lea.vmem %s369_s0, 32 }
  0xb8   : > { %p2620_p10 = scmp.ne.s32.totalorder %s369_s0, %s2619_s22  ;;  %p2627_p13 = scmp.lt.s32.totalorder %s369_s0, %s369_s0 }
  0xb9   : > { %p2628_p0 = scmp.lt.s32.totalorder %s2626_s1, %s2619_s22 }
  0xba   : > { %p2622_p11 = pnand %p2620_p10, %p3047_p7 }
  0xbb   : > { %p2629_p2 = por %p2628_p0, %p2627_p13 }
  0xbc   : > { %p2623_p12 = pneg %p2622_p11 }
  0xbe   : > { %p2630_p4 = pnand %p2629_p2, %p2623_p12 }
  0xc0   : > { %2633 = shalt.err (!%p2630_p4)
}
  0xc1   : > { %2212 = dma.hbm_to_vmem [thread:$0]  (!%p3033_p5), %s3644_s2, 16, %s369_s0, [#allocation7]  }
  0xc2   : > { %s2907_s24 = smov [#allocation11]   ;;  %s2908_s14 = smov [#allocation14]  }
  0xc3   : > { %s392_s15 = sshll.u32 %s2907_s24, 4  ;;  %s416_s13 = sshll.u32 %s2908_s14, 4  ;;  %s393_s15 = int_to_ptr.vmem [resolvable:$true] %s392_s15  ;;  %s417_s13 = int_to_ptr.vmem [resolvable:$true] %s416_s13 }
  0xc4   : > { %s2634_s30 = scalar_lea.hbm %s3604_s4, 32 }
  0xc5   : > { %p2635_p6 = scmp.ne.s32.totalorder %s3604_s4, %s2634_s30  ;;  %p2641_p1 = scmp.lt.u32.totalorder %s2634_s30, %s3604_s4 }
  0xc7   : > { %p2637_p8 = pnand %p2635_p6, %p3047_p7 }
  0xc9   : > { %p2638_p9 = pneg %p2637_p8 }
  0xcb   : > { %p2643_p3 = pnand %p2641_p1, %p2638_p9 }
  0xcd   : > { %2646 = shalt.err (!%p2643_p3)
}
  0xce   : > { %s2647_s0 = scalar_lea.vmem %s393_s15, 32  ;;  %p2655_p13 = scmp.lt.s32.totalorder %s393_s15, %s393_s15 }
  0xcf   : > { %p2648_p10 = scmp.ne.s32.totalorder %s393_s15, %s2647_s0  ;;  %p2656_p0 = scmp.lt.s32.totalorder %s2647_s0, %s2647_s0 }
  0xd1   : > { %p2650_p11 = pnand %p2648_p10, %p3047_p7  ;;  %p2657_p2 = por %p2656_p0, %p2655_p13 }
  0xd3   : > { %p2651_p12 = pneg %p2650_p11 }
  0xd5   : > { %p2658_p4 = pnand %p2657_p2, %p2651_p12 }
  0xd7   : > { %2661 = shalt.err (!%p2658_p4)
}
  0xd8   : > { %2218 = dma.hbm_to_vmem [thread:$0]  (!%p3033_p5), %s3604_s4, 32, %s393_s15, [#allocation10]  }
  0xd9   : > { %s2662_s23 = scalar_lea.hbm %s3606_s6, 16 }
  0xda   : > { %p2663_p6 = scmp.ne.s32.totalorder %s3606_s6, %s2662_s23  ;;  %p2669_p1 = scmp.lt.u32.totalorder %s2662_s23, %s3606_s6 }
  0xdc   : > { %p2665_p8 = pnand %p2663_p6, %p3047_p7 }
  0xde   : > { %p2666_p9 = pneg %p2665_p8 }
  0xe0   : > { %p2671_p3 = pnand %p2669_p1, %p2666_p9 }
  0xe2   : > { %2674 = shalt.err (!%p2671_p3)
}
  0xe3   : > { %s2675_s22 = scalar_lea.vmem %s417_s13, 16  ;;  %s2682_s15 = scalar_lea.vmem %s417_s13, 32 }
  0xe4   : > { %p2676_p10 = scmp.ne.s32.totalorder %s417_s13, %s2675_s22  ;;  %p2683_p13 = scmp.lt.s32.totalorder %s417_s13, %s417_s13 }
  0xe5   : > { %p2684_p0 = scmp.lt.s32.totalorder %s2682_s15, %s2675_s22 }
  0xe6   : > { %p2678_p11 = pnand %p2676_p10, %p3047_p7 }
  0xe7   : > { %p2685_p2 = por %p2684_p0, %p2683_p13 }
  0xe8   : > { %p2679_p12 = pneg %p2678_p11 }
  0xea   : > { %p2686_p4 = pnand %p2685_p2, %p2679_p12 }
  0xec   : > { %2689 = shalt.err (!%p2686_p4)
}
  0xed   : > { %2224 = dma.hbm_to_vmem [thread:$0]  (!%p3033_p5), %s3606_s6, 16, %s417_s13, [#allocation13]  }
  0xee   : > { %s2909_s25 = smov [#allocation17]   ;;  %s2910_s24 = smov [#allocation20]  }
  0xef   : > { %s438_s3 = sshll.u32 %s2909_s25, 4  ;;  %s462_s14 = sshll.u32 %s2910_s24, 4  ;;  %s439_s3 = int_to_ptr.vmem [resolvable:$true] %s438_s3  ;;  %s463_s14 = int_to_ptr.vmem [resolvable:$true] %s462_s14 }
  0xf0   : > { %s2690_s30 = scalar_lea.hbm %s3608_s8, 16 }
  0xf1   : > { %p2691_p6 = scmp.ne.s32.totalorder %s3608_s8, %s2690_s30  ;;  %p2697_p1 = scmp.lt.u32.totalorder %s2690_s30, %s3608_s8 }
  0xf3   : > { %p2693_p8 = pnand %p2691_p6, %p3047_p7 }
  0xf5   : > { %p2694_p9 = pneg %p2693_p8 }
  0xf7   : > { %p2699_p3 = pnand %p2697_p1, %p2694_p9 }
  0xf9   : > { %2702 = shalt.err (!%p2699_p3)
}
  0xfa   : > { %s2703_s13 = scalar_lea.vmem %s439_s3, 16  ;;  %s2710_s1 = scalar_lea.vmem %s439_s3, 32 }
  0xfb   : > { %p2704_p10 = scmp.ne.s32.totalorder %s439_s3, %s2703_s13  ;;  %p2711_p13 = scmp.lt.s32.totalorder %s439_s3, %s439_s3 }
  0xfc   : > { %p2712_p0 = scmp.lt.s32.totalorder %s2710_s1, %s2703_s13 }
  0xfd   : > { %p2706_p11 = pnand %p2704_p10, %p3047_p7 }
  0xfe   : > { %p2713_p2 = por %p2712_p0, %p2711_p13 }
  0xff   : > { %p2707_p12 = pneg %p2706_p11 }
 0x101   : > { %p2714_p4 = pnand %p2713_p2, %p2707_p12 }
 0x103   : > { %2717 = shalt.err (!%p2714_p4)
}
 0x104   : > { %2230 = dma.hbm_to_vmem [thread:$0]  (!%p3033_p5), %s3608_s8, 16, %s439_s3, [#allocation16]  }
 0x105   : > { %s2718_s21 = scalar_lea.hbm %s3610_s10, 32 }
 0x106   : > { %p2719_p6 = scmp.ne.s32.totalorder %s3610_s10, %s2718_s21  ;;  %p2725_p1 = scmp.lt.u32.totalorder %s2718_s21, %s3610_s10 }
 0x108   : > { %p2721_p8 = pnand %p2719_p6, %p3047_p7 }
 0x10a   : > { %p2722_p9 = pneg %p2721_p8 }
 0x10c   : > { %p2727_p3 = pnand %p2725_p1, %p2722_p9 }
 0x10e   : > { %2730 = shalt.err (!%p2727_p3)
}
 0x10f   : > { %s2731_s15 = scalar_lea.vmem %s463_s14, 32  ;;  %p2739_p13 = scmp.lt.s32.totalorder %s463_s14, %s463_s14 }
 0x110   : > { %p2732_p10 = scmp.ne.s32.totalorder %s463_s14, %s2731_s15  ;;  %p2740_p0 = scmp.lt.s32.totalorder %s2731_s15, %s2731_s15 }
 0x112   : > { %p2734_p11 = pnand %p2732_p10, %p3047_p7  ;;  %p2741_p2 = por %p2740_p0, %p2739_p13 }
 0x114   : > { %p2735_p12 = pneg %p2734_p11 }
 0x116   : > { %p2742_p4 = pnand %p2741_p2, %p2735_p12 }
 0x118   : > { %2745 = shalt.err (!%p2742_p4)
}
 0x119   : > { %2236 = dma.hbm_to_vmem [thread:$0]  (!%p3033_p5), %s3610_s10, 32, %s463_s14, [#allocation19]  }
 0x11a   : > { %s2911_s1 = smov [#allocation23]   ;;  %s2746_s23 = scalar_lea.hbm %s3612_s12, 16 }
 0x11b   : > { %s486_s0 = sshll.u32 %s2911_s1, 4  ;;  %p2747_p6 = scmp.ne.s32.totalorder %s3612_s12, %s2746_s23  ;;  %s487_s0 = int_to_ptr.vmem [resolvable:$true] %s486_s0 }
 0x11c   : > { %p2753_p1 = scmp.lt.u32.totalorder %s2746_s23, %s3612_s12 }
 0x11d   : > { %p2749_p8 = pnand %p2747_p6, %p3047_p7 }
 0x11f   : > { %p2750_p9 = pneg %p2749_p8 }
 0x121   : > { %p2755_p3 = pnand %p2753_p1, %p2750_p9 }
 0x123   : > { %2758 = shalt.err (!%p2755_p3)
}
 0x124   : > { %s2759_s14 = scalar_lea.vmem %s487_s0, 16  ;;  %s2766_s22 = scalar_lea.vmem %s487_s0, 32 }
 0x125   : > { %p2760_p10 = scmp.ne.s32.totalorder %s487_s0, %s2759_s14  ;;  %p2767_p13 = scmp.lt.s32.totalorder %s487_s0, %s487_s0 }
 0x126   : > { %p2768_p0 = scmp.lt.s32.totalorder %s2766_s22, %s2759_s14 }
 0x127   : > { %p2762_p11 = pnand %p2760_p10, %p3047_p7 }
 0x128   : > { %p2769_p2 = por %p2768_p0, %p2767_p13 }
 0x129   : > { %p2763_p12 = pneg %p2762_p11 }
 0x12b   : > { %p2770_p4 = pnand %p2769_p2, %p2763_p12 }
 0x12d   : > { %2773 = shalt.err (!%p2770_p4)
}
 0x12e   : > { %s3645_s16 = sld [smem:[#allocation33_spill]]  ;;  %s3646_s13 = sld [smem:[#allocation34_spill]] }
 0x12f   : > { %2242 = dma.hbm_to_vmem [thread:$0]  (!%p3033_p5), %s3612_s12, 16, %s487_s0, [#allocation22]  }
 0x130   : > { %s1958_s1 = sadd.s32 4294967294, %s2894_s28   ;;  %s3285_s18 = sadd.s32 1, %s2894_s28  }
 0x131   : > { %s39_s25 = ssub.s32 %s2894_s28, %s3285_s18  ;;  %s42_s24 = sadd.s32 1, %s2890_s27 }
 0x132   : > { %p40_p7 = scmp.eq.s32.totalorder %s39_s25, 0  ;;  %p49_p6 = scmp.ne.s32.totalorder %s2890_s27, %s2886_s26 }
 0x133   : > { %p50_p8 = scmp.eq.s32.totalorder %s2894_s28, 0  ;;  %p337_p11 = scmp.eq.s32.totalorder %s1958_s1, 5 }
 0x134   : > { %p55_p9 = scmp.ne.s32.totalorder %s2886_s26, %s3645_s16  ;;  %p3648_p3 = scmp.eq.s32.totalorder %s3646_s13, 0 }
 0x135   : > { %s3296_s23 = scalar_select %p40_p7, %s2890_s27, %s42_s24  }
 0x136   : > { %p3298_p1 = por %p50_p8, %p49_p6  ;;  %p3304_p5 = por %p3648_p3, %p55_p9 }
 0x137   : > { %p331_p10 = scmp.eq.s32.totalorder %s3646_s13, 5  ;;  %p2263_p12 = scmp.lt.s32.totalorder %s2894_s28, 6 }
 0x138   : > { %s497_s30 = sand.u32 1, %s2890_s27   ;;  %p3315_p0 = por %p337_p11, %p55_p9 }
 0x139   : > { %p3311_p13 = por %p331_p10, %p49_p6  ;;  %s1973_s14 = sshll.u32 %s497_s30, 4 }
 0x13a   : > { %s3651_s29 = scalar_select %p3315_p0, 1, 0 }
 0x13b   : > { %s3650_s17 = scalar_select %p3311_p13, 1, 0 }
 0x13c   : > { %s2049_s22 = sshll.u32 %s2894_s28, 8  ;;  %s3652_s16 = sld [smem:[#allocation36_spill]] }
 0x13d   : > { %s501_s13 = scalar_lea.vmem [#allocation3], %s1973_s14  ;;  %p3329_p2 = pnand %p2263_p12, %p3298_p1 }
 0x13e   : > { %s508_s1 = sshll.u32 %s501_s13, 4  ;;  %s3333_s2 = scalar_lea.sflag [#allocation4], %s497_s30  ;;  %s3325_s1 = int_to_ptr.vmem [resolvable:$true] %s508_s1 }
 0x13f   : > { %p2776_p7 = pneg %p3329_p2 }
 0x142   : > { %s3323_s25 = scalar_lea.hbm %s3652_s16, %s2049_s22  ;;  %s2779_s21 = scalar_lea.hbm %s3652_s16, 1536 }
 0x143   : > { %s2774_s15 = scalar_lea.hbm %s3323_s25, 256  ;;  %p2780_p9 = scmp.lt.u32.totalorder %s3323_s25, %s3652_s16 }
 0x144   : > { %p2775_p4 = scmp.ne.s32.totalorder %s3323_s25, %s2774_s15  ;;  %p2781_p1 = scmp.lt.u32.totalorder %s2779_s21, %s2774_s15 }
 0x145   : > { %p2783_p10 = scmp.lt.u32.totalorder %s2774_s15, %s3323_s25 }
 0x146   : > { %p2777_p6 = pnand %p2776_p7, %p2775_p4  ;;  %p2782_p3 = por %p2781_p1, %p2780_p9 }
 0x148   : > { %p2778_p8 = pneg %p2777_p6  ;;  %p2784_p11 = por %p2783_p10, %p2782_p3 }
 0x14a   : > { %p2785_p12 = pnand %p2784_p11, %p2778_p8 }
 0x14c   : > { %2788 = shalt.err (!%p2785_p12)
}
 0x14d   : > { %s2789_s30 = scalar_lea.vmem %s3325_s1, 256  ;;  %s2912_s14 = smov [#allocation3]  }
 0x14e   : > { %p2790_p4 = scmp.ne.s32.totalorder %s3325_s1, %s2789_s30  ;;  %s2794_s22 = sshll.u32 %s2912_s14, 4  ;;  %s2795_s22 = int_to_ptr.vmem [resolvable:$false] %s2794_s22 }
 0x14f   : > { %s2796_s3 = scalar_lea.vmem %s2795_s22, 512  ;;  %p2797_p13 = scmp.lt.s32.totalorder %s3325_s1, %s2795_s22 }
 0x150   : > { %p2792_p6 = pnand %p2790_p4, %p2776_p7  ;;  %p2798_p9 = scmp.lt.s32.totalorder %s2796_s3, %s2789_s30 }
 0x152   : > { %p2793_p0 = pneg %p2792_p6  ;;  %p2799_p1 = por %p2798_p9, %p2797_p13 }
 0x154   : > { %p2800_p3 = pnand %p2799_p1, %p2793_p0 }
 0x156   : > { %2803 = shalt.err (!%p2800_p3)
}
 0x157   : > { %2246 = dma.hbm_to_vmem [thread:$0]  (!%p3329_p2), %s3323_s25, 256, %s3325_s1, %s3333_s2, %s3642_s20, %s3642_s20, %s3641_s19  }
 0x158   : > { %s3654_s15 = sld [smem:[#allocation35_spill]] }
 0x15e   : > { %p3655_p7 = scmp.ne.s32.totalorder %s3654_s15, 0 }
 0x15f   : > { %s3367_s21 = sand.u32 (!%p3655_p7), 1, %s2886_s26  }
 0x160   : > { %520 = sbr.rel (%p3655_p7) target bundleno = 3005 (0xbbd), region = 72  ;;  %s1977_s13 = sshll.u32 (!%p3655_p7), %s3367_s21, 4 }
 0x161   : > { %s523_s30 = scalar_lea.sflag (!%p3655_p7), [#allocation4], %s3367_s21  ;;  %s526_s24 = scalar_lea.vmem (!%p3655_p7), [#allocation3], %s1977_s13 }
 0x167   : > { %2849 = dma.done.wait (%p3304_p5), %s523_s30, 256  }
 0x168   : > { %2851 = vsyncadd (%p3304_p5), %s523_s30, 4294967040  ;;  %s3656_s2 = sld [smem:[#allocation34_spill]] }
 0x16e   : > { %p3657_p13 = scmp.eq.s32.totalorder %s3656_s2, 0 }
 0x170   : > { %2853 = dma.done.wait (%p3657_p13), [#allocation7], 32   ;;  %p3658_p0 = pmov %p3657_p13 }
 0x172   : > { %2855 = vsyncadd (%p3658_p0), [#allocation7], 4294967264  ;;  %p3659_p2 = pmov %p3658_p0 }
 0x173   : > { %p3660_p8 = pmov %p3658_p0 }
 0x174   : > { %2857 = dma.done.wait (%p3659_p2), [#allocation10], 1056  }
 0x175   : > { %2859 = vsyncadd (%p3660_p8), [#allocation10], 4294966240  ;;  %p3661_p10 = pmov %p3658_p0 }
 0x176   : > { %p3662_p11 = pmov %p3658_p0 }
 0x177   : > { %2861 = dma.done.wait (%p3661_p10), [#allocation13], 528  }
 0x178   : > { %2863 = vsyncadd (%p3662_p11), [#allocation13], 4294966768  ;;  %p3663_p5 = pmov %p3658_p0 }
 0x179   : > { %p3664_p12 = pmov %p3658_p0 }
 0x17a   : > { %2865 = dma.done.wait (%p3663_p5), [#allocation16], 32  }
 0x17b   : > { %2867 = vsyncadd (%p3664_p12), [#allocation16], 4294967264  ;;  %p3665_p4 = pmov %p3658_p0 }
 0x17c   : > { %p3666_p6 = pmov %p3658_p0 }
 0x17d   : > { %2869 = dma.done.wait (%p3665_p4), [#allocation19], 1056  }
 0x17e   : > { %2871 = vsyncadd (%p3666_p6), [#allocation19], 4294966240  ;;  %p3667_p9 = pmov %p3658_p0 }
 0x17f   : > { %p3668_p1 = pmov %p3658_p0 }
 0x180   : > { %2873 = dma.done.wait (%p3667_p9), [#allocation22], 2064  }
 0x181   : > { %2875 = vsyncadd (%p3668_p1), [#allocation22], 4294965232  ;;  %vm622_vm0 = vcmask 523264   ;;  %v3401_v0 = vld [vmem:[%s526_s24] sm:$0xff]  ;;  %v3403_v1 = vld [vmem:[%s526_s24 + $0x8] sm:$0xff]  ;;  %v2913_v22 = vmov 0   ;;  %v677_v40 = vlaneseq }
 0x182   : > { %v623_v2 = vsel %vm622_vm0, %v3401_v0, 0.0  ;;  %v626_v3 = vsel %vm622_vm0, %v3403_v1, 0.0  ;;  %v2338_v14 = vld [vmem:[#allocation9 + $0x4] ss:$8 sps:$4 sm:$0xff]   ;;  %v2340_v15 = vld [vmem:[#allocation9] ss:$8 sps:$4 sm:$0xff]   ;;  %762 = vmatprep.mubr.bf16.mxu1 %v2913_v22 }
 0x183   : > { %624 = vadd.xlane.f32.xlu0 %v623_v2  ;;  %730 = vmatprep.subr.bf16.mxu1 %v2338_v14  ;;  %v2341_v16 = vld [vmem:[#allocation9 + $0x14] ss:$8 sps:$4 sm:$0xff]   ;;  %v2343_v17 = vld [vmem:[#allocation9 + $0x10] ss:$8 sps:$4 sm:$0xff]   ;;  %v2344_v18 = vld [vmem:[#allocation9 + $0x24] ss:$8 sps:$4 sm:$0xff]  }
 0x184   : > { %731 = vmatpush1.bf16.msra.mxu1 %v2340_v15  ;;  %v2346_v19 = vld [vmem:[#allocation9 + $0x20] ss:$8 sps:$4 sm:$0xff]   ;;  %v2347_v20 = vld [vmem:[#allocation9 + $0x34] ss:$8 sps:$4 sm:$0xff]   ;;  %v2349_v21 = vld [vmem:[#allocation9 + $0x30] ss:$8 sps:$4 sm:$0xff]  }
 0x185   : > { %732 = vmatprep.subr.bf16.mxu1 %v2341_v16  ;;  %v1991_v31 = vld [vmem:[#allocation6] ss:$0 sm:$0xff]  ;;  %v1992_v35 = vld [vmem:[#allocation8] ss:$0 sm:$0xff]  ;;  %v3416_v41 = vshrl.u32 %v677_v40, 7  ;;  %v2914_v44 = vmov 0.0  }
 0x186   : > { %v675_v43 = vld [vmem:[#allocation11] sm:$0x3]  ;;  %2106 = vmatprep.subr.bf16.mxu0 %v2914_v44  ;;  %vm2915_vm1 = vmmov 0   ;;  %s2916_s19 = smov 48   ;;  %s2917_s20 = smov 64   ;;  %vm793_vm2 = vcmask 130048  }
 0x187   : > { %627 = vadd.xlane.f32.xlu0 %v626_v3  ;;  %v679_v42 = vsub.s32 0, %v3416_v41  ;;  %v683_v45 = vsub.s32 1, %v3416_v41  ;;  %2108 = vmatprep.mubr.msk.bf16.mxu0 %vm2915_vm1, %v2914_v44  ;;  %s2918_s0 = smov 96   ;;  %s2919_s25 = smov 112   ;;  %vm1041_vm8 = vcmask 261248   ;;  %vm1173_vm9 = vcmask 392448  }
 0x188   : > { %733 = vmatpush1.bf16.msra.mxu1 %v2343_v17  ;;  %s2920_s1 = smov 80   ;;  %s2921_s14 = smov 32   ;;  %vm1305_vm10 = vcmask 523648  }
 0x189   : > { %734 = vmatprep.subr.bf16.mxu1 %v2344_v18  ;;  %v680_v46 = vrot.slane %v675_v43, %v679_v42  ;;  %v684_v48 = vrot.slane %v675_v43, %v683_v45  ;;  %s2922_s22 = smov 16   ;;  %s2050_s3 = sshll.u32 %s3656_s2, 8 }
 0x18a   : > { %s616_s15 = scalar_lea.vmem [#allocation24], %s1977_s13  ;;  %s1758_s13 = scalar_lea.sflag [#allocation5], %s3367_s21 }
 0x18b   : > { %s1771_s30 = sshll.u32 %s616_s15, 4  ;;  %p3670_p7 = scmp.ne.s32.totalorder %s3650_s17, 0  ;;  %s3554_s30 = int_to_ptr.vmem [resolvable:$true] %s1771_s30 }
 0x18c   : > { %735 = vmatpush1.bf16.msra.mxu1 %v2346_v19  ;;  %s2804_s2 = scalar_lea.vmem %s3554_s30, 256 }
 0x18d   : > { %736 = vmatprep.subr.bf16.mxu1 %v2347_v20  ;;  %p2805_p3 = scmp.ne.s32.totalorder %s3554_s30, %s2804_s2 }
 0x18f   : > { %p2806_p13 = pnand %p2805_p3, %p3670_p7 }
 0x190   : > { %737 = vmatpush1.bf16.msra.mxu1 %v2349_v21 }
 0x191   : > { %2094 = vmatprep.subr.bf16.mxu1 %v2914_v44  ;;  %p2807_p0 = pneg %p2806_p13 }
 0x210   : > { %v625_v4 = vpop.xlane.xlu0 %624 }
 0x211   : > { %v630_v5 = vmul.f32 0.015625, %v625_v4 }
 0x213   : > { %v632_v6 = vsub.f32 %v3401_v0, %v630_v5 }
 0x214   : > { %v628_v7 = vpop.xlane.xlu0 %627 }
 0x215   : > { %v631_v8 = vmul.f32 0.015625, %v628_v7  ;;  %v634_v9 = vmul.f32 %v632_v6, %v632_v6 }
 0x217   : > { %v633_v10 = vsub.f32 %v3403_v1, %v631_v8  ;;  %v636_v11 = vsel %vm622_vm0, %v634_v9, 0.0 }
 0x218   : > { %637 = vadd.xlane.f32.xlu1 %v636_v11  ;;  %v775_v11 = vadd.s32 8, %v3416_v41 }
 0x219   : > { %v635_v12 = vmul.f32 %v633_v10, %v633_v10 }
 0x21b   : > { %v639_v13 = vsel %vm622_vm0, %v635_v12, 0.0  ;;  %v2923_v12 = vmov -1e+09  }
 0x21c   : > { %640 = vadd.xlane.f32.xlu1 %v639_v13 }
 0x2a5   : > { %v638_v23 = vpop.xlane.xlu1 %637 }
 0x2a6   : > { %v642_v24 = vmul.f32 0.015625, %v638_v23 }
 0x2a8   : > { %v644_v25 = vadd.f32 1e-05, %v642_v24 }
 0x2a9   : > { %v641_v26 = vpop.xlane.xlu1 %640 }
 0x2aa   : > { %2382 = vrsqrt.f32 %v644_v25  ;;  %v643_v27 = vmul.f32 0.015625, %v641_v26 }
 0x2ac   : > { %v645_v28 = vadd.f32 1e-05, %v643_v27 }
 0x2ae   : > { %2384 = vrsqrt.f32 %v645_v28 }
 0x2b4   : > { %v2383_v29 = vpop.eup %2382 }
 0x2b5   : > { %v648_v30 = vmul.f32 %v2383_v29, %v632_v6 }
 0x2b7   : > { %v656_v34 = vmul.f32 %v1991_v31, %v648_v30 }
 0x2b8   : > { %v2385_v32 = vpop.eup %2384 }
 0x2b9   : > { %v649_v33 = vmul.f32 %v2385_v32, %v633_v10  ;;  %v664_v37 = vadd.f32 %v1992_v35, %v656_v34  ;;  %v777_v10 = vand.u32 127, %v677_v40 }
 0x2bb   : > { %v657_v36 = vmul.f32 %v1991_v31, %v649_v33  ;;  %vm778_vm3 = vcmp.lt.s32.totalorder %v777_v10, 16  ;;  %vm779_vm4 = vcmp.le.s32.totalorder %v777_v10, %v3416_v41  ;;  %vm780_vm5 = vcmp.le.s32.totalorder %v777_v10, %v775_v11 }
 0x2bc   : > { %vm781_vm6 = vmand %vm778_vm3, %vm779_vm4 }
 0x2bd   : > { %v665_v38 = vadd.f32 %v1992_v35, %v657_v36  ;;  %vm782_vm7 = vmand %vm778_vm3, %vm780_vm5  ;;  %v783_v13 = vsel %vm781_vm6, 0.0, %v2923_v12 }
 0x2be   : > { %v784_v16 = vsel %vm782_vm7, 0.0, %v2923_v12 }
 0x2bf   : > { %v666_v39 = vpack.c.bf16 %v665_v38, %v664_v37 }
 0x2c1   : > { %2001 = vmatmul.mubr.msk.bf16.vlgmr.msra.gmra.mrb[0].mxu1 %vm622_vm0, %v666_v39 }
 0x2c2   : > { %2096 = vmatprep.mubr.msk.bf16.mxu1 %vm2915_vm1, %v2914_v44 }
 0x394   : > { %v764_v47 = vpop.f32.mrb[0].mxu1 }
 0x395   : > { %v765_v49 = vadd.f32 %v764_v47, %v680_v46  ;;  %v766_v50 = vpop.f32.mrb[1].mxu1 }
 0x396   : > { %v768_v51 = vpop.f32.mrb[2].mxu1  ;;  %v767_v54 = vadd.f32 %v766_v50, %v684_v48 }
 0x397   : > { %v769_v52 = vadd.f32 %v768_v51, %v680_v46  ;;  %v770_v53 = vpop.f32.mrb[3].mxu1  ;;  %v785_v56 = vmul.f32 0.25, %v765_v49 }
 0x398   : > { %v771_v55 = vadd.f32 %v770_v53, %v684_v48 }
 0x399   : > { %v786_v57 = vmul.f32 0.25, %v769_v52  ;;  %v788_v58 = vpack.c.bf16 %v769_v52, %v765_v49 }
 0x39a   : > { %v3430_v59 = vpack.c.bf16 %v771_v55, %v767_v54 }
 0x39b   : > { %v787_v60 = vpack.c.bf16 %v786_v57, %v785_v56  ;;  %913 = vrot.lane.b32.xlu1 %v788_v58, %s2916_s19  ;;  %791 = vrot.lane.b32.xlu0 %v788_v58, %s2917_s20  ;;  %s3669_s20 = sld [smem:[#allocation40_spill]] }
 0x39f   : > { %1044 = vrot.lane.b32.xlu0 %v787_v60, %s2918_s0  ;;  %911 = vrot.lane.b32.xlu1 %v787_v60, %s2919_s25 }
 0x3a3   : > { %1176 = vrot.lane.b32.xlu0 %v787_v60, %s2920_s1  ;;  %1046 = vrot.lane.b32.xlu1 %v788_v58, %s2921_s14 }
 0x3a7   : > { %1178 = vrot.lane.b32.xlu1 %v788_v58, %s2922_s22 }
 0x40d   : > { %v914_v61 = vpop.permute.xlu1 %913  ;;  %v792_v62 = vpop.permute.xlu0 %791 }
 0x40e   : > { %v798_v63 = vsel %vm793_vm2, %v792_v62, 0  ;;  %v919_v2 = vsel %vm793_vm2, %v914_v61, 0 }
 0x40f   : > { %2095 = vmatpush3.bf16.xpose.msra.mxu1 %v798_v63  ;;  %2107 = vmatpush3.bf16.xpose.msra.mxu0 %v919_v2 }
 0x410   : > { %2100 = vmatprep.subr.bf16.mxu1 %v2914_v44  ;;  %2118 = vmatprep.subr.bf16.mxu0 %v2914_v44 }
 0x411   : > { %v912_v3 = vpop.permute.xlu1 %911  ;;  %v1045_v7 = vpop.permute.xlu0 %1044 }
 0x415   : > { %v1047_v4 = vpop.permute.xlu1 %1046  ;;  %v1177_v9 = vpop.permute.xlu0 %1176 }
 0x416   : > { %v1052_v5 = vsel %vm793_vm2, %v1047_v4, 0  ;;  %2097 = vmatmul.mubr.msk.bf16.vlgmr.msra.gmra.mrb[4].mxu1 %vm793_vm2, %v787_v60  ;;  %2109 = vmatmul.mubr.msk.bf16.vlgmr.msra.gmra.mrb[0].mxu0 %vm793_vm2, %v912_v3 }
 0x417   : > { %2101 = vmatpush3.bf16.msra.mxu1 %v3430_v59  ;;  %2119 = vmatpush3.bf16.xpose.msra.mxu0 %v1052_v5 }
 0x418   : > { %2120 = vmatprep.mubr.msk.bf16.mxu0 %vm2915_vm1, %v2914_v44  ;;  %2130 = vmatprep.subr.bf16.mxu0 %v2914_v44 }
 0x419   : > { %2102 = vmatprep.mubr.msk.bf16.mxu1 %vm2915_vm1, %v2914_v44  ;;  %2112 = vmatprep.subr.bf16.mxu1 %v2914_v44  ;;  %v1179_v6 = vpop.permute.xlu1 %1178 }
 0x41a   : > { %v1184_v8 = vsel %vm793_vm2, %v1179_v6, 0 }
 0x41e   : > { %2121 = vmatmul.mubr.msk.bf16.vlgmr.msra.gmra.mrb[4].mxu0 %vm793_vm2, %v1045_v7 }
 0x41f   : > { %2131 = vmatpush3.bf16.xpose.msra.mxu0 %v1184_v8  ;;  %2132 = vmatprep.mubr.msk.bf16.mxu0 %vm2915_vm1, %v2914_v44 }
 0x420   : > { %2142 = vmatprep.subr.bf16.mxu0 %v2914_v44 }
 0x426   : > { %2133 = vmatmul.mubr.msk.bf16.vlgmr.msra.gmra.mrb[8].mxu0 %vm793_vm2, %v1177_v9 }
 0x427   : > { %2150 = vmatprep.mubr.msk.bf16.mxu0 %vm2915_vm1, %v2914_v44 }
 0x4e9   : > { %v834_v14 = vpop.f32.mrb[4].mxu1  ;;  %v955_v15 = vpop.f32.mrb[0].mxu0 }
 0x4ea   : > { %v835_v17 = vadd.f32 %v834_v14, %v783_v13  ;;  %v2098_v18 = vpop.f32.mrb[5].mxu1  ;;  %v2110_v19 = vpop.f32.mrb[1].mxu0  ;;  %v3464_v27 = vadd.f32 %v955_v15, %v783_v13 }
 0x4eb   : > { %v837_v20 = vpop.f32.mrb[6].mxu1  ;;  %v958_v21 = vpop.f32.mrb[2].mxu0 }
 0x4ec   : > { %v838_v23 = vadd.f32 %v837_v20, %v784_v16  ;;  %v2099_v24 = vpop.f32.mrb[7].mxu1  ;;  %v2111_v25 = vpop.f32.mrb[3].mxu0  ;;  %v841_v26 = vsel %vm793_vm2, %v835_v17, -inf  ;;  %v959_v30 = vadd.f32 %v958_v21, %v784_v16  ;;  %v962_v33 = vsel %vm793_vm2, %v3464_v27, -inf }
 0x4ed   : > { %842 = vmax.xlane.f32.xlu1 %v841_v26 }
 0x4ee   : > { %v844_v28 = vsel %vm793_vm2, %v838_v23, -inf  ;;  %v965_v38 = vsel %vm793_vm2, %v959_v30, -inf }
 0x4ef   : > { %845 = vmax.xlane.f32.xlu0 %v844_v28 }
 0x4f1   : > { %v1088_v29 = vpop.f32.mrb[4].mxu0 }
 0x4f2   : > { %v3467_v31 = vadd.f32 %v1088_v29, %v783_v13  ;;  %v2122_v32 = vpop.f32.mrb[5].mxu0 }
 0x4f3   : > { %v1091_v34 = vpop.f32.mrb[6].mxu0  ;;  %963 = vmax.xlane.f32.xlu0 %v962_v33 }
 0x4f4   : > { %v2123_v35 = vpop.f32.mrb[7].mxu0  ;;  %v1095_v36 = vsel %vm793_vm2, %v3467_v31, -inf  ;;  %v1092_v37 = vadd.f32 %v1091_v34, %v784_v16 }
 0x4f5   : > { %1096 = vmax.xlane.f32.xlu1 %v1095_v36 }
 0x4f6   : > { %v1098_v46 = vsel %vm793_vm2, %v1092_v37, -inf }
 0x4f7   : > { %966 = vmax.xlane.f32.xlu0 %v965_v38 }
 0x4f9   : > { %v1220_v39 = vpop.f32.mrb[8].mxu0 }
 0x4fa   : > { %v1221_v40 = vadd.f32 %v1220_v39, %v783_v13  ;;  %v2134_v43 = vpop.f32.mrb[9].mxu0 }
 0x4fb   : > { %v1223_v47 = vpop.f32.mrb[10].mxu0  ;;  %1099 = vmax.xlane.f32.xlu0 %v1098_v46 }
 0x4fc   : > { %v1224_v48 = vadd.f32 %v1223_v47, %v784_v16  ;;  %v2135_v49 = vpop.f32.mrb[11].mxu0  ;;  %v1227_v50 = vsel %vm793_vm2, %v1221_v40, -inf }
 0x4fd   : > { %1228 = vmax.xlane.f32.xlu1 %v1227_v50 }
 0x4fe   : > { %v1230_v51 = vsel %vm793_vm2, %v1224_v48, -inf }
 0x4ff   : > { %1231 = vmax.xlane.f32.xlu0 %v1230_v51 }
 0x57a   : > { %v843_v52 = vpop.xlane.xlu1 %842 }
 0x57b   : > { %v847_v53 = vsub.f32 %v835_v17, %v843_v52 }
 0x57c   : > { %v846_v54 = vpop.xlane.xlu0 %845 }
 0x57d   : > { %v849_v55 = vmul.f32 1.442695, %v847_v53  ;;  %v848_v56 = vsub.f32 %v838_v23, %v846_v54 }
 0x57f   : > { %2386 = vpow2.f32 %v849_v55  ;;  %v851_v57 = vmul.f32 1.442695, %v848_v56 }
 0x580   : > { %v964_v58 = vpop.xlane.xlu0 %963 }
 0x581   : > { %2388 = vpow2.f32 %v851_v57  ;;  %v968_v17 = vsub.f32 %v3464_v27, %v964_v58 }
 0x582   : > { %v1097_v18 = vpop.xlane.xlu1 %1096 }
 0x583   : > { %v970_v19 = vmul.f32 1.442695, %v968_v17  ;;  %v1101_v20 = vsub.f32 %v3467_v31, %v1097_v18  ;;  %v2353_v18 = vld [vmem:[#allocation12 + $0x18] sm:$0xff]  }
 0x584   : > { %v967_v60 = vpop.xlane.xlu0 %966 }
 0x585   : > { %v969_v61 = vsub.f32 %v959_v30, %v967_v60  ;;  %v1103_v23 = vmul.f32 1.442695, %v1101_v20 }
 0x587   : > { %v972_v62 = vmul.f32 1.442695, %v969_v61 }
 0x588   : > { %v1100_v63 = vpop.xlane.xlu0 %1099 }
 0x589   : > { %v2387_v2 = vpop.eup %2386  ;;  %2390 = vpow2.f32 %v972_v62  ;;  %v1102_v3 = vsub.f32 %v1092_v37, %v1100_v63 }
 0x58a   : > { %v853_v4 = vsel %vm793_vm2, %v2387_v2, 0.0  ;;  %v1229_v21 = vpop.xlane.xlu1 %1228 }
 0x58b   : > { %v2389_v5 = vpop.eup %2388  ;;  %v1105_v6 = vmul.f32 1.442695, %v1102_v3  ;;  %854 = vadd.xlane.f32.xlu1 %v853_v4  ;;  %v1233_v24 = vsub.f32 %v1221_v40, %v1229_v21 }
 0x58c   : > { %v1232_v7 = vpop.xlane.xlu0 %1231  ;;  %v856_v8 = vsel %vm793_vm2, %v2389_v5, 0.0 }
 0x58d   : > { %2392 = vpow2.f32 %v1105_v6  ;;  %v1234_v9 = vsub.f32 %v1224_v48, %v1232_v7  ;;  %857 = vadd.xlane.f32.xlu0 %v856_v8  ;;  %v1235_v25 = vmul.f32 1.442695, %v1233_v24 }
 0x58f   : > { %v1237_v10 = vmul.f32 1.442695, %v1234_v9  ;;  %v2350_v9 = vld [vmem:[#allocation12] sm:$0xff]  }
 0x590   : > { %2143 = vmatpush3.bf16.msra.mxu0 %v2350_v9 }
 0x591   : > { %2394 = vpow2.f32 %v1237_v10  ;;  %2144 = vmatprep.subr.bf16.mxu0 %v2914_v44 }
 0x592   : > { %2396 = vpow2.f32 %v970_v19 }
 0x593   : > { %v2391_v11 = vpop.eup %2390  ;;  %2398 = vpow2.f32 %v1103_v23 }
 0x594   : > { %v977_v12 = vsel %vm793_vm2, %v2391_v11, 0.0  ;;  %2400 = vpow2.f32 %v1235_v25 }
 0x595   : > { %978 = vadd.xlane.f32.xlu0 %v977_v12 }
 0x597   : > { %v3480_v13 = vpop.eup %2392 }
 0x598   : > { %v1110_v14 = vsel %vm793_vm2, %v3480_v13, 0.0 }
 0x599   : > { %1111 = vadd.xlane.f32.xlu0 %v1110_v14  ;;  %v2351_v14 = vld [vmem:[#allocation12 + $0x8] sm:$0xff]  }
 0x59a   : > { %2145 = vmatpush3.bf16.msra.mxu0 %v2351_v14  ;;  %v2017_v14 = vld [vmem:[#allocation17] ss:$0 sm:$0xff] }
 0x59b   : > { %v3484_v15 = vpop.eup %2394  ;;  %2146 = vmatprep.subr.bf16.mxu0 %v2914_v44 }
 0x59c   : > { %986 = vrot.lane.b32.xlu1 %v3430_v59, %s2919_s25  ;;  %v1242_v16 = vsel %vm793_vm2, %v3484_v15, 0.0  ;;  %v2397_v26 = vpop.eup %2396  ;;  %s2924_s25 = smov [#allocation24]  }
 0x59d   : > { %1243 = vadd.xlane.f32.xlu0 %v1242_v16  ;;  %v974_v28 = vsel %vm793_vm2, %v2397_v26, 0.0  ;;  %v2399_v29 = vpop.eup %2398 }
 0x59e   : > { %v1107_v27 = vsel %vm793_vm2, %v2399_v29, 0.0  ;;  %v2401_v30 = vpop.eup %2400 }
 0x59f   : > { %v1239_v31 = vsel %vm793_vm2, %v2401_v30, 0.0 }
 0x5b3   : > { %1118 = vrot.lane.b32.xlu0 %v3430_v59, %s2918_s0  ;;  %s3552_s0 = scalar_lea.hbm %s3669_s20, %s2050_s3 }
 0x5c0   : > { %975 = vadd.xlane.f32.xlu1 %v974_v28 }
 0x5c4   : > { %1108 = vadd.xlane.f32.xlu1 %v1107_v27 }
 0x5c8   : > { %1240 = vadd.xlane.f32.xlu1 %v1239_v31 }
 0x5d9   : > { %1250 = vrot.lane.b32.xlu1 %v3430_v59, %s2920_s1  ;;  %s2808_s1 = sshll.u32 %s2924_s25, 4  ;;  %s2809_s1 = int_to_ptr.vmem [resolvable:$false] %s2808_s1 }
 0x5da   : > { %p2811_p2 = scmp.lt.s32.totalorder %s3554_s30, %s2809_s1 }
 0x618   : > { %v855_v32 = vpop.xlane.xlu1 %854 }
 0x619   : > { %2402 = vrcp.f32 %v855_v32 }
 0x61a   : > { %v858_v33 = vpop.xlane.xlu0 %857 }
 0x61b   : > { %2404 = vrcp.f32 %v858_v33  ;;  %v2010_v33 = vld [vmem:[#allocation14] ss:$0 sm:$0xff] }
 0x61c   : > { %v987_v39 = vpop.permute.xlu1 %986 }
 0x622   : > { %v979_v40 = vpop.xlane.xlu0 %978 }
 0x623   : > { %v2403_v34 = vpop.eup %2402  ;;  %2406 = vrcp.f32 %v979_v40 }
 0x624   : > { %v861_v36 = vmul.f32 %v2403_v34, %v2387_v2 }
 0x625   : > { %v2405_v35 = vpop.eup %2404 }
 0x626   : > { %v862_v37 = vmul.f32 %v2405_v35, %v2389_v5  ;;  %v1112_v43 = vpop.xlane.xlu0 %1111 }
 0x628   : > { %v863_v38 = vpack.c.bf16 %v862_v37, %v861_v36 }
 0x62a   : > { %2103 = vmatmul.mubr.msk.bf16.vlgmr.msra.gmra.mrb[8].mxu1 %vm793_vm2, %v863_v38  ;;  %v1244_v48 = vpop.xlane.xlu0 %1243 }
 0x62b   : > { %2113 = vmatpush3.bf16.msra.mxu1 %v987_v39  ;;  %2114 = vmatprep.mubr.msk.bf16.mxu1 %vm2915_vm1, %v2914_v44 }
 0x62c   : > { %2124 = vmatprep.subr.bf16.mxu1 %v2914_v44 }
 0x62d   : > { %v2407_v47 = vpop.eup %2406 }
 0x62e   : > { %v983_v51 = vmul.f32 %v2407_v47, %v2391_v11  ;;  %v1119_v55 = vpop.permute.xlu0 %1118 }
 0x64d   : > { %v976_v59 = vpop.xlane.xlu1 %975 }
 0x64e   : > { %2408 = vrcp.f32 %v976_v59 }
 0x651   : > { %v1109_v46 = vpop.xlane.xlu1 %1108 }
 0x652   : > { %2410 = vrcp.f32 %v1109_v46 }
 0x653   : > { %2412 = vrcp.f32 %v1112_v43 }
 0x655   : > { %v1241_v49 = vpop.xlane.xlu1 %1240 }
 0x656   : > { %2414 = vrcp.f32 %v1241_v49 }
 0x657   : > { %2416 = vrcp.f32 %v1244_v48 }
 0x658   : > { %v2409_v50 = vpop.eup %2408 }
 0x659   : > { %v982_v52 = vmul.f32 %v2409_v50, %v2397_v26  ;;  %v1251_v62 = vpop.permute.xlu1 %1250 }
 0x65b   : > { %v984_v53 = vpack.c.bf16 %v983_v51, %v982_v52 }
 0x65c   : > { %v2411_v54 = vpop.eup %2410 }
 0x65d   : > { %2115 = vmatmul.mubr.msk.bf16.vlgmr.msra.gmra.mrb[12].mxu1 %vm793_vm2, %v984_v53  ;;  %v2413_v56 = vpop.eup %2412  ;;  %v1115_v57 = vmul.f32 %v2411_v54, %v2399_v29 }
 0x65e   : > { %2125 = vmatpush3.bf16.msra.mxu1 %v1119_v55  ;;  %2126 = vmatprep.mubr.msk.bf16.mxu1 %vm2915_vm1, %v2914_v44  ;;  %v1116_v58 = vmul.f32 %v2413_v56, %v3480_v13  ;;  %v2356_v55 = vld [vmem:[#allocation18 + $0x4] ss:$8 sps:$4 sm:$0xff]   ;;  %v2354_v56 = vld [vmem:[#allocation18] ss:$8 sps:$4 sm:$0xff]  }
 0x65f   : > { %2136 = vmatprep.subr.bf16.mxu1 %v2914_v44 }
 0x660   : > { %v1117_v60 = vpack.c.bf16 %v1116_v58, %v1115_v57  ;;  %v2415_v61 = vpop.eup %2414  ;;  %v2359_v57 = vld [vmem:[#allocation18 + $0x14] ss:$8 sps:$4 sm:$0xff]   ;;  %v2357_v58 = vld [vmem:[#allocation18 + $0x10] ss:$8 sps:$4 sm:$0xff]  }
 0x661   : > { %v2417_v63 = vpop.eup %2416  ;;  %v1247_v2 = vmul.f32 %v2415_v61, %v2401_v30  ;;  %v2360_v61 = vld [vmem:[#allocation18 + $0x20] ss:$8 sps:$4 sm:$0xff]  }
 0x662   : > { %v1248_v3 = vmul.f32 %v2417_v63, %v3484_v15  ;;  %v2365_v63 = vld [vmem:[#allocation18 + $0x34] ss:$8 sps:$4 sm:$0xff]  }
 0x664   : > { %v1249_v4 = vpack.c.bf16 %v1248_v3, %v1247_v2 }
 0x665   : > { %2127 = vmatmul.mubr.msk.bf16.vlgmr.msra.gmra.mrb[16].mxu1 %vm793_vm2, %v1117_v60  ;;  %v2362_v60 = vld [vmem:[#allocation18 + $0x24] ss:$8 sps:$4 sm:$0xff]  }
 0x666   : > { %2137 = vmatpush3.bf16.msra.mxu1 %v1251_v62  ;;  %2138 = vmatprep.mubr.msk.bf16.mxu1 %vm2915_vm1, %v2914_v44  ;;  %v2363_v62 = vld [vmem:[#allocation18 + $0x30] ss:$8 sps:$4 sm:$0xff]  }
 0x667   : > { %1504 = vmatprep.subr.bf16.mxu1 %v2356_v55 }
 0x66d   : > { %2139 = vmatmul.mubr.msk.bf16.vlgmr.msra.gmra.mrb[20].mxu1 %vm793_vm2, %v1249_v4 }
 0x66e   : > { %1536 = vmatprep.mubr.bf16.mxu1 %v2913_v22  ;;  %v2352_v22 = vld [vmem:[#allocation12 + $0x10] sm:$0xff]   ;;  %1505 = vmatpush1.bf16.msra.mxu1 %v2354_v56 }
 0x66f   : > { %2147 = vmatpush3.bf16.msra.mxu0 %v2352_v22  ;;  %1506 = vmatprep.subr.bf16.mxu1 %v2359_v57 }
 0x670   : > { %2148 = vmatprep.subr.bf16.mxu0 %v2914_v44 }
 0x672   : > { %1507 = vmatpush1.bf16.msra.mxu1 %v2357_v58 }
 0x673   : > { %2149 = vmatpush3.bf16.msra.mxu0 %v2353_v18  ;;  %1508 = vmatprep.subr.bf16.mxu1 %v2362_v60  ;;  %v2366_v18 = vld [vmem:[#allocation21 + $0x40] sm:$0xff]  }
 0x674   : > { %2072 = vmatprep.subr.bf16.mxu0 %v2366_v18 }
 0x676   : > { %1509 = vmatpush1.bf16.msra.mxu1 %v2360_v61 }
 0x677   : > { %1510 = vmatprep.subr.bf16.mxu1 %v2365_v63 }
 0x67a   : > { %1511 = vmatpush1.bf16.msra.mxu1 %v2363_v62 }
 0x6fd   : > { %v901_v5 = vpop.f32.mrb[8].mxu1 }
 0x6fe   : > { %908 = vst.msk [vmem:[#allocation2] sm:$0xff] %vm793_vm2, %v901_v5  ;;  %v2104_v6 = vpop.f32.mrb[9].mxu1 }
 0x6ff   : > { %v904_v7 = vpop.f32.mrb[10].mxu1 }
 0x700   : > { %909 = vst.msk [vmem:[#allocation2 + $0x8] sm:$0xff] %vm793_vm2, %v904_v7  ;;  %v2105_v8 = vpop.f32.mrb[11].mxu1 }
 0x730   : > { %v1026_v10 = vpop.f32.mrb[12].mxu1 }
 0x731   : > { %1035 = vrot.lane.b32.xlu1 %v1026_v10, %s2922_s22  ;;  %v2116_v11 = vpop.f32.mrb[13].mxu1  ;;  %v2016_v10 = vld [vmem:[#allocation15] ss:$0 sm:$0xff] }
 0x732   : > { %v1029_v12 = vpop.f32.mrb[14].mxu1 }
 0x733   : > { %v2117_v13 = vpop.f32.mrb[15].mxu1 }
 0x735   : > { %1037 = vrot.lane.b32.xlu1 %v1029_v12, %s2922_s22 }
 0x738   : > { %v1158_v15 = vpop.f32.mrb[16].mxu1 }
 0x739   : > { %1167 = vrot.lane.b32.xlu0 %v1158_v15, %s2921_s14  ;;  %v2128_v16 = vpop.f32.mrb[17].mxu1 }
 0x73a   : > { %v1161_v17 = vpop.f32.mrb[18].mxu1 }
 0x73b   : > { %1169 = vrot.lane.b32.xlu1 %v1161_v17, %s2921_s14  ;;  %v2129_v19 = vpop.f32.mrb[19].mxu1  ;;  %s2810_s14 = scalar_lea.vmem %s2809_s1, 512 }
 0x73c   : > { %v2367_v19 = vld [vmem:[#allocation21] sm:$0xff]   ;;  %p2812_p8 = scmp.lt.s32.totalorder %s2810_s14, %s2804_s2 }
 0x73e   : > { %p2813_p10 = por %p2812_p8, %p2811_p2 }
 0x740   : > { %v1290_v20 = vpop.f32.mrb[20].mxu1  ;;  %p2814_p11 = pnand %p2813_p10, %p2807_p0 }
 0x741   : > { %1299 = vrot.lane.b32.xlu0 %v1290_v20, %s2916_s19  ;;  %v2140_v21 = vpop.f32.mrb[21].mxu1  ;;  %v2368_v20 = vld [vmem:[#allocation21 + $0x48] sm:$0xff]  }
 0x742   : > { %v1293_v23 = vpop.f32.mrb[22].mxu1  ;;  %v2369_v21 = vld [vmem:[#allocation21 + $0x8] sm:$0xff]  }
 0x743   : > { %1301 = vrot.lane.b32.xlu1 %v1293_v23, %s2916_s19  ;;  %v2141_v24 = vpop.f32.mrb[23].mxu1  ;;  %v2370_v23 = vld [vmem:[#allocation21 + $0x50] sm:$0xff]  }
 0x744   : > { %v2371_v24 = vld [vmem:[#allocation21 + $0x10] sm:$0xff]  }
 0x7a3   : > { %v1036_v25 = vpop.permute.xlu1 %1035 }
 0x7a4   : > { %1042 = vst.msk [vmem:[#allocation2] sm:$0xff] %vm1041_vm8, %v1036_v25  ;;  %v2372_v25 = vld [vmem:[#allocation21 + $0x58] sm:$0xff]  }
 0x7a7   : > { %v1038_v26 = vpop.permute.xlu1 %1037 }
 0x7a8   : > { %1043 = vst.msk [vmem:[#allocation2 + $0x8] sm:$0xff] %vm1041_vm8, %v1038_v26  ;;  %v2373_v26 = vld [vmem:[#allocation21 + $0x18] sm:$0xff]  }
 0x7ab   : > { %v1168_v28 = vpop.permute.xlu0 %1167 }
 0x7ac   : > { %1174 = vst.msk [vmem:[#allocation2] sm:$0xff] %vm1173_vm9, %v1168_v28  ;;  %v2374_v28 = vld [vmem:[#allocation21 + $0x60] sm:$0xff]  }
 0x7ad   : > { %v1170_v29 = vpop.permute.xlu1 %1169 }
 0x7ae   : > { %1175 = vst.msk [vmem:[#allocation2 + $0x8] sm:$0xff] %vm1173_vm9, %v1170_v29  ;;  %v2375_v29 = vld [vmem:[#allocation21 + $0x20] sm:$0xff]  }
 0x7b3   : > { %v1300_v44 = vpop.permute.xlu0 %1299 }
 0x7b4   : > { %1306 = vst.msk [vmem:[#allocation2] sm:$0xff] %vm1305_vm10, %v1300_v44  ;;  %v2376_v44 = vld [vmem:[#allocation21 + $0x68] sm:$0xff]  }
 0x7b5   : > { %v1302_v27 = vpop.permute.xlu1 %1301 }
 0x7b6   : > { %1307 = vst.msk [vmem:[#allocation2 + $0x8] sm:$0xff] %vm1305_vm10, %v1302_v27  ;;  %v2377_v27 = vld [vmem:[#allocation21 + $0x28] sm:$0xff]  }
 0x7bb   : > { %v1308_v30 = vld [vmem:[#allocation2] sm:$0xff] }
 0x7bd   : > { %v1309_v31 = vld [vmem:[#allocation2 + $0x8] sm:$0xff] }
 0x7be   : > { %v1310_v32 = vpack.c.bf16 %v1309_v31, %v1308_v30  ;;  %v2378_v30 = vld [vmem:[#allocation21 + $0x70] sm:$0xff]  }
 0x7bf   : > { %v2379_v31 = vld [vmem:[#allocation21 + $0x30] sm:$0xff]  }
 0x7c0   : > { %2151 = vmatmul.mubr.msk.bf16.vlgmr.msra.gmra.mrb[12].mxu0 %vm622_vm0, %v1310_v32  ;;  %v2380_v32 = vld [vmem:[#allocation21 + $0x78] sm:$0xff]  }
 0x7c1   : > { %2073 = vmatpush3.bf16.msra.mxu0 %v2367_v19 }
 0x7c2   : > { %2074 = vmatprep.subr.bf16.mxu0 %v2368_v20 }
 0x7c5   : > { %2075 = vmatpush3.bf16.msra.mxu0 %v2369_v21 }
 0x7c6   : > { %2076 = vmatprep.subr.bf16.mxu0 %v2370_v23 }
 0x7c9   : > { %2077 = vmatpush3.bf16.msra.mxu0 %v2371_v24 }
 0x7ca   : > { %2078 = vmatprep.subr.bf16.mxu0 %v2372_v25 }
 0x7cd   : > { %2079 = vmatpush3.bf16.msra.mxu0 %v2373_v26 }
 0x7ce   : > { %2080 = vmatprep.subr.bf16.mxu0 %v2374_v28 }
 0x7d1   : > { %2081 = vmatpush3.bf16.msra.mxu0 %v2375_v29 }
 0x7d2   : > { %2082 = vmatprep.subr.bf16.mxu0 %v2376_v44 }
 0x7d5   : > { %2083 = vmatpush3.bf16.msra.mxu0 %v2377_v27 }
 0x7d6   : > { %2084 = vmatprep.subr.bf16.mxu0 %v2378_v30 }
 0x7d9   : > { %2085 = vmatpush3.bf16.msra.mxu0 %v2379_v31 }
 0x7da   : > { %2086 = vmatprep.subr.bf16.mxu0 %v2380_v32 }
 0x893   : > { %v1387_v34 = vpop.f32.mrb[12].mxu0 }
 0x894   : > { %v1388_v35 = vadd.f32 %v2010_v33, %v1387_v34  ;;  %v2152_v36 = vpop.f32.mrb[13].mxu0  ;;  %v1449_v34 = vld [vmem:[#allocation20] sm:$0x3] }
 0x895   : > { %v1390_v37 = vpop.f32.mrb[14].mxu0  ;;  %v1458_v36 = vrot.slane %v1449_v34, %v683_v45 }
 0x896   : > { %v3527_v38 = vadd.f32 %v1388_v35, %v3401_v0  ;;  %v1391_v39 = vadd.f32 %v2010_v33, %v1390_v37  ;;  %v2153_v40 = vpop.f32.mrb[15].mxu0  ;;  %v2381_v33 = vld [vmem:[#allocation21 + $0x38] sm:$0xff]   ;;  %v1454_v35 = vrot.slane %v1449_v34, %v679_v42 }
 0x897   : > { %2087 = vmatpush3.bf16.msra.mxu0 %v2381_v33 }
 0x898   : > { %v3530_v59 = vadd.f32 %v1391_v39, %v3403_v1  ;;  %v1398_v43 = vsel %vm622_vm0, %v3527_v38, 0.0 }
 0x899   : > { %1399 = vadd.xlane.f32.xlu0 %v1398_v43 }
 0x89a   : > { %v1401_v46 = vsel %vm622_vm0, %v3530_v59, 0.0 }
 0x89b   : > { %1402 = vadd.xlane.f32.xlu1 %v1401_v46 }
 0x926   : > { %v1400_v47 = vpop.xlane.xlu0 %1399 }
 0x927   : > { %v1404_v48 = vmul.f32 0.015625, %v1400_v47 }
 0x928   : > { %v1403_v49 = vpop.xlane.xlu1 %1402 }
 0x929   : > { %v1406_v50 = vsub.f32 %v3527_v38, %v1404_v48  ;;  %v1405_v0 = vmul.f32 0.015625, %v1403_v49 }
 0x92b   : > { %v1407_v51 = vsub.f32 %v3530_v59, %v1405_v0  ;;  %v1408_v52 = vmul.f32 %v1406_v50, %v1406_v50 }
 0x92d   : > { %v1410_v1 = vsel %vm622_vm0, %v1408_v52, 0.0  ;;  %v1409_v53 = vmul.f32 %v1407_v51, %v1407_v51 }
 0x92e   : > { %1411 = vadd.xlane.f32.xlu0 %v1410_v1 }
 0x92f   : > { %v1413_v54 = vsel %vm622_vm0, %v1409_v53, 0.0 }
 0x932   : > { %1414 = vadd.xlane.f32.xlu0 %v1413_v54 }
 0x9bb   : > { %v1412_v2 = vpop.xlane.xlu0 %1411 }
 0x9bc   : > { %v1416_v3 = vmul.f32 0.015625, %v1412_v2 }
 0x9be   : > { %v1418_v4 = vadd.f32 1e-05, %v1416_v3 }
 0x9bf   : > { %v1415_v5 = vpop.xlane.xlu0 %1414 }
 0x9c0   : > { %2418 = vrsqrt.f32 %v1418_v4  ;;  %v1417_v6 = vmul.f32 0.015625, %v1415_v5 }
 0x9c2   : > { %v1419_v7 = vadd.f32 1e-05, %v1417_v6 }
 0x9c4   : > { %2420 = vrsqrt.f32 %v1419_v7 }
 0x9ca   : > { %v2419_v8 = vpop.eup %2418 }
 0x9cb   : > { %v1422_v9 = vmul.f32 %v2419_v8, %v1406_v50 }
 0x9cd   : > { %v1430_v12 = vmul.f32 %v2016_v10, %v1422_v9 }
 0x9ce   : > { %v2421_v11 = vpop.eup %2420 }
 0x9cf   : > { %v1423_v13 = vmul.f32 %v2421_v11, %v1407_v51  ;;  %v1438_v15 = vadd.f32 %v2017_v14, %v1430_v12  ;;  %v2027_v11 = vld [vmem:[#allocation23] ss:$0 sm:$0xff] }
 0x9d1   : > { %v1431_v22 = vmul.f32 %v2016_v10, %v1423_v13 }
 0x9d3   : > { %v1439_v16 = vadd.f32 %v2017_v14, %v1431_v22 }
 0x9d5   : > { %v1440_v17 = vpack.c.bf16 %v1439_v16, %v1438_v15 }
 0x9d7   : > { %2026 = vmatmul.mubr.msk.bf16.vlgmr.msra.gmra.mrb[24].mxu1 %vm622_vm0, %v1440_v17 }
 0xaaa   : > { %v1538_v37 = vpop.f32.mrb[24].mxu1 }
 0xaab   : > { %v1539_v39 = vadd.f32 %v1538_v37, %v1454_v35  ;;  %v1540_v40 = vpop.f32.mrb[25].mxu1 }
 0xaac   : > { %v1541_v43 = vadd.f32 %v1540_v40, %v1458_v36  ;;  %v1542_v46 = vpop.f32.mrb[26].mxu1 }
 0xaad   : > { %v1547_v47 = vmul.f32 -1.702, %v1539_v39  ;;  %v1543_v48 = vadd.f32 %v1542_v46, %v1454_v35  ;;  %v1544_v49 = vpop.f32.mrb[27].mxu1 }
 0xaae   : > { %v1548_v50 = vmul.f32 -1.702, %v1541_v43  ;;  %v1545_v0 = vadd.f32 %v1544_v49, %v1458_v36 }
 0xaaf   : > { %v1551_v51 = vmul.f32 1.442695, %v1547_v47  ;;  %v1549_v52 = vmul.f32 -1.702, %v1543_v48 }
 0xab0   : > { %v1553_v1 = vmul.f32 1.442695, %v1548_v50  ;;  %v1550_v53 = vmul.f32 -1.702, %v1545_v0 }
 0xab1   : > { %2422 = vpow2.f32 %v1551_v51  ;;  %v1555_v54 = vmul.f32 1.442695, %v1549_v52 }
 0xab2   : > { %2424 = vpow2.f32 %v1553_v1  ;;  %v1557_v42 = vmul.f32 1.442695, %v1550_v53 }
 0xab3   : > { %2426 = vpow2.f32 %v1555_v54 }
 0xab4   : > { %2428 = vpow2.f32 %v1557_v42 }
 0xabb   : > { %v2423_v41 = vpop.eup %2422 }
 0xabc   : > { %v2425_v45 = vpop.eup %2424  ;;  %v1559_v55 = vadd.f32 1.0, %v2423_v41 }
 0xabd   : > { %v2427_v56 = vpop.eup %2426  ;;  %v1560_v57 = vadd.f32 1.0, %v2425_v45 }
 0xabe   : > { %v2429_v58 = vpop.eup %2428  ;;  %2430 = vrcp.f32 %v1559_v55  ;;  %v1561_v60 = vadd.f32 1.0, %v2427_v56 }
 0xabf   : > { %2432 = vrcp.f32 %v1560_v57  ;;  %v1562_v61 = vadd.f32 1.0, %v2429_v58 }
 0xac0   : > { %2434 = vrcp.f32 %v1561_v60 }
 0xac1   : > { %2436 = vrcp.f32 %v1562_v61 }
 0xac8   : > { %v2431_v62 = vpop.eup %2430 }
 0xac9   : > { %v2433_v63 = vpop.eup %2432  ;;  %v1571_v4 = vmul.f32 %v2431_v62, %v1539_v39 }
 0xaca   : > { %v2435_v2 = vpop.eup %2434  ;;  %v1572_v6 = vmul.f32 %v2433_v63, %v1541_v43 }
 0xacb   : > { %v2437_v3 = vpop.eup %2436  ;;  %v1573_v5 = vmul.f32 %v2435_v2, %v1543_v48 }
 0xacc   : > { %v1574_v7 = vmul.f32 %v2437_v3, %v1545_v0 }
 0xacd   : > { %v1575_v8 = vpack.c.bf16 %v1573_v5, %v1571_v4 }
 0xace   : > { %v1576_v9 = vpack.c.bf16 %v1574_v7, %v1572_v6 }
 0xad0   : > { %1744 = vmatprep.mubr.bf16.mxu0 %v1576_v9 }
 0xad1   : > { %1745 = vmatmul.mubr.bf16.vlgmr.msra.gmra.mrb[16].mxu0 %v1575_v8 }
 0xba4   : > { %v2088_v10 = vpop.f32.mrb[16].mxu0 }
 0xba5   : > { %v2089_v12 = vpop.f32.mrb[17].mxu0 }
 0xba6   : > { %v2090_v13 = vadd.f32 %v2089_v12, %v2088_v10  ;;  %v2091_v14 = vpop.f32.mrb[18].mxu0 }
 0xba7   : > { %v2092_v22 = vpop.f32.mrb[19].mxu0 }
 0xba8   : > { %v1747_v15 = vadd.f32 %v2090_v13, %v2027_v11  ;;  %v2093_v16 = vadd.f32 %v2092_v22, %v2091_v14 }
 0xbaa   : > { %v1753_v17 = vadd.f32 %v1747_v15, %v3527_v38  ;;  %v1750_v18 = vadd.f32 %v2093_v16, %v2027_v11 }
 0xbac   : > { %1755 = vst.msk [vmem:[%s616_s15] sm:$0xff] %vm622_vm0, %v1753_v17  ;;  %v1754_v19 = vadd.f32 %v1750_v18, %v3530_v59 }
 0xbae   : > { %1756 = vst.msk [vmem:[%s616_s15 + $0x8] sm:$0xff] %vm622_vm0, %v1754_v19 }
 0xbaf   : > { %2817 = shalt.err (!%p2814_p11)
}
 0xbb0   : > { %s2818_s22 = scalar_lea.hbm %s3552_s0, 256  ;;  %s2822_s24 = scalar_lea.hbm %s3669_s20, 1536 }
 0xbb1   : > { %p2819_p5 = scmp.ne.s32.totalorder %s3552_s0, %s2818_s22  ;;  %p2823_p6 = scmp.lt.u32.totalorder %s3552_s0, %s3669_s20 }
 0xbb2   : > { %p2824_p9 = scmp.lt.u32.totalorder %s2822_s24, %s2818_s22  ;;  %p2826_p3 = scmp.lt.u32.totalorder %s2818_s22, %s3552_s0 }
 0xbb3   : > { %p2820_p12 = pnand %p2819_p5, %p3670_p7 }
 0xbb4   : > { %p2825_p1 = por %p2824_p9, %p2823_p6 }
 0xbb5   : > { %p2821_p4 = pneg %p2820_p12 }
 0xbb6   : > { %p2827_p13 = por %p2826_p3, %p2825_p1 }
 0xbb8   : > { %p2828_p0 = pnand %p2827_p13, %p2821_p4 }
 0xbba   : > { %2831 = shalt.err (!%p2828_p0)
}
 0xbbb   : > { %s2925_s2 = smov 128   ;;  %s2926_s1 = smov 8  }
 0xbbc   : > { %2204 = dma.vmem_to_hbm [thread:$0]  (%p3670_p7), %s3554_s30, 256, %s3552_s0, %s1758_s13, %s2925_s2, %s2925_s2, %s2926_s1  }
 0xbbd PF: > { %s3671_s14 = sld [smem:[#allocation33_spill]]  ;;  %p2276_p2 = scmp.ge.s32.totalorder %s2894_s28, 2 }
 0xbbe   : > { %p3672_p8 = scmp.ne.s32.totalorder %s3651_s29, 0 }
 0xbc0   : > { %p2248_p10 = pnand %p2276_p2, %p3672_p8 }
 0xbc3   : > { %s1786_s3 = sand.u32 1, %s3671_s14  }
 0xbc4   : > { %s1787_s22 = scalar_lea.sflag [#allocation5], %s1786_s3 }
 0xbc5   : > { %2877 = dma.done.wait (!%p2248_p10), %s1787_s22, 256  }
 0xbc6   : > { %2879 = vsyncadd (!%p2248_p10), %s1787_s22, 4294967040  ;;  %p32_p11 = scmp.ge.s32.totalorder %s3285_s18, 8   ;;  %s3673_s25 = smov %s2886_s26 }
 0xbc7   : > { %s3674_s26 = smov %s2890_s27  ;;  %s3675_s27 = smov %s3296_s23 }
 0xbc8   : > { %s3676_s28 = smov %s3285_s18  ;;  %34 = sbr.rel (!%p32_p11) target bundleno = 17 (0x11), region = 165 }
 0xbcf   :  { %1792 = vsyncpa [#allocation4], 1 }
 0xbd0   :  { %1794 = vsyncpa [#allocation4 + $0x1], 1 }
 0xbd1   :  { %1795 = vsyncpa [#allocation7], 1 }
 0xbd2   :  { %1796 = vsyncpa [#allocation10], 1 }
 0xbd3   :  { %1797 = vsyncpa [#allocation13], 1 }
 0xbd4   :  { %1798 = vsyncpa [#allocation16], 1 }
 0xbd5   :  { %1799 = vsyncpa [#allocation19], 1 }
 0xbd6   :  { %1800 = vsyncpa [#allocation22], 1 }
 0xbd7   :  { %1801 = vsyncpa [#allocation5], 1 }
 0xbd8   :  { %1803 = vsyncpa [#allocation5 + $0x1], 1 }

// kernel: custom_clip_forward.17
= control target key start
LH: loop header
LB: loop body
LE: loop exit
PB: predicated region body
PF: predicated region fallthrough
CT: control target
= control target key end

     0   :  { %s2571_s0 = inlined_call_operand.hbm [shape: f32[2,32], index: 0, kind: input, shape index: {}]   ;;  %s2572_s1 = inlined_call_operand.hbm [shape: f32[128,32], index: 1, kind: input, shape index: {}]   ;;  %s2573_s2 = inlined_call_operand.hbm [shape: f32[128,32], index: 2, kind: input, shape index: {}]   ;;  %s2574_s3 = inlined_call_operand.hbm [shape: f32[128,32], index: 3, kind: input, shape index: {}]   ;;  %s2575_s4 = inlined_call_operand.hbm [shape: f32[128,32], index: 4, kind: input, shape index: {}]   ;;  %s2576_s5 = inlined_call_operand.<no memory space> [shape: f32[1,1], index: 5, kind: input, shape index: {}]   ;;  %s2577_s6 = inlined_call_operand.hbm [shape: f32[2,128], index: 6, kind: output, shape index: {0}]   ;;  %s2578_s7 = inlined_call_operand.hbm [shape: f32[2,128], index: 7, kind: output, shape index: {1}]   ;;  %s2579_s8 = inlined_call_operand.hbm [shape: f32[1,128], index: 8, kind: output, shape index: {2}]  }
   0x1   :  { %v14_v0 = vstv %s2576_s5 }
   0x2   :  { %15 = vst [vmem:[#allocation2] sm:$0x1] %v14_v0 }
   0x3   :  { %16 = vsyncpa [#allocation4], 0 }
   0x4   :  { %17 = vsyncpa [#allocation7], 0 }
   0x5   :  { %18 = vsyncpa [#allocation10], 0 }
   0x6   :  { %19 = vsyncpa [#allocation5], 0 }
   0x7   :  { %20 = vsyncpa [#allocation14], 0  ;;  %s1783_s29 = smov [#allocation6]   ;;  %s1597_s11 = scalar_lea.hbm %s2572_s1, 2048 }
   0x8   :  { %s36_s30 = sshll.u32 %s1783_s29, 4  ;;  %p1598_p0 = scmp.ne.s32.totalorder %s2572_s1, %s1597_s11  ;;  %s37_s30 = int_to_ptr.vmem [resolvable:$true] %s36_s30 }
   0x9   :  { %p1601_p1 = scmp.lt.u32.totalorder %s1597_s11, %s2572_s1 }
   0xb   :  { %p1603_p2 = pnand %p1601_p1, %p1598_p0 }
   0xd   :  { %1606 = shalt.err (!%p1603_p2)
}
   0xe   :  { %s1607_s5 = scalar_lea.vmem %s37_s30, 2048  ;;  %p1612_p4 = scmp.lt.s32.totalorder %s37_s30, %s37_s30 }
   0xf   :  { %p1608_p3 = scmp.ne.s32.totalorder %s37_s30, %s1607_s5  ;;  %p1613_p5 = scmp.lt.s32.totalorder %s1607_s5, %s1607_s5 }
  0x11   :  { %p1614_p6 = por %p1613_p5, %p1612_p4 }
  0x13   :  { %p1615_p7 = pnand %p1614_p6, %p1608_p3 }
  0x15   :  { %1618 = shalt.err (!%p1615_p7)
}
  0x16   :  { %s1784_s16 = smov 128   ;;  %s1785_s17 = smov 8  }
  0x17   :  { %42 = dma.hbm_to_vmem [thread:$0]  %s2572_s1, 2048, %s37_s30, [#allocation7], %s1784_s16, %s1784_s16, %s1785_s17  }
  0x18   :  { %s1786_s20 = smov [#allocation9]   ;;  %s1787_s22 = smov [#allocation3]  }
  0x19   :  { %s60_s21 = sshll.u32 %s1786_s20, 4  ;;  %s27_s23 = sshll.u32 %s1787_s22, 4  ;;  %s61_s21 = int_to_ptr.vmem [resolvable:$true] %s60_s21  ;;  %s28_s23 = int_to_ptr.vmem [resolvable:$true] %s27_s23 }
  0x1a   :  { %s1619_s26 = scalar_lea.hbm %s2574_s3, 2048 }
  0x1b   :  { %p1620_p8 = scmp.ne.s32.totalorder %s2574_s3, %s1619_s26  ;;  %p1623_p9 = scmp.lt.u32.totalorder %s1619_s26, %s2574_s3 }
  0x1d   :  { %p1625_p10 = pnand %p1623_p9, %p1620_p8 }
  0x1f   :  { %1628 = shalt.err (!%p1625_p10)
}
  0x20   :  { %s1629_s1 = scalar_lea.vmem %s61_s21, 2048  ;;  %p1634_p12 = scmp.lt.s32.totalorder %s61_s21, %s61_s21 }
  0x21   :  { %p1630_p11 = scmp.ne.s32.totalorder %s61_s21, %s1629_s1  ;;  %p1635_p13 = scmp.lt.s32.totalorder %s1629_s1, %s1629_s1 }
  0x23   :  { %p1636_p0 = por %p1635_p13, %p1634_p12 }
  0x25   :  { %p1637_p1 = pnand %p1636_p0, %p1630_p11 }
  0x27   :  { %1640 = shalt.err (!%p1637_p1)
}
  0x28   :  { %66 = dma.hbm_to_vmem [thread:$0]  %s2574_s3, 2048, %s61_s21, [#allocation10], %s1784_s16, %s1784_s16, %s1785_s17  }
  0x29   :  { %s1641_s13 = scalar_lea.hbm %s2571_s0, 32 }
  0x2a   :  { %p1642_p2 = scmp.ne.s32.totalorder %s2571_s0, %s1641_s13  ;;  %p1645_p3 = scmp.lt.u32.totalorder %s1641_s13, %s2571_s0 }
  0x2c   :  { %p1647_p4 = pnand %p1645_p3, %p1642_p2 }
  0x2e   :  { %1650 = shalt.err (!%p1647_p4)
}
  0x2f   :  { %s1651_s19 = scalar_lea.vmem %s28_s23, 32  ;;  %p1656_p6 = scmp.lt.s32.totalorder %s28_s23, %s28_s23 }
  0x30   :  { %p1652_p5 = scmp.ne.s32.totalorder %s28_s23, %s1651_s19  ;;  %p1657_p7 = scmp.lt.s32.totalorder %s1651_s19, %s1651_s19 }
  0x32   :  { %p1658_p8 = por %p1657_p7, %p1656_p6 }
  0x34   :  { %p1659_p9 = pnand %p1658_p8, %p1652_p5 }
  0x36   :  { %1662 = shalt.err (!%p1659_p9)
}
  0x37   :  { %30 = dma.hbm_to_vmem [thread:$0]  %s2571_s0, 32, %s28_s23, [#allocation4]  }
  0x38   :  { %s1788_s21 = smov [#allocation8]   ;;  %s1789_s24 = smov [#allocation11]  }
  0x39   :  { %s48_s22 = sshll.u32 %s1788_s21, 4  ;;  %s72_s25 = sshll.u32 %s1789_s24, 4  ;;  %s49_s22 = int_to_ptr.vmem [resolvable:$true] %s48_s22  ;;  %s73_s25 = int_to_ptr.vmem [resolvable:$true] %s72_s25 }
  0x3a   :  { %s1663_s28 = scalar_lea.hbm %s2573_s2, 2048 }
  0x3b   :  { %p1664_p10 = scmp.ne.s32.totalorder %s2573_s2, %s1663_s28  ;;  %p1667_p11 = scmp.lt.u32.totalorder %s1663_s28, %s2573_s2 }
  0x3d   :  { %p1669_p12 = pnand %p1667_p11, %p1664_p10 }
  0x3f   :  { %1672 = shalt.err (!%p1669_p12)
}
  0x40   :  { %s1673_s0 = scalar_lea.vmem %s49_s22, 2048  ;;  %p1678_p0 = scmp.lt.s32.totalorder %s49_s22, %s49_s22 }
  0x41   :  { %p1674_p13 = scmp.ne.s32.totalorder %s49_s22, %s1673_s0  ;;  %p1679_p1 = scmp.lt.s32.totalorder %s1673_s0, %s1673_s0 }
  0x43   :  { %p1680_p2 = por %p1679_p1, %p1678_p0 }
  0x45   :  { %p1681_p3 = pnand %p1680_p2, %p1674_p13 }
  0x47   :  { %1684 = shalt.err (!%p1681_p3)
}
  0x48   :  { %54 = dma.hbm_to_vmem [thread:$0]  %s2573_s2, 2048, %s49_s22, [#allocation7], %s1784_s16, %s1784_s16, %s1785_s17  }
  0x49   :  { %s1685_s13 = scalar_lea.hbm %s2575_s4, 2048 }
  0x4a   :  { %p1686_p4 = scmp.ne.s32.totalorder %s2575_s4, %s1685_s13  ;;  %p1689_p5 = scmp.lt.u32.totalorder %s1685_s13, %s2575_s4 }
  0x4c   :  { %p1691_p6 = pnand %p1689_p5, %p1686_p4 }
  0x4e   :  { %1694 = shalt.err (!%p1691_p6)
}
  0x4f   :  { %s1695_s19 = scalar_lea.vmem %s73_s25, 2048  ;;  %p1700_p8 = scmp.lt.s32.totalorder %s73_s25, %s73_s25 }
  0x50   :  { %p1696_p7 = scmp.ne.s32.totalorder %s73_s25, %s1695_s19  ;;  %p1701_p9 = scmp.lt.s32.totalorder %s1695_s19, %s1695_s19 }
  0x52   :  { %p1702_p10 = por %p1701_p9, %p1700_p8 }
  0x54   :  { %p1703_p11 = pnand %p1702_p10, %p1696_p7 }
  0x56   :  { %1706 = shalt.err (!%p1703_p11)
}
  0x57   :  { %78 = dma.hbm_to_vmem [thread:$0]  %s2575_s4, 2048, %s73_s25, [#allocation10], %s1784_s16, %s1784_s16, %s1785_s17  }
  0x58   :  { %1773 = dma.done.wait [#allocation4], 32  }
  0x59   :  { %1774 = vsyncadd [#allocation4], 4294967264 }
  0x5a   :  { %1775 = dma.done.wait [#allocation7], 4096  }
  0x5b   :  { %1776 = vsyncadd [#allocation7], 4294963200 }
  0x5c   :  { %1777 = dma.done.wait [#allocation10], 4096  }
  0x5d   :  { %1778 = vsyncadd [#allocation10], 4294963200  ;;  %vm137_vm0 = vcmask 261120   ;;  %v1917_v1 = vld [vmem:[#allocation8] sm:$0xff]  ;;  %v1921_v3 = vld [vmem:[#allocation8 + $0x8] sm:$0xff]  ;;  %vm98_vm1 = vcmask 254976  }
  0x5e   :  { %v1919_v2 = vld [vmem:[#allocation6] sm:$0xff]  ;;  %v250_v4 = vmul.f32 %v1917_v1, %v1917_v1  ;;  %v251_v6 = vmul.f32 %v1921_v3, %v1921_v3  ;;  %v1929_v7 = vld [vmem:[#allocation6 + $0x8] sm:$0xff]  ;;  %v1933_v9 = vld [vmem:[#allocation8 + $0x10] sm:$0xff]  ;;  %vm1791_vm2 = vmmov 0   ;;  %s1794_s4 = smov [#allocation13]   ;;  %s1795_s17 = smov [#allocation12]  }
  0x5f   :  { %v121_v5 = vmul.f32 %v1919_v2, %v1919_v2  ;;  %v122_v8 = vmul.f32 %v1929_v7, %v1929_v7  ;;  %v1935_v10 = vld [vmem:[#allocation8 + $0x18] sm:$0xff]  ;;  %v252_v15 = vmul.f32 %v1933_v9, %v1933_v9  ;;  %v1945_v17 = vld [vmem:[#allocation6 + $0x10] sm:$0xff]  ;;  %v1955_v23 = vld [vmem:[#allocation8 + $0x20] sm:$0xff]  ;;  %s1217_s16 = sshll.u32 %s1794_s4, 4  ;;  %s1207_s20 = sshll.u32 %s1795_s17, 4  ;;  %s1218_s16 = int_to_ptr.vmem [resolvable:$true] %s1217_s16  ;;  %s2527_s20 = int_to_ptr.vmem [resolvable:$true] %s1207_s20 }
  0x60   :  { %v266_v11 = vsel %vm137_vm0, %v250_v4, 0.0  ;;  %v269_v13 = vsel %vm137_vm0, %v251_v6, 0.0  ;;  %v253_v16 = vmul.f32 %v1935_v10, %v1935_v10  ;;  %v1947_v18 = vld [vmem:[#allocation6 + $0x18] sm:$0xff]  ;;  %v123_v21 = vmul.f32 %v1945_v17, %v1945_v17  ;;  %v1957_v24 = vld [vmem:[#allocation8 + $0x28] sm:$0xff]  ;;  %v1965_v29 = vld [vmem:[#allocation6 + $0x20] sm:$0xff]  ;;  %s1707_s21 = scalar_lea.vmem %s1218_s16, 32  ;;  %p1712_p13 = scmp.lt.s32.totalorder %s1218_s16, %s1218_s16 }
  0x61   :  { %v138_v12 = vsel %vm137_vm0, %v121_v5, 0.0  ;;  %267 = vadd.xlane.f32.xlu0 %v266_v11  ;;  %v141_v14 = vsel %vm137_vm0, %v122_v8, 0.0  ;;  %v272_v19 = vsel %vm137_vm0, %v252_v15, 0.0  ;;  %v124_v22 = vmul.f32 %v1947_v18, %v1947_v18  ;;  %v1967_v30 = vld [vmem:[#allocation6 + $0x28] sm:$0xff]  ;;  %v1975_v35 = vld [vmem:[#allocation8 + $0x30] sm:$0xff]  ;;  %v1977_v36 = vld [vmem:[#allocation8 + $0x38] sm:$0xff]  ;;  %p1708_p12 = scmp.ne.s32.totalorder %s1218_s16, %s1707_s21  ;;  %p1713_p0 = scmp.lt.s32.totalorder %s1707_s21, %s1707_s21 }
  0x62   :  { %139 = vadd.xlane.f32.xlu1 %v138_v12  ;;  %v275_v20 = vsel %vm137_vm0, %v253_v16, 0.0  ;;  %v144_v25 = vsel %vm137_vm0, %v123_v21, 0.0  ;;  %v254_v27 = vmul.f32 %v1955_v23, %v1955_v23  ;;  %v255_v28 = vmul.f32 %v1957_v24, %v1957_v24  ;;  %v1985_v41 = vld [vmem:[#allocation6 + $0x30] sm:$0xff]  ;;  %v1987_v42 = vld [vmem:[#allocation6 + $0x38] sm:$0xff]  ;;  %v1995_v47 = vld [vmem:[#allocation8 + $0x40] sm:$0xff] }
  0x63   :  { %v147_v26 = vsel %vm137_vm0, %v124_v22, 0.0  ;;  %v125_v33 = vmul.f32 %v1965_v29, %v1965_v29  ;;  %v126_v34 = vmul.f32 %v1967_v30, %v1967_v30  ;;  %v256_v39 = vmul.f32 %v1975_v35, %v1975_v35  ;;  %v1997_v48 = vld [vmem:[#allocation8 + $0x48] sm:$0xff]  ;;  %v2005_v53 = vld [vmem:[#allocation6 + $0x40] sm:$0xff]  ;;  %v2015_v59 = vld [vmem:[#allocation8 + $0x50] sm:$0xff]  ;;  %p1714_p1 = por %p1713_p0, %p1712_p13 }
  0x64   :  { %v278_v31 = vsel %vm137_vm0, %v254_v27, 0.0  ;;  %v281_v32 = vsel %vm137_vm0, %v255_v28, 0.0  ;;  %v257_v40 = vmul.f32 %v1977_v36, %v1977_v36  ;;  %v127_v45 = vmul.f32 %v1985_v41, %v1985_v41  ;;  %v2007_v54 = vld [vmem:[#allocation6 + $0x48] sm:$0xff]  ;;  %v2017_v60 = vld [vmem:[#allocation8 + $0x58] sm:$0xff]  ;;  %v2025_v4 = vld [vmem:[#allocation6 + $0x50] sm:$0xff] }
  0x65   :  { %270 = vadd.xlane.f32.xlu0 %v269_v13  ;;  %v150_v37 = vsel %vm137_vm0, %v125_v33, 0.0  ;;  %v153_v38 = vsel %vm137_vm0, %v126_v34, 0.0  ;;  %v284_v43 = vsel %vm137_vm0, %v256_v39, 0.0  ;;  %v128_v46 = vmul.f32 %v1987_v42, %v1987_v42  ;;  %v2027_v5 = vld [vmem:[#allocation6 + $0x58] sm:$0xff]  ;;  %v2039_v15 = vld [vmem:[#allocation8 + $0x68] sm:$0xff]  ;;  %v2047_v22 = vld [vmem:[#allocation6 + $0x60] sm:$0xff]  ;;  %p1715_p2 = pnand %p1714_p1, %p1708_p12 }
  0x66   :  { %142 = vadd.xlane.f32.xlu1 %v141_v14  ;;  %v287_v44 = vsel %vm137_vm0, %v257_v40, 0.0  ;;  %v156_v49 = vsel %vm137_vm0, %v127_v45, 0.0  ;;  %v258_v51 = vmul.f32 %v1995_v47, %v1995_v47  ;;  %v259_v52 = vmul.f32 %v1997_v48, %v1997_v48  ;;  %v2037_v14 = vld [vmem:[#allocation8 + $0x60] sm:$0xff]  ;;  %v2059_v33 = vld [vmem:[#allocation8 + $0x78] sm:$0xff]  ;;  %v2067_v40 = vld [vmem:[#allocation6 + $0x70] sm:$0xff] }
  0x67   :  { %v159_v50 = vsel %vm137_vm0, %v128_v46, 0.0  ;;  %v129_v57 = vmul.f32 %v2005_v53, %v2005_v53  ;;  %v130_v58 = vmul.f32 %v2007_v54, %v2007_v54  ;;  %v260_v63 = vmul.f32 %v2015_v59, %v2015_v59  ;;  %vm2259_vm3 = vmpackc.low %vm137_vm0, %vm137_vm0 }
  0x68   :  { %v290_v55 = vsel %vm137_vm0, %v258_v51, 0.0  ;;  %v293_v56 = vsel %vm137_vm0, %v259_v52, 0.0  ;;  %v261_v0 = vmul.f32 %v2017_v60, %v2017_v60  ;;  %v2580_v6 = vmov 0.0|0.0   ;;  %v2079_v51 = vld [vmem:[#allocation3] sm:$0x3] }
  0x69   :  { %273 = vadd.xlane.f32.xlu0 %v272_v19  ;;  %v162_v61 = vsel %vm137_vm0, %v129_v57, 0.0  ;;  %v165_v62 = vsel %vm137_vm0, %v130_v58, 0.0  ;;  %1385 = vmatprep.subr.bf16.mxu0 %v2580_v6  ;;  %v296_v8 = vsel %vm137_vm0, %v260_v63, 0.0  ;;  %v131_v12 = vmul.f32 %v2025_v4, %v2025_v4  ;;  %v2087_v58 = vld [vmem:[#allocation9] sm:$0xff] }
  0x6a   :  { %276 = vadd.xlane.f32.xlu1 %v275_v20  ;;  %1417 = vmatprep.subr.bf16.mxu1 %v2580_v6  ;;  %v299_v11 = vsel %vm137_vm0, %v261_v0, 0.0  ;;  %v132_v13 = vmul.f32 %v2027_v5, %v2027_v5  ;;  %v262_v20 = vmul.f32 %v2037_v14, %v2037_v14  ;;  %v263_v21 = vmul.f32 %v2039_v15, %v2039_v15  ;;  %v2188_v6 = vld [vmem:[#allocation9 + $0x50] sm:$0xff] }
  0x6b   :  { %v168_v16 = vsel %vm137_vm0, %v131_v12, 0.0  ;;  %v133_v28 = vmul.f32 %v2047_v22, %v2047_v22  ;;  %v265_v39 = vmul.f32 %v2059_v33, %v2059_v33  ;;  %v135_v46 = vmul.f32 %v2067_v40, %v2067_v40  ;;  %v2098_v12 = vld [vmem:[#allocation9 + $0x8] sm:$0xff]  ;;  %2609 = vst [vmem:[#allocation28_spill] sm:$0xff] %v2188_v6 }
  0x6c   :  { %v171_v19 = vsel %vm137_vm0, %v132_v13, 0.0  ;;  %v305_v27 = vsel %vm137_vm0, %v263_v21, 0.0  ;;  %v97_v57 = vmul.f32 %v2079_v51, %v2079_v51  ;;  %v378_v0 = vmul.f32 %v2087_v58, %v2087_v58  ;;  %v2106_v21 = vld [vmem:[#allocation11 + $0x18] sm:$0xff] }
  0x6d   :  { %145 = vadd.xlane.f32.xlu0 %v144_v25  ;;  %v2049_v25 = vld [vmem:[#allocation6 + $0x68] sm:$0xff]  ;;  %v174_v34 = vsel %vm137_vm0, %v133_v28, 0.0  ;;  %v311_v45 = vsel %vm137_vm0, %v265_v39, 0.0  ;;  %v180_v52 = vsel %vm137_vm0, %v135_v46, 0.0 }
  0x6e   :  { %148 = vadd.xlane.f32.xlu1 %v147_v26  ;;  %v302_v26 = vsel %vm137_vm0, %v262_v20, 0.0  ;;  %v99_v63 = vsel %vm98_vm1, %v97_v57, 0.0  ;;  %v394_v13 = vsel %vm137_vm0, %v378_v0, 0.0  ;;  %v379_v20 = vmul.f32 %v2098_v12, %v2098_v12  ;;  %v2138_v0 = vld [vmem:[#allocation9 + $0x28] sm:$0xff] }
  0x70   :  { %v397_v28 = vsel %vm137_vm0, %v379_v20, 0.0  ;;  %v2146_v20 = vld [vmem:[#allocation11 + $0x38] sm:$0xff] }
  0x71   :  { %279 = vadd.xlane.f32.xlu0 %v278_v31  ;;  %v134_v31 = vmul.f32 %v2049_v25, %v2049_v25 }
  0x72   :  { %282 = vadd.xlane.f32.xlu1 %v281_v32  ;;  %v2057_v32 = vld [vmem:[#allocation8 + $0x70] sm:$0xff] }
  0x75   :  { %151 = vadd.xlane.f32.xlu0 %v150_v37  ;;  %v177_v37 = vsel %vm137_vm0, %v134_v31, 0.0  ;;  %v509_v31 = vmul.f32 %v2106_v21, %v2106_v21 }
  0x76   :  { %154 = vadd.xlane.f32.xlu1 %v153_v38  ;;  %v264_v38 = vmul.f32 %v2057_v32, %v2057_v32 }
  0x77   :  { %v531_v39 = vsel %vm137_vm0, %v509_v31, 0.0 }
  0x79   :  { %285 = vadd.xlane.f32.xlu0 %v284_v43  ;;  %v2069_v43 = vld [vmem:[#allocation6 + $0x78] sm:$0xff] }
  0x7a   :  { %288 = vadd.xlane.f32.xlu1 %v287_v44  ;;  %v308_v44 = vsel %vm137_vm0, %v264_v38, 0.0  ;;  %v2118_v38 = vld [vmem:[#allocation9 + $0x18] sm:$0xff] }
  0x7b   :  { %v381_v46 = vmul.f32 %v2118_v38, %v2118_v38 }
  0x7d   :  { %157 = vadd.xlane.f32.xlu0 %v156_v49  ;;  %v136_v49 = vmul.f32 %v2069_v43, %v2069_v43 }
  0x7e   :  { %160 = vadd.xlane.f32.xlu1 %v159_v50  ;;  %v2077_v50 = vld [vmem:[#allocation11] sm:$0xff] }
  0x81   :  { %291 = vadd.xlane.f32.xlu0 %v290_v55  ;;  %v183_v55 = vsel %vm137_vm0, %v136_v49, 0.0  ;;  %v2126_v49 = vld [vmem:[#allocation11 + $0x28] sm:$0xff] }
  0x82   :  { %294 = vadd.xlane.f32.xlu1 %v293_v56  ;;  %v506_v56 = vmul.f32 %v2077_v50, %v2077_v50  ;;  %v511_v57 = vmul.f32 %v2126_v49, %v2126_v49 }
  0x85   :  { %163 = vadd.xlane.f32.xlu0 %v162_v61  ;;  %v2089_v61 = vld [vmem:[#allocation11 + $0x8] sm:$0xff] }
  0x86   :  { %166 = vadd.xlane.f32.xlu1 %v165_v62  ;;  %v522_v62 = vsel %vm137_vm0, %v506_v56, 0.0  ;;  %v403_v56 = vsel %vm137_vm0, %v381_v46, 0.0 }
  0x89   :  { %297 = vadd.xlane.f32.xlu0 %v296_v8  ;;  %v507_v8 = vmul.f32 %v2089_v61, %v2089_v61 }
  0x8a   :  { %300 = vadd.xlane.f32.xlu1 %v299_v11  ;;  %v2096_v11 = vld [vmem:[#allocation11 + $0x10] sm:$0xff] }
  0x8d   :  { %169 = vadd.xlane.f32.xlu0 %v168_v16  ;;  %v525_v16 = vsel %vm137_vm0, %v507_v8, 0.0  ;;  %v537_v8 = vsel %vm137_vm0, %v511_v57, 0.0 }
  0x8e   :  { %172 = vadd.xlane.f32.xlu1 %v171_v19  ;;  %v508_v19 = vmul.f32 %v2096_v11, %v2096_v11 }
  0x91   :  { %303 = vadd.xlane.f32.xlu0 %v302_v26  ;;  %v2108_v26 = vld [vmem:[#allocation9 + $0x10] sm:$0xff] }
  0x92   :  { %306 = vadd.xlane.f32.xlu1 %v305_v27  ;;  %v528_v27 = vsel %vm137_vm0, %v508_v19, 0.0  ;;  %v383_v19 = vmul.f32 %v2138_v0, %v2138_v0 }
  0x94   :  { %v409_v31 = vsel %vm137_vm0, %v383_v19, 0.0 }
  0x95   :  { %175 = vadd.xlane.f32.xlu0 %v174_v34  ;;  %v380_v34 = vmul.f32 %v2108_v26, %v2108_v26 }
  0x96   :  { %178 = vadd.xlane.f32.xlu1 %v177_v37  ;;  %v2116_v37 = vld [vmem:[#allocation11 + $0x20] sm:$0xff] }
  0x99   :  { %309 = vadd.xlane.f32.xlu0 %v308_v44  ;;  %v400_v44 = vsel %vm137_vm0, %v380_v34, 0.0  ;;  %v513_v34 = vmul.f32 %v2146_v20, %v2146_v20 }
  0x9a   :  { %312 = vadd.xlane.f32.xlu1 %v311_v45  ;;  %v510_v45 = vmul.f32 %v2116_v37, %v2116_v37 }
  0x9b   :  { %v543_v46 = vsel %vm137_vm0, %v513_v34, 0.0  ;;  %v2178_v34 = vld [vmem:[#allocation9 + $0x48] sm:$0xff] }
  0x9c   :  { %2607 = vst [vmem:[#allocation26_spill] sm:$0xff] %v2178_v34 }
  0x9d   :  { %181 = vadd.xlane.f32.xlu0 %v180_v52  ;;  %v2128_v52 = vld [vmem:[#allocation9 + $0x20] sm:$0xff] }
  0x9e   :  { %184 = vadd.xlane.f32.xlu1 %v183_v55  ;;  %v534_v55 = vsel %vm137_vm0, %v510_v45, 0.0  ;;  %v2158_v45 = vld [vmem:[#allocation9 + $0x38] sm:$0xff] }
  0x9f   :  { %2603 = vst [vmem:[#allocation22_spill] sm:$0xff] %v2158_v45  ;;  %v385_v57 = vmul.f32 %v2158_v45, %v2158_v45 }
  0xa1   :  { %100 = vadd.xlane.f32.xlu0 %v99_v63  ;;  %v2136_v63 = vld [vmem:[#allocation11 + $0x30] sm:$0xff] }
  0xa2   :  { %523 = vadd.xlane.f32.xlu1 %v522_v62  ;;  %v382_v62 = vmul.f32 %v2128_v52, %v2128_v52 }
  0xa5   :  { %526 = vadd.xlane.f32.xlu0 %v525_v16  ;;  %v512_v16 = vmul.f32 %v2136_v63, %v2136_v63 }
  0xa6   :  { %395 = vadd.xlane.f32.xlu1 %v394_v13  ;;  %v406_v13 = vsel %vm137_vm0, %v382_v62, 0.0  ;;  %v2166_v62 = vld [vmem:[#allocation11 + $0x48] sm:$0xff] }
  0xa7   :  { %2604 = vst [vmem:[#allocation23_spill] sm:$0xff] %v2166_v62  ;;  %v515_v19 = vmul.f32 %v2166_v62, %v2166_v62 }
  0xa9   :  { %398 = vadd.xlane.f32.xlu0 %v397_v28  ;;  %v540_v28 = vsel %vm137_vm0, %v512_v16, 0.0  ;;  %v415_v16 = vsel %vm137_vm0, %v385_v57, 0.0  ;;  %v2186_v57 = vld [vmem:[#allocation11 + $0x58] sm:$0xff] }
  0xaa   :  { %529 = vadd.xlane.f32.xlu1 %v528_v27  ;;  %v2148_v27 = vld [vmem:[#allocation9 + $0x30] sm:$0xff]  ;;  %2608 = vst [vmem:[#allocation27_spill] sm:$0xff] %v2186_v57 }
  0xad   :  { %401 = vadd.xlane.f32.xlu0 %v400_v44  ;;  %v2156_v44 = vld [vmem:[#allocation11 + $0x40] sm:$0xff] }
  0xae   :  { %532 = vadd.xlane.f32.xlu1 %v531_v39  ;;  %v384_v39 = vmul.f32 %v2148_v27, %v2148_v27  ;;  %2602 = vst [vmem:[#allocation21_spill] sm:$0xff] %v2156_v44 }
  0xb1   :  { %404 = vadd.xlane.f32.xlu0 %v403_v56  ;;  %v514_v56 = vmul.f32 %v2156_v44, %v2156_v44 }
  0xb2   :  { %535 = vadd.xlane.f32.xlu1 %v534_v55  ;;  %v412_v55 = vsel %vm137_vm0, %v384_v39, 0.0 }
  0xb5   :  { %407 = vadd.xlane.f32.xlu0 %v406_v13  ;;  %v546_v13 = vsel %vm137_vm0, %v514_v56, 0.0 }
  0xb6   :  { %538 = vadd.xlane.f32.xlu1 %v537_v8  ;;  %v2168_v8 = vld [vmem:[#allocation9 + $0x40] sm:$0xff] }
  0xb7   :  { %2605 = vst [vmem:[#allocation24_spill] sm:$0xff] %v2168_v8 }
  0xb9   :  { %410 = vadd.xlane.f32.xlu0 %v409_v31  ;;  %v2176_v31 = vld [vmem:[#allocation11 + $0x50] sm:$0xff] }
  0xba   :  { %541 = vadd.xlane.f32.xlu1 %v540_v28  ;;  %v386_v28 = vmul.f32 %v2168_v8, %v2168_v8  ;;  %2606 = vst [vmem:[#allocation25_spill] sm:$0xff] %v2176_v31  ;;  %v516_v39 = vmul.f32 %v2176_v31, %v2176_v31  ;;  %v2585_v8 = vmov 0.0   ;;  %v2200_v31 = vld [vmem:[#allocation9 + $0x58] sm:$0xff] }
  0xbb   :  { %1347 = vmatprep.mubr.msk.f32.mxu0 %vm1791_vm2, %v2585_v8  ;;  %1382 = vmatprep.mubr.msk.f32.mxu1 %vm1791_vm2, %v2585_v8  ;;  %2611 = vst [vmem:[#allocation30_spill] sm:$0xff] %v2200_v31 }
  0xbc   :  { %v418_v56 = vsel %vm137_vm0, %v386_v28, 0.0  ;;  %v388_v28 = vmul.f32 %v2188_v6, %v2188_v6 }
  0xbd   :  { %413 = vadd.xlane.f32.xlu0 %v412_v55  ;;  %v549_v55 = vsel %vm137_vm0, %v515_v19, 0.0  ;;  %v517_v19 = vmul.f32 %v2186_v57, %v2186_v57  ;;  %v2210_v57 = vld [vmem:[#allocation9 + $0x60] sm:$0xff] }
  0xbe   :  { %544 = vadd.xlane.f32.xlu1 %v543_v46  ;;  %v387_v46 = vmul.f32 %v2178_v34, %v2178_v34  ;;  %v2198_v34 = vld [vmem:[#allocation11 + $0x60] sm:$0xff]  ;;  %2613 = vst [vmem:[#allocation32_spill] sm:$0xff] %v2210_v57 }
  0xbf   :  { %2610 = vst [vmem:[#allocation29_spill] sm:$0xff] %v2198_v34  ;;  %v555_v8 = vsel %vm137_vm0, %v517_v19, 0.0  ;;  %v390_v19 = vmul.f32 %v2210_v57, %v2210_v57 }
  0xc1   :  { %416 = vadd.xlane.f32.xlu0 %v415_v16  ;;  %v421_v16 = vsel %vm137_vm0, %v387_v46, 0.0  ;;  %v389_v46 = vmul.f32 %v2200_v31, %v2200_v31 }
  0xc2   :  { %547 = vadd.xlane.f32.xlu1 %v546_v13  ;;  %v552_v13 = vsel %vm137_vm0, %v516_v39, 0.0  ;;  %v518_v39 = vmul.f32 %v2198_v34, %v2198_v34  ;;  %v2220_v34 = vld [vmem:[#allocation9 + $0x68] sm:$0xff] }
  0xc3   :  { %2615 = vst [vmem:[#allocation34_spill] sm:$0xff] %v2220_v34 }
  0xc4   :  { %v558_v6 = vsel %vm137_vm0, %v518_v39, 0.0  ;;  %v391_v39 = vmul.f32 %v2220_v34, %v2220_v34 }
  0xc5   :  { %419 = vadd.xlane.f32.xlu0 %v418_v56  ;;  %v2208_v56 = vld [vmem:[#allocation11 + $0x68] sm:$0xff] }
  0xc6   :  { %550 = vadd.xlane.f32.xlu1 %v549_v55  ;;  %v424_v55 = vsel %vm137_vm0, %v388_v28, 0.0  ;;  %2612 = vst [vmem:[#allocation31_spill] sm:$0xff] %v2208_v56  ;;  %v2218_v28 = vld [vmem:[#allocation11 + $0x70] sm:$0xff] }
  0xc7   :  { %2614 = vst [vmem:[#allocation33_spill] sm:$0xff] %v2218_v28 }
  0xc9   :  { %422 = vadd.xlane.f32.xlu0 %v421_v16  ;;  %v519_v16 = vmul.f32 %v2208_v56, %v2208_v56  ;;  %v2230_v56 = vld [vmem:[#allocation9 + $0x70] sm:$0xff] }
  0xca   :  { %553 = vadd.xlane.f32.xlu1 %v552_v13  ;;  %v427_v13 = vsel %vm137_vm0, %v389_v46, 0.0  ;;  %v2228_v46 = vld [vmem:[#allocation11 + $0x78] sm:$0xff]  ;;  %2617 = vst [vmem:[#allocation36_spill] sm:$0xff] %v2230_v56 }
  0xcb   :  { %v561_v31 = vsel %vm137_vm0, %v519_v16, 0.0  ;;  %2616 = vst [vmem:[#allocation35_spill] sm:$0xff] %v2228_v46  ;;  %v392_v16 = vmul.f32 %v2230_v56, %v2230_v56 }
  0xcd   :  { %425 = vadd.xlane.f32.xlu0 %v424_v55  ;;  %v520_v55 = vmul.f32 %v2218_v28, %v2218_v28  ;;  %v436_v28 = vsel %vm137_vm0, %v392_v16, 0.0 }
  0xce   :  { %556 = vadd.xlane.f32.xlu1 %v555_v8  ;;  %v430_v8 = vsel %vm137_vm0, %v390_v19, 0.0  ;;  %v2238_v19 = vld [vmem:[#allocation9 + $0x78] sm:$0xff] }
  0xcf   :  { %v564_v57 = vsel %vm137_vm0, %v520_v55, 0.0  ;;  %2618 = vst [vmem:[#allocation37_spill] sm:$0xff] %v2238_v19 }
  0xd1   :  { %428 = vadd.xlane.f32.xlu0 %v427_v13  ;;  %v521_v13 = vmul.f32 %v2228_v46, %v2228_v46 }
  0xd2   :  { %559 = vadd.xlane.f32.xlu1 %v558_v6  ;;  %v433_v6 = vsel %vm137_vm0, %v391_v39, 0.0 }
  0xd3   :  { %v567_v34 = vsel %vm137_vm0, %v521_v13, 0.0 }
  0xd5   :  { %431 = vadd.xlane.f32.xlu0 %v430_v8 }
  0xd6   :  { %562 = vadd.xlane.f32.xlu1 %v561_v31  ;;  %v393_v31 = vmul.f32 %v2238_v19, %v2238_v19 }
  0xd8   :  { %v439_v8 = vsel %vm137_vm0, %v393_v31, 0.0 }
  0xd9   :  { %434 = vadd.xlane.f32.xlu0 %v433_v6 }
  0xda   :  { %565 = vadd.xlane.f32.xlu1 %v564_v57 }
  0xdd   :  { %437 = vadd.xlane.f32.xlu0 %v436_v28 }
  0xde   :  { %568 = vadd.xlane.f32.xlu1 %v567_v34 }
  0xe1   :  { %440 = vadd.xlane.f32.xlu0 %v439_v8 }
  0xee   :  { %v268_v55 = vpop.xlane.xlu0 %267 }
  0xef   :  { %v140_v39 = vpop.xlane.xlu1 %139  ;;  %v314_v46 = vmax.f32 %v268_v55, 1e-12 }
  0xf0   :  { %v186_v56 = vmax.f32 %v140_v39, 1e-12 }
  0xf2   :  { %1465 = vrsqrt.f32 %v186_v56  ;;  %v271_v62 = vpop.xlane.xlu0 %270 }
  0xf3   :  { %v143_v57 = vpop.xlane.xlu1 %142  ;;  %1467 = vrsqrt.f32 %v314_v46  ;;  %v315_v6 = vmax.f32 %v271_v62, 1e-12 }
  0xf4   :  { %v187_v13 = vmax.f32 %v143_v57, 1e-12 }
  0xf5   :  { %1469 = vrsqrt.f32 %v315_v6 }
  0xf6   :  { %1471 = vrsqrt.f32 %v187_v13  ;;  %v274_v16 = vpop.xlane.xlu0 %273 }
  0xf7   :  { %v277_v45 = vpop.xlane.xlu1 %276  ;;  %v316_v19 = vmax.f32 %v274_v16, 1e-12 }
  0xf8   :  { %v317_v34 = vmax.f32 %v277_v45, 1e-12 }
  0xf9   :  { %1473 = vrsqrt.f32 %v316_v19 }
  0xfa   :  { %1475 = vrsqrt.f32 %v317_v34  ;;  %v146_v28 = vpop.xlane.xlu0 %145 }
  0xfb   :  { %v149_v31 = vpop.xlane.xlu1 %148  ;;  %v188_v8 = vmax.f32 %v146_v28, 1e-12 }
  0xfc   :  { %v189_v44 = vmax.f32 %v149_v31, 1e-12  ;;  %v1466_v55 = vpop.eup %1465 }
  0xfd   :  { %v1468_v39 = vpop.eup %1467  ;;  %1477 = vrsqrt.f32 %v188_v8  ;;  %v2246_v13 = vmul.f32 %v1466_v55, %v1919_v2 }
  0xfe   :  { %1479 = vrsqrt.f32 %v189_v44  ;;  %v280_v56 = vpop.xlane.xlu0 %279  ;;  %v2249_v45 = vmul.f32 %v1468_v39, %v1917_v1 }
  0xff   :  { %v283_v46 = vpop.xlane.xlu1 %282  ;;  %v1470_v62 = vpop.eup %1469  ;;  %v318_v57 = vmax.f32 %v280_v56, 1e-12  ;;  %v2621_v56 = vmov 0.0|0.0  }
 0x100   :  { %v319_v6 = vmax.f32 %v283_v46, 1e-12  ;;  %v1472_v16 = vpop.eup %1471  ;;  %v2252_v19 = vmul.f32 %v1470_v62, %v1921_v3 }
 0x101   :  { %1481 = vrsqrt.f32 %v318_v57  ;;  %v2255_v34 = vmul.f32 %v1472_v16, %v1929_v7  ;;  %v1793_v7 = vmov 0  }
 0x102   :  { %1483 = vrsqrt.f32 %v319_v6  ;;  %v152_v2 = vpop.xlane.xlu0 %151  ;;  %v1418_v1 = vpack.c.bf16 %v2252_v19, %v2249_v45  ;;  %1463 = vset.pattern.permute.xlu1 %v1793_v7  ;;  %1464 = vset.pattern.permute.xlu0 %v1793_v7 }
 0x103   :  { %v155_v28 = vpop.xlane.xlu1 %154  ;;  %v1474_v31 = vpop.eup %1473  ;;  %v190_v8 = vmax.f32 %v152_v2, 1e-12  ;;  %v1386_v55 = vpack.c.bf16 %v2255_v34, %v2246_v13 }
 0x104   :  { %v191_v3 = vmax.f32 %v155_v28, 1e-12  ;;  %v1476_v39 = vpop.eup %1475  ;;  %1420 = vmatpush3.bf16.xpose.msk.msra.mxu1 %vm2259_vm3, %v1418_v1  ;;  %v2274_v57 = vmul.f32 %v1474_v31, %v1933_v9 }
 0x105   :  { %1485 = vrsqrt.f32 %v190_v8  ;;  %1388 = vmatpush3.bf16.xpose.msk.msra.mxu0 %vm2259_vm3, %v1386_v55  ;;  %1421 = vmatprep.subr.bf16.mxu1 %v2621_v56  ;;  %v2277_v6 = vmul.f32 %v1476_v39, %v1935_v10 }
 0x106   :  { %1487 = vrsqrt.f32 %v191_v3  ;;  %v286_v46 = vpop.xlane.xlu0 %285  ;;  %1389 = vmatprep.subr.bf16.mxu0 %v2621_v56 }
 0x107   :  { %v289_v62 = vpop.xlane.xlu1 %288  ;;  %v1478_v16 = vpop.eup %1477  ;;  %v320_v2 = vmax.f32 %v286_v46, 1e-12  ;;  %v1422_v9 = vpack.c.bf16 %v2277_v6, %v2274_v57 }
 0x108   :  { %v321_v28 = vmax.f32 %v289_v62, 1e-12  ;;  %v1480_v1 = vpop.eup %1479  ;;  %v2280_v8 = vmul.f32 %v1478_v16, %v1945_v17 }
 0x109   :  { %1489 = vrsqrt.f32 %v320_v2  ;;  %v2283_v3 = vmul.f32 %v1480_v1, %v1947_v18 }
 0x10a   :  { %1491 = vrsqrt.f32 %v321_v28  ;;  %v158_v55 = vpop.xlane.xlu0 %157 }
 0x10b   :  { %v161_v7 = vpop.xlane.xlu1 %160  ;;  %v1482_v31 = vpop.eup %1481  ;;  %v192_v10 = vmax.f32 %v158_v55, 1e-12  ;;  %v1390_v46 = vpack.c.bf16 %v2283_v3, %v2280_v8 }
 0x10c   :  { %v193_v39 = vmax.f32 %v161_v7, 1e-12  ;;  %v1484_v62 = vpop.eup %1483  ;;  %1424 = vmatpush3.bf16.xpose.msk.msra.mxu1 %vm2259_vm3, %v1422_v9  ;;  %v2296_v16 = vmul.f32 %v1482_v31, %v1955_v23 }
 0x10d   :  { %1493 = vrsqrt.f32 %v192_v10  ;;  %1392 = vmatpush3.bf16.xpose.msk.msra.mxu0 %vm2259_vm3, %v1390_v46  ;;  %1425 = vmatprep.subr.bf16.mxu1 %v2621_v56  ;;  %v2299_v2 = vmul.f32 %v1484_v62, %v1957_v24 }
 0x10e   :  { %1495 = vrsqrt.f32 %v193_v39  ;;  %v292_v17 = vpop.xlane.xlu0 %291  ;;  %1393 = vmatprep.subr.bf16.mxu0 %v2621_v56 }
 0x10f   :  { %v295_v18 = vpop.xlane.xlu1 %294  ;;  %v1486_v28 = vpop.eup %1485  ;;  %v322_v1 = vmax.f32 %v292_v17, 1e-12  ;;  %v1426_v23 = vpack.c.bf16 %v2299_v2, %v2296_v16 }
 0x110   :  { %v323_v55 = vmax.f32 %v295_v18, 1e-12  ;;  %v1488_v7 = vpop.eup %1487  ;;  %v2302_v9 = vmul.f32 %v1486_v28, %v1965_v29 }
 0x111   :  { %1497 = vrsqrt.f32 %v322_v1  ;;  %v2305_v10 = vmul.f32 %v1488_v7, %v1967_v30 }
 0x112   :  { %1499 = vrsqrt.f32 %v323_v55  ;;  %v164_v39 = vpop.xlane.xlu0 %163 }
 0x113   :  { %v167_v46 = vpop.xlane.xlu1 %166  ;;  %v1490_v31 = vpop.eup %1489  ;;  %v194_v24 = vmax.f32 %v164_v39, 1e-12  ;;  %v1394_v17 = vpack.c.bf16 %v2305_v10, %v2302_v9 }
 0x114   :  { %v195_v62 = vmax.f32 %v167_v46, 1e-12  ;;  %v1492_v18 = vpop.eup %1491  ;;  %1428 = vmatpush3.bf16.xpose.msk.msra.mxu1 %vm2259_vm3, %v1426_v23  ;;  %v2318_v28 = vmul.f32 %v1490_v31, %v1975_v35 }
 0x115   :  { %1501 = vrsqrt.f32 %v194_v24  ;;  %1396 = vmatpush3.bf16.xpose.msk.msra.mxu0 %vm2259_vm3, %v1394_v17  ;;  %1429 = vmatprep.subr.bf16.mxu1 %v2621_v56  ;;  %v2321_v1 = vmul.f32 %v1492_v18, %v1977_v36 }
 0x116   :  { %1503 = vrsqrt.f32 %v195_v62  ;;  %v298_v29 = vpop.xlane.xlu0 %297  ;;  %1397 = vmatprep.subr.bf16.mxu0 %v2621_v56 }
 0x117   :  { %v301_v30 = vpop.xlane.xlu1 %300  ;;  %v1494_v55 = vpop.eup %1493  ;;  %v324_v7 = vmax.f32 %v298_v29, 1e-12  ;;  %v1430_v35 = vpack.c.bf16 %v2321_v1, %v2318_v28 }
 0x118   :  { %v325_v39 = vmax.f32 %v301_v30, 1e-12  ;;  %v1496_v46 = vpop.eup %1495  ;;  %v2324_v23 = vmul.f32 %v1494_v55, %v1985_v41 }
 0x119   :  { %1505 = vrsqrt.f32 %v324_v7  ;;  %v2327_v24 = vmul.f32 %v1496_v46, %v1987_v42 }
 0x11a   :  { %1507 = vrsqrt.f32 %v325_v39  ;;  %v170_v62 = vpop.xlane.xlu0 %169 }
 0x11b   :  { %v173_v17 = vpop.xlane.xlu1 %172  ;;  %v1498_v31 = vpop.eup %1497  ;;  %v196_v36 = vmax.f32 %v170_v62, 1e-12  ;;  %v1398_v29 = vpack.c.bf16 %v2327_v24, %v2324_v23 }
 0x11c   :  { %v197_v18 = vmax.f32 %v173_v17, 1e-12  ;;  %v1500_v30 = vpop.eup %1499  ;;  %1432 = vmatpush3.bf16.xpose.msk.msra.mxu1 %vm2259_vm3, %v1430_v35  ;;  %v2340_v55 = vmul.f32 %v1498_v31, %v1995_v47 }
 0x11d   :  { %1509 = vrsqrt.f32 %v196_v36  ;;  %1400 = vmatpush3.bf16.xpose.msk.msra.mxu0 %vm2259_vm3, %v1398_v29  ;;  %1433 = vmatprep.subr.bf16.mxu1 %v2621_v56  ;;  %v2343_v7 = vmul.f32 %v1500_v30, %v1997_v48 }
 0x11e   :  { %1511 = vrsqrt.f32 %v197_v18  ;;  %v304_v41 = vpop.xlane.xlu0 %303  ;;  %1401 = vmatprep.subr.bf16.mxu0 %v2621_v56 }
 0x11f   :  { %v307_v42 = vpop.xlane.xlu1 %306  ;;  %v1502_v39 = vpop.eup %1501  ;;  %v326_v46 = vmax.f32 %v304_v41, 1e-12  ;;  %v1434_v47 = vpack.c.bf16 %v2343_v7, %v2340_v55 }
 0x120   :  { %v327_v62 = vmax.f32 %v307_v42, 1e-12  ;;  %v1504_v17 = vpop.eup %1503  ;;  %v2346_v35 = vmul.f32 %v1502_v39, %v2005_v53 }
 0x121   :  { %1513 = vrsqrt.f32 %v326_v46  ;;  %v2349_v36 = vmul.f32 %v1504_v17, %v2007_v54 }
 0x122   :  { %1515 = vrsqrt.f32 %v327_v62  ;;  %v176_v18 = vpop.xlane.xlu0 %175 }
 0x123   :  { %v179_v29 = vpop.xlane.xlu1 %178  ;;  %v1506_v31 = vpop.eup %1505  ;;  %v198_v48 = vmax.f32 %v176_v18, 1e-12  ;;  %v1402_v41 = vpack.c.bf16 %v2349_v36, %v2346_v35 }
 0x124   :  { %v199_v30 = vmax.f32 %v179_v29, 1e-12  ;;  %v1508_v42 = vpop.eup %1507  ;;  %1436 = vmatpush3.bf16.xpose.msk.msra.mxu1 %vm2259_vm3, %v1434_v47  ;;  %v2362_v39 = vmul.f32 %v1506_v31, %v2015_v59 }
 0x125   :  { %1517 = vrsqrt.f32 %v198_v48  ;;  %1404 = vmatpush3.bf16.xpose.msk.msra.mxu0 %vm2259_vm3, %v1402_v41  ;;  %1437 = vmatprep.subr.bf16.mxu1 %v2621_v56  ;;  %v2365_v46 = vmul.f32 %v1508_v42, %v2017_v60 }
 0x126   :  { %1519 = vrsqrt.f32 %v199_v30  ;;  %v310_v53 = vpop.xlane.xlu0 %309  ;;  %1405 = vmatprep.subr.bf16.mxu0 %v2621_v56 }
 0x127   :  { %v313_v54 = vpop.xlane.xlu1 %312  ;;  %v1510_v62 = vpop.eup %1509  ;;  %v328_v17 = vmax.f32 %v310_v53, 1e-12  ;;  %v1438_v59 = vpack.c.bf16 %v2365_v46, %v2362_v39 }
 0x128   :  { %v329_v18 = vmax.f32 %v313_v54, 1e-12  ;;  %v1512_v29 = vpop.eup %1511  ;;  %v2368_v47 = vmul.f32 %v1510_v62, %v2025_v4 }
 0x129   :  { %1521 = vrsqrt.f32 %v328_v17  ;;  %v2371_v48 = vmul.f32 %v1512_v29, %v2027_v5 }
 0x12a   :  { %1523 = vrsqrt.f32 %v329_v18  ;;  %v182_v30 = vpop.xlane.xlu0 %181 }
 0x12b   :  { %2622 = vst [vmem:[#allocation38_spill] sm:$0xff] %v2371_v48  ;;  %v185_v41 = vpop.xlane.xlu1 %184  ;;  %v1514_v31 = vpop.eup %1513  ;;  %v200_v60 = vmax.f32 %v182_v30, 1e-12  ;;  %v1406_v53 = vpack.c.bf16 %v2371_v48, %v2368_v47 }
 0x12c   :  { %v201_v42 = vmax.f32 %v185_v41, 1e-12  ;;  %v1516_v54 = vpop.eup %1515  ;;  %1440 = vmatpush3.bf16.xpose.msk.msra.mxu1 %vm2259_vm3, %v1438_v59  ;;  %v2384_v62 = vmul.f32 %v1514_v31, %v2037_v14 }
 0x12d   :  { %1525 = vrsqrt.f32 %v200_v60  ;;  %1408 = vmatpush3.bf16.xpose.msk.msra.mxu0 %vm2259_vm3, %v1406_v53  ;;  %1441 = vmatprep.subr.bf16.mxu1 %v2621_v56  ;;  %v2387_v17 = vmul.f32 %v1516_v54, %v2039_v15 }
 0x12e   :  { %1527 = vrsqrt.f32 %v201_v42  ;;  %v101_v5 = vpop.xlane.xlu0 %100  ;;  %1409 = vmatprep.subr.bf16.mxu0 %v2621_v56 }
 0x12f   :  { %v524_v4 = vpop.xlane.xlu1 %523  ;;  %v1518_v18 = vpop.eup %1517  ;;  %v102_v41 = vmax.f32 %v101_v5, 1e-12  ;;  %v1442_v14 = vpack.c.bf16 %v2387_v17, %v2384_v62 }
 0x130   :  { %v570_v29 = vmax.f32 %v524_v4, 1e-12  ;;  %v1520_v30 = vpop.eup %1519  ;;  %v2390_v59 = vmul.f32 %v1518_v18, %v2047_v22 }
 0x131   :  { %v2393_v60 = vmul.f32 %v1520_v30, %v2049_v25 }
 0x132   :  { %1529 = vrsqrt.f32 %v570_v29  ;;  %v527_v53 = vpop.xlane.xlu0 %526 }
 0x133   :  { %v396_v42 = vpop.xlane.xlu1 %395  ;;  %v1522_v31 = vpop.eup %1521  ;;  %v571_v15 = vmax.f32 %v527_v53, 1e-12  ;;  %v1410_v54 = vpack.c.bf16 %v2393_v60, %v2390_v59  ;;  %1531 = vrsqrt.f32 %v102_v41 }
 0x134   :  { %v442_v48 = vmax.f32 %v396_v42, 1e-12  ;;  %v1524_v4 = vpop.eup %1523  ;;  %1444 = vmatpush3.bf16.xpose.msk.msra.mxu1 %vm2259_vm3, %v1442_v14  ;;  %v2406_v5 = vmul.f32 %v1522_v31, %v2057_v32 }
 0x135   :  { %1412 = vmatpush3.bf16.xpose.msk.msra.mxu0 %vm2259_vm3, %v1410_v54  ;;  %1445 = vmatprep.subr.bf16.mxu1 %v2621_v56  ;;  %v2409_v18 = vmul.f32 %v1524_v4, %v2059_v33 }
 0x136   :  { %1533 = vrsqrt.f32 %v442_v48  ;;  %v399_v25 = vpop.xlane.xlu0 %398  ;;  %1413 = vmatprep.subr.bf16.mxu0 %v2621_v56 }
 0x137   :  { %1535 = vrsqrt.f32 %v571_v15  ;;  %v530_v22 = vpop.xlane.xlu1 %529  ;;  %v1526_v29 = vpop.eup %1525  ;;  %v443_v41 = vmax.f32 %v399_v25, 1e-12  ;;  %v1446_v32 = vpack.c.bf16 %v2409_v18, %v2406_v5 }
 0x138   :  { %v572_v30 = vmax.f32 %v530_v22, 1e-12  ;;  %v1528_v48 = vpop.eup %1527  ;;  %v2412_v42 = vmul.f32 %v1526_v29, %v2067_v40 }
 0x139   :  { %v2415_v53 = vmul.f32 %v1528_v48, %v2069_v43 }
 0x13a   :  { %1537 = vrsqrt.f32 %v572_v30  ;;  %v402_v56 = vpop.xlane.xlu0 %401 }
 0x13b   :  { %1539 = vrsqrt.f32 %v443_v41  ;;  %v533_v14 = vpop.xlane.xlu1 %532  ;;  %v444_v15 = vmax.f32 %v402_v56, 1e-12  ;;  %v1414_v54 = vpack.c.bf16 %v2415_v53, %v2412_v42 }
 0x13c   :  { %v1530_v31 = vpop.eup %1529  ;;  %v573_v33 = vmax.f32 %v533_v14, 1e-12  ;;  %1448 = vmatpush3.bf16.xpose.msk.msra.mxu1 %vm2259_vm3, %v1446_v32 }
 0x13d   :  { %v602_v40 = vmul.f32 %v1530_v31, %v2077_v50  ;;  %1416 = vmatpush3.bf16.xpose.msk.msra.mxu0 %vm2259_vm3, %v1414_v54  ;;  %v1532_v43 = vpop.eup %1531 }
 0x13e   :  { %1541 = vrsqrt.f32 %v573_v33  ;;  %v405_v22 = vpop.xlane.xlu0 %404  ;;  %v104_v50 = vmul.f32 %v1532_v43, %v2079_v51 }
 0x13f   :  { %1543 = vrsqrt.f32 %v444_v15  ;;  %v536_v4 = vpop.xlane.xlu1 %535  ;;  %v1046_v25 = vmul.f32 %v602_v40, %v2249_v45  ;;  %v445_v41 = vmax.f32 %v405_v22, 1e-12 }
 0x140   :  { %v1534_v29 = vpop.eup %1533  ;;  %v574_v30 = vmax.f32 %v536_v4, 1e-12 }
 0x141   :  { %v1536_v48 = vpop.eup %1535  ;;  %v1062_v14 = vsel %vm137_vm0, %v1046_v25, 0.0  ;;  %v474_v56 = vmul.f32 %v1534_v29, %v2087_v58 }
 0x142   :  { %1545 = vrsqrt.f32 %v574_v30  ;;  %1063 = vadd.xlane.f32.xlu1 %v1062_v14  ;;  %v603_v44 = vmul.f32 %v1536_v48, %v2089_v61  ;;  %v408_v31 = vpop.xlane.xlu0 %407 }
 0x143   :  { %1547 = vrsqrt.f32 %v445_v41  ;;  %v539_v32 = vpop.xlane.xlu1 %538  ;;  %v876_v33 = vmul.f32 %v474_v56, %v2246_v13  ;;  %v446_v54 = vmax.f32 %v408_v31, 1e-12  ;;  %1383 = vmatmul.mubr.msk.f32.vlgmr.msra.gmra.mrb[0].mxu1 %vm137_vm0, %v104_v50 }
 0x144   :  { %v1538_v45 = vpop.eup %1537  ;;  %v575_v15 = vmax.f32 %v539_v32, 1e-12  ;;  %v1047_v40 = vmul.f32 %v603_v44, %v2252_v19  ;;  %1348 = vmatmul.mubr.msk.f32.vlgmr.msra.gmra.mrb[0].mxu0 %vm137_vm0, %v104_v50 }
 0x145   :  { %v1540_v4 = vpop.eup %1539  ;;  %v892_v58 = vsel %vm137_vm0, %v876_v33, 0.0  ;;  %v604_v51 = vmul.f32 %v1538_v45, %v2096_v11 }
 0x146   :  { %1549 = vrsqrt.f32 %v575_v15  ;;  %893 = vadd.xlane.f32.xlu1 %v892_v58  ;;  %v1065_v61 = vsel %vm137_vm0, %v1047_v40, 0.0  ;;  %v475_v13 = vmul.f32 %v1540_v4, %v2098_v12  ;;  %v411_v22 = vpop.xlane.xlu0 %410 }
 0x147   :  { %1551 = vrsqrt.f32 %v446_v54  ;;  %1066 = vadd.xlane.f32.xlu0 %v1065_v61  ;;  %v542_v43 = vpop.xlane.xlu1 %541  ;;  %v1048_v25 = vmul.f32 %v604_v51, %v2274_v57  ;;  %v447_v30 = vmax.f32 %v411_v22, 1e-12 }
 0x148   :  { %v1542_v19 = vpop.eup %1541  ;;  %v576_v29 = vmax.f32 %v542_v43, 1e-12  ;;  %v877_v41 = vmul.f32 %v475_v13, %v2255_v34 }
 0x149   :  { %v1544_v48 = vpop.eup %1543  ;;  %v1068_v11 = vsel %vm137_vm0, %v1048_v25, 0.0  ;;  %v605_v14 = vmul.f32 %v1542_v19, %v2106_v21 }
 0x14a   :  { %1553 = vrsqrt.f32 %v576_v29  ;;  %1069 = vadd.xlane.f32.xlu1 %v1068_v11  ;;  %v895_v12 = vsel %vm137_vm0, %v877_v41, 0.0  ;;  %v476_v56 = vmul.f32 %v1544_v48, %v2108_v26  ;;  %v414_v57 = vpop.xlane.xlu0 %413 }
 0x14b   :  { %1555 = vrsqrt.f32 %v447_v30  ;;  %896 = vadd.xlane.f32.xlu0 %v895_v12  ;;  %v545_v50 = vpop.xlane.xlu1 %544  ;;  %v1049_v44 = vmul.f32 %v605_v14, %v2277_v6  ;;  %v448_v34 = vmax.f32 %v414_v57, 1e-12 }
 0x14c   :  { %v1546_v32 = vpop.eup %1545  ;;  %v577_v31 = vmax.f32 %v545_v50, 1e-12  ;;  %v878_v33 = vmul.f32 %v476_v56, %v2280_v8 }
 0x14d   :  { %v1548_v45 = vpop.eup %1547  ;;  %v1071_v21 = vsel %vm137_vm0, %v1049_v44, 0.0  ;;  %v606_v15 = vmul.f32 %v1546_v32, %v2116_v37 }
 0x14e   :  { %1557 = vrsqrt.f32 %v577_v31  ;;  %1072 = vadd.xlane.f32.xlu1 %v1071_v21  ;;  %v898_v26 = vsel %vm137_vm0, %v878_v33, 0.0  ;;  %v477_v54 = vmul.f32 %v1548_v45, %v2118_v38  ;;  %v417_v6 = vpop.xlane.xlu0 %416 }
 0x14f   :  { %1559 = vrsqrt.f32 %v448_v34  ;;  %899 = vadd.xlane.f32.xlu0 %v898_v26  ;;  %v548_v40 = vpop.xlane.xlu1 %547  ;;  %v1050_v4 = vmul.f32 %v606_v15, %v2296_v16  ;;  %v449_v8 = vmax.f32 %v417_v6, 1e-12 }
 0x150   :  { %v1550_v58 = vpop.eup %1549  ;;  %v578_v51 = vmax.f32 %v548_v40, 1e-12  ;;  %v879_v61 = vmul.f32 %v477_v54, %v2283_v3  ;;  %v2623_v40 = vld [vmem:[#allocation21_spill] sm:$0xff] }
 0x151   :  { %v1552_v13 = vpop.eup %1551  ;;  %v1074_v37 = vsel %vm137_vm0, %v1050_v4, 0.0  ;;  %v607_v43 = vmul.f32 %v1550_v58, %v2126_v49  ;;  %v2624_v4 = vld [vmem:[#allocation22_spill] sm:$0xff] }
 0x152   :  { %1561 = vrsqrt.f32 %v578_v51  ;;  %1075 = vadd.xlane.f32.xlu1 %v1074_v37  ;;  %v901_v38 = vsel %vm137_vm0, %v879_v61, 0.0  ;;  %v478_v22 = vmul.f32 %v1552_v13, %v2128_v52  ;;  %v420_v16 = vpop.xlane.xlu0 %419 }
 0x153   :  { %1563 = vrsqrt.f32 %v449_v8  ;;  %902 = vadd.xlane.f32.xlu0 %v901_v38  ;;  %v551_v25 = vpop.xlane.xlu1 %550  ;;  %v1051_v19 = vmul.f32 %v607_v43, %v2299_v2  ;;  %v450_v3 = vmax.f32 %v420_v16, 1e-12 }
 0x154   :  { %v1554_v29 = vpop.eup %1553  ;;  %v579_v30 = vmax.f32 %v551_v25, 1e-12  ;;  %v880_v41 = vmul.f32 %v478_v22, %v2302_v9  ;;  %v2625_v22 = vld [vmem:[#allocation23_spill] sm:$0xff] }
 0x155   :  { %v1556_v48 = vpop.eup %1555  ;;  %v1077_v49 = vsel %vm137_vm0, %v1051_v19, 0.0  ;;  %v608_v11 = vmul.f32 %v1554_v29, %v2136_v63  ;;  %v2626_v19 = vld [vmem:[#allocation24_spill] sm:$0xff] }
 0x156   :  { %1565 = vrsqrt.f32 %v579_v30  ;;  %1078 = vadd.xlane.f32.xlu1 %v1077_v49  ;;  %v904_v52 = vsel %vm137_vm0, %v880_v41, 0.0  ;;  %v479_v14 = vmul.f32 %v1556_v48, %v2138_v0  ;;  %v423_v2 = vpop.xlane.xlu0 %422 }
 0x157   :  { %1567 = vrsqrt.f32 %v450_v3  ;;  %905 = vadd.xlane.f32.xlu0 %v904_v52  ;;  %v554_v12 = vpop.xlane.xlu1 %553  ;;  %v1052_v56 = vmul.f32 %v608_v11, %v2318_v28  ;;  %v451_v9 = vmax.f32 %v423_v2, 1e-12 }
 0x158   :  { %v1558_v50 = vpop.eup %1557  ;;  %v580_v57 = vmax.f32 %v554_v12, 1e-12  ;;  %v881_v44 = vmul.f32 %v479_v14, %v2305_v10  ;;  %v2627_v14 = vld [vmem:[#allocation25_spill] sm:$0xff] }
 0x159   :  { %v1560_v32 = vpop.eup %1559  ;;  %v1080_v63 = vsel %vm137_vm0, %v1052_v56, 0.0  ;;  %v609_v31 = vmul.f32 %v1558_v50, %v2146_v20  ;;  %v2628_v56 = vld [vmem:[#allocation26_spill] sm:$0xff] }
 0x15a   :  { %1569 = vrsqrt.f32 %v580_v57  ;;  %1081 = vadd.xlane.f32.xlu1 %v1080_v63  ;;  %v907_v0 = vsel %vm137_vm0, %v881_v44, 0.0  ;;  %v480_v34 = vmul.f32 %v1560_v32, %v2148_v27  ;;  %v426_v28 = vpop.xlane.xlu0 %425 }
 0x15b   :  { %1571 = vrsqrt.f32 %v451_v9  ;;  %908 = vadd.xlane.f32.xlu0 %v907_v0  ;;  %v557_v33 = vpop.xlane.xlu1 %556  ;;  %v1053_v45 = vmul.f32 %v609_v31, %v2321_v1  ;;  %v452_v10 = vmax.f32 %v426_v28, 1e-12 }
 0x15c   :  { %v1562_v21 = vpop.eup %1561  ;;  %v581_v15 = vmax.f32 %v557_v33, 1e-12  ;;  %v882_v26 = vmul.f32 %v480_v34, %v2324_v23  ;;  %v2629_v34 = vld [vmem:[#allocation27_spill] sm:$0xff] }
 0x15d   :  { %v1564_v54 = vpop.eup %1563  ;;  %v1083_v20 = vsel %vm137_vm0, %v1053_v45, 0.0  ;;  %v610_v6 = vmul.f32 %v1562_v21, %v2623_v40  ;;  %v2630_v45 = vld [vmem:[#allocation28_spill] sm:$0xff] }
 0x15e   :  { %1573 = vrsqrt.f32 %v581_v15  ;;  %1084 = vadd.xlane.f32.xlu1 %v1083_v20  ;;  %v910_v27 = vsel %vm137_vm0, %v882_v26, 0.0  ;;  %v481_v58 = vmul.f32 %v1564_v54, %v2624_v4  ;;  %v429_v1 = vpop.xlane.xlu0 %428 }
 0x15f   :  { %1575 = vrsqrt.f32 %v452_v10  ;;  %911 = vadd.xlane.f32.xlu0 %v910_v27  ;;  %v560_v51 = vpop.xlane.xlu1 %559  ;;  %v1054_v8 = vmul.f32 %v610_v6, %v2340_v55  ;;  %v453_v23 = vmax.f32 %v429_v1, 1e-12  ;;  %v2631_v27 = vld [vmem:[#allocation29_spill] sm:$0xff] }
 0x160   :  { %v1566_v61 = vpop.eup %1565  ;;  %v582_v13 = vmax.f32 %v560_v51, 1e-12  ;;  %v883_v37 = vmul.f32 %v481_v58, %v2327_v24  ;;  %v2632_v51 = vld [vmem:[#allocation30_spill] sm:$0xff] }
 0x161   :  { %v1568_v43 = vpop.eup %1567  ;;  %v1086_v38 = vsel %vm137_vm0, %v1054_v8, 0.0  ;;  %v611_v25 = vmul.f32 %v1566_v61, %v2625_v22 }
 0x162   :  { %1577 = vrsqrt.f32 %v582_v13  ;;  %1087 = vadd.xlane.f32.xlu1 %v1086_v38  ;;  %v913_v16 = vsel %vm137_vm0, %v883_v37, 0.0  ;;  %v482_v29 = vmul.f32 %v1568_v43, %v2626_v19  ;;  %v432_v55 = vpop.xlane.xlu0 %431  ;;  %v2634_v38 = vld [vmem:[#allocation31_spill] sm:$0xff] }
 0x163   :  { %1579 = vrsqrt.f32 %v453_v23  ;;  %914 = vadd.xlane.f32.xlu0 %v913_v16  ;;  %v563_v30 = vpop.xlane.xlu1 %562  ;;  %v1055_v3 = vmul.f32 %v611_v25, %v2343_v7  ;;  %v454_v24 = vmax.f32 %v432_v55, 1e-12  ;;  %v2633_v23 = vld [vmem:[#allocation38_spill] sm:$0xff]  ;;  %v2635_v16 = vld [vmem:[#allocation32_spill] sm:$0xff] }
 0x164   :  { %v1570_v41 = vpop.eup %1569  ;;  %v583_v48 = vmax.f32 %v563_v30, 1e-12  ;;  %v884_v49 = vmul.f32 %v482_v29, %v2346_v35 }
 0x165   :  { %v1572_v11 = vpop.eup %1571  ;;  %v1089_v52 = vsel %vm137_vm0, %v1055_v3, 0.0  ;;  %v612_v12 = vmul.f32 %v1570_v41, %v2627_v14  ;;  %v2636_v41 = vld [vmem:[#allocation33_spill] sm:$0xff]  ;;  %v618_v14 = vld [vmem:[#allocation2] sm:$0x1] }
 0x166   :  { %1581 = vrsqrt.f32 %v583_v48  ;;  %1090 = vadd.xlane.f32.xlu1 %v1089_v52  ;;  %v916_v2 = vsel %vm137_vm0, %v884_v49, 0.0  ;;  %v483_v50 = vmul.f32 %v1572_v11, %v2628_v56  ;;  %v435_v7 = vpop.xlane.xlu0 %434  ;;  %v2637_v49 = vld [vmem:[#allocation34_spill] sm:$0xff]  ;;  %v2638_v56 = vld [vmem:[#allocation35_spill] sm:$0xff] }
 0x167   :  { %1583 = vrsqrt.f32 %v454_v24  ;;  %917 = vadd.xlane.f32.xlu0 %v916_v2  ;;  %v566_v57 = vpop.xlane.xlu1 %565  ;;  %v1056_v9 = vmul.f32 %v612_v12, %v2362_v39  ;;  %v455_v35 = vmax.f32 %v435_v7, 1e-12  ;;  %v2639_v7 = vld [vmem:[#allocation36_spill] sm:$0xff] }
 0x168   :  { %v1574_v44 = vpop.eup %1573  ;;  %v584_v32 = vmax.f32 %v566_v57, 1e-12  ;;  %v885_v63 = vmul.f32 %v483_v50, %v2349_v36 }
 0x169   :  { %v1576_v31 = vpop.eup %1575  ;;  %v1092_v0 = vsel %vm137_vm0, %v1056_v9, 0.0  ;;  %v613_v33 = vmul.f32 %v1574_v44, %v2629_v34  ;;  %v619_v44 = vmul.f32 1.442695, %v618_v14 }
 0x16a   :  { %1585 = vrsqrt.f32 %v584_v32  ;;  %1093 = vadd.xlane.f32.xlu1 %v1092_v0  ;;  %v919_v28 = vsel %vm137_vm0, %v885_v63, 0.0  ;;  %v484_v21 = vmul.f32 %v1576_v31, %v2630_v45  ;;  %v438_v39 = vpop.xlane.xlu0 %437 }
 0x16b   :  { %1587 = vrsqrt.f32 %v455_v35  ;;  %920 = vadd.xlane.f32.xlu0 %v919_v28  ;;  %v569_v15 = vpop.xlane.xlu1 %568  ;;  %v1057_v10 = vmul.f32 %v613_v33, %v2365_v46  ;;  %v456_v36 = vmax.f32 %v438_v39, 1e-12  ;;  %v743_v33 = vlaneseq }
 0x16c   :  { %v1578_v26 = vpop.eup %1577  ;;  %v585_v54 = vmax.f32 %v569_v15, 1e-12  ;;  %v886_v20 = vmul.f32 %v484_v21, %v2368_v47 }
 0x16d   :  { %v1580_v40 = vpop.eup %1579  ;;  %v1095_v6 = vsel %vm137_vm0, %v1057_v10, 0.0  ;;  %v614_v4 = vmul.f32 %v1578_v26, %v2631_v27 }
 0x16e   :  { %1589 = vrsqrt.f32 %v585_v54  ;;  %1096 = vadd.xlane.f32.xlu1 %v1095_v6  ;;  %v922_v58 = vsel %vm137_vm0, %v886_v20, 0.0  ;;  %v485_v1 = vmul.f32 %v1580_v40, %v2632_v51  ;;  %v441_v8 = vpop.xlane.xlu0 %440 }
 0x16f   :  { %1591 = vrsqrt.f32 %v456_v36  ;;  %923 = vadd.xlane.f32.xlu0 %v922_v58  ;;  %v1058_v46 = vmul.f32 %v614_v4, %v2384_v62  ;;  %v457_v13 = vmax.f32 %v441_v8, 1e-12  ;;  %v2641_v8 = vmov 0.0  }
 0x170   :  { %v1582_v61 = vpop.eup %1581  ;;  %v887_v47 = vmul.f32 %v485_v1, %v2633_v23 }
 0x171   :  { %v1584_v37 = vpop.eup %1583  ;;  %v1098_v43 = vsel %vm137_vm0, %v1058_v46, 0.0  ;;  %v615_v22 = vmul.f32 %v1582_v61, %v2634_v38  ;;  %1593 = vrsqrt.f32 %v457_v13 }
 0x172   :  { %1099 = vadd.xlane.f32.xlu1 %v1098_v43  ;;  %v925_v25 = vsel %vm137_vm0, %v887_v47, 0.0  ;;  %v486_v19 = vmul.f32 %v1584_v37, %v2635_v16  ;;  %1595 = vpow2.f32 %v619_v44 }
 0x173   :  { %926 = vadd.xlane.f32.xlu0 %v925_v25  ;;  %v1059_v29 = vmul.f32 %v615_v22, %v2387_v17 }
 0x174   :  { %v1586_v30 = vpop.eup %1585  ;;  %v888_v62 = vmul.f32 %v486_v19, %v2390_v59 }
 0x175   :  { %v1588_v55 = vpop.eup %1587  ;;  %v1101_v3 = vsel %vm137_vm0, %v1059_v29, 0.0  ;;  %v616_v48 = vmul.f32 %v1586_v30, %v2636_v41 }
 0x176   :  { %1102 = vadd.xlane.f32.xlu1 %v1101_v3  ;;  %v928_v24 = vsel %vm137_vm0, %v888_v62, 0.0  ;;  %v487_v11 = vmul.f32 %v1588_v55, %v2637_v49 }
 0x177   :  { %929 = vadd.xlane.f32.xlu0 %v928_v24  ;;  %v1060_v52 = vmul.f32 %v616_v48, %v2406_v5 }
 0x178   :  { %v1590_v12 = vpop.eup %1589  ;;  %v889_v17 = vmul.f32 %v487_v11, %v2393_v60  ;;  %v2640_v60 = vld [vmem:[#allocation37_spill] sm:$0xff] }
 0x179   :  { %v1592_v2 = vpop.eup %1591  ;;  %v1104_v59 = vsel %vm137_vm0, %v1060_v52, 0.0  ;;  %v617_v50 = vmul.f32 %v1590_v12, %v2638_v56 }
 0x17a   :  { %1105 = vadd.xlane.f32.xlu1 %v1104_v59  ;;  %v931_v57 = vsel %vm137_vm0, %v889_v17, 0.0  ;;  %v488_v9 = vmul.f32 %v1592_v2, %v2639_v7 }
 0x17b   :  { %932 = vadd.xlane.f32.xlu0 %v931_v57  ;;  %v1061_v32 = vmul.f32 %v617_v50, %v2409_v18  ;;  %v1594_v35 = vpop.eup %1593  ;;  %v744_v18 = vshrl.u32 %v743_v33, 7 }
 0x17c   :  { %v890_v5 = vmul.f32 %v488_v9, %v2412_v42  ;;  %v489_v31 = vmul.f32 %v1594_v35, %v2640_v60  ;;  %v1596_v21 = vpop.eup %1595 }
 0x17d   :  { %v1107_v63 = vsel %vm137_vm0, %v1061_v32, 0.0  ;;  %v745_v45 = vsub.s32 0, %v744_v18  ;;  %vm1110_vm4 = vcmp.lt.s32.totalorder %v744_v18, 2  ;;  %vm957_vm5 = vcmp.lt.s32.totalorder %v744_v18, 4 }
 0x17e   :  { %1108 = vadd.xlane.f32.xlu1 %v1107_v63  ;;  %v934_v0 = vsel %vm137_vm0, %v890_v5, 0.0  ;;  %v891_v34 = vmul.f32 %v489_v31, %v2415_v53  ;;  %v1280_v46 = vsel %vm1110_vm4, 1.0, %v2641_v8  ;;  %v1279_v43 = vsel %vm957_vm5, 1.0, %v2641_v8 }
 0x17f   :  { %935 = vadd.xlane.f32.xlu0 %v934_v0  ;;  %v746_v42 = vrot.slane %v1596_v21, %v745_v45 }
 0x180   :  { %v937_v28 = vsel %vm137_vm0, %v891_v34, 0.0 }
 0x183   :  { %938 = vadd.xlane.f32.xlu0 %v937_v28 }
 0x18f   :  { %748 = vperm.xlu1 %1463, %v746_v42  }
 0x1cf   :  { %v1064_v15 = vpop.xlane.xlu1 %1063 }
 0x1d0   :  { %v1158_v23 = vmul.f32 %v1280_v46, %v1064_v15 }
 0x1d3   :  { %v894_v39 = vpop.xlane.xlu1 %893 }
 0x1d4   :  { %v1067_v10 = vpop.xlane.xlu0 %1066  ;;  %v1005_v62 = vmul.f32 %v1279_v43, %v894_v39 }
 0x1d5   :  { %v1159_v61 = vmul.f32 0.0, %v1067_v10 }
 0x1d7   :  { %v1070_v26 = vpop.xlane.xlu1 %1069  ;;  %v1174_v38 = vadd.f32 %v1159_v61, %v1158_v23 }
 0x1d8   :  { %v897_v54 = vpop.xlane.xlu0 %896  ;;  %v1160_v47 = vmul.f32 0.0, %v1070_v26 }
 0x1d9   :  { %v1006_v25 = vmul.f32 0.0, %v897_v54 }
 0x1da   :  { %v1175_v19 = vadd.f32 %v1174_v38, %v1160_v47 }
 0x1db   :  { %v1073_v36 = vpop.xlane.xlu1 %1072  ;;  %v1021_v48 = vadd.f32 %v1006_v25, %v1005_v62 }
 0x1dc   :  { %v900_v20 = vpop.xlane.xlu0 %899  ;;  %v1161_v22 = vmul.f32 0.0, %v1073_v36 }
 0x1dd   :  { %v1007_v55 = vmul.f32 0.0, %v900_v20 }
 0x1de   :  { %v1176_v3 = vadd.f32 %v1175_v19, %v1161_v22 }
 0x1df   :  { %v1076_v40 = vpop.xlane.xlu1 %1075  ;;  %v1022_v12 = vadd.f32 %v1021_v48, %v1007_v55 }
 0x1e0   :  { %v903_v6 = vpop.xlane.xlu0 %902  ;;  %v1162_v29 = vmul.f32 0.0, %v1076_v40 }
 0x1e1   :  { %v1008_v24 = vmul.f32 0.0, %v903_v6 }
 0x1e2   :  { %v1177_v11 = vadd.f32 %v1176_v3, %v1162_v29 }
 0x1e3   :  { %v1079_v53 = vpop.xlane.xlu1 %1078  ;;  %v1023_v56 = vadd.f32 %v1022_v12, %v1008_v24 }
 0x1e4   :  { %v906_v27 = vpop.xlane.xlu0 %905  ;;  %v1163_v41 = vmul.f32 0.0, %v1079_v53 }
 0x1e5   :  { %v1009_v17 = vmul.f32 0.0, %v906_v27 }
 0x1e6   :  { %v1178_v2 = vadd.f32 %v1177_v11, %v1163_v41 }
 0x1e7   :  { %v1082_v4 = vpop.xlane.xlu1 %1081  ;;  %v1024_v32 = vadd.f32 %v1023_v56, %v1009_v17 }
 0x1e8   :  { %v909_v58 = vpop.xlane.xlu0 %908  ;;  %v1164_v52 = vmul.f32 0.0, %v1082_v4 }
 0x1e9   :  { %v1010_v50 = vmul.f32 0.0, %v909_v58 }
 0x1ea   :  { %v1179_v7 = vadd.f32 %v1178_v2, %v1164_v52 }
 0x1eb   :  { %v1085_v51 = vpop.xlane.xlu1 %1084  ;;  %v1025_v60 = vadd.f32 %v1024_v32, %v1010_v50 }
 0x1ec   :  { %v912_v1 = vpop.xlane.xlu0 %911  ;;  %v1165_v59 = vmul.f32 0.0, %v1085_v51 }
 0x1ed   :  { %v1011_v35 = vmul.f32 0.0, %v912_v1 }
 0x1ee   :  { %v1180_v5 = vadd.f32 %v1179_v7, %v1165_v59 }
 0x1ef   :  { %v1088_v13 = vpop.xlane.xlu1 %1087  ;;  %v1026_v45 = vadd.f32 %v1025_v60, %v1011_v35 }
 0x1f0   :  { %v915_v37 = vpop.xlane.xlu0 %914  ;;  %v1166_v9 = vmul.f32 0.0, %v1088_v13 }
 0x1f1   :  { %v1012_v31 = vmul.f32 0.0, %v915_v37 }
 0x1f2   :  { %v1181_v34 = vadd.f32 %v1180_v5, %v1166_v9 }
 0x1f3   :  { %v1091_v16 = vpop.xlane.xlu1 %1090  ;;  %v1027_v39 = vadd.f32 %v1026_v45, %v1012_v31 }
 0x1f4   :  { %v918_v30 = vpop.xlane.xlu0 %917  ;;  %v1167_v63 = vmul.f32 0.0, %v1091_v16 }
 0x1f5   :  { %v1013_v21 = vmul.f32 0.0, %v918_v30 }
 0x1f6   :  { %v1182_v42 = vadd.f32 %v1181_v34, %v1167_v63 }
 0x1f7   :  { %v1094_v49 = vpop.xlane.xlu1 %1093  ;;  %v1028_v40 = vadd.f32 %v1027_v39, %v1013_v21 }
 0x1f8   :  { %v921_v14 = vpop.xlane.xlu0 %920  ;;  %v1168_v28 = vmul.f32 0.0, %v1094_v49 }
 0x1f9   :  { %v1014_v10 = vmul.f32 0.0, %v921_v14 }
 0x1fa   :  { %v1183_v54 = vadd.f32 %v1182_v42, %v1168_v28 }
 0x1fb   :  { %v1097_v57 = vpop.xlane.xlu1 %1096  ;;  %v1029_v4 = vadd.f32 %v1028_v40, %v1014_v10 }
 0x1fc   :  { %v924_v44 = vpop.xlane.xlu0 %923  ;;  %v1169_v15 = vmul.f32 0.0, %v1097_v57 }
 0x1fd   :  { %v1015_v6 = vmul.f32 0.0, %v924_v44 }
 0x1fe   :  { %v1184_v53 = vadd.f32 %v1183_v54, %v1169_v15 }
 0x1ff   :  { %v1100_v0 = vpop.xlane.xlu1 %1099  ;;  %v1030_v61 = vadd.f32 %v1029_v4, %v1015_v6 }
 0x200   :  { %v927_v18 = vpop.xlane.xlu0 %926  ;;  %v1170_v36 = vmul.f32 0.0, %v1100_v0 }
 0x201   :  { %v1016_v58 = vmul.f32 0.0, %v927_v18 }
 0x202   :  { %v1185_v1 = vadd.f32 %v1184_v53, %v1170_v36 }
 0x203   :  { %v1103_v26 = vpop.xlane.xlu1 %1102  ;;  %v1031_v47 = vadd.f32 %v1030_v61, %v1016_v58 }
 0x204   :  { %v930_v20 = vpop.xlane.xlu0 %929  ;;  %v1171_v27 = vmul.f32 0.0, %v1103_v26 }
 0x205   :  { %v1017_v13 = vmul.f32 0.0, %v930_v20 }
 0x206   :  { %v1186_v23 = vadd.f32 %v1185_v1, %v1171_v27 }
 0x207   :  { %v1106_v51 = vpop.xlane.xlu1 %1105  ;;  %v1032_v16 = vadd.f32 %v1031_v47, %v1017_v13 }
 0x208   :  { %v1172_v8 = vmul.f32 0.0, %v1106_v51  ;;  %v933_v46 = vpop.xlane.xlu0 %932 }
 0x209   :  { %v1018_v37 = vmul.f32 0.0, %v933_v46 }
 0x20a   :  { %v1187_v38 = vadd.f32 %v1186_v23, %v1172_v8 }
 0x20b   :  { %v1109_v43 = vpop.xlane.xlu1 %1108  ;;  %v1033_v30 = vadd.f32 %v1032_v16, %v1018_v37 }
 0x20c   :  { %v1173_v22 = vmul.f32 0.0, %v1109_v43  ;;  %v936_v25 = vpop.xlane.xlu0 %935 }
 0x20d   :  { %v1019_v19 = vmul.f32 0.0, %v936_v25 }
 0x20e   :  { %v1188_v29 = vadd.f32 %v1187_v38, %v1173_v22 }
 0x20f   :  { %v1034_v3 = vadd.f32 %v1033_v30, %v1019_v19  ;;  %v749_v52 = vpop.permute.xlu1 %748 }
 0x210   :  { %v1189_v62 = vrot.slane %v1188_v29, 4  ;;  %v939_v55 = vpop.xlane.xlu0 %938 }
 0x211   :  { %v1020_v41 = vmul.f32 0.0, %v939_v55 }
 0x212   :  { %v1190_v48 = vadd.f32 %v1189_v62, %v1188_v29 }
 0x213   :  { %v1035_v24 = vadd.f32 %v1034_v3, %v1020_v41 }
 0x214   :  { %v1191_v49 = vrot.slane %v1190_v48, 2 }
 0x215   :  { %v1036_v11 = vrot.slane %v1035_v24, 4 }
 0x216   :  { %v1192_v14 = vadd.f32 %v1191_v49, %v1190_v48  ;;  %v867_v17 = vpop.f32.mrb[0].mxu1 }
 0x217   :  { %v1037_v12 = vadd.f32 %v1036_v11, %v1035_v24  ;;  %v738_v59 = vpop.f32.mrb[0].mxu0  ;;  %v871_v56 = vmul.f32 %v867_v17, %v749_v52  ;;  %v1384_v50 = vpop.f32.mrb[1].mxu1 }
 0x218   :  { %v1193_v2 = vrot.slane %v1192_v14, 1  ;;  %v751_v7 = vmul.f32 %v749_v52, %v738_v59  ;;  %v1349_v9 = vpop.f32.mrb[1].mxu0 }
 0x219   :  { %v1038_v57 = vrot.slane %v1037_v12, 2  ;;  %872 = vst [vmem:[#allocation13] sm:$0x3] %v871_v56 }
 0x21a   :  { %v1194_v44 = vadd.f32 %v1193_v2, %v1192_v14  ;;  %752 = vst [vmem:[#allocation12] sm:$0x3] %v751_v7 }
 0x21b   :  { %v1039_v32 = vadd.f32 %v1038_v57, %v1037_v12 }
 0x21c   :  { %1718 = shalt.err (!%p1715_p2)
}
 0x21d   :  { %s1719_s25 = scalar_lea.hbm %s2578_s7, 32 }
 0x21e   :  { %p1720_p3 = scmp.ne.s32.totalorder %s2578_s7, %s1719_s25  ;;  %p1723_p4 = scmp.lt.u32.totalorder %s1719_s25, %s2578_s7 }
 0x220   :  { %p1725_p5 = pnand %p1723_p4, %p1720_p3 }
 0x222   :  { %1728 = shalt.err (!%p1725_p5)
}
 0x223   :  { %1220 = dma.vmem_to_hbm [thread:$0]  %s1218_s16, 32, %s2578_s7, [#allocation14]   ;;  %v1196_v35 = vmul.f32 0.5, %v1194_v44 }
 0x224   :  { %s1729_s30 = scalar_lea.vmem %s2527_s20, 32  ;;  %p1734_p7 = scmp.lt.s32.totalorder %s2527_s20, %s2527_s20 }
 0x225   :  { %p1730_p6 = scmp.ne.s32.totalorder %s2527_s20, %s1729_s30  ;;  %p1735_p8 = scmp.lt.s32.totalorder %s1729_s30, %s1729_s30 }
 0x227   :  { %p1736_p9 = por %p1735_p8, %p1734_p7 }
 0x229   :  { %p1737_p10 = pnand %p1736_p9, %p1730_p6 }
 0x22b   :  { %1740 = shalt.err (!%p1737_p10)
}
 0x22c   :  { %s1741_s10 = scalar_lea.hbm %s2577_s6, 32 }
 0x22d   :  { %p1742_p11 = scmp.ne.s32.totalorder %s2577_s6, %s1741_s10  ;;  %p1745_p12 = scmp.lt.u32.totalorder %s1741_s10, %s2577_s6 }
 0x22f   :  { %p1747_p13 = pnand %p1745_p12, %p1742_p11 }
 0x231   :  { %1750 = shalt.err (!%p1747_p13)
}
 0x232   :  { %1210 = dma.vmem_to_hbm [thread:$0]  %s2527_s20, 32, %s2577_s6, [#allocation5]   ;;  %v1040_v5 = vrot.slane %v1039_v32, 1  ;;  %v874_v63 = vand.u32 127, %v743_v33  ;;  %v1197_v31 = vsub.f32 1.0, %v1196_v35 }
 0x233   :  { %s1796_s5 = smov [#allocation15]  }
 0x234   :  { %v1041_v60 = vadd.f32 %v1040_v5, %v1039_v32  ;;  %vm1045_vm6 = vcmp.eq.s32.totalorder %v874_v63, 1  ;;  %s1227_s18 = sshll.u32 %s1796_s5, 4  ;;  %vm875_vm7 = vcmp.eq.s32.totalorder %v874_v63, 0  ;;  %s1228_s18 = int_to_ptr.vmem [resolvable:$true] %s1227_s18 }
 0x235   :  { %v1198_v28 = vsel %vm1045_vm6, %v1197_v31, 0.0  ;;  %s1751_s19 = scalar_lea.vmem %s1228_s18, 16  ;;  %s1755_s2 = scalar_lea.vmem %s1228_s18, 32 }
 0x236   :  { %v1043_v0 = vmul.f32 0.25, %v1041_v60  ;;  %p1752_p0 = scmp.ne.s32.totalorder %s1228_s18, %s1751_s19  ;;  %p1756_p1 = scmp.lt.s32.totalorder %s1228_s18, %s1228_s18 }
 0x237   :  { %p1757_p2 = scmp.lt.s32.totalorder %s1755_s2, %s1751_s19 }
 0x238   :  { %v1044_v34 = vsub.f32 1.0, %v1043_v0 }
 0x239   :  { %p1758_p3 = por %p1757_p2, %p1756_p1 }
 0x23a   :  { %v1199_v18 = vsel %vm875_vm7, %v1044_v34, %v1198_v28 }
 0x23b   :  { %1200 = vst [vmem:[#allocation15] sm:$0x1] %v1199_v18  ;;  %p1759_p4 = pnand %p1758_p3, %p1752_p0 }
 0x23d   :  { %1762 = shalt.err (!%p1759_p4)
}
 0x23e   :  { %s1763_s4 = scalar_lea.hbm %s2579_s8, 16 }
 0x23f   :  { %p1764_p5 = scmp.ne.s32.totalorder %s2579_s8, %s1763_s4  ;;  %p1767_p6 = scmp.lt.u32.totalorder %s1763_s4, %s2579_s8 }
 0x241   :  { %p1769_p7 = pnand %p1767_p6, %p1764_p5 }
 0x243   :  { %1772 = shalt.err (!%p1769_p7)
}
 0x244   :  { %1230 = dma.vmem_to_hbm [thread:$0]  %s1228_s18, 16, %s2579_s8, [#allocation14]  }
 0x245   :  { %1779 = dma.done.wait [#allocation5], 32  }
 0x246   :  { %1780 = vsyncadd [#allocation5], 4294967264 }
 0x247   :  { %1781 = dma.done.wait [#allocation14], 48  }
 0x248   :  { %1782 = vsyncadd [#allocation14], 4294967248 }
 0x249   :  { %1240 = vsyncpa [#allocation4], 1 }
 0x24a   :  { %1241 = vsyncpa [#allocation7], 1 }
 0x24b   :  { %1242 = vsyncpa [#allocation10], 1 }
 0x24c   :  { %1243 = vsyncpa [#allocation5], 1 }
 0x24d   :  { %1244 = vsyncpa [#allocation14], 1 }

</bundles_post_ra>
